<compile_context>
chip_gen: v6e
topology: v6e:2x2x1
jax: 0.10.0
libtpu: 0.0.40
codegen_flags: <defaults>
</compile_context>

<pallas_src>
import functools

import jax
import jax.numpy as jnp
from jax import lax
from jax.experimental import pallas as pl
from jax.experimental.pallas import tpu as pltpu


def _sk_kernel(xext_ref, mask_ref, w_ref, gamma_ref, beta_ref,
               wfc_ref, bfc_ref, wfcs_ref, bfcs_ref, pool_ref,
               out_ref, im2col_scr, feas_scr,
               *, B, H, W, C, M, K, pad, eps):
    HW = H * W
    N = B * HW
    S = pad * (W + 1)                     # flat zero-extension on each side
    inv_n = 1.0 / float(N)

    # ---- Phase 0: lane-dense im2col, built once, reused by every branch ----
    # patches[(kh*K+kw)*C + cin, n] = x[cin, n + (kh-pad)*W + (kw-pad)], masked
    # to zero outside the 'same'-padding window.  Each store is an unmasked
    # 512-lane vst at a sublane offset that is a multiple of C (= 32).
    for kh in range(K):
        for kw in range(K):
            idx = kh * K + kw
            off = S + (kh - pad) * W + (kw - pad)         # static, >= 0
            win = xext_ref[:, off:off + N]                # [C, N] bf16
            msk = mask_ref[idx:idx + 1, :]                # [1, N] bf16
            im2col_scr[idx * C:(idx + 1) * C, :] = win * msk
    patches = im2col_scr[...]                             # [K*K*C, N] bf16

    # ---- Phase 1: all branch convs in ONE deep MXU matmul, then BN + ReLU --
    # (conv bias omitted: a per-channel constant cancels in train-mode BN.)
    conv = jnp.dot(w_ref[...], patches,
                   preferred_element_type=jnp.float32)    # [M*C, N] f32
    s1 = jnp.sum(conv, axis=1, keepdims=True) * inv_n             # E[x]
    s2 = jnp.sum(conv * conv, axis=1, keepdims=True) * inv_n      # E[x^2]
    var = jnp.maximum(s2 - s1 * s1, 0.0)                  # biased batch variance
    scale = gamma_ref[...] * lax.rsqrt(var + eps)         # [M*C, 1]
    shift = beta_ref[...] - s1 * scale                    # [M*C, 1]
    fea = jnp.maximum(conv * scale + shift, 0.0)          # ReLU, [M*C, N] f32
    fea_bf = fea.astype(jnp.bfloat16)
    feas_scr[...] = fea_bf                                # bf16 branch features

    # ---- Phase 2: global average pool (per batch) + squeeze FC -------------
    # One deep-contraction matmul; the branch sum happens at tiny [C, B] size,
    # so no [C, N] f32 fea_U is ever live.
    pooled = jnp.dot(fea_bf, pool_ref[...],
                     preferred_element_type=jnp.float32)  # [M*C, B]
    fea_s = pooled[0:C, :]
    for m in range(1, M):
        fea_s = fea_s + pooled[m * C:(m + 1) * C, :]      # [C, B]
    fea_z = jnp.dot(wfc_ref[...], fea_s,
                    preferred_element_type=jnp.float32) + bfc_ref[...]    # [d, B]

    # ---- Phase 3: fused excitation + exact softmax over branches -----------
    logits = jnp.dot(wfcs_ref[...], fea_z,
                     preferred_element_type=jnp.float32) + bfcs_ref[...]  # [M*C, B]
    lg = [logits[m * C:(m + 1) * C, :] for m in range(M)]          # [C, B] each
    mmax = lg[0]
    for m in range(1, M):
        mmax = jnp.maximum(mmax, lg[m])
    ex = [jnp.exp(v - mmax) for v in lg]
    den = ex[0]
    for m in range(1, M):
        den = den + ex[m]
    inv_den = 1.0 / den                     # exact: weights sum to 1; [C,B] is tiny
    att = [e * inv_den for e in ex]

    # ---- Phase 4: attention-weighted fusion (VPU lane-broadcast) -----------
    # Per (batch, branch) block: [C, HW] bf16 reload * [C, 1] attention column.
    # Lane offsets b*HW (HW = 256 here) are 128-aligned -> unmasked stores.
    for b in range(B):
        acc = (feas_scr[0:C, b * HW:(b + 1) * HW].astype(jnp.float32)
               * att[0][:, b:b + 1])
        for m in range(1, M):
            acc = acc + (feas_scr[m * C:(m + 1) * C, b * HW:(b + 1) * HW]
                         .astype(jnp.float32) * att[m][:, b:b + 1])
        out_ref[:, b * HW:(b + 1) * HW] = acc


def sk_att_block(x_nchw, params, *, kernel_list, eps=1e-5):
    """x_nchw: [B, C, H, W] -> [B, C, H, W] (PyTorch layout at the boundary)."""
    B, C, H, W = x_nchw.shape
    M = len(kernel_list)
    K = max(kernel_list)
    pad = (K - 1) // 2
    HW = H * W
    N = B * HW
    KKC = K * K * C
    S = pad * (W + 1)
    d = params['fc_w'].shape[0]

    # Channel-major, lane-dense flat input (leading-axis swap only, no minor-dim
    # NCHW->NHWC relayout), zero-extended along N so every (kh, kw) window in
    # the kernel is a static, in-bounds lane slice.
    x_cn = jnp.transpose(x_nchw, (1, 0, 2, 3)).reshape(C, N)
    xext = jnp.pad(x_cn, ((0, 0), (S, S))).astype(jnp.bfloat16)    # [C, N+2S]

    # Border masks per (kh, kw) offset (identical for every batch) and the
    # per-batch mean-pool matrix (deep-contraction MXU pooling).
    n_idx = jnp.arange(HW, dtype=jnp.int32)
    h_idx, w_idx = n_idx // W, n_idx % W
    rows = []
    for kh in range(K):
        for kw in range(K):
            dh, dw = kh - pad, kw - pad
            valid = ((h_idx + dh >= 0) & (h_idx + dh < H) &
                     (w_idx + dw >= 0) & (w_idx + dw < W))
            rows.append(jnp.tile(valid, (B,)))
    mask = jnp.stack(rows).astype(jnp.bfloat16)                    # [K*K, N]
    batch_of_n = jnp.arange(N, dtype=jnp.int32) // HW
    pool = ((batch_of_n[:, None] == jnp.arange(B, dtype=jnp.int32)[None, :])
            .astype(jnp.bfloat16) * (1.0 / float(HW)))             # [N, B]

    # NOTE: params['conv_b'] is intentionally NOT passed to the kernel: a
    # per-channel bias before train-mode BatchNorm is a mathematical no-op.
    inputs = (xext, mask, params['conv_w'].astype(jnp.bfloat16),
              params['bn_gamma'], params['bn_beta'],
              params['fc_w'], params['fc_b'], params['fcs_w'], params['fcs_b'],
              pool)

    # VMEM budget (actual bytes + headroom, capped at 48 MiB for v7x) + cost hint.
    scratch_bytes = KKC * N * 2 + M * C * N * 2
    io_bytes = sum(int(a.size) * a.dtype.itemsize for a in inputs) + C * N * 4
    vmem_limit = int(min(48 * 1024 * 1024, scratch_bytes + io_bytes + (8 << 20)))
    flops = (2 * M * C * KKC * N           # fused branch convs
             + 2 * M * C * N * B           # pooling matmul
             + 2 * d * C * B + 2 * M * C * d * B
             + 12 * M * C * N)             # im2col mask, BN, ReLU, fusion
    transcendentals = M * C + M * C * B
    cost = pl.CostEstimate(flops=int(flops),
                           transcendentals=int(transcendentals),
                           bytes_accessed=int(io_bytes))

    kernel = functools.partial(_sk_kernel, B=B, H=H, W=W, C=C, M=M, K=K,
                               pad=pad, eps=eps)
    out_cn = pl.pallas_call(
        kernel,
        out_shape=jax.ShapeDtypeStruct((C, N), jnp.float32),       # lane-dense output
        in_specs=[pl.BlockSpec(memory_space=pltpu.MemorySpace.VMEM)] * len(inputs),
        out_specs=pl.BlockSpec(memory_space=pltpu.MemorySpace.VMEM),
        scratch_shapes=[pltpu.VMEM((KKC, N), jnp.bfloat16),        # lane-dense im2col
                        pltpu.VMEM((M * C, N), jnp.bfloat16)],     # branch features
        compiler_params=pltpu.CompilerParams(vmem_limit_bytes=vmem_limit),
        cost_estimate=cost,
    )(*inputs)

    # [C, N] -> [B, C, H, W] (leading-axis swap only).
    return jnp.transpose(out_cn.reshape(C, B, H, W), (1, 0, 2, 3))


def make_params(key, features, kernel_list, G, r=16, L=32):
    """Deterministic synthetic parameters matching SKAttBlock.__init__ shapes,
    pre-packed into the fused layouts the kernel consumes."""
    M = len(kernel_list)
    d = max(int(features / r), L)
    Cg = features // G
    Kmax = max(kernel_list)
    keys = jax.random.split(key, 4 * M + 4)

    conv_w, conv_b, bn_g, bn_b = [], [], [], []
    for i, k in enumerate(kernel_list):
        # PyTorch grouped-conv weight: [C_out, C_in/G, k, k]
        wk = jax.random.normal(keys[4 * i + 0], (features, Cg, k, k),
                               jnp.float32) * (1.0 / float(Cg * k * k) ** 0.5)
        cb = 0.1 * jax.random.normal(keys[4 * i + 1], (features,), jnp.float32)
        g_ = 1.0 + 0.1 * jax.random.normal(keys[4 * i + 2], (features,), jnp.float32)
        b_ = 0.1 * jax.random.normal(keys[4 * i + 3], (features,), jnp.float32)

        # Densify grouped weight to block-diagonal [k, k, C_in, C_out].
        wf = jnp.zeros((k, k, features, features), jnp.float32)
        for g in range(G):
            blk = wk[g * Cg:(g + 1) * Cg]                  # [Cg_out, Cg_in, k, k]
            blk = jnp.transpose(blk, (2, 3, 1, 0))         # [k, k, Cg_in, Cg_out]
            wf = wf.at[:, :, g * Cg:(g + 1) * Cg, g * Cg:(g + 1) * Cg].set(blk)
        # Zero-pad smaller kernels to Kmax ('same' stride-1 conv is unchanged).
        p = (Kmax - k) // 2
        wf = jnp.pad(wf, ((p, p), (p, p), (0, 0), (0, 0)))  # [Kmax, Kmax, C, C]
        # Pack: [C_out, Kmax*Kmax*C_in], column = (kh*Kmax + kw)*C + cin.
        wt = jnp.transpose(wf, (3, 0, 1, 2)).reshape(features, Kmax * Kmax * features)
        conv_w.append(wt); conv_b.append(cb); bn_g.append(g_); bn_b.append(b_)

    kfc_w, kfc_b, kfcs_w, kfcs_b = keys[4 * M:4 * M + 4]
    fc_w = jax.random.normal(kfc_w, (d, features), jnp.float32) * (1.0 / features ** 0.5)
    fc_b = 0.1 * jax.random.normal(kfc_b, (d,), jnp.float32)
    fcs_w = jax.random.normal(kfcs_w, (M, features, d), jnp.float32) * (1.0 / d ** 0.5)
    fcs_b = 0.1 * jax.random.normal(kfcs_b, (M, features), jnp.float32)

    return {
        'conv_w': jnp.stack(conv_w).reshape(M * features, Kmax * Kmax * features),
        'conv_b': jnp.stack(conv_b),          # kept for module fidelity; no-op under train-mode BN
        'bn_gamma': jnp.stack(bn_g).reshape(M * features, 1),
        'bn_beta': jnp.stack(bn_b).reshape(M * features, 1),
        'fc_w': fc_w,                                      # [d, C]
        'fc_b': fc_b[:, None],                             # [d, 1]
        'fcs_w': fcs_w.reshape(M * features, d),           # [M*C, d]
        'fcs_b': fcs_b.reshape(M * features, 1),           # [M*C, 1]
    }


if __name__ == "__main__":
    B, C, H, W = 2, 32, 16, 16
    kernel_list = [3, 5]
    G, r, L = 8, 16, 32          # features=32, G=8 -> 4 channels per group

    key = jax.random.PRNGKey(0)
    kx, kp = jax.random.split(key)
    x = jax.random.normal(kx, (B, C, H, W), jnp.float32)
    params = make_params(kp, C, kernel_list, G, r=r, L=L)

    out = sk_att_block(x, params, kernel_list=kernel_list)
    out = jax.block_until_ready(out)
    assert out.shape == (B, C, H, W)
    assert bool(jnp.all(jnp.isfinite(out)))
    print("KERNEL_OK")
</pallas_src>

<mosaic_0001>
module attributes {stable_mosaic.version = 11 : i64} {
  func.func @_sk_kernel(%arg0: memref<32x580xbf16, #tpu.memory_space<vmem>>, %arg1: memref<25x512xbf16, #tpu.memory_space<vmem>>, %arg2: memref<64x800xbf16, #tpu.memory_space<vmem>>, %arg3: memref<64x1xf32, #tpu.memory_space<vmem>>, %arg4: memref<64x1xf32, #tpu.memory_space<vmem>>, %arg5: memref<32x32xf32, #tpu.memory_space<vmem>>, %arg6: memref<32x1xf32, #tpu.memory_space<vmem>>, %arg7: memref<64x32xf32, #tpu.memory_space<vmem>>, %arg8: memref<64x1xf32, #tpu.memory_space<vmem>>, %arg9: memref<512x2xbf16, #tpu.memory_space<vmem>>, %arg10: memref<32x512xf32, #tpu.memory_space<vmem>>, %arg11: memref<800x512xbf16, #tpu.memory_space<vmem>>, %arg12: memref<64x512xbf16, #tpu.memory_space<vmem>>) attributes {dimension_semantics = [], scalar_prefetch = 0 : i64, scratch_operands = 2 : i64, tpu.core_type = #tpu.core_type<tc>} {
    %c0 = arith.constant 0 : index
    %c0_0 = arith.constant 0 : index
    %0 = vector.load %arg0[%c0, %c0_0] : memref<32x580xbf16, #tpu.memory_space<vmem>>, vector<32x512xbf16>
    %c0_1 = arith.constant 0 : index
    %c0_2 = arith.constant 0 : index
    %1 = vector.load %arg1[%c0_1, %c0_2] : memref<25x512xbf16, #tpu.memory_space<vmem>>, vector<1x512xbf16>
    %2 = vector.broadcast %1 : vector<1x512xbf16> to vector<32x512xbf16>
    %3 = arith.mulf %0, %2 : vector<32x512xbf16>
    %c0_3 = arith.constant 0 : index
    %c0_4 = arith.constant 0 : index
    %4 = vector.load %arg11[%c0_3, %c0_4] : memref<800x512xbf16, #tpu.memory_space<vmem>>, vector<32x512xbf16>
    tpu.vector_store %arg11[%c0_3, %c0_4], %3 {strides = array<i32>} : memref<800x512xbf16, #tpu.memory_space<vmem>>, vector<32x512xbf16>,
    %c0_5 = arith.constant 0 : index
    %c1 = arith.constant 1 : index
    %5 = vector.load %arg0[%c0_5, %c1] : memref<32x580xbf16, #tpu.memory_space<vmem>>, vector<32x512xbf16>
    %c1_6 = arith.constant 1 : index
    %c0_7 = arith.constant 0 : index
    %6 = vector.load %arg1[%c1_6, %c0_7] : memref<25x512xbf16, #tpu.memory_space<vmem>>, vector<1x512xbf16>
    %7 = vector.broadcast %6 : vector<1x512xbf16> to vector<32x512xbf16>
    %8 = arith.mulf %5, %7 : vector<32x512xbf16>
    %c32 = arith.constant 32 : index
    %c0_8 = arith.constant 0 : index
    %9 = vector.load %arg11[%c32, %c0_8] : memref<800x512xbf16, #tpu.memory_space<vmem>>, vector<32x512xbf16>
    tpu.vector_store %arg11[%c32, %c0_8], %8 {strides = array<i32>} : memref<800x512xbf16, #tpu.memory_space<vmem>>, vector<32x512xbf16>,
    %c0_9 = arith.constant 0 : index
    %c2 = arith.constant 2 : index
    %10 = vector.load %arg0[%c0_9, %c2] : memref<32x580xbf16, #tpu.memory_space<vmem>>, vector<32x512xbf16>
    %c2_10 = arith.constant 2 : index
    %c0_11 = arith.constant 0 : index
    %11 = vector.load %arg1[%c2_10, %c0_11] : memref<25x512xbf16, #tpu.memory_space<vmem>>, vector<1x512xbf16>
    %12 = vector.broadcast %11 : vector<1x512xbf16> to vector<32x512xbf16>
    %13 = arith.mulf %10, %12 : vector<32x512xbf16>
    %c64 = arith.constant 64 : index
    %c0_12 = arith.constant 0 : index
    %14 = vector.load %arg11[%c64, %c0_12] : memref<800x512xbf16, #tpu.memory_space<vmem>>, vector<32x512xbf16>
    tpu.vector_store %arg11[%c64, %c0_12], %13 {strides = array<i32>} : memref<800x512xbf16, #tpu.memory_space<vmem>>, vector<32x512xbf16>,
    %c0_13 = arith.constant 0 : index
    %c3 = arith.constant 3 : index
    %15 = vector.load %arg0[%c0_13, %c3] : memref<32x580xbf16, #tpu.memory_space<vmem>>, vector<32x512xbf16>
    %c3_14 = arith.constant 3 : index
    %c0_15 = arith.constant 0 : index
    %16 = vector.load %arg1[%c3_14, %c0_15] : memref<25x512xbf16, #tpu.memory_space<vmem>>, vector<1x512xbf16>
    %17 = vector.broadcast %16 : vector<1x512xbf16> to vector<32x512xbf16>
    %18 = arith.mulf %15, %17 : vector<32x512xbf16>
    %c96 = arith.constant 96 : index
    %c0_16 = arith.constant 0 : index
    %19 = vector.load %arg11[%c96, %c0_16] : memref<800x512xbf16, #tpu.memory_space<vmem>>, vector<32x512xbf16>
    tpu.vector_store %arg11[%c96, %c0_16], %18 {strides = array<i32>} : memref<800x512xbf16, #tpu.memory_space<vmem>>, vector<32x512xbf16>,
    %c0_17 = arith.constant 0 : index
    %c4 = arith.constant 4 : index
    %20 = vector.load %arg0[%c0_17, %c4] : memref<32x580xbf16, #tpu.memory_space<vmem>>, vector<32x512xbf16>
    %c4_18 = arith.constant 4 : index
    %c0_19 = arith.constant 0 : index
    %21 = vector.load %arg1[%c4_18, %c0_19] : memref<25x512xbf16, #tpu.memory_space<vmem>>, vector<1x512xbf16>
    %22 = vector.broadcast %21 : vector<1x512xbf16> to vector<32x512xbf16>
    %23 = arith.mulf %20, %22 : vector<32x512xbf16>
    %c128 = arith.constant 128 : index
    %c0_20 = arith.constant 0 : index
    %24 = vector.load %arg11[%c128, %c0_20] : memref<800x512xbf16, #tpu.memory_space<vmem>>, vector<32x512xbf16>
    tpu.vector_store %arg11[%c128, %c0_20], %23 {strides = array<i32>} : memref<800x512xbf16, #tpu.memory_space<vmem>>, vector<32x512xbf16>,
    %c0_21 = arith.constant 0 : index
    %c16 = arith.constant 16 : index
    %25 = vector.load %arg0[%c0_21, %c16] : memref<32x580xbf16, #tpu.memory_space<vmem>>, vector<32x512xbf16>
    %c5 = arith.constant 5 : index
    %c0_22 = arith.constant 0 : index
    %26 = vector.load %arg1[%c5, %c0_22] : memref<25x512xbf16, #tpu.memory_space<vmem>>, vector<1x512xbf16>
    %27 = vector.broadcast %26 : vector<1x512xbf16> to vector<32x512xbf16>
    %28 = arith.mulf %25, %27 : vector<32x512xbf16>
    %c160 = arith.constant 160 : index
    %c0_23 = arith.constant 0 : index
    %29 = vector.load %arg11[%c160, %c0_23] : memref<800x512xbf16, #tpu.memory_space<vmem>>, vector<32x512xbf16>
    tpu.vector_store %arg11[%c160, %c0_23], %28 {strides = array<i32>} : memref<800x512xbf16, #tpu.memory_space<vmem>>, vector<32x512xbf16>,
    %c0_24 = arith.constant 0 : index
    %c17 = arith.constant 17 : index
    %30 = vector.load %arg0[%c0_24, %c17] : memref<32x580xbf16, #tpu.memory_space<vmem>>, vector<32x512xbf16>
    %c6 = arith.constant 6 : index
    %c0_25 = arith.constant 0 : index
    %31 = vector.load %arg1[%c6, %c0_25] : memref<25x512xbf16, #tpu.memory_space<vmem>>, vector<1x512xbf16>
    %32 = vector.broadcast %31 : vector<1x512xbf16> to vector<32x512xbf16>
    %33 = arith.mulf %30, %32 : vector<32x512xbf16>
    %c192 = arith.constant 192 : index
    %c0_26 = arith.constant 0 : index
    %34 = vector.load %arg11[%c192, %c0_26] : memref<800x512xbf16, #tpu.memory_space<vmem>>, vector<32x512xbf16>
    tpu.vector_store %arg11[%c192, %c0_26], %33 {strides = array<i32>} : memref<800x512xbf16, #tpu.memory_space<vmem>>, vector<32x512xbf16>,
    %c0_27 = arith.constant 0 : index
    %c18 = arith.constant 18 : index
    %35 = vector.load %arg0[%c0_27, %c18] : memref<32x580xbf16, #tpu.memory_space<vmem>>, vector<32x512xbf16>
    %c7 = arith.constant 7 : index
    %c0_28 = arith.constant 0 : index
    %36 = vector.load %arg1[%c7, %c0_28] : memref<25x512xbf16, #tpu.memory_space<vmem>>, vector<1x512xbf16>
    %37 = vector.broadcast %36 : vector<1x512xbf16> to vector<32x512xbf16>
    %38 = arith.mulf %35, %37 : vector<32x512xbf16>
    %c224 = arith.constant 224 : index
    %c0_29 = arith.constant 0 : index
    %39 = vector.load %arg11[%c224, %c0_29] : memref<800x512xbf16, #tpu.memory_space<vmem>>, vector<32x512xbf16>
    tpu.vector_store %arg11[%c224, %c0_29], %38 {strides = array<i32>} : memref<800x512xbf16, #tpu.memory_space<vmem>>, vector<32x512xbf16>,
    %c0_30 = arith.constant 0 : index
    %c19 = arith.constant 19 : index
    %40 = vector.load %arg0[%c0_30, %c19] : memref<32x580xbf16, #tpu.memory_space<vmem>>, vector<32x512xbf16>
    %c8 = arith.constant 8 : index
    %c0_31 = arith.constant 0 : index
    %41 = vector.load %arg1[%c8, %c0_31] : memref<25x512xbf16, #tpu.memory_space<vmem>>, vector<1x512xbf16>
    %42 = vector.broadcast %41 : vector<1x512xbf16> to vector<32x512xbf16>
    %43 = arith.mulf %40, %42 : vector<32x512xbf16>
    %c256 = arith.constant 256 : index
    %c0_32 = arith.constant 0 : index
    %44 = vector.load %arg11[%c256, %c0_32] : memref<800x512xbf16, #tpu.memory_space<vmem>>, vector<32x512xbf16>
    tpu.vector_store %arg11[%c256, %c0_32], %43 {strides = array<i32>} : memref<800x512xbf16, #tpu.memory_space<vmem>>, vector<32x512xbf16>,
    %c0_33 = arith.constant 0 : index
    %c20 = arith.constant 20 : index
    %45 = vector.load %arg0[%c0_33, %c20] : memref<32x580xbf16, #tpu.memory_space<vmem>>, vector<32x512xbf16>
    %c9 = arith.constant 9 : index
    %c0_34 = arith.constant 0 : index
    %46 = vector.load %arg1[%c9, %c0_34] : memref<25x512xbf16, #tpu.memory_space<vmem>>, vector<1x512xbf16>
    %47 = vector.broadcast %46 : vector<1x512xbf16> to vector<32x512xbf16>
    %48 = arith.mulf %45, %47 : vector<32x512xbf16>
    %c288 = arith.constant 288 : index
    %c0_35 = arith.constant 0 : index
    %49 = vector.load %arg11[%c288, %c0_35] : memref<800x512xbf16, #tpu.memory_space<vmem>>, vector<32x512xbf16>
    tpu.vector_store %arg11[%c288, %c0_35], %48 {strides = array<i32>} : memref<800x512xbf16, #tpu.memory_space<vmem>>, vector<32x512xbf16>,
    %c0_36 = arith.constant 0 : index
    %c32_37 = arith.constant 32 : index
    %50 = vector.load %arg0[%c0_36, %c32_37] : memref<32x580xbf16, #tpu.memory_space<vmem>>, vector<32x512xbf16>
    %c10 = arith.constant 10 : index
    %c0_38 = arith.constant 0 : index
    %51 = vector.load %arg1[%c10, %c0_38] : memref<25x512xbf16, #tpu.memory_space<vmem>>, vector<1x512xbf16>
    %52 = vector.broadcast %51 : vector<1x512xbf16> to vector<32x512xbf16>
    %53 = arith.mulf %50, %52 : vector<32x512xbf16>
    %c320 = arith.constant 320 : index
    %c0_39 = arith.constant 0 : index
    %54 = vector.load %arg11[%c320, %c0_39] : memref<800x512xbf16, #tpu.memory_space<vmem>>, vector<32x512xbf16>
    tpu.vector_store %arg11[%c320, %c0_39], %53 {strides = array<i32>} : memref<800x512xbf16, #tpu.memory_space<vmem>>, vector<32x512xbf16>,
    %c0_40 = arith.constant 0 : index
    %c33 = arith.constant 33 : index
    %55 = vector.load %arg0[%c0_40, %c33] : memref<32x580xbf16, #tpu.memory_space<vmem>>, vector<32x512xbf16>
    %c11 = arith.constant 11 : index
    %c0_41 = arith.constant 0 : index
    %56 = vector.load %arg1[%c11, %c0_41] : memref<25x512xbf16, #tpu.memory_space<vmem>>, vector<1x512xbf16>
    %57 = vector.broadcast %56 : vector<1x512xbf16> to vector<32x512xbf16>
    %58 = arith.mulf %55, %57 : vector<32x512xbf16>
    %c352 = arith.constant 352 : index
    %c0_42 = arith.constant 0 : index
    %59 = vector.load %arg11[%c352, %c0_42] : memref<800x512xbf16, #tpu.memory_space<vmem>>, vector<32x512xbf16>
    tpu.vector_store %arg11[%c352, %c0_42], %58 {strides = array<i32>} : memref<800x512xbf16, #tpu.memory_space<vmem>>, vector<32x512xbf16>,
    %c0_43 = arith.constant 0 : index
    %c34 = arith.constant 34 : index
    %60 = vector.load %arg0[%c0_43, %c34] : memref<32x580xbf16, #tpu.memory_space<vmem>>, vector<32x512xbf16>
    %c12 = arith.constant 12 : index
    %c0_44 = arith.constant 0 : index
    %61 = vector.load %arg1[%c12, %c0_44] : memref<25x512xbf16, #tpu.memory_space<vmem>>, vector<1x512xbf16>
    %62 = vector.broadcast %61 : vector<1x512xbf16> to vector<32x512xbf16>
    %63 = arith.mulf %60, %62 : vector<32x512xbf16>
    %c384 = arith.constant 384 : index
    %c0_45 = arith.constant 0 : index
    %64 = vector.load %arg11[%c384, %c0_45] : memref<800x512xbf16, #tpu.memory_space<vmem>>, vector<32x512xbf16>
    tpu.vector_store %arg11[%c384, %c0_45], %63 {strides = array<i32>} : memref<800x512xbf16, #tpu.memory_space<vmem>>, vector<32x512xbf16>,
    %c0_46 = arith.constant 0 : index
    %c35 = arith.constant 35 : index
    %65 = vector.load %arg0[%c0_46, %c35] : memref<32x580xbf16, #tpu.memory_space<vmem>>, vector<32x512xbf16>
    %c13 = arith.constant 13 : index
    %c0_47 = arith.constant 0 : index
    %66 = vector.load %arg1[%c13, %c0_47] : memref<25x512xbf16, #tpu.memory_space<vmem>>, vector<1x512xbf16>
    %67 = vector.broadcast %66 : vector<1x512xbf16> to vector<32x512xbf16>
    %68 = arith.mulf %65, %67 : vector<32x512xbf16>
    %c416 = arith.constant 416 : index
    %c0_48 = arith.constant 0 : index
    %69 = vector.load %arg11[%c416, %c0_48] : memref<800x512xbf16, #tpu.memory_space<vmem>>, vector<32x512xbf16>
    tpu.vector_store %arg11[%c416, %c0_48], %68 {strides = array<i32>} : memref<800x512xbf16, #tpu.memory_space<vmem>>, vector<32x512xbf16>,
    %c0_49 = arith.constant 0 : index
    %c36 = arith.constant 36 : index
    %70 = vector.load %arg0[%c0_49, %c36] : memref<32x580xbf16, #tpu.memory_space<vmem>>, vector<32x512xbf16>
    %c14 = arith.constant 14 : index
    %c0_50 = arith.constant 0 : index
    %71 = vector.load %arg1[%c14, %c0_50] : memref<25x512xbf16, #tpu.memory_space<vmem>>, vector<1x512xbf16>
    %72 = vector.broadcast %71 : vector<1x512xbf16> to vector<32x512xbf16>
    %73 = arith.mulf %70, %72 : vector<32x512xbf16>
    %c448 = arith.constant 448 : index
    %c0_51 = arith.constant 0 : index
    %74 = vector.load %arg11[%c448, %c0_51] : memref<800x512xbf16, #tpu.memory_space<vmem>>, vector<32x512xbf16>
    tpu.vector_store %arg11[%c448, %c0_51], %73 {strides = array<i32>} : memref<800x512xbf16, #tpu.memory_space<vmem>>, vector<32x512xbf16>,
    %c0_52 = arith.constant 0 : index
    %c48 = arith.constant 48 : index
    %75 = vector.load %arg0[%c0_52, %c48] : memref<32x580xbf16, #tpu.memory_space<vmem>>, vector<32x512xbf16>
    %c15 = arith.constant 15 : index
    %c0_53 = arith.constant 0 : index
    %76 = vector.load %arg1[%c15, %c0_53] : memref<25x512xbf16, #tpu.memory_space<vmem>>, vector<1x512xbf16>
    %77 = vector.broadcast %76 : vector<1x512xbf16> to vector<32x512xbf16>
    %78 = arith.mulf %75, %77 : vector<32x512xbf16>
    %c480 = arith.constant 480 : index
    %c0_54 = arith.constant 0 : index
    %79 = vector.load %arg11[%c480, %c0_54] : memref<800x512xbf16, #tpu.memory_space<vmem>>, vector<32x512xbf16>
    tpu.vector_store %arg11[%c480, %c0_54], %78 {strides = array<i32>} : memref<800x512xbf16, #tpu.memory_space<vmem>>, vector<32x512xbf16>,
    %c0_55 = arith.constant 0 : index
    %c49 = arith.constant 49 : index
    %80 = vector.load %arg0[%c0_55, %c49] : memref<32x580xbf16, #tpu.memory_space<vmem>>, vector<32x512xbf16>
    %c16_56 = arith.constant 16 : index
    %c0_57 = arith.constant 0 : index
    %81 = vector.load %arg1[%c16_56, %c0_57] : memref<25x512xbf16, #tpu.memory_space<vmem>>, vector<1x512xbf16>
    %82 = vector.broadcast %81 : vector<1x512xbf16> to vector<32x512xbf16>
    %83 = arith.mulf %80, %82 : vector<32x512xbf16>
    %c512 = arith.constant 512 : index
    %c0_58 = arith.constant 0 : index
    %84 = vector.load %arg11[%c512, %c0_58] : memref<800x512xbf16, #tpu.memory_space<vmem>>, vector<32x512xbf16>
    tpu.vector_store %arg11[%c512, %c0_58], %83 {strides = array<i32>} : memref<800x512xbf16, #tpu.memory_space<vmem>>, vector<32x512xbf16>,
    %c0_59 = arith.constant 0 : index
    %c50 = arith.constant 50 : index
    %85 = vector.load %arg0[%c0_59, %c50] : memref<32x580xbf16, #tpu.memory_space<vmem>>, vector<32x512xbf16>
    %c17_60 = arith.constant 17 : index
    %c0_61 = arith.constant 0 : index
    %86 = vector.load %arg1[%c17_60, %c0_61] : memref<25x512xbf16, #tpu.memory_space<vmem>>, vector<1x512xbf16>
    %87 = vector.broadcast %86 : vector<1x512xbf16> to vector<32x512xbf16>
    %88 = arith.mulf %85, %87 : vector<32x512xbf16>
    %c544 = arith.constant 544 : index
    %c0_62 = arith.constant 0 : index
    %89 = vector.load %arg11[%c544, %c0_62] : memref<800x512xbf16, #tpu.memory_space<vmem>>, vector<32x512xbf16>
    tpu.vector_store %arg11[%c544, %c0_62], %88 {strides = array<i32>} : memref<800x512xbf16, #tpu.memory_space<vmem>>, vector<32x512xbf16>,
    %c0_63 = arith.constant 0 : index
    %c51 = arith.constant 51 : index
    %90 = vector.load %arg0[%c0_63, %c51] : memref<32x580xbf16, #tpu.memory_space<vmem>>, vector<32x512xbf16>
    %c18_64 = arith.constant 18 : index
    %c0_65 = arith.constant 0 : index
    %91 = vector.load %arg1[%c18_64, %c0_65] : memref<25x512xbf16, #tpu.memory_space<vmem>>, vector<1x512xbf16>
    %92 = vector.broadcast %91 : vector<1x512xbf16> to vector<32x512xbf16>
    %93 = arith.mulf %90, %92 : vector<32x512xbf16>
    %c576 = arith.constant 576 : index
    %c0_66 = arith.constant 0 : index
    %94 = vector.load %arg11[%c576, %c0_66] : memref<800x512xbf16, #tpu.memory_space<vmem>>, vector<32x512xbf16>
    tpu.vector_store %arg11[%c576, %c0_66], %93 {strides = array<i32>} : memref<800x512xbf16, #tpu.memory_space<vmem>>, vector<32x512xbf16>,
    %c0_67 = arith.constant 0 : index
    %c52 = arith.constant 52 : index
    %95 = vector.load %arg0[%c0_67, %c52] : memref<32x580xbf16, #tpu.memory_space<vmem>>, vector<32x512xbf16>
    %c19_68 = arith.constant 19 : index
    %c0_69 = arith.constant 0 : index
    %96 = vector.load %arg1[%c19_68, %c0_69] : memref<25x512xbf16, #tpu.memory_space<vmem>>, vector<1x512xbf16>
    %97 = vector.broadcast %96 : vector<1x512xbf16> to vector<32x512xbf16>
    %98 = arith.mulf %95, %97 : vector<32x512xbf16>
    %c608 = arith.constant 608 : index
    %c0_70 = arith.constant 0 : index
    %99 = vector.load %arg11[%c608, %c0_70] : memref<800x512xbf16, #tpu.memory_space<vmem>>, vector<32x512xbf16>
    tpu.vector_store %arg11[%c608, %c0_70], %98 {strides = array<i32>} : memref<800x512xbf16, #tpu.memory_space<vmem>>, vector<32x512xbf16>,
    %c0_71 = arith.constant 0 : index
    %c64_72 = arith.constant 64 : index
    %100 = vector.load %arg0[%c0_71, %c64_72] : memref<32x580xbf16, #tpu.memory_space<vmem>>, vector<32x512xbf16>
    %c20_73 = arith.constant 20 : index
    %c0_74 = arith.constant 0 : index
    %101 = vector.load %arg1[%c20_73, %c0_74] : memref<25x512xbf16, #tpu.memory_space<vmem>>, vector<1x512xbf16>
    %102 = vector.broadcast %101 : vector<1x512xbf16> to vector<32x512xbf16>
    %103 = arith.mulf %100, %102 : vector<32x512xbf16>
    %c640 = arith.constant 640 : index
    %c0_75 = arith.constant 0 : index
    %104 = vector.load %arg11[%c640, %c0_75] : memref<800x512xbf16, #tpu.memory_space<vmem>>, vector<32x512xbf16>
    tpu.vector_store %arg11[%c640, %c0_75], %103 {strides = array<i32>} : memref<800x512xbf16, #tpu.memory_space<vmem>>, vector<32x512xbf16>,
    %c0_76 = arith.constant 0 : index
    %c65 = arith.constant 65 : index
    %105 = vector.load %arg0[%c0_76, %c65] : memref<32x580xbf16, #tpu.memory_space<vmem>>, vector<32x512xbf16>
    %c21 = arith.constant 21 : index
    %c0_77 = arith.constant 0 : index
    %106 = vector.load %arg1[%c21, %c0_77] : memref<25x512xbf16, #tpu.memory_space<vmem>>, vector<1x512xbf16>
    %107 = vector.broadcast %106 : vector<1x512xbf16> to vector<32x512xbf16>
    %108 = arith.mulf %105, %107 : vector<32x512xbf16>
    %c672 = arith.constant 672 : index
    %c0_78 = arith.constant 0 : index
    %109 = vector.load %arg11[%c672, %c0_78] : memref<800x512xbf16, #tpu.memory_space<vmem>>, vector<32x512xbf16>
    tpu.vector_store %arg11[%c672, %c0_78], %108 {strides = array<i32>} : memref<800x512xbf16, #tpu.memory_space<vmem>>, vector<32x512xbf16>,
    %c0_79 = arith.constant 0 : index
    %c66 = arith.constant 66 : index
    %110 = vector.load %arg0[%c0_79, %c66] : memref<32x580xbf16, #tpu.memory_space<vmem>>, vector<32x512xbf16>
    %c22 = arith.constant 22 : index
    %c0_80 = arith.constant 0 : index
    %111 = vector.load %arg1[%c22, %c0_80] : memref<25x512xbf16, #tpu.memory_space<vmem>>, vector<1x512xbf16>
    %112 = vector.broadcast %111 : vector<1x512xbf16> to vector<32x512xbf16>
    %113 = arith.mulf %110, %112 : vector<32x512xbf16>
    %c704 = arith.constant 704 : index
    %c0_81 = arith.constant 0 : index
    %114 = vector.load %arg11[%c704, %c0_81] : memref<800x512xbf16, #tpu.memory_space<vmem>>, vector<32x512xbf16>
    tpu.vector_store %arg11[%c704, %c0_81], %113 {strides = array<i32>} : memref<800x512xbf16, #tpu.memory_space<vmem>>, vector<32x512xbf16>,
    %c0_82 = arith.constant 0 : index
    %c67 = arith.constant 67 : index
    %115 = vector.load %arg0[%c0_82, %c67] : memref<32x580xbf16, #tpu.memory_space<vmem>>, vector<32x512xbf16>
    %c23 = arith.constant 23 : index
    %c0_83 = arith.constant 0 : index
    %116 = vector.load %arg1[%c23, %c0_83] : memref<25x512xbf16, #tpu.memory_space<vmem>>, vector<1x512xbf16>
    %117 = vector.broadcast %116 : vector<1x512xbf16> to vector<32x512xbf16>
    %118 = arith.mulf %115, %117 : vector<32x512xbf16>
    %c736 = arith.constant 736 : index
    %c0_84 = arith.constant 0 : index
    %119 = vector.load %arg11[%c736, %c0_84] : memref<800x512xbf16, #tpu.memory_space<vmem>>, vector<32x512xbf16>
    tpu.vector_store %arg11[%c736, %c0_84], %118 {strides = array<i32>} : memref<800x512xbf16, #tpu.memory_space<vmem>>, vector<32x512xbf16>,
    %c0_85 = arith.constant 0 : index
    %c68 = arith.constant 68 : index
    %120 = vector.load %arg0[%c0_85, %c68] : memref<32x580xbf16, #tpu.memory_space<vmem>>, vector<32x512xbf16>
    %c24 = arith.constant 24 : index
    %c0_86 = arith.constant 0 : index
    %121 = vector.load %arg1[%c24, %c0_86] : memref<25x512xbf16, #tpu.memory_space<vmem>>, vector<1x512xbf16>
    %122 = vector.broadcast %121 : vector<1x512xbf16> to vector<32x512xbf16>
    %123 = arith.mulf %120, %122 : vector<32x512xbf16>
    %c768 = arith.constant 768 : index
    %c0_87 = arith.constant 0 : index
    %124 = vector.load %arg11[%c768, %c0_87] : memref<800x512xbf16, #tpu.memory_space<vmem>>, vector<32x512xbf16>
    tpu.vector_store %arg11[%c768, %c0_87], %123 {strides = array<i32>} : memref<800x512xbf16, #tpu.memory_space<vmem>>, vector<32x512xbf16>,
    %c0_88 = arith.constant 0 : index
    %c0_89 = arith.constant 0 : index
    %125 = vector.load %arg11[%c0_88, %c0_89] : memref<800x512xbf16, #tpu.memory_space<vmem>>, vector<800x512xbf16>
    %c0_90 = arith.constant 0 : index
    %c0_91 = arith.constant 0 : index
    %126 = vector.load %arg2[%c0_90, %c0_91] : memref<64x800xbf16, #tpu.memory_space<vmem>>, vector<64x800xbf16>
    %cst = arith.constant dense<0.000000e+00> : vector<64x512xf32>
    %127 = tpu.matmul %126, %125, %cst {dimension_numbers = #tpu.dot_dimension_numbers<[1], [0], [0], [1], [0, 0, 1, 1], [], []>} : vector<64x800xbf16>, vector<800x512xbf16>, vector<64x512xf32> -> vector<64x512xf32>
    %cst_92 = arith.constant dense<0.000000e+00> : vector<64xf32>
    %128 = vector.multi_reduction <add>, %127, %cst_92 [1] : vector<64x512xf32> to vector<64xf32>
    %129 = vector.shape_cast %128 : vector<64xf32> to vector<64x1xf32>
    %cst_93 = arith.constant 0.001953125 : f32
    %130 = vector.broadcast %cst_93 : f32 to vector<64x1xf32>
    %131 = arith.mulf %129, %130 : vector<64x1xf32>
    %132 = arith.mulf %127, %127 : vector<64x512xf32>
    %cst_94 = arith.constant dense<0.000000e+00> : vector<64xf32>
    %133 = vector.multi_reduction <add>, %132, %cst_94 [1] : vector<64x512xf32> to vector<64xf32>
    %134 = vector.shape_cast %133 : vector<64xf32> to vector<64x1xf32>
    %cst_95 = arith.constant 0.001953125 : f32
    %135 = vector.broadcast %cst_95 : f32 to vector<64x1xf32>
    %136 = arith.mulf %134, %135 : vector<64x1xf32>
    %137 = arith.mulf %131, %131 : vector<64x1xf32>
    %138 = arith.subf %136, %137 : vector<64x1xf32>
    %cst_96 = arith.constant 0.000000e+00 : f32
    %139 = vector.broadcast %cst_96 : f32 to vector<64x1xf32>
    %140 = arith.maximumf %138, %139 : vector<64x1xf32>
    %c0_97 = arith.constant 0 : index
    %c0_98 = arith.constant 0 : index
    %141 = vector.load %arg3[%c0_97, %c0_98] : memref<64x1xf32, #tpu.memory_space<vmem>>, vector<64x1xf32>
    %cst_99 = arith.constant 9.99999974E-6 : f32
    %142 = vector.broadcast %cst_99 : f32 to vector<64x1xf32>
    %143 = arith.addf %140, %142 : vector<64x1xf32>
    %144 = math.rsqrt %143 : vector<64x1xf32>
    %145 = arith.mulf %141, %144 : vector<64x1xf32>
    %c0_100 = arith.constant 0 : index
    %c0_101 = arith.constant 0 : index
    %146 = vector.load %arg4[%c0_100, %c0_101] : memref<64x1xf32, #tpu.memory_space<vmem>>, vector<64x1xf32>
    %147 = arith.mulf %131, %145 : vector<64x1xf32>
    %148 = arith.subf %146, %147 : vector<64x1xf32>
    %149 = vector.broadcast %145 : vector<64x1xf32> to vector<64x512xf32>
    %150 = arith.mulf %127, %149 : vector<64x512xf32>
    %151 = vector.broadcast %148 : vector<64x1xf32> to vector<64x512xf32>
    %152 = arith.addf %150, %151 : vector<64x512xf32>
    %cst_102 = arith.constant 0.000000e+00 : f32
    %153 = vector.broadcast %cst_102 : f32 to vector<64x512xf32>
    %154 = arith.maximumf %152, %153 : vector<64x512xf32>
    %155 = arith.truncf %154 : vector<64x512xf32> to vector<64x512xbf16>
    %c0_103 = arith.constant 0 : index
    %c0_104 = arith.constant 0 : index
    %156 = vector.load %arg12[%c0_103, %c0_104] : memref<64x512xbf16, #tpu.memory_space<vmem>>, vector<64x512xbf16>
    tpu.vector_store %arg12[%c0_103, %c0_104], %155 {strides = array<i32>} : memref<64x512xbf16, #tpu.memory_space<vmem>>, vector<64x512xbf16>,
    %c0_105 = arith.constant 0 : index
    %c0_106 = arith.constant 0 : index
    %157 = vector.load %arg9[%c0_105, %c0_106] : memref<512x2xbf16, #tpu.memory_space<vmem>>, vector<512x2xbf16>
    %cst_107 = arith.constant dense<0.000000e+00> : vector<64x2xf32>
    %158 = tpu.matmul %155, %157, %cst_107 {dimension_numbers = #tpu.dot_dimension_numbers<[1], [0], [0], [1], [0, 0, 1, 1], [], []>} : vector<64x512xbf16>, vector<512x2xbf16>, vector<64x2xf32> -> vector<64x2xf32>
    %159 = vector.extract_strided_slice %158 {offsets = [0, 0], sizes = [32, 2], strides = [1, 1]} : vector<64x2xf32> to vector<32x2xf32>
    %160 = vector.extract_strided_slice %158 {offsets = [32, 0], sizes = [32, 2], strides = [1, 1]} : vector<64x2xf32> to vector<32x2xf32>
    %161 = arith.addf %159, %160 : vector<32x2xf32>
    %c0_108 = arith.constant 0 : index
    %c0_109 = arith.constant 0 : index
    %162 = vector.load %arg5[%c0_108, %c0_109] : memref<32x32xf32, #tpu.memory_space<vmem>>, vector<32x32xf32>
    %cst_110 = arith.constant dense<0.000000e+00> : vector<32x2xf32>
    %163 = tpu.matmul %162, %161, %cst_110 {dimension_numbers = #tpu.dot_dimension_numbers<[1], [0], [0], [1], [0, 0, 1, 1], [], []>} : vector<32x32xf32>, vector<32x2xf32>, vector<32x2xf32> -> vector<32x2xf32>
    %c0_111 = arith.constant 0 : index
    %c0_112 = arith.constant 0 : index
    %164 = vector.load %arg6[%c0_111, %c0_112] : memref<32x1xf32, #tpu.memory_space<vmem>>, vector<32x1xf32>
    %165 = vector.broadcast %164 : vector<32x1xf32> to vector<32x2xf32>
    %166 = arith.addf %163, %165 : vector<32x2xf32>
    %c0_113 = arith.constant 0 : index
    %c0_114 = arith.constant 0 : index
    %167 = vector.load %arg7[%c0_113, %c0_114] : memref<64x32xf32, #tpu.memory_space<vmem>>, vector<64x32xf32>
    %cst_115 = arith.constant dense<0.000000e+00> : vector<64x2xf32>
    %168 = tpu.matmul %167, %166, %cst_115 {dimension_numbers = #tpu.dot_dimension_numbers<[1], [0], [0], [1], [0, 0, 1, 1], [], []>} : vector<64x32xf32>, vector<32x2xf32>, vector<64x2xf32> -> vector<64x2xf32>
    %c0_116 = arith.constant 0 : index
    %c0_117 = arith.constant 0 : index
    %169 = vector.load %arg8[%c0_116, %c0_117] : memref<64x1xf32, #tpu.memory_space<vmem>>, vector<64x1xf32>
    %170 = vector.broadcast %169 : vector<64x1xf32> to vector<64x2xf32>
    %171 = arith.addf %168, %170 : vector<64x2xf32>
    %172 = vector.extract_strided_slice %171 {offsets = [0, 0], sizes = [32, 2], strides = [1, 1]} : vector<64x2xf32> to vector<32x2xf32>
    %173 = vector.extract_strided_slice %171 {offsets = [32, 0], sizes = [32, 2], strides = [1, 1]} : vector<64x2xf32> to vector<32x2xf32>
    %174 = arith.maximumf %172, %173 : vector<32x2xf32>
    %175 = arith.subf %172, %174 : vector<32x2xf32>
    %176 = math.exp %175 : vector<32x2xf32>
    %177 = arith.subf %173, %174 : vector<32x2xf32>
    %178 = math.exp %177 : vector<32x2xf32>
    %179 = arith.addf %176, %178 : vector<32x2xf32>
    %cst_118 = arith.constant 1.000000e+00 : f32
    %180 = vector.broadcast %cst_118 : f32 to vector<32x2xf32>
    %181 = arith.divf %180, %179 : vector<32x2xf32>
    %182 = arith.mulf %176, %181 : vector<32x2xf32>
    %183 = arith.mulf %178, %181 : vector<32x2xf32>
    %c0_119 = arith.constant 0 : index
    %c0_120 = arith.constant 0 : index
    %184 = vector.load %arg12[%c0_119, %c0_120] : memref<64x512xbf16, #tpu.memory_space<vmem>>, vector<32x256xbf16>
    %185 = arith.extf %184 : vector<32x256xbf16> to vector<32x256xf32>
    %186 = vector.extract_strided_slice %182 {offsets = [0, 0], sizes = [32, 1], strides = [1, 1]} : vector<32x2xf32> to vector<32x1xf32>
    %187 = vector.broadcast %186 : vector<32x1xf32> to vector<32x256xf32>
    %188 = arith.mulf %185, %187 : vector<32x256xf32>
    %c32_121 = arith.constant 32 : index
    %c0_122 = arith.constant 0 : index
    %189 = vector.load %arg12[%c32_121, %c0_122] : memref<64x512xbf16, #tpu.memory_space<vmem>>, vector<32x256xbf16>
    %190 = arith.extf %189 : vector<32x256xbf16> to vector<32x256xf32>
    %191 = vector.extract_strided_slice %183 {offsets = [0, 0], sizes = [32, 1], strides = [1, 1]} : vector<32x2xf32> to vector<32x1xf32>
    %192 = vector.broadcast %191 : vector<32x1xf32> to vector<32x256xf32>
    %193 = arith.mulf %190, %192 : vector<32x256xf32>
    %194 = arith.addf %188, %193 : vector<32x256xf32>
    %c0_123 = arith.constant 0 : index
    %c0_124 = arith.constant 0 : index
    %195 = vector.load %arg10[%c0_123, %c0_124] : memref<32x512xf32, #tpu.memory_space<vmem>>, vector<32x256xf32>
    tpu.vector_store %arg10[%c0_123, %c0_124], %194 {strides = array<i32>} : memref<32x512xf32, #tpu.memory_space<vmem>>, vector<32x256xf32>,
    %c0_125 = arith.constant 0 : index
    %c256_126 = arith.constant 256 : index
    %196 = vector.load %arg12[%c0_125, %c256_126] : memref<64x512xbf16, #tpu.memory_space<vmem>>, vector<32x256xbf16>
    %197 = arith.extf %196 : vector<32x256xbf16> to vector<32x256xf32>
    %198 = vector.extract_strided_slice %182 {offsets = [0, 1], sizes = [32, 1], strides = [1, 1]} : vector<32x2xf32> to vector<32x1xf32>
    %199 = vector.broadcast %198 : vector<32x1xf32> to vector<32x256xf32>
    %200 = arith.mulf %197, %199 : vector<32x256xf32>
    %c32_127 = arith.constant 32 : index
    %c256_128 = arith.constant 256 : index
    %201 = vector.load %arg12[%c32_127, %c256_128] : memref<64x512xbf16, #tpu.memory_space<vmem>>, vector<32x256xbf16>
    %202 = arith.extf %201 : vector<32x256xbf16> to vector<32x256xf32>
    %203 = vector.extract_strided_slice %183 {offsets = [0, 1], sizes = [32, 1], strides = [1, 1]} : vector<32x2xf32> to vector<32x1xf32>
    %204 = vector.broadcast %203 : vector<32x1xf32> to vector<32x256xf32>
    %205 = arith.mulf %202, %204 : vector<32x256xf32>
    %206 = arith.addf %200, %205 : vector<32x256xf32>
    %c0_129 = arith.constant 0 : index
    %c256_130 = arith.constant 256 : index
    %207 = vector.load %arg10[%c0_129, %c256_130] : memref<32x512xf32, #tpu.memory_space<vmem>>, vector<32x256xf32>
    tpu.vector_store %arg10[%c0_129, %c256_130], %206 {strides = array<i32>} : memref<32x512xf32, #tpu.memory_space<vmem>>, vector<32x256xf32>,
    return
  }
}

</mosaic_0001>

<bundles_post_ra>
// kernel: tpu_custom_call.1
= control target key start
LH: loop header
LB: loop body
LE: loop exit
PB: predicated region body
PF: predicated region fallthrough
CT: control target
= control target key end

     0   :  { %v60_v0 = vlaneseq  ;;  %s12575_s27 = smov 32   ;;  %s8534_s12 = smov 33   ;;  %s12488_s0 = inlined_call_operand.vmem [shape: bf16[32,580], index: 0, kind: input, shape index: {}]   ;;  %s12489_s1 = inlined_call_operand.vmem [shape: bf16[25,512], index: 1, kind: input, shape index: {}]   ;;  %s12490_s2 = inlined_call_operand.vmem [shape: bf16[64,800], index: 2, kind: input, shape index: {}]   ;;  %s12491_s3 = inlined_call_operand.vmem [shape: f32[64,1], index: 3, kind: input, shape index: {}]   ;;  %s12492_s4 = inlined_call_operand.vmem [shape: f32[64,1], index: 4, kind: input, shape index: {}]   ;;  %s12493_s5 = inlined_call_operand.vmem [shape: f32[32,32], index: 5, kind: input, shape index: {}]   ;;  %s12494_s6 = inlined_call_operand.vmem [shape: f32[32,1], index: 6, kind: input, shape index: {}]   ;;  %s12495_s7 = inlined_call_operand.vmem [shape: f32[64,32], index: 7, kind: input, shape index: {}]   ;;  %s12496_s8 = inlined_call_operand.vmem [shape: f32[64,1], index: 8, kind: input, shape index: {}]   ;;  %s12497_s9 = inlined_call_operand.vmem [shape: bf16[512,2], index: 9, kind: input, shape index: {}]   ;;  %s12498_s10 = inlined_call_operand.hbm [shape: f32[32,512], index: 10, kind: output, shape index: {}]  }
   0x1   :  { %v1659_v1 = vld [vmem:[%s12489_s1 + $0x18] sm:$0x22]  ;;  %v1658_v2 = vld [vmem:[%s12489_s1 + $0x10] sm:$0x22]  ;;  %v466_v8 = vld [vmem:[%s12489_s1] sm:$0x22] }
   0x2   :  { %v7668_v3 = vcombine.low %v1659_v1, %v1659_v1  ;;  %v7669_v4 = vcombine.high %v1659_v1, %v1659_v1  ;;  %v7666_v5 = vcombine.low %v1658_v2, %v1658_v2  ;;  %v7667_v6 = vcombine.high %v1658_v2, %v1658_v2  ;;  %v1826_v7 = vld [vmem:[%s12489_s1 + $0x10] sm:$0x22]  ;;  %v1827_v13 = vld [vmem:[%s12489_s1 + $0x18] sm:$0x22]  ;;  %v467_v34 = vld [vmem:[%s12489_s1 + $0x8] sm:$0x22] }
   0x3   :  { %v8651_v9 = vshrl.u32 %v60_v0, 7  ;;  %v7672_v10 = vcombine.low %v1826_v7, %v1826_v7  ;;  %v7673_v11 = vcombine.high %v1826_v7, %v1826_v7  ;;  %v7624_v12 = vcombine.low %v466_v8, %v466_v8  ;;  %v299_v39 = vld [vmem:[%s12489_s1 + $0x8] sm:$0x22]  ;;  %v298_v47 = vld [vmem:[%s12489_s1] sm:$0x22]  ;;  %s8535_s15 = smov 3  }
   0x4   :  { %v1685_v14 = vpack.i.b16 %v7668_v3, %v7668_v3  ;;  %v1692_v15 = vpack.i.b16 %v7669_v4, %v7669_v4  ;;  %v1671_v16 = vpack.i.b16 %v7666_v5, %v7666_v5  ;;  %v1678_v17 = vpack.i.b16 %v7667_v6, %v7667_v6  ;;  %v1487_v57 = vld [vmem:[%s12489_s1 + $0x18] sm:$0x11]  ;;  %v1486_v2 = vld [vmem:[%s12489_s1 + $0x10] sm:$0x11]  ;;  %s8536_s24 = smov 2   ;;  %s8538_s17 = smov 1  }
   0x5   :  { %v8657_v18 = vsub.s32 1, %v8651_v9  ;;  %v8660_v19 = vsub.s32 0, %v8651_v9  ;;  %v1839_v20 = vshrl.u32 %v7672_v10, 16  ;;  %v1847_v21 = vshrl.u32 %v7673_v11, 16  ;;  %s8539_s18 = smov 19   ;;  %s8540_s25 = smov 48  }
   0x6   :  { %v7625_v22 = vcombine.high %v466_v8, %v466_v8  ;;  %v479_v23 = vshrl.u32 %v7624_v12, 16  ;;  %v7674_v24 = vcombine.low %v1827_v13, %v1827_v13  ;;  %v7675_v25 = vcombine.high %v1827_v13, %v1827_v13  ;;  %v125_v12 = vld [vmem:[%s12489_s1] sm:$0x11]  ;;  %s8541_s11 = smov 18   ;;  %s8542_s16 = smov 36  }
   0x7   :  { %v1690_v26 = vrot.slane %v1685_v14, %v8657_v18  ;;  %v1697_v27 = vrot.slane %v1692_v15, %v8657_v18  ;;  %v1676_v28 = vrot.slane %v1671_v16, %v8657_v18  ;;  %v1683_v29 = vrot.slane %v1678_v17, %v8657_v18  ;;  %s8543_s21 = smov 17   ;;  %s8544_s29 = smov 35  }
   0x8   :  { %v1840_v30 = vpack.i.b16 %v1839_v20, %v1839_v20  ;;  %v1848_v31 = vpack.i.b16 %v1847_v21, %v1847_v21  ;;  %v480_v32 = vpack.i.b16 %v479_v23, %v479_v23  ;;  %v487_v33 = vshrl.u32 %v7625_v22, 16  ;;  %v126_v23 = vld [vmem:[%s12489_s1 + $0x8] sm:$0x11] }
   0x9   :  { %v7671_v35 = vcombine.low %v1690_v26, %v1697_v27  ;;  %v7670_v36 = vcombine.low %v1676_v28, %v1683_v29  ;;  %v1855_v37 = vshrl.u32 %v7674_v24, 16  ;;  %v1863_v38 = vshrl.u32 %v7675_v25, 16 }
   0xa   :  { %v1845_v40 = vrot.slane %v1840_v30, %v8657_v18  ;;  %v1853_v41 = vrot.slane %v1848_v31, %v8657_v18  ;;  %v485_v42 = vrot.slane %v480_v32, %v8657_v18  ;;  %v488_v43 = vpack.i.b16 %v487_v33, %v487_v33  ;;  %v1318_v32 = vld [vmem:[%s12489_s1 + $0x10] sm:$0x11] }
   0xb   :  { %1710 = vrot.lane.b32.xlu1 %v7671_v35, %s12575_s27  ;;  %1708 = vrot.lane.b32.xlu0 %v7670_v36, %s12575_s27  ;;  %v1856_v44 = vpack.i.b16 %v1855_v37, %v1855_v37  ;;  %v1864_v45 = vpack.i.b16 %v1863_v38, %v1863_v38  ;;  %v7626_v46 = vcombine.low %v467_v34, %v467_v34  ;;  %v8681_v48 = vsub.s32 3, %v8651_v9  ;;  %v1319_v37 = vld [vmem:[%s12489_s1 + $0x18] sm:$0x11] }
   0xc   :  { %v7676_v49 = vcombine.low %v1845_v40, %v1853_v41  ;;  %v493_v50 = vrot.slane %v488_v43, %v8657_v18  ;;  %v7627_v51 = vcombine.high %v467_v34, %v467_v34  ;;  %v7620_v52 = vcombine.low %v299_v39, %v299_v39 }
   0xd   :  { %v1861_v53 = vrot.slane %v1856_v44, %v8657_v18  ;;  %v1869_v54 = vrot.slane %v1864_v45, %v8657_v18  ;;  %v495_v55 = vshrl.u32 %v7626_v46, 16  ;;  %v7621_v56 = vcombine.high %v299_v39, %v299_v39  ;;  %v2506_v46 = vld [vmem:[%s12489_s1 + $0x10] sm:$0x88] }
   0xe   :  { %v7628_v58 = vcombine.low %v485_v42, %v493_v50  ;;  %v503_v59 = vshrl.u32 %v7627_v51, 16  ;;  %v325_v60 = vpack.i.b16 %v7620_v52, %v7620_v52  ;;  %v7618_v61 = vcombine.low %v298_v47, %v298_v47  ;;  %v2507_v52 = vld [vmem:[%s12489_s1 + $0x18] sm:$0x88] }
   0xf   :  { %1880 = vrot.lane.b32.xlu0 %v7676_v49, %s8534_s12  ;;  %v7677_v62 = vcombine.low %v1861_v53, %v1869_v54  ;;  %v496_v63 = vpack.i.b16 %v495_v55, %v495_v55  ;;  %v332_v0 = vpack.i.b16 %v7621_v56, %v7621_v56  ;;  %v7619_v1 = vcombine.high %v298_v47, %v298_v47 }
  0x10   :  { %520 = vrot.lane.b32.xlu1 %v7628_v58, %s8535_s15  ;;  %v504_v3 = vpack.i.b16 %v503_v59, %v503_v59  ;;  %v330_v4 = vrot.slane %v325_v60, %v8657_v18  ;;  %v311_v5 = vpack.i.b16 %v7618_v61, %v7618_v61  ;;  %v7662_v6 = vcombine.low %v1487_v57, %v1487_v57 }
  0x11   :  { %v501_v7 = vrot.slane %v496_v63, %v8657_v18  ;;  %v337_v8 = vrot.slane %v332_v0, %v8657_v18  ;;  %v318_v10 = vpack.i.b16 %v7619_v1, %v7619_v1  ;;  %v7663_v11 = vcombine.high %v1487_v57, %v1487_v57  ;;  %v1146_v1 = vld [vmem:[%s12489_s1] sm:$0x88] }
  0x12   :  { %v509_v13 = vrot.slane %v504_v3, %v8657_v18  ;;  %v316_v14 = vrot.slane %v311_v5, %v8657_v18  ;;  %v1515_v15 = vshrl.u32 %v7662_v6, 16  ;;  %v7660_v16 = vcombine.low %v1486_v2, %v1486_v2  ;;  %v1147_v6 = vld [vmem:[%s12489_s1 + $0x8] sm:$0x88] }
  0x13   :  { %1882 = vrot.lane.b32.xlu0 %v7677_v62, %s8534_s12  ;;  %v7623_v17 = vcombine.low %v330_v4, %v337_v8  ;;  %v323_v20 = vrot.slane %v318_v10, %v8657_v18  ;;  %v1523_v21 = vshrl.u32 %v7663_v11, 16  ;;  %v7661_v22 = vcombine.high %v1486_v2, %v1486_v2  ;;  %s8537_s12 = smov 20  }
  0x14   :  { %v7629_v24 = vcombine.low %v501_v7, %v509_v13  ;;  %v1516_v25 = vpack.i.b16 %v1515_v15, %v1515_v15  ;;  %v1499_v26 = vshrl.u32 %v7660_v16, 16  ;;  %v7612_v27 = vcombine.low %v125_v12, %v125_v12 }
  0x15   :  { %v7622_v28 = vcombine.low %v316_v14, %v323_v20  ;;  %v1524_v29 = vpack.i.b16 %v1523_v21, %v1523_v21  ;;  %v1507_v30 = vshrl.u32 %v7661_v22, 16  ;;  %v7613_v31 = vcombine.high %v125_v12, %v125_v12  ;;  %v2338_v22 = vld [vmem:[%s12489_s1 + $0x10] sm:$0x88] }
  0x16   :  { %522 = vrot.lane.b32.xlu1 %v7629_v24, %s8535_s15  ;;  %v1521_v33 = vrot.slane %v1516_v25, %v8660_v19  ;;  %v1500_v34 = vpack.i.b16 %v1499_v26, %v1499_v26  ;;  %v138_v35 = vshrl.u32 %v7612_v27, 16  ;;  %v7614_v36 = vcombine.low %v126_v23, %v126_v23 }
  0x17   :  { %348 = vrot.lane.b32.xlu0 %v7622_v28, %s8536_s24  ;;  %v1529_v38 = vrot.slane %v1524_v29, %v8660_v19  ;;  %v1508_v39 = vpack.i.b16 %v1507_v30, %v1507_v30  ;;  %v146_v40 = vshrl.u32 %v7613_v31, 16  ;;  %v7615_v41 = vcombine.high %v126_v23, %v126_v23 }
  0x18   :  { %v1505_v42 = vrot.slane %v1500_v34, %v8660_v19  ;;  %v139_v43 = vpack.i.b16 %v138_v35, %v138_v35  ;;  %v154_v44 = vshrl.u32 %v7614_v36, 16  ;;  %v7654_v45 = vcombine.low %v1318_v32, %v1318_v32 }
  0x19   :  { %v7665_v47 = vcombine.low %v1521_v33, %v1529_v38  ;;  %v1513_v49 = vrot.slane %v1508_v39, %v8660_v19  ;;  %v147_v50 = vpack.i.b16 %v146_v40, %v146_v40  ;;  %v162_v51 = vshrl.u32 %v7615_v41, 16 }
  0x1a   :  { %350 = vrot.lane.b32.xlu1 %v7623_v17, %s8536_s24  ;;  %v144_v53 = vrot.slane %v139_v43, %v8660_v19  ;;  %v155_v54 = vpack.i.b16 %v154_v44, %v154_v44  ;;  %v7655_v55 = vcombine.high %v1318_v32, %v1318_v32  ;;  %v1331_v56 = vpack.i.b16 %v7654_v45, %v7654_v45  ;;  %v2339_v43 = vld [vmem:[%s12489_s1 + $0x18] sm:$0x88] }
  0x1b   :  { %v7664_v57 = vcombine.low %v1505_v42, %v1513_v49  ;;  %v152_v58 = vrot.slane %v147_v50, %v8660_v19  ;;  %v163_v59 = vpack.i.b16 %v162_v51, %v162_v51  ;;  %v7656_v60 = vcombine.low %v1319_v37, %v1319_v37  ;;  %v978_v49 = vld [vmem:[%s12489_s1] sm:$0x88] }
  0x1c   :  { %v160_v61 = vrot.slane %v155_v54, %v8660_v19  ;;  %v1336_v62 = vrot.slane %v1331_v56, %v8660_v19  ;;  %v1338_v63 = vpack.i.b16 %v7655_v55, %v7655_v55  ;;  %v7657_v0 = vcombine.high %v1319_v37, %v1319_v37  ;;  %v979_v54 = vld [vmem:[%s12489_s1 + $0x8] sm:$0x88] }
  0x1d   :  { %1540 = vrot.lane.b32.xlu0 %v7664_v57, %s8537_s12  ;;  %v7616_v2 = vcombine.low %v144_v53, %v152_v58  ;;  %v168_v3 = vrot.slane %v163_v59, %v8660_v19  ;;  %v1345_v4 = vpack.i.b16 %v7656_v60, %v7656_v60  ;;  %v7696_v5 = vcombine.low %v2506_v46, %v2506_v46 }
  0x1e   :  { %1542 = vrot.lane.b32.xlu1 %v7665_v47, %s8537_s12  ;;  %v1343_v7 = vrot.slane %v1338_v63, %v8660_v19  ;;  %v1352_v8 = vpack.i.b16 %v7657_v0, %v7657_v0  ;;  %v7697_v10 = vcombine.high %v2506_v46, %v2506_v46  ;;  %v7698_v11 = vcombine.low %v2507_v52, %v2507_v52  ;;  %v2166_v63 = vld [vmem:[%s12489_s1 + $0x10] sm:$0x44]  ;;  %s8545_s12 = smov 16  }
  0x1f   :  { %v7617_v12 = vcombine.low %v160_v61, %v168_v3  ;;  %v1350_v13 = vrot.slane %v1345_v4, %v8660_v19  ;;  %v2519_v14 = vshrl.u32 %v7696_v5, 16  ;;  %v7699_v15 = vcombine.high %v2507_v52, %v2507_v52  ;;  %v2167_v4 = vld [vmem:[%s12489_s1 + $0x18] sm:$0x44] }
  0x20   :  { %v7658_v16 = vcombine.low %v1336_v62, %v1343_v7  ;;  %v1357_v17 = vrot.slane %v1352_v8, %v8660_v19  ;;  %v2527_v20 = vshrl.u32 %v7697_v10, 16  ;;  %v2535_v21 = vshrl.u32 %v7698_v11, 16 }
  0x21   :  { %179 = vrot.lane.b32.xlu0 %v7616_v2, %s8538_s17  ;;  %v2520_v23 = vpack.i.b16 %v2519_v14, %v2519_v14  ;;  %v2543_v24 = vshrl.u32 %v7699_v15, 16  ;;  %v7648_v25 = vcombine.low %v1146_v1, %v1146_v1  ;;  %v7649_v26 = vcombine.high %v1146_v1, %v1146_v1 }
  0x22   :  { %181 = vrot.lane.b32.xlu1 %v7617_v12, %s8538_s17  ;;  %v7659_v27 = vcombine.low %v1350_v13, %v1357_v17  ;;  %v2528_v28 = vpack.i.b16 %v2527_v20, %v2527_v20  ;;  %v2536_v29 = vpack.i.b16 %v2535_v21, %v2535_v21  ;;  %v7650_v30 = vcombine.low %v1147_v6, %v1147_v6 }
  0x23   :  { %v2525_v31 = vrot.slane %v2520_v23, %v8681_v48  ;;  %v2544_v32 = vpack.i.b16 %v2543_v24, %v2543_v24  ;;  %v1159_v33 = vshrl.u32 %v7648_v25, 16  ;;  %v1167_v34 = vshrl.u32 %v7649_v26, 16  ;;  %v806_v24 = vld [vmem:[%s12489_s1] sm:$0x44] }
  0x24   :  { %v2533_v35 = vrot.slane %v2528_v28, %v8681_v48  ;;  %v2541_v36 = vrot.slane %v2536_v29, %v8681_v48  ;;  %v7651_v37 = vcombine.high %v1147_v6, %v1147_v6  ;;  %v1175_v38 = vshrl.u32 %v7650_v30, 16  ;;  %v807_v29 = vld [vmem:[%s12489_s1 + $0x8] sm:$0x44] }
  0x25   :  { %1368 = vrot.lane.b32.xlu0 %v7658_v16, %s8539_s18  ;;  %v2549_v39 = vrot.slane %v2544_v32, %v8681_v48  ;;  %v1160_v40 = vpack.i.b16 %v1159_v33, %v1159_v33  ;;  %v1168_v41 = vpack.i.b16 %v1167_v34, %v1167_v34  ;;  %v7690_v42 = vcombine.low %v2338_v22, %v2338_v22 }
  0x26   :  { %1370 = vrot.lane.b32.xlu1 %v7659_v27, %s8539_s18  ;;  %v7700_v44 = vcombine.low %v2525_v31, %v2533_v35  ;;  %v1176_v45 = vpack.i.b16 %v1175_v38, %v1175_v38  ;;  %v1183_v46 = vshrl.u32 %v7651_v37, 16  ;;  %v7691_v47 = vcombine.high %v2338_v22, %v2338_v22  ;;  %v1998_v37 = vld [vmem:[%s12489_s1 + $0x10] sm:$0x44] }
  0x27   :  { %v7701_v50 = vcombine.low %v2541_v36, %v2549_v39  ;;  %v1165_v51 = vrot.slane %v1160_v40, %v8681_v48  ;;  %v1173_v52 = vrot.slane %v1168_v41, %v8681_v48  ;;  %v2351_v53 = vpack.i.b16 %v7690_v42, %v7690_v42 }
  0x28   :  { %v1181_v55 = vrot.slane %v1176_v45, %v8681_v48  ;;  %v1184_v56 = vpack.i.b16 %v1183_v46, %v1183_v46  ;;  %v2358_v57 = vpack.i.b16 %v7691_v47, %v7691_v47  ;;  %v7692_v58 = vcombine.low %v2339_v43, %v2339_v43  ;;  %v1999_v46 = vld [vmem:[%s12489_s1 + $0x18] sm:$0x44] }
  0x29   :  { %2560 = vrot.lane.b32.xlu0 %v7700_v44, %s8540_s25  ;;  %v7652_v59 = vcombine.low %v1165_v51, %v1173_v52  ;;  %v2356_v60 = vrot.slane %v2351_v53, %v8681_v48  ;;  %v7693_v61 = vcombine.high %v2339_v43, %v2339_v43  ;;  %v7642_v62 = vcombine.low %v978_v49, %v978_v49 }
  0x2a   :  { %2562 = vrot.lane.b32.xlu1 %v7701_v50, %s8540_s25  ;;  %v1189_v0 = vrot.slane %v1184_v56, %v8681_v48  ;;  %v2363_v1 = vrot.slane %v2358_v57, %v8681_v48  ;;  %v2365_v2 = vpack.i.b16 %v7692_v58, %v7692_v58  ;;  %v7643_v3 = vcombine.high %v978_v49, %v978_v49  ;;  %v638_v56 = vld [vmem:[%s12489_s1] sm:$0x44] }
  0x2b   :  { %v2372_v5 = vpack.i.b16 %v7693_v61, %v7693_v61  ;;  %v991_v6 = vpack.i.b16 %v7642_v62, %v7642_v62  ;;  %v7644_v7 = vcombine.low %v979_v54, %v979_v54  ;;  %v7645_v8 = vcombine.high %v979_v54, %v979_v54  ;;  %v639_v61 = vld [vmem:[%s12489_s1 + $0x8] sm:$0x44] }
  0x2c   :  { %v7653_v10 = vcombine.low %v1181_v55, %v1189_v0  ;;  %v7694_v11 = vcombine.low %v2356_v60, %v2363_v1  ;;  %v2370_v12 = vrot.slane %v2365_v2, %v8681_v48  ;;  %v998_v13 = vpack.i.b16 %v7643_v3, %v7643_v3 }
  0x2d   :  { %1200 = vrot.lane.b32.xlu0 %v7652_v59, %s8541_s11  ;;  %v2377_v14 = vrot.slane %v2372_v5, %v8681_v48  ;;  %v996_v15 = vrot.slane %v991_v6, %v8681_v48  ;;  %v1005_v16 = vpack.i.b16 %v7644_v7, %v7644_v7  ;;  %v1012_v17 = vpack.i.b16 %v7645_v8, %v7645_v8  ;;  %v3186_v6 = vld [vmem:[%s12489_s1 + $0x20] sm:$0x22] }
  0x2e   :  { %1202 = vrot.lane.b32.xlu1 %v7653_v10, %s8541_s11  ;;  %v1003_v20 = vrot.slane %v998_v13, %v8681_v48  ;;  %v8769_v21 = vsub.s32 2, %v8651_v9  ;;  %v7684_v22 = vcombine.low %v2166_v63, %v2166_v63  ;;  %v7685_v23 = vcombine.high %v2166_v63, %v2166_v63 }
  0x2f   :  { %v7695_v25 = vcombine.low %v2370_v12, %v2377_v14  ;;  %v1010_v26 = vrot.slane %v1005_v16, %v8681_v48  ;;  %v1017_v27 = vrot.slane %v1012_v17, %v8681_v48  ;;  %v7686_v28 = vcombine.low %v2167_v4, %v2167_v4  ;;  %v3187_v16 = vld [vmem:[%s12489_s1 + $0x28] sm:$0x22] }
  0x30   :  { %v7646_v30 = vcombine.low %v996_v15, %v1003_v20  ;;  %v2179_v31 = vshrl.u32 %v7684_v22, 16  ;;  %v2187_v9 = vshrl.u32 %v7685_v23, 16  ;;  %v7687_v32 = vcombine.high %v2167_v4, %v2167_v4 }
  0x31   :  { %2388 = vrot.lane.b32.xlu0 %v7694_v11, %s8542_s16  ;;  %v7647_v33 = vcombine.low %v1010_v26, %v1017_v27  ;;  %v2195_v34 = vshrl.u32 %v7686_v28, 16  ;;  %v7636_v35 = vcombine.low %v806_v24, %v806_v24  ;;  %v7637_v36 = vcombine.high %v806_v24, %v806_v24 }
  0x32   :  { %2390 = vrot.lane.b32.xlu1 %v7695_v25, %s8542_s16  ;;  %v2180_v38 = vpack.i.b16 %v2179_v31, %v2179_v31  ;;  %v2188_v39 = vpack.i.b16 %v2187_v9, %v2187_v9  ;;  %v2203_v40 = vshrl.u32 %v7687_v32, 16  ;;  %v7638_v41 = vcombine.low %v807_v29, %v807_v29 }
  0x33   :  { %v2196_v42 = vpack.i.b16 %v2195_v34, %v2195_v34  ;;  %v819_v43 = vshrl.u32 %v7636_v35, 16  ;;  %v827_v44 = vshrl.u32 %v7637_v36, 16  ;;  %v7639_v45 = vcombine.high %v807_v29, %v807_v29 }
  0x34   :  { %v2185_v47 = vrot.slane %v2180_v38, %v8769_v21  ;;  %v2193_v49 = vrot.slane %v2188_v39, %v8769_v21  ;;  %v2204_v50 = vpack.i.b16 %v2203_v40, %v2203_v40  ;;  %v835_v51 = vshrl.u32 %v7638_v41, 16 }
  0x35   :  { %1028 = vrot.lane.b32.xlu0 %v7646_v30, %s8543_s21  ;;  %v2201_v52 = vrot.slane %v2196_v42, %v8769_v21  ;;  %v820_v53 = vpack.i.b16 %v819_v43, %v819_v43  ;;  %v828_v54 = vpack.i.b16 %v827_v44, %v827_v44  ;;  %v843_v55 = vshrl.u32 %v7639_v45, 16 }
  0x36   :  { %1030 = vrot.lane.b32.xlu1 %v7647_v33, %s8543_s21  ;;  %v7688_v57 = vcombine.low %v2185_v47, %v2193_v49  ;;  %v2209_v58 = vrot.slane %v2204_v50, %v8769_v21  ;;  %v836_v59 = vpack.i.b16 %v835_v51, %v835_v51  ;;  %v7678_v60 = vcombine.low %v1998_v37, %v1998_v37 }
  0x37   :  { %v825_v62 = vrot.slane %v820_v53, %v8769_v21  ;;  %v833_v63 = vrot.slane %v828_v54, %v8769_v21  ;;  %v844_v0 = vpack.i.b16 %v843_v55, %v843_v55  ;;  %v7679_v1 = vcombine.high %v1998_v37, %v1998_v37 }
  0x38   :  { %v7689_v2 = vcombine.low %v2201_v52, %v2209_v58  ;;  %v841_v3 = vrot.slane %v836_v59, %v8769_v21  ;;  %v2011_v4 = vpack.i.b16 %v7678_v60, %v7678_v60  ;;  %v7680_v5 = vcombine.low %v1999_v46, %v1999_v46 }
  0x39   :  { %2220 = vrot.lane.b32.xlu0 %v7688_v57, %s8544_s29  ;;  %v7640_v7 = vcombine.low %v825_v62, %v833_v63  ;;  %v849_v8 = vrot.slane %v844_v0, %v8769_v21  ;;  %v2018_v10 = vpack.i.b16 %v7679_v1, %v7679_v1  ;;  %v7681_v11 = vcombine.high %v1999_v46, %v1999_v46 }
  0x3a   :  { %2222 = vrot.lane.b32.xlu1 %v7689_v2, %s8544_s29  ;;  %v2016_v12 = vrot.slane %v2011_v4, %v8769_v21  ;;  %v2025_v13 = vpack.i.b16 %v7680_v5, %v7680_v5  ;;  %v7630_v14 = vcombine.low %v638_v56, %v638_v56  ;;  %v7631_v15 = vcombine.high %v638_v56, %v638_v56 }
  0x3b   :  { %v7641_v17 = vcombine.low %v841_v3, %v849_v8  ;;  %v2023_v20 = vrot.slane %v2018_v10, %v8769_v21  ;;  %v2032_v22 = vpack.i.b16 %v7681_v11, %v7681_v11  ;;  %v7632_v23 = vcombine.low %v639_v61, %v639_v61 }
  0x3c   :  { %v2030_v24 = vrot.slane %v2025_v13, %v8769_v21  ;;  %v651_v25 = vpack.i.b16 %v7630_v14, %v7630_v14  ;;  %v658_v26 = vpack.i.b16 %v7631_v15, %v7631_v15  ;;  %v7633_v27 = vcombine.high %v639_v61, %v639_v61 }
  0x3d   :  { %860 = vrot.lane.b32.xlu0 %v7640_v7, %s8545_s12  ;;  %v7682_v28 = vcombine.low %v2016_v12, %v2023_v20  ;;  %v2037_v29 = vrot.slane %v2032_v22, %v8769_v21  ;;  %v665_v30 = vpack.i.b16 %v7632_v23, %v7632_v23  ;;  %v7720_v31 = vcombine.low %v3186_v6, %v3186_v6 }
  0x3e   :  { %862 = vrot.lane.b32.xlu1 %v7641_v17, %s8545_s12  ;;  %v656_v9 = vrot.slane %v651_v25, %v8769_v21  ;;  %v663_v32 = vrot.slane %v658_v26, %v8769_v21  ;;  %v672_v33 = vpack.i.b16 %v7633_v27, %v7633_v27  ;;  %v7721_v34 = vcombine.high %v3186_v6, %v3186_v6 }
  0x3f   :  { %15 = vsyncpa [#allocation5], 0  ;;  %v7683_v35 = vcombine.low %v2030_v24, %v2037_v29  ;;  %v670_v36 = vrot.slane %v665_v30, %v8769_v21  ;;  %v3199_v37 = vshrl.u32 %v7720_v31, 16  ;;  %v7722_v38 = vcombine.low %v3187_v16, %v3187_v16  ;;  %v3018_v39 = vld [vmem:[%s12489_s1 + $0x20] sm:$0x22]  ;;  %s8546_s17 = smov 34  }
  0x40   :  { %v677_v40 = vrot.slane %v672_v33, %v8769_v21  ;;  %v3207_v41 = vshrl.u32 %v7721_v34, 16  ;;  %v7723_v42 = vcombine.high %v3187_v16, %v3187_v16  ;;  %v3019_v43 = vld [vmem:[%s12489_s1 + $0x28] sm:$0x22]  ;;  %v7634_v44 = vcombine.low %v656_v9, %v663_v32  ;;  %s8547_s18 = smov 4   ;;  %s8548_s19 = smov 52   ;;  %v8850_v25 = vld [vmem:[%s12488_s0 + $0x3c] sm:$0xff] }
  0x41   :  { %2048 = vrot.lane.b32.xlu0 %v7682_v28, %s8546_s17  ;;  %v3200_v45 = vpack.i.b16 %v3199_v37, %v3199_v37  ;;  %v3215_v46 = vshrl.u32 %v7722_v38, 16  ;;  %v7714_v51 = vcombine.low %v3018_v39, %v3018_v39  ;;  %v7715_v54 = vcombine.high %v3018_v39, %v3018_v39  ;;  %s8549_s20 = smov 51   ;;  %v8832_v14 = vld [vmem:[%s12488_s0 + $0x28] sm:$0xff]  ;;  %s8550_s28 = smov 96  }
  0x42   :  { %2050 = vrot.lane.b32.xlu1 %v7683_v35, %s8546_s17  ;;  %v7635_v47 = vcombine.low %v670_v36, %v677_v40  ;;  %v3208_v49 = vpack.i.b16 %v3207_v41, %v3207_v41  ;;  %v3223_v50 = vshrl.u32 %v7723_v42, 16  ;;  %v7716_v55 = vcombine.low %v3019_v43, %v3019_v43  ;;  %v8856_v26 = vld [vmem:[%s12488_s0 + $0x44] sm:$0xff]  ;;  %s8551_s11 = smov 126   ;;  %s8553_s21 = smov 125  }
  0x43   :  { %v3205_v52 = vrot.slane %v3200_v45, %v8657_v18  ;;  %v3216_v53 = vpack.i.b16 %v3215_v46, %v3215_v46  ;;  %v3031_v58 = vpack.i.b16 %v7714_v51, %v7714_v51  ;;  %v7717_v59 = vcombine.high %v3019_v43, %v3019_v43  ;;  %v8874_v40 = vld [vmem:[%s12488_s0] sm:$0xff]  ;;  %v8883_v43 = vld [vmem:[%s12488_s0 + $0x8] sm:$0xff]  ;;  %s8554_s26 = smov 108   ;;  %s8555_s29 = smov 127  }
  0x44   :  { %v3213_v56 = vrot.slane %v3208_v49, %v8657_v18  ;;  %v3224_v57 = vpack.i.b16 %v3223_v50, %v3223_v50  ;;  %v3038_v61 = vpack.i.b16 %v7715_v54, %v7715_v54  ;;  %v3045_v62 = vpack.i.b16 %v7716_v55, %v7716_v55  ;;  %s8556_s30 = smov 50   ;;  %s8557_s22 = smov 68  }
  0x45   :  { %688 = vrot.lane.b32.xlu0 %v7634_v44, %s8547_s18  ;;  %v3221_v60 = vrot.slane %v3216_v53, %v8657_v18  ;;  %v3036_v1 = vrot.slane %v3031_v58, %v8657_v18  ;;  %v3052_v2 = vpack.i.b16 %v7717_v59, %v7717_v59  ;;  %vm187_vm0 = vcmask 1043456   ;;  %v8888_v44 = vld [vmem:[%s12488_s0 + $0x14] sm:$0xff]  ;;  %s8558_s23 = smov 109   ;;  %s8559_s24 = smov 49  }
  0x46   :  { %690 = vrot.lane.b32.xlu1 %v7635_v47, %s8547_s18  ;;  %v7724_v63 = vcombine.low %v3205_v52, %v3213_v56  ;;  %v3229_v0 = vrot.slane %v3224_v57, %v8657_v18  ;;  %v3043_v3 = vrot.slane %v3038_v61, %v8657_v18  ;;  %v3050_v4 = vrot.slane %v3045_v62, %v8657_v18  ;;  %v8897_v47 = vld [vmem:[%s12488_s0 + $0x1c] sm:$0xff]  ;;  %s8560_s14 = smov 80   ;;  %s8561_s15 = smov 110  }
  0x47   :  { %v3057_v6 = vrot.slane %v3052_v2, %v8657_v18  ;;  %vm1714_vm1 = vcmask 261120   ;;  %v8837_v18 = vld [vmem:[%s12488_s0 + $0x30] sm:$0xff]  ;;  %vm354_vm2 = vcmask 15360   ;;  %vm1886_vm3 = vcmask 269312   ;;  %s8562_s16 = smov 67   ;;  %s8565_s25 = smov 66  }
  0x48   :  { %v7725_v5 = vcombine.low %v3221_v60, %v3229_v0  ;;  %v7718_v7 = vcombine.low %v3036_v1, %v3043_v3  ;;  %vm526_vm4 = vcmask 23552   ;;  %vm1546_vm5 = vcmask 162816   ;;  %s12593_s18 = smov 93   ;;  %s12585_s17 = smov 94  }
  0x49   :  { %3240 = vrot.lane.b32.xlu0 %v7724_v63, %s8548_s19  ;;  %v7719_v8 = vcombine.low %v3050_v4, %v3057_v6  ;;  %vm185_vm6 = vcmask 7168   ;;  %vm1374_vm7 = vcmask 154624   ;;  %vm2566_vm8 = vcmask 392192   ;;  %s8571_s12 = smov 64   ;;  %s8572_s13 = smov 76  }
  0x4a   :  { %3242 = vrot.lane.b32.xlu1 %v7725_v5, %s8548_s19  ;;  %vm1206_vm9 = vcmask 146432   ;;  %vm2394_vm10 = vcmask 293888   ;;  %vm1954_vm11 = vcmask 777216   ;;  %vm1034_vm12 = vcmask 138240   ;;  %s12660_s27 = smov 77   ;;  %s12635_s19 = smov 78  }
  0x4b   :  { %vm594_vm13 = vcmask 1022976   ;;  %vm1782_vm14 = vcmask 785408   ;;  %vm422_vm15 = vcmask 1031168  }
  0x4d   :  { %3068 = vrot.lane.b32.xlu0 %v7718_v7, %s8549_s20 }
  0x4e   :  { %3070 = vrot.lane.b32.xlu1 %v7719_v8, %s8549_s20  ;;  %s8552_s20 = smov 95  }
  0x7d   :  { %v1711_v10 = vpop.permute.xlu1 %1710  ;;  %v1709_v11 = vpop.permute.xlu0 %1708 }
  0x7e   :  { %v8827_v12 = vrot.slane %v1711_v10, 4  ;;  %v1712_v13 = vrot.slane %v1709_v11, 4 }
  0x80   :  { %12737 = vst [vmem:[#allocation7_spill] sm:$0xff] %v8827_v12  ;;  %v1715_v15 = vsel %vm1714_vm1, %v1712_v13, %v1709_v11  ;;  %v1716_v16 = vsel %vm187_vm0, %v1712_v13, %v8827_v12 }
  0x81   :  { %v1881_v17 = vpop.permute.xlu0 %1880  ;;  %v1727_v20 = vmul.bf16 %v1715_v15, %v8832_v14  ;;  %v1717_v22 = vsel %vm1714_vm1, %v1716_v16, %v1711_v10  ;;  %v1730_v28 = vmul.bf16 %v1715_v15, %v8850_v25  ;;  %v1721_v42 = vmul.bf16 %v1715_v15, %v8874_v40 }
  0x82   :  { %v8844_v23 = vpop.permute.xlu1 %520  ;;  %v1728_v24 = vmul.bf16 %v1717_v22, %v8837_v18  ;;  %v1731_v29 = vmul.bf16 %v1717_v22, %v8856_v26  ;;  %v1722_v45 = vmul.bf16 %v1717_v22, %v8883_v43  ;;  %v1724_v46 = vmul.bf16 %v1715_v15, %v8888_v44 }
  0x83   :  { %1757 = vrot.lane.b32.xlu0 %v1727_v20, %s8550_s28  ;;  %v1725_v49 = vmul.bf16 %v1717_v22, %v8897_v47  ;;  %v1884_v51 = vrot.slane %v1881_v17, 4  ;;  %v524_v59 = vrot.slane %v8844_v23, 4 }
  0x84   :  { %1759 = vrot.lane.b32.xlu1 %v1728_v24, %s8550_s28 }
  0x85   :  { %v1883_v27 = vpop.permute.xlu0 %1882  ;;  %v1887_v55 = vsel %vm1886_vm3, %v1884_v51, %v1881_v17  ;;  %v527_v0 = vsel %vm526_vm4, %v524_v59, %v8844_v23 }
  0x86   :  { %v8903_v52 = vrot.slane %v1883_v27, 4  ;;  %v1899_v58 = vmul.bf16 %v1887_v55, %v8832_v14  ;;  %v1902_v63 = vmul.bf16 %v1887_v55, %v8850_v25  ;;  %v539_v4 = vmul.bf16 %v8832_v14, %v527_v0 }
  0x87   :  { %1763 = vrot.lane.b32.xlu0 %v1730_v28, %s8550_s28  ;;  %v542_v10 = vmul.bf16 %v8850_v25, %v527_v0  ;;  %v1893_v15 = vmul.bf16 %v1887_v55, %v8874_v40  ;;  %v1896_v20 = vmul.bf16 %v1887_v55, %v8888_v44 }
  0x88   :  { %v523_v30 = vpop.permute.xlu1 %522  ;;  %1765 = vrot.lane.b32.xlu1 %v1731_v29, %s8550_s28  ;;  %12739 = vst [vmem:[#allocation9_spill] sm:$0xff] %v8903_v52  ;;  %v1888_v56 = vsel %vm187_vm0, %v1884_v51, %v8903_v52 }
  0x89   :  { %v349_v31 = vpop.permute.xlu0 %348  ;;  %v1889_v60 = vsel %vm1886_vm3, %v1888_v56, %v1883_v27  ;;  %v8916_v61 = vrot.slane %v523_v30, 4  ;;  %v533_v27 = vmul.bf16 %v8874_v40, %v527_v0  ;;  %vm1614_vm3 = vcmask 883712  }
  0x8a   :  { %v352_v9 = vrot.slane %v349_v31, 4  ;;  %v1900_v62 = vmul.bf16 %v1889_v60, %v8837_v18  ;;  %v1903_v3 = vmul.bf16 %v1889_v60, %v8856_v26  ;;  %v1894_v17 = vmul.bf16 %v1889_v60, %v8883_v43 }
  0x8b   :  { %12740 = vst [vmem:[#allocation10_spill] sm:$0xff] %v8916_v61  ;;  %v528_v1 = vsel %vm187_vm0, %v524_v59, %v8916_v61  ;;  %v1897_v24 = vmul.bf16 %v1889_v60, %v8897_v47 }
  0x8c   :  { %v351_v32 = vpop.permute.xlu1 %350  ;;  %v355_v33 = vsel %vm354_vm2, %v352_v9, %v349_v31  ;;  %v529_v5 = vsel %vm526_vm4, %v528_v1, %v523_v30  ;;  %v2846_v31 = vld [vmem:[%s12489_s1 + $0x20] sm:$0x11]  ;;  %vm866_vm4 = vcmask 130048  }
  0x8d   :  { %v8863_v34 = vrot.slane %v351_v32, 4  ;;  %v367_v35 = vmul.bf16 %v8832_v14, %v355_v33  ;;  %v370_v39 = vmul.bf16 %v8850_v25, %v355_v33  ;;  %v361_v50 = vmul.bf16 %v8874_v40, %v355_v33 }
  0x8e   :  { %v364_v54 = vmul.bf16 %v8888_v44, %v355_v33  ;;  %v540_v8 = vmul.bf16 %v8837_v18, %v529_v5  ;;  %v543_v13 = vmul.bf16 %v8856_v26, %v529_v5 }
  0x8f   :  { %12738 = vst [vmem:[#allocation8_spill] sm:$0xff] %v8863_v34  ;;  %v356_v36 = vsel %vm187_vm0, %v352_v9, %v8863_v34  ;;  %397 = vrot.lane.b32.xlu0 %v367_v35, %s8551_s11  ;;  %v1541_v2 = vpop.permute.xlu0 %1540  ;;  %v534_v9 = vmul.bf16 %v8883_v43, %v529_v5 }
  0x90   :  { %v357_v37 = vsel %vm354_vm2, %v356_v36, %v351_v32  ;;  %v1543_v6 = vpop.permute.xlu1 %1542  ;;  %v1544_v28 = vrot.slane %v1541_v2, 4  ;;  %v536_v32 = vmul.bf16 %v8888_v44, %v527_v0  ;;  %vm2226_vm2 = vcmask 285696  }
  0x91   :  { %v368_v38 = vmul.bf16 %v8837_v18, %v357_v37  ;;  %v371_v41 = vmul.bf16 %v8856_v26, %v357_v37  ;;  %v362_v53 = vmul.bf16 %v8883_v43, %v357_v37  ;;  %v365_v57 = vmul.bf16 %v8897_v47, %v357_v37 }
  0x92   :  { %v8952_v29 = vrot.slane %v1543_v6, 4  ;;  %v8965_v35 = vsel %vm1546_vm5, %v1544_v28, %v1541_v2  ;;  %v7708_v37 = vcombine.low %v2846_v31, %v2846_v31 }
  0x93   :  { %399 = vrot.lane.b32.xlu1 %v368_v38, %s8551_s11  ;;  %403 = vrot.lane.b32.xlu0 %v370_v39, %s8551_s11  ;;  %v180_v7 = vpop.permute.xlu0 %179  ;;  %v7709_v38 = vcombine.high %v2846_v31, %v2846_v31  ;;  %v2847_v39 = vld [vmem:[%s12489_s1 + $0x28] sm:$0x11] }
  0x94   :  { %v182_v11 = vpop.permute.xlu1 %181  ;;  %12741 = vst [vmem:[#allocation11_spill] sm:$0xff] %v8952_v29  ;;  %v1548_v36 = vsel %vm187_vm0, %v1544_v28, %v8952_v29  ;;  %v7711_v56 = vcombine.high %v2847_v39, %v2847_v39 }
  0x95   :  { %v8983_v51 = vrot.slane %v182_v11, 4  ;;  %v2867_v55 = vshrl.u32 %v7709_v38, 16 }
  0x96   :  { %v2883_v2 = vshrl.u32 %v7711_v56, 16 }
  0x97   :  { %405 = vrot.lane.b32.xlu1 %v371_v41, %s8551_s11  ;;  %1745 = vrot.lane.b32.xlu0 %v1721_v42, %s8550_s28  ;;  %v8937_v16 = vpop.permute.xlu0 %1368  ;;  %v537_v41 = vmul.bf16 %v8897_v47, %v529_v5  ;;  %v1559_v42 = vmul.bf16 %v8832_v14, %v8965_v35  ;;  %12742 = vst [vmem:[#allocation12_spill] sm:$0xff] %v8983_v51 }
  0x98   :  { %v8943_v22 = vpop.permute.xlu1 %1370  ;;  %v2868_v1 = vpack.i.b16 %v2867_v55, %v2867_v55 }
  0x9b   :  { %1747 = vrot.lane.b32.xlu1 %v1722_v45, %s8550_s28  ;;  %1751 = vrot.lane.b32.xlu0 %v1724_v46, %s8550_s28  ;;  %v8947_v23 = vpop.permute.xlu0 %2560  ;;  %v183_v46 = vrot.slane %v180_v7, 4 }
  0x9c   :  { %v8955_v30 = vpop.permute.xlu1 %2562 }
  0x9d   :  { %v8993_v59 = vsel %vm185_vm6, %v183_v46, %v180_v7 }
  0x9f   :  { %1753 = vrot.lane.b32.xlu1 %v1725_v49, %s8550_s28  ;;  %385 = vrot.lane.b32.xlu0 %v361_v50, %s8551_s11  ;;  %v8962_v33 = vpop.permute.xlu0 %1200  ;;  %v8980_v49 = vsel %vm1546_vm5, %v1548_v36, %v1543_v6  ;;  %v7710_v50 = vcombine.low %v2847_v39, %v2847_v39  ;;  %v4037_v36 = vld [vmem:[%s12489_s1 + $0x30] sm:$0x11]  ;;  %vm254_vm5 = vcmask 1039360  }
  0xa0   :  { %v8977_v45 = vpop.permute.xlu1 %1202  ;;  %v7750_v39 = vcombine.low %v4037_v36, %v4037_v36 }
  0xa1   :  { %v2875_v60 = vshrl.u32 %v7710_v50, 16  ;;  %v1556_v50 = vmul.bf16 %v8888_v44, %v8965_v35 }
  0xa3   :  { %387 = vrot.lane.b32.xlu1 %v362_v53, %s8551_s11  ;;  %391 = vrot.lane.b32.xlu0 %v364_v54, %s8551_s11  ;;  %v8986_v53 = vpop.permute.xlu0 %2388  ;;  %v2859_v54 = vshrl.u32 %v7708_v37, 16  ;;  %v2876_v7 = vpack.i.b16 %v2875_v60, %v2875_v60  ;;  %v1553_v37 = vmul.bf16 %v8874_v40, %v8965_v35 }
  0xa5   :  { %v2860_v0 = vpack.i.b16 %v2859_v54, %v2859_v54 }
  0xa7   :  { %393 = vrot.lane.b32.xlu1 %v365_v57, %s8551_s11  ;;  %1929 = vrot.lane.b32.xlu0 %v1899_v58, %s8552_s20  ;;  %v1560_v57 = vmul.bf16 %v8837_v18, %v8980_v49  ;;  %v1562_v58 = vmul.bf16 %v8850_v25, %v8965_v35  ;;  %v9005_v5 = vpop.permute.xlu0 %1028 }
  0xab   :  { %1931 = vrot.lane.b32.xlu1 %v1900_v62, %s8552_s20  ;;  %1935 = vrot.lane.b32.xlu0 %v1902_v63, %s8552_s20  ;;  %v188_v62 = vsel %vm187_vm0, %v183_v46, %v8983_v51  ;;  %v8999_v63 = vpop.permute.xlu1 %2390  ;;  %v9024_v28 = vpop.permute.xlu0 %2220  ;;  %v1554_v46 = vmul.bf16 %v8883_v43, %v8980_v49 }
  0xac   :  { %v9008_v6 = vsel %vm185_vm6, %v188_v62, %v182_v11  ;;  %v1557_v62 = vmul.bf16 %v8897_v47, %v8980_v49  ;;  %vm2054_vm6 = vcmask 277504  }
  0xad   :  { %v203_v31 = vmul.bf16 %v8856_v26, %v9008_v6 }
  0xaf   :  { %1937 = vrot.lane.b32.xlu1 %v1903_v3, %s8552_s20  ;;  %569 = vrot.lane.b32.xlu0 %v539_v4, %s8553_s21  ;;  %v1563_v3 = vmul.bf16 %v8856_v26, %v8980_v49  ;;  %v199_v4 = vmul.bf16 %v8832_v14, %v8993_v59  ;;  %v9036_v38 = vpop.permute.xlu0 %860  ;;  %v194_v49 = vmul.bf16 %v8883_v43, %v9008_v6 }
  0xb3   :  { %571 = vrot.lane.b32.xlu1 %v540_v8, %s8553_s21  ;;  %575 = vrot.lane.b32.xlu0 %v542_v10, %s8553_s21  ;;  %v2865_v8 = vrot.slane %v2860_v0, %v8660_v19  ;;  %v2873_v10 = vrot.slane %v2868_v1, %v8660_v19  ;;  %v193_v0 = vmul.bf16 %v8874_v40, %v8993_v59 }
  0xb5   :  { %v7712_v11 = vcombine.low %v2865_v8, %v2873_v10  ;;  %v196_v8 = vmul.bf16 %v8888_v44, %v8993_v59 }
  0xb7   :  { %577 = vrot.lane.b32.xlu1 %v543_v13, %s8553_s21  ;;  %1917 = vrot.lane.b32.xlu0 %v1893_v15, %s8552_s20  ;;  %v2884_v13 = vpack.i.b16 %v2883_v2, %v2883_v2  ;;  %v200_v15 = vmul.bf16 %v8837_v18, %v9008_v6 }
  0xbb   :  { %1919 = vrot.lane.b32.xlu1 %v1894_v17, %s8552_s20  ;;  %1923 = vrot.lane.b32.xlu0 %v1896_v20, %s8552_s20  ;;  %v202_v17 = vmul.bf16 %v8850_v25, %v8993_v59  ;;  %v9018_v20 = vpop.permute.xlu1 %1030  ;;  %v2679_v59 = vld [vmem:[%s12489_s1 + $0x28] sm:$0x11] }
  0xbf   :  { %1925 = vrot.lane.b32.xlu1 %v1897_v24, %s8552_s20  ;;  %557 = vrot.lane.b32.xlu0 %v533_v27, %s8553_s21  ;;  %v2881_v24 = vrot.slane %v2876_v7, %v8660_v19  ;;  %v2889_v27 = vrot.slane %v2884_v13, %v8660_v19  ;;  %v2678_v7 = vld [vmem:[%s12489_s1 + $0x20] sm:$0x11]  ;;  %v1372_v13 = vrot.slane %v8937_v16, 4 }
  0xc3   :  { %559 = vrot.lane.b32.xlu1 %v534_v9, %s8553_s21  ;;  %563 = vrot.lane.b32.xlu0 %v536_v32, %s8553_s21  ;;  %v7713_v9 = vcombine.low %v2881_v24, %v2889_v27  ;;  %v9029_v32 = vpop.permute.xlu1 %2222  ;;  %v7702_v27 = vcombine.low %v2678_v7, %v2678_v7 }
  0xc7   :  { %565 = vrot.lane.b32.xlu1 %v537_v41, %s8553_s21  ;;  %1589 = vrot.lane.b32.xlu0 %v1559_v42, %s8554_s26  ;;  %v7751_v41 = vcombine.high %v4037_v36, %v4037_v36  ;;  %v4038_v42 = vld [vmem:[%s12489_s1 + $0x38] sm:$0x11]  ;;  %v9046_v54 = vpop.permute.xlu1 %862 }
  0xc8   :  { %v7752_v55 = vcombine.low %v4038_v42, %v4038_v42  ;;  %v7753_v56 = vcombine.high %v4038_v42, %v4038_v42  ;;  %v7705_v42 = vcombine.high %v2679_v59, %v2679_v59 }
  0xc9   :  { %v4057_v60 = vpack.i.b16 %v7751_v41, %v7751_v41  ;;  %v7704_v41 = vcombine.low %v2679_v59, %v2679_v59 }
  0xca   :  { %v4064_v1 = vpack.i.b16 %v7752_v55, %v7752_v55  ;;  %v4071_v35 = vpack.i.b16 %v7753_v56, %v7753_v56  ;;  %v2691_v55 = vpack.i.b16 %v7702_v27, %v7702_v27  ;;  %v2564_v27 = vrot.slane %v8947_v23, 4 }
  0xcb   :  { %1591 = vrot.lane.b32.xlu1 %v1560_v57, %s8554_s26  ;;  %1595 = vrot.lane.b32.xlu0 %v1562_v58, %s8554_s26  ;;  %v9050_v57 = vpop.permute.xlu0 %2048  ;;  %v4050_v58 = vpack.i.b16 %v7750_v39, %v7750_v39  ;;  %v9058_v2 = vpop.permute.xlu1 %2050 }
  0xcf   :  { %1597 = vrot.lane.b32.xlu1 %v1563_v3, %s8554_s26  ;;  %229 = vrot.lane.b32.xlu0 %v199_v4, %s8555_s29  ;;  %v4055_v3 = vrot.slane %v4050_v58, %v8660_v19  ;;  %v4062_v4 = vrot.slane %v4057_v60, %v8660_v19  ;;  %v9069_v10 = vpop.permute.xlu0 %688  ;;  %v9084_v36 = vpop.permute.xlu1 %690 }
  0xd1   :  { %v7754_v24 = vcombine.low %v4055_v3, %v4062_v4 }
  0xd3   :  { %231 = vrot.lane.b32.xlu1 %v200_v15, %s8555_s29  ;;  %235 = vrot.lane.b32.xlu0 %v202_v17, %s8555_s29  ;;  %v4069_v15 = vrot.slane %v4064_v1, %v8660_v19  ;;  %v4076_v17 = vrot.slane %v4071_v35, %v8660_v19  ;;  %v9096_v60 = vpop.permute.xlu1 %3242  ;;  %v2712_v1 = vpack.i.b16 %v7705_v42, %v7705_v42 }
  0xd5   :  { %v7755_v39 = vcombine.low %v4069_v15, %v4076_v17 }
  0xd7   :  { %237 = vrot.lane.b32.xlu1 %v203_v31, %s8555_s29  ;;  %2900 = vrot.lane.b32.xlu0 %v7712_v11, %s8556_s30  ;;  %v9075_v11 = vrot.slane %v8943_v22, 4  ;;  %v7703_v31 = vcombine.high %v2678_v7, %v2678_v7 }
  0xd9   :  { %12743 = vst [vmem:[#allocation13_spill] sm:$0xff] %v9075_v11  ;;  %v2698_v56 = vpack.i.b16 %v7703_v31, %v7703_v31  ;;  %v9118_v31 = vrot.slane %v8955_v30, 4 }
  0xdb   :  { %2902 = vrot.lane.b32.xlu1 %v7713_v9, %s8556_s30  ;;  %1577 = vrot.lane.b32.xlu0 %v1553_v37, %s8554_s26  ;;  %v197_v9 = vmul.bf16 %v8897_v47, %v9008_v6  ;;  %v1375_v37 = vsel %vm1374_vm7, %v1372_v13, %v8937_v16  ;;  %v2705_v16 = vpack.i.b16 %v7704_v41, %v7704_v41  ;;  %s8568_s30 = smov 65  }
  0xdc   :  { %v1387_v6 = vmul.bf16 %v8832_v14, %v1375_v37  ;;  %v1390_v4 = vmul.bf16 %v8850_v25, %v1375_v37  ;;  %12744 = vst [vmem:[#allocation14_spill] sm:$0xff] %v9118_v31  ;;  %v1384_v42 = vmul.bf16 %v8888_v44, %v1375_v37 }
  0xdd   :  { %v2710_v7 = vrot.slane %v2705_v16, %v8660_v19  ;;  %v3866_v16 = vld [vmem:[%s12489_s1 + $0x28] sm:$0x88] }
  0xdf   :  { %1579 = vrot.lane.b32.xlu1 %v1554_v46, %s8554_s26  ;;  %1583 = vrot.lane.b32.xlu0 %v1556_v50, %s8554_s26  ;;  %v1376_v46 = vsel %vm187_vm0, %v1372_v13, %v9075_v11  ;;  %v9091_v50 = vpop.permute.xlu0 %3240 }
  0xe0   :  { %v1377_v58 = vsel %vm1374_vm7, %v1376_v46, %v8943_v22  ;;  %v9132_v46 = vsel %vm2566_vm8, %v2564_v27, %v8947_v23  ;;  %vm1442_vm7 = vcmask 891904  }
  0xe1   :  { %v1388_v35 = vmul.bf16 %v8837_v18, %v1377_v58  ;;  %v1391_v13 = vmul.bf16 %v8856_v26, %v1377_v58  ;;  %v1382_v41 = vmul.bf16 %v8883_v43, %v1377_v58  ;;  %v2579_v23 = vmul.bf16 %v9132_v46, %v8832_v14 }
  0xe3   :  { %1585 = vrot.lane.b32.xlu1 %v1557_v62, %s8554_s26  ;;  %217 = vrot.lane.b32.xlu0 %v193_v0, %s8555_s29  ;;  %v2696_v62 = vrot.slane %v2691_v55, %v8660_v19  ;;  %v2703_v0 = vrot.slane %v2698_v56, %v8660_v19  ;;  %v9102_v3 = vpop.permute.xlu0 %3068  ;;  %v2568_v55 = vsel %vm187_vm0, %v2564_v27, %v9118_v31  ;;  %v9232_v31 = vrot.slane %v8999_v63, 4 }
  0xe5   :  { %v7706_v22 = vcombine.low %v2696_v62, %v2703_v0  ;;  %12751 = vst [vmem:[#allocation21_spill] sm:$0xff] %v9232_v31 }
  0xe7   :  { %219 = vrot.lane.b32.xlu1 %v194_v49, %s8555_s29  ;;  %223 = vrot.lane.b32.xlu0 %v196_v8, %s8555_s29  ;;  %v2717_v49 = vrot.slane %v2712_v1, %v8660_v19  ;;  %v9109_v8 = vpop.permute.xlu1 %3070  ;;  %v9150_v1 = vsel %vm2566_vm8, %v2568_v55, %v8955_v30  ;;  %vm694_vm8 = vcmask 31744  }
  0xe8   :  { %v2580_v30 = vmul.bf16 %v9150_v1, %v8837_v18 }
  0xe9   :  { %v7707_v17 = vcombine.low %v2710_v7, %v2717_v49  ;;  %v7747_v49 = vcombine.high %v3866_v16, %v3866_v16 }
  0xeb   :  { %225 = vrot.lane.b32.xlu1 %v197_v9, %s8555_s29  ;;  %4087 = vrot.lane.b32.xlu0 %v7754_v24, %s8557_s22  ;;  %v1381_v24 = vmul.bf16 %v8874_v40, %v1375_v37  ;;  %v3865_v9 = vld [vmem:[%s12489_s1 + $0x20] sm:$0x88]  ;;  %v1385_v37 = vmul.bf16 %v8897_v47, %v1377_v58 }
  0xec   :  { %v7744_v56 = vcombine.low %v3865_v9, %v3865_v9 }
  0xee   :  { %v3878_v58 = vshrl.u32 %v7744_v56, 16  ;;  %v3902_v56 = vshrl.u32 %v7747_v49, 16 }
  0xef   :  { %4089 = vrot.lane.b32.xlu1 %v7755_v39, %s8557_s22  ;;  %1417 = vrot.lane.b32.xlu0 %v1387_v6, %s8558_s23  ;;  %v7745_v6 = vcombine.high %v3865_v9, %v3865_v9 }
  0xf1   :  { %v3886_v7 = vshrl.u32 %v7745_v6, 16 }
  0xf3   :  { %1419 = vrot.lane.b32.xlu1 %v1388_v35, %s8558_s23  ;;  %1423 = vrot.lane.b32.xlu0 %v1390_v4, %s8558_s23  ;;  %v1204_v35 = vrot.slane %v8962_v33, 4  ;;  %v7746_v4 = vcombine.low %v3866_v16, %v3866_v16  ;;  %v3887_v55 = vpack.i.b16 %v3886_v7, %v3886_v7  ;;  %v2583_v16 = vmul.bf16 %v9150_v1, %v8856_v26 }
  0xf4   :  { %v3903_v7 = vpack.i.b16 %v3902_v56, %v3902_v56 }
  0xf5   :  { %v9113_v15 = vpop.permute.xlu0 %1757  ;;  %v9168_v27 = vsel %vm1206_vm9, %v1204_v35, %v8962_v33  ;;  %v3894_v9 = vshrl.u32 %v7746_v4, 16 }
  0xf6   :  { %v9120_v59 = vpop.permute.xlu1 %1759  ;;  %v1219_v33 = vmul.bf16 %v8832_v14, %v9168_v27  ;;  %v1216_v12 = vmul.bf16 %v8888_v44, %v9168_v27 }
  0xf7   :  { %1425 = vrot.lane.b32.xlu1 %v1391_v13, %s8558_s23  ;;  %2728 = vrot.lane.b32.xlu0 %v7706_v22, %s8559_s24  ;;  %12745 = vst [vmem:[#allocation15_spill] sm:$0xff] %v9120_v59  ;;  %v9154_v22 = vrot.slane %v8977_v45, 4 }
  0xf9   :  { %v9126_v39 = vpop.permute.xlu0 %1763  ;;  %12747 = vst [vmem:[#allocation17_spill] sm:$0xff] %v9154_v22 }
  0xfa   :  { %v9141_v62 = vpop.permute.xlu1 %1765 }
  0xfb   :  { %2730 = vrot.lane.b32.xlu1 %v7707_v17, %s8559_s24  ;;  %1405 = vrot.lane.b32.xlu0 %v1381_v24, %s8558_s23  ;;  %12746 = vst [vmem:[#allocation16_spill] sm:$0xff] %v9141_v62  ;;  %v2582_v24 = vmul.bf16 %v9132_v46, %v8850_v25  ;;  %s12595_s24 = smov 92  }
  0xff   :  { %1407 = vrot.lane.b32.xlu1 %v1382_v41, %s8558_s23  ;;  %1411 = vrot.lane.b32.xlu0 %v1384_v42, %s8558_s23  ;;  %v1208_v41 = vsel %vm187_vm0, %v1204_v35, %v9154_v22  ;;  %v3879_v42 = vpack.i.b16 %v3878_v58, %v3878_v58  ;;  %v3895_v35 = vpack.i.b16 %v3894_v9, %v3894_v9 }
 0x100   :  { %v3892_v58 = vrot.slane %v3887_v55, %v8681_v48 }
 0x101   :  { %v9144_v0 = vpop.permute.xlu0 %397  ;;  %v3884_v4 = vrot.slane %v3879_v42, %v8681_v48  ;;  %v3908_v42 = vrot.slane %v3903_v7, %v8681_v48 }
 0x103   :  { %1413 = vrot.lane.b32.xlu1 %v1385_v37, %s8558_s23  ;;  %2609 = vrot.lane.b32.xlu0 %v2579_v23, %s8560_s14  ;;  %v9184_v23 = vsel %vm1206_vm9, %v1208_v41, %v8977_v45  ;;  %v1222_v45 = vmul.bf16 %v8850_v25, %v9168_v27  ;;  %v7748_v9 = vcombine.low %v3884_v4, %v3892_v58  ;;  %vm12688_vm9 = vcmask 654336  }
 0x104   :  { %v3900_v41 = vrot.slane %v3895_v35, %v8681_v48  ;;  %v1223_v56 = vmul.bf16 %v8856_v26, %v9184_v23  ;;  %v2573_v35 = vmul.bf16 %v9132_v46, %v8874_v40  ;;  %v2574_v58 = vmul.bf16 %v9150_v1, %v8883_v43 }
 0x105   :  { %v9158_v13 = vpop.permute.xlu1 %399  ;;  %v9162_v17 = vpop.permute.xlu0 %403 }
 0x107   :  { %2611 = vrot.lane.b32.xlu1 %v2580_v30, %s8560_s14  ;;  %2615 = vrot.lane.b32.xlu0 %v2582_v24, %s8560_s14  ;;  %v1220_v30 = vmul.bf16 %v8837_v18, %v9184_v23 }
 0x109   :  { %v9174_v6 = vpop.permute.xlu1 %405  ;;  %v9178_v37 = vpop.permute.xlu0 %1745 }
 0x10b   :  { %2617 = vrot.lane.b32.xlu1 %v2583_v16, %s8560_s14  ;;  %1249 = vrot.lane.b32.xlu0 %v1219_v33, %s8561_s15  ;;  %v7749_v33 = vcombine.low %v3900_v41, %v3908_v42  ;;  %v2392_v41 = vrot.slane %v8986_v53, 4 }
 0x10d   :  { %v9190_v49 = vpop.permute.xlu1 %1747  ;;  %v9194_v24 = vpop.permute.xlu0 %1751  ;;  %v9239_v11 = vsel %vm2394_vm10, %v2392_v41, %v8986_v53 }
 0x10e   :  { %12748 = vst [vmem:[#allocation18_spill] sm:$0xff] %v9190_v49 }
 0x10f   :  { %1251 = vrot.lane.b32.xlu1 %v1220_v30, %s8561_s15  ;;  %1255 = vrot.lane.b32.xlu0 %v1222_v45, %s8561_s15 }
 0x111   :  { %v9202_v55 = vpop.permute.xlu1 %1753  ;;  %v9206_v16 = vpop.permute.xlu0 %385 }
 0x112   :  { %12749 = vst [vmem:[#allocation19_spill] sm:$0xff] %v9202_v55 }
 0x113   :  { %1257 = vrot.lane.b32.xlu1 %v1223_v56, %s8561_s15  ;;  %3919 = vrot.lane.b32.xlu0 %v7748_v9, %s8562_s16  ;;  %v2576_v9 = vmul.bf16 %v9132_v46, %v8888_v44  ;;  %v2577_v56 = vmul.bf16 %v9150_v1, %v8897_v47  ;;  %v1217_v44 = vmul.bf16 %v8897_v47, %v9184_v23 }
 0x115   :  { %v9209_v30 = vpop.permute.xlu1 %387  ;;  %v9211_v45 = vpop.permute.xlu0 %391 }
 0x117   :  { %3921 = vrot.lane.b32.xlu1 %v7749_v33, %s8562_s16  ;;  %2597 = vrot.lane.b32.xlu0 %v2573_v35, %s8560_s14  ;;  %v1213_v35 = vmul.bf16 %v8874_v40, %v9168_v27  ;;  %v1214_v40 = vmul.bf16 %v8883_v43, %v9184_v23  ;;  %v1032_v43 = vrot.slane %v9005_v5, 4  ;;  %s8564_s16 = smov 111  }
 0x119   :  { %v9216_v4 = vpop.permute.xlu1 %393  ;;  %v1930_v7 = vpop.permute.xlu0 %1929 }
 0x11a   :  { %v1947_v46 = vrot.slane %v1930_v7, 4 }
 0x11b   :  { %2599 = vrot.lane.b32.xlu1 %v2574_v58, %s8560_s14  ;;  %2603 = vrot.lane.b32.xlu0 %v2576_v9, %s8560_s14  ;;  %v2396_v58 = vsel %vm187_vm0, %v2392_v41, %v9232_v31  ;;  %v2407_v41 = vmul.bf16 %v9239_v11, %v8832_v14 }
 0x11d   :  { %v9225_v42 = vpop.permute.xlu1 %1931  ;;  %v1936_v33 = vpop.permute.xlu0 %1935 }
 0x11e   :  { %12750 = vst [vmem:[#allocation20_spill] sm:$0xff] %v9225_v42  ;;  %v1950_v9 = vrot.slane %v1936_v33, 4 }
 0x11f   :  { %2605 = vrot.lane.b32.xlu1 %v2577_v56, %s8560_s14  ;;  %1237 = vrot.lane.b32.xlu0 %v1213_v35, %s8561_s15  ;;  %v12753_v35 = vrot.slane %v9225_v42, 4 }
 0x121   :  { %v9241_v1 = vpop.permute.xlu1 %1937  ;;  %v570_v29 = vpop.permute.xlu0 %569  ;;  %v1962_v53 = vsel %vm187_vm0, %v1947_v46, %v12753_v35  ;;  %v3697_v46 = vld [vmem:[%s12489_s1 + $0x20] sm:$0x88] }
 0x122   :  { %12752 = vst [vmem:[#allocation22_spill] sm:$0xff] %v9241_v1  ;;  %v12507_v56 = vrot.slane %v9241_v1, 4  ;;  %v1963_v47 = vsel %vm1954_vm11, %v1930_v7, %v1962_v53  ;;  %v7739_v31 = vcombine.high %v3697_v46, %v3697_v46  ;;  %v9285_v7 = vsel %vm1034_vm12, %v1032_v43, %v9005_v5 }
 0x123   :  { %1239 = vrot.lane.b32.xlu1 %v1214_v40, %s8561_s15  ;;  %1243 = vrot.lane.b32.xlu0 %v1216_v12, %s8561_s15  ;;  %v9268_v40 = vsel %vm2394_vm10, %v2396_v58, %v8999_v63  ;;  %v9271_v12 = vrot.slane %v9018_v20, 4  ;;  %v3698_v63 = vld [vmem:[%s12489_s1 + $0x28] sm:$0x88]  ;;  %v7738_v58 = vcombine.low %v3697_v46, %v3697_v46  ;;  %v2410_v53 = vmul.bf16 %v9239_v11, %v8850_v25 }
 0x124   :  { %v1966_v27 = vsel %vm187_vm0, %v1950_v9, %v12507_v56  ;;  %v587_v56 = vrot.slane %v570_v29, 4  ;;  %v2408_v5 = vmul.bf16 %v9268_v40, %v8837_v18  ;;  %v2411_v14 = vmul.bf16 %v9268_v40, %v8856_v26 }
 0x125   :  { %12754 = vst [vmem:[#allocation23_spill] sm:$0xff] %v9271_v12  ;;  %v9273_v35 = vpop.permute.xlu1 %571  ;;  %v1967_v23 = vsel %vm1954_vm11, %v1936_v33, %v1966_v27  ;;  %v576_v9 = vpop.permute.xlu0 %575  ;;  %v9292_v27 = vld [vmem:[%s12488_s0 + $0x28] sm:$0xff]  ;;  %vm1274_vm10 = vcmask 900096  }
 0x126   :  { %12755 = vst [vmem:[#allocation24_spill] sm:$0xff] %v9273_v35  ;;  %v7877_v1 = vcombine.high %v1963_v47, %v1967_v23  ;;  %v7876_v42 = vcombine.low %v1963_v47, %v1967_v23  ;;  %v590_v33 = vrot.slane %v576_v9, 4  ;;  %v7741_v47 = vcombine.high %v3698_v63, %v3698_v63 }
 0x127   :  { %1245 = vrot.lane.b32.xlu1 %v1217_v44, %s8561_s15  ;;  %2437 = vrot.lane.b32.xlu0 %v2407_v41, %s12595_s24  ;;  %v1036_v44 = vsel %vm187_vm0, %v1032_v43, %v9271_v12  ;;  %v12756_v52 = vrot.slane %v9273_v35, 4  ;;  %v1047_v18 = vmul.bf16 %v9285_v7, %v9292_v27  ;;  %v3717_v43 = vpack.i.b16 %v7739_v31, %v7739_v31  ;;  %v9327_v12 = vld [vmem:[%s12488_s0 + $0x30] sm:$0xff] }
 0x128   :  { %5651 = vmatprep.subr.bf16.mxu1 %v7877_v1  ;;  %v7740_v1 = vcombine.low %v3698_v63, %v3698_v63  ;;  %v9312_v63 = vsel %vm1034_vm12, %v1036_v44, %v9018_v20  ;;  %v1778_v23 = vrot.slane %v9126_v39, 4  ;;  %v3731_v51 = vpack.i.b16 %v7741_v47, %v7741_v47 }
 0x129   :  { %v9296_v41 = vpop.permute.xlu1 %577  ;;  %5652 = vmatpush1.bf16.msra.mxu1 %v7876_v42  ;;  %v1918_v46 = vpop.permute.xlu0 %1917  ;;  %v602_v22 = vsel %vm187_vm0, %v587_v56, %v12756_v52  ;;  %v3710_v42 = vpack.i.b16 %v7738_v58, %v7738_v58  ;;  %v12758_v47 = vrot.slane %v9141_v62, 4  ;;  %vm3246_vm12 = vcmask 424960  }
 0x12a   :  { %v12757_v35 = vrot.slane %v9296_v41, 4  ;;  %v3724_v31 = vpack.i.b16 %v7740_v1, %v7740_v1  ;;  %v1941_v34 = vrot.slane %v1918_v46, 4  ;;  %v1050_v1 = vmul.bf16 %v8850_v25, %v9285_v7 }
 0x12b   :  { %2439 = vrot.lane.b32.xlu1 %v2408_v5, %s12595_s24  ;;  %2443 = vrot.lane.b32.xlu0 %v2410_v53, %s12595_s24  ;;  %v603_v53 = vsel %vm594_vm13, %v570_v29, %v602_v22  ;;  %v3715_v29 = vrot.slane %v3710_v42, %v8681_v48  ;;  %v3722_v22 = vrot.slane %v3717_v43, %v8681_v48  ;;  %v418_v43 = vrot.slane %v9162_v17, 4 }
 0x12c   :  { %v606_v52 = vsel %vm187_vm0, %v590_v33, %v12757_v35  ;;  %v1775_v35 = vrot.slane %v9113_v15, 4  ;;  %v12528_v33 = vrot.slane %v9120_v59, 4  ;;  %v1051_v25 = vmul.bf16 %v8856_v26, %v9312_v63 }
 0x12d   :  { %v9319_v56 = vpop.permute.xlu1 %1919  ;;  %v607_v5 = vsel %vm594_vm13, %v576_v9, %v606_v52  ;;  %v1924_v58 = vpop.permute.xlu0 %1923  ;;  %v1794_v52 = vsel %vm187_vm0, %v1778_v23, %v12758_v47  ;;  %v3736_v47 = vrot.slane %v3731_v51, %v8681_v48 }
 0x12e   :  { %v12529_v20 = vrot.slane %v9319_v56, 4  ;;  %v7813_v44 = vcombine.high %v603_v53, %v607_v5  ;;  %v7812_v61 = vcombine.low %v603_v53, %v607_v5  ;;  %v1944_v9 = vrot.slane %v1924_v58, 4 }
 0x12f   :  { %2445 = vrot.lane.b32.xlu1 %v2411_v14, %s12595_s24  ;;  %1077 = vrot.lane.b32.xlu0 %v1047_v18, %s8564_s16  ;;  %v1772_v53 = vrot.slane %v9194_v24, 4  ;;  %v1048_v18 = vmul.bf16 %v9312_v63, %v9327_v12  ;;  %v1790_v14 = vsel %vm187_vm0, %v1775_v35, %v12528_v33  ;;  %v1795_v26 = vsel %vm1782_vm14, %v9126_v39, %v1794_v52  ;;  %v9377_v39 = vld [vmem:[%s12488_s0] sm:$0xff] }
 0x130   :  { %5578 = vmatprep.subr.bf16.mxu0 %v7813_v44  ;;  %v1953_v23 = vsel %vm187_vm0, %v1941_v34, %v12529_v20  ;;  %v3729_v44 = vrot.slane %v3724_v31, %v8681_v48  ;;  %v1769_v34 = vrot.slane %v9178_v37, 4  ;;  %v12530_v31 = vrot.slane %v9190_v49, 4 }
 0x131   :  { %v9342_v5 = vpop.permute.xlu1 %1925  ;;  %5579 = vmatpush1.bf16.msra.mxu0 %v7812_v61  ;;  %v9346_v42 = vpop.permute.xlu0 %557  ;;  %v7742_v61 = vcombine.low %v3715_v29, %v3722_v22  ;;  %v1955_v22 = vsel %vm1954_vm11, %v1918_v46, %v1953_v23  ;;  %v12760_v52 = vrot.slane %v9202_v55, 4  ;;  %v9387_v46 = vld [vmem:[%s12488_s0 + $0x14] sm:$0xff] }
 0x132   :  { %v12759_v48 = vrot.slane %v9342_v5, 4 }
 0x133   :  { %1079 = vrot.lane.b32.xlu1 %v1048_v18, %s8564_s16  ;;  %1083 = vrot.lane.b32.xlu0 %v1050_v1, %s8564_s16  ;;  %v1786_v33 = vsel %vm187_vm0, %v1772_v53, %v12760_v52  ;;  %v1791_v53 = vsel %vm1782_vm14, %v9113_v15, %v1790_v14 }
 0x134   :  { %v1958_v51 = vsel %vm187_vm0, %v1944_v9, %v12759_v48  ;;  %v581_v9 = vrot.slane %v9346_v42, 4  ;;  %v7869_v52 = vcombine.high %v1791_v53, %v1795_v26  ;;  %v2401_v48 = vmul.bf16 %v9239_v11, %v9377_v39 }
 0x135   :  { %v9370_v29 = vpop.permute.xlu1 %559  ;;  %v1959_v35 = vsel %vm1954_vm11, %v1924_v58, %v1958_v51  ;;  %v564_v18 = vpop.permute.xlu0 %563  ;;  %v415_v58 = vrot.slane %v9144_v0, 4  ;;  %v7743_v51 = vcombine.low %v3729_v44, %v3736_v47  ;;  %v2404_v47 = vmul.bf16 %v9239_v11, %v9387_v46 }
 0x136   :  { %v7873_v20 = vcombine.high %v1955_v22, %v1959_v35  ;;  %v7872_v1 = vcombine.low %v1955_v22, %v1959_v35  ;;  %v9397_v22 = vld [vmem:[%s12488_s0 + $0x8] sm:$0xff]  ;;  %v584_v35 = vrot.slane %v564_v18, 4  ;;  %v7868_v49 = vcombine.low %v1791_v53, %v1795_v26 }
 0x137   :  { %1085 = vrot.lane.b32.xlu1 %v1051_v25, %s8564_s16  ;;  %3747 = vrot.lane.b32.xlu0 %v7742_v61, %s8565_s25  ;;  %v1781_v25 = vsel %vm187_vm0, %v1769_v34, %v12530_v31  ;;  %v412_v61 = vrot.slane %v9211_v45, 4  ;;  %v2402_v34 = vmul.bf16 %v9268_v40, %v9397_v22  ;;  %v12761_v31 = vrot.slane %v9370_v29, 4 }
 0x138   :  { %5653 = vmatprep.subr.bf16.mxu1 %v7873_v20  ;;  %v1787_v20 = vsel %vm1782_vm14, %v9194_v24, %v1786_v33  ;;  %v1783_v11 = vsel %vm1782_vm14, %v9178_v37, %v1781_v25  ;;  %v12763_v24 = vrot.slane %v9158_v13, 4  ;;  %v12765_v25 = vrot.slane %v9216_v4, 4 }
 0x139   :  { %v9406_v14 = vpop.permute.xlu1 %565  ;;  %5654 = vmatpush1.bf16.msra.mxu1 %v7872_v1  ;;  %v9408_v44 = vpop.permute.xlu0 %1589  ;;  %v593_v15 = vsel %vm187_vm0, %v581_v9, %v12761_v31  ;;  %v12762_v1 = vrot.slane %v9174_v6, 4  ;;  %v12539_v31 = vrot.slane %v9209_v30, 4  ;;  %v7865_v9 = vcombine.high %v1783_v11, %v1787_v20 }
 0x13a   :  { %v12540_v23 = vrot.slane %v9406_v14, 4  ;;  %5655 = vmatprep.subr.bf16.mxu1 %v7869_v52  ;;  %v430_v33 = vsel %vm187_vm0, %v415_v58, %v12763_v24  ;;  %v409_v52 = vrot.slane %v9206_v16, 4  ;;  %v595_v37 = vsel %vm594_vm13, %v9346_v42, %v593_v15 }
 0x13b   :  { %v434_v55 = vsel %vm187_vm0, %v418_v43, %v12762_v1  ;;  %3749 = vrot.lane.b32.xlu1 %v7743_v51, %s8565_s25  ;;  %2425 = vrot.lane.b32.xlu0 %v2401_v48, %s12595_s24  ;;  %v9444_v51 = vld [vmem:[%s12488_s0 + $0x1c] sm:$0xff]  ;;  %v7864_v15 = vcombine.low %v1783_v11, %v1787_v20  ;;  %s8567_s25 = smov 112  }
 0x13c   :  { %v598_v43 = vsel %vm187_vm0, %v584_v35, %v12540_v23  ;;  %v435_v58 = vsel %vm422_vm15, %v9162_v17, %v434_v55  ;;  %v426_v35 = vsel %vm187_vm0, %v412_v61, %v12765_v25  ;;  %v431_v17 = vsel %vm422_vm15, %v9144_v0, %v430_v33 }
 0x13d   :  { %v9434_v26 = vpop.permute.xlu1 %1591  ;;  %5656 = vmatpush1.bf16.msra.mxu1 %v7868_v49  ;;  %v599_v48 = vsel %vm594_vm13, %v564_v18, %v598_v43  ;;  %v1596_v53 = vpop.permute.xlu0 %1595  ;;  %v1607_v49 = vrot.slane %v9408_v44, 4  ;;  %v7805_v24 = vcombine.high %v431_v17, %v435_v58  ;;  %v2405_v61 = vmul.bf16 %v9268_v40, %v9444_v51 }
 0x13e   :  { %12764 = vst [vmem:[#allocation25_spill] sm:$0xff] %v9434_v26  ;;  %v12536_v1 = vrot.slane %v9434_v26, 4  ;;  %5657 = vmatprep.subr.bf16.mxu1 %v7865_v9  ;;  %v7809_v42 = vcombine.high %v595_v37, %v599_v48  ;;  %v7808_v18 = vcombine.low %v595_v37, %v599_v48  ;;  %v1610_v55 = vrot.slane %v1596_v53, 4 }
 0x13f   :  { %2427 = vrot.lane.b32.xlu1 %v2402_v34, %s12595_s24  ;;  %2431 = vrot.lane.b32.xlu0 %v2404_v47, %s12595_s24  ;;  %v421_v9 = vsel %vm187_vm0, %v409_v52, %v12539_v31  ;;  %v2224_v43 = vrot.slane %v9024_v28, 4  ;;  %v9462_v34 = vrot.slane %v9029_v32, 4  ;;  %v1041_v47 = vmul.bf16 %v9377_v39, %v9285_v7 }
 0x140   :  { %5580 = vmatprep.subr.bf16.mxu0 %v7809_v42  ;;  %v427_v40 = vsel %vm422_vm15, %v9211_v45, %v426_v35  ;;  %v1622_v33 = vsel %vm187_vm0, %v1607_v49, %v12536_v1  ;;  %v7804_v52 = vcombine.low %v431_v17, %v435_v58  ;;  %v423_v37 = vsel %vm422_vm15, %v9206_v16, %v421_v9  ;;  %v3525_v58 = vld [vmem:[%s12489_s1 + $0x20] sm:$0x44] }
 0x141   :  { %v9464_v20 = vpop.permute.xlu1 %1597  ;;  %5581 = vmatpush1.bf16.msra.mxu0 %v7808_v18  ;;  %5658 = vmatpush1.bf16.msra.mxu1 %v7864_v15  ;;  %v9466_v0 = vpop.permute.xlu0 %229  ;;  %v7801_v48 = vcombine.high %v423_v37, %v427_v40  ;;  %v1042_v45 = vmul.bf16 %v9397_v22, %v9312_v63  ;;  %v1044_v35 = vmul.bf16 %v9387_v46, %v9285_v7 }
 0x142   :  { %12766 = vst [vmem:[#allocation26_spill] sm:$0xff] %v9464_v20  ;;  %v12535_v11 = vrot.slane %v9464_v20, 4  ;;  %5582 = vmatprep.subr.bf16.mxu0 %v7805_v24  ;;  %v9492_v49 = vsel %vm2226_vm2, %v2224_v43, %v9024_v28  ;;  %v2228_v16 = vsel %vm187_vm0, %v2224_v43, %v9462_v34  ;;  %v1623_v18 = vsel %vm1614_vm3, %v9408_v44, %v1622_v33  ;;  %v3526_v44 = vld [vmem:[%s12489_s1 + $0x28] sm:$0x44] }
 0x143   :  { %2433 = vrot.lane.b32.xlu1 %v2405_v61, %s12595_s24  ;;  %1065 = vrot.lane.b32.xlu0 %v1041_v47, %s8564_s16  ;;  %v247_v17 = vrot.slane %v9466_v0, 4  ;;  %v7800_v61 = vcombine.low %v423_v37, %v427_v40  ;;  %v7732_v9 = vcombine.low %v3525_v58, %v3525_v58  ;;  %v7733_v43 = vcombine.high %v3525_v58, %v3525_v58  ;;  %s12631_s24 = smov 60  }
 0x144   :  { %v1626_v25 = vsel %vm187_vm0, %v1610_v55, %v12535_v11  ;;  %v9510_v47 = vsel %vm2226_vm2, %v2228_v16, %v9029_v32  ;;  %v864_v33 = vrot.slane %v9036_v38, 4  ;;  %v1045_v40 = vmul.bf16 %v9444_v51, %v9312_v63  ;;  %v45_v63 = vld [vmem:[%s12489_s1] sm:$0x11] }
 0x145   :  { %v9496_v42 = vpop.permute.xlu1 %231  ;;  %5583 = vmatpush1.bf16.msra.mxu0 %v7804_v52  ;;  %v1627_v15 = vsel %vm1614_vm3, %v1596_v53, %v1626_v25  ;;  %v236_v7 = vpop.permute.xlu0 %235  ;;  %v9534_v58 = vrot.slane %v9046_v54, 4  ;;  %v3538_v16 = vshrl.u32 %v7732_v9, 16  ;;  %vm3074_vm2 = vcmask 416768  }
 0x146   :  { %v12537_v55 = vrot.slane %v9496_v42, 4  ;;  %5584 = vmatprep.subr.bf16.mxu0 %v7801_v48  ;;  %v7861_v24 = vcombine.high %v1623_v18, %v1627_v15  ;;  %v7860_v28 = vcombine.low %v1623_v18, %v1627_v15  ;;  %v250_v53 = vrot.slane %v236_v7, 4 }
 0x147   :  { %1067 = vrot.lane.b32.xlu1 %v1042_v45, %s8564_s16  ;;  %1071 = vrot.lane.b32.xlu0 %v1044_v35, %s8564_s16  ;;  %v2239_v48 = vmul.bf16 %v9492_v49, %v9292_v27  ;;  %v9524_v45 = vld [vmem:[%s12488_s0 + $0x3c] sm:$0xff]  ;;  %v7734_v35 = vcombine.low %v3526_v44, %v3526_v44  ;;  %v3546_v18 = vshrl.u32 %v7733_v43, 16  ;;  %v7735_v15 = vcombine.high %v3526_v44, %v3526_v44 }
 0x148   :  { %5659 = vmatprep.subr.bf16.mxu1 %v7861_v24  ;;  %v262_v25 = vsel %vm187_vm0, %v247_v17, %v12537_v55  ;;  %v2240_v24 = vmul.bf16 %v9510_v47, %v9327_v12  ;;  %v7606_v43 = vcombine.low %v45_v63, %v45_v63  ;;  %v7607_v44 = vcombine.high %v45_v63, %v45_v63 }
 0x149   :  { %v9513_v52 = vpop.permute.xlu1 %237  ;;  %5585 = vmatpush1.bf16.msra.mxu0 %v7800_v61  ;;  %5660 = vmatpush1.bf16.msra.mxu1 %v7860_v28  ;;  %v9517_v37 = vpop.permute.xlu0 %2900  ;;  %v2242_v28 = vmul.bf16 %v9492_v49, %v9524_v45  ;;  %v9552_v11 = vsel %vm866_vm4, %v864_v33, %v9036_v38  ;;  %v3562_v63 = vshrl.u32 %v7735_v15, 16 }
 0x14a   :  { %v12538_v32 = vrot.slane %v9513_v52, 4 }
 0x14b   :  { %1073 = vrot.lane.b32.xlu1 %v1045_v40, %s8564_s16  ;;  %2269 = vrot.lane.b32.xlu0 %v2239_v48, %s12593_s18  ;;  %v263_v40 = vsel %vm254_vm5, %v9466_v0, %v262_v25  ;;  %v868_v0 = vsel %vm187_vm0, %v864_v33, %v9534_v58  ;;  %v3547_v25 = vpack.i.b16 %v3546_v18, %v3546_v18 }
 0x14c   :  { %v266_v17 = vsel %vm187_vm0, %v250_v53, %v12538_v32  ;;  %v9557_v53 = vld [vmem:[%s12488_s0 + $0x44] sm:$0xff]  ;;  %v3554_v32 = vshrl.u32 %v7734_v35, 16  ;;  %v879_v35 = vmul.bf16 %v9292_v27, %v9552_v11  ;;  %v65_v33 = vpack.i.b16 %v7607_v44, %v7607_v44 }
 0x14d   :  { %v9545_v61 = vpop.permute.xlu1 %2902  ;;  %v267_v48 = vsel %vm254_vm5, %v236_v7, %v266_v17  ;;  %v1578_v9 = vpop.permute.xlu0 %1577  ;;  %v3539_v7 = vpack.i.b16 %v3538_v16, %v3538_v16  ;;  %v2243_v17 = vmul.bf16 %v9510_v47, %v9557_v53  ;;  %v3552_v15 = vrot.slane %v3547_v25, %v8769_v21 }
 0x14e   :  { %v7797_v1 = vcombine.high %v263_v40, %v267_v48  ;;  %v7796_v55 = vcombine.low %v263_v40, %v267_v48  ;;  %v58_v48 = vpack.i.b16 %v7606_v43, %v7606_v43  ;;  %v1601_v16 = vrot.slane %v1578_v9, 4 }
 0x14f   :  { %2271 = vrot.lane.b32.xlu1 %v2240_v24, %s12593_s18  ;;  %2275 = vrot.lane.b32.xlu0 %v2242_v28, %s12593_s18  ;;  %v9571_v24 = vsel %vm866_vm4, %v868_v0, %v9046_v54  ;;  %v3563_v28 = vpack.i.b16 %v3562_v63, %v3562_v63  ;;  %v70_v31 = vrot.slane %v65_v33, %v8660_v19  ;;  %vm12647_vm4 = vcmask 752640  }
 0x150   :  { %5586 = vmatprep.subr.bf16.mxu0 %v7797_v1  ;;  %v3555_v1 = vpack.i.b16 %v3554_v32, %v3554_v32  ;;  %v880_v54 = vmul.bf16 %v9327_v12, %v9571_v24  ;;  %v882_v32 = vmul.bf16 %v9524_v45, %v9552_v11 }
 0x151   :  { %v9563_v38 = vpop.permute.xlu1 %1579  ;;  %5587 = vmatpush1.bf16.msra.mxu0 %v7796_v55  ;;  %v1584_v40 = vpop.permute.xlu0 %1583  ;;  %v3544_v55 = vrot.slane %v3539_v7, %v8769_v21  ;;  %v3568_v23 = vrot.slane %v3563_v28, %v8769_v21 }
 0x152   :  { %12767 = vst [vmem:[#allocation27_spill] sm:$0xff] %v9563_v38  ;;  %v12543_v18 = vrot.slane %v9563_v38, 4  ;;  %v1604_v43 = vrot.slane %v1584_v40, 4  ;;  %v3560_v63 = vrot.slane %v3555_v1, %v8769_v21  ;;  %v883_v38 = vmul.bf16 %v9557_v53, %v9571_v24 }
 0x153   :  { %2277 = vrot.lane.b32.xlu1 %v2243_v17, %s12593_s18  ;;  %909 = vrot.lane.b32.xlu0 %v879_v35, %s8567_s25  ;;  %v63_v17 = vrot.slane %v58_v48, %v8660_v19  ;;  %v7736_v25 = vcombine.low %v3544_v55, %v3552_v15 }
 0x154   :  { %v1613_v7 = vsel %vm187_vm0, %v1601_v16, %v12543_v18 }
 0x155   :  { %v9578_v44 = vpop.permute.xlu1 %1585  ;;  %v218_v0 = vpop.permute.xlu0 %217  ;;  %v1615_v16 = vsel %vm1614_vm3, %v1578_v9, %v1613_v7 }
 0x156   :  { %12768 = vst [vmem:[#allocation28_spill] sm:$0xff] %v9578_v44  ;;  %v12544_v35 = vrot.slane %v9578_v44, 4  ;;  %v241_v55 = vrot.slane %v218_v0, 4 }
 0x157   :  { %911 = vrot.lane.b32.xlu1 %v880_v54, %s8567_s25  ;;  %915 = vrot.lane.b32.xlu0 %v882_v32, %s8567_s25  ;;  %v7610_v32 = vcombine.low %v63_v17, %v70_v31  ;;  %v2233_v31 = vmul.bf16 %v9377_v39, %v9492_v49 }
 0x158   :  { %v1618_v48 = vsel %vm187_vm0, %v1604_v43, %v12544_v35  ;;  %v7737_v43 = vcombine.low %v3560_v63, %v3568_v23 }
 0x159   :  { %v9597_v33 = vpop.permute.xlu1 %219  ;;  %v1619_v54 = vsel %vm1614_vm3, %v1584_v40, %v1618_v48  ;;  %v224_v18 = vpop.permute.xlu0 %223  ;;  %v103_v23 = vmul.bf16 %v7610_v32, %v9524_v45  ;;  %v2234_v48 = vmul.bf16 %v9397_v22, %v9510_v47 }
 0x15a   :  { %v12548_v1 = vrot.slane %v9597_v33, 4  ;;  %v7857_v15 = vcombine.high %v1615_v16, %v1619_v54  ;;  %v7856_v28 = vcombine.low %v1615_v16, %v1619_v54  ;;  %v244_v35 = vrot.slane %v224_v18, 4 }
 0x15b   :  { %917 = vrot.lane.b32.xlu1 %v883_v38, %s8567_s25  ;;  %3579 = vrot.lane.b32.xlu0 %v7736_v25, %s8568_s30  ;;  %v101_v38 = vmul.bf16 %v7610_v32, %v9292_v27  ;;  %v2236_v25 = vmul.bf16 %v9387_v46, %v9492_v49 }
 0x15c   :  { %5661 = vmatprep.subr.bf16.mxu1 %v7857_v15  ;;  %v253_v17 = vsel %vm187_vm0, %v241_v55, %v12548_v1  ;;  %v97_v15 = vmul.bf16 %v7610_v32, %v9377_v39 }
 0x15d   :  { %v9605_v44 = vpop.permute.xlu1 %225  ;;  %5662 = vmatpush1.bf16.msra.mxu1 %v7856_v28  ;;  %v9607_v9 = vpop.permute.xlu0 %4087  ;;  %v255_v16 = vsel %vm254_vm5, %v218_v0, %v253_v17  ;;  %v2237_v0 = vmul.bf16 %v9444_v51, %v9510_v47  ;;  %v873_v17 = vmul.bf16 %v9377_v39, %v9552_v11 }
 0x15e   :  { %v12547_v40 = vrot.slane %v9605_v44, 4 }
 0x15f   :  { %3581 = vrot.lane.b32.xlu1 %v7737_v43, %s8568_s30  ;;  %2257 = vrot.lane.b32.xlu0 %v2233_v31, %s12593_s18  ;;  %v7789_v31 = vcombine.high %v101_v38, %v103_v23  ;;  %s8570_s30 = smov 124  }
 0x160   :  { %v258_v7 = vsel %vm187_vm0, %v244_v35, %v12547_v40  ;;  %v99_v35 = vmul.bf16 %v7610_v32, %v9387_v46 }
 0x161   :  { %v9623_v63 = vpop.permute.xlu1 %4089  ;;  %v259_v54 = vsel %vm254_vm5, %v224_v18, %v258_v7  ;;  %v1418_v55 = vpop.permute.xlu0 %1417  ;;  %v7788_v7 = vcombine.low %v101_v38, %v103_v23  ;;  %v874_v38 = vmul.bf16 %v9397_v22, %v9571_v24 }
 0x162   :  { %v7793_v28 = vcombine.high %v255_v16, %v259_v54  ;;  %v7792_v43 = vcombine.low %v255_v16, %v259_v54  ;;  %v2052_v16 = vrot.slane %v9050_v57, 4  ;;  %v1435_v54 = vrot.slane %v1418_v55, 4 }
 0x163   :  { %2259 = vrot.lane.b32.xlu1 %v2234_v48, %s12593_s18  ;;  %2263 = vrot.lane.b32.xlu0 %v2236_v25, %s12593_s18  ;;  %v7785_v48 = vcombine.high %v97_v15, %v99_v35  ;;  %v9642_v25 = vrot.slane %v9058_v2, 4 }
 0x164   :  { %5588 = vmatprep.subr.bf16.mxu0 %v7793_v28  ;;  %v9656_v40 = vsel %vm2054_vm6, %v2052_v16, %v9050_v57 }
 0x165   :  { %v9633_v49 = vpop.permute.xlu1 %1419  ;;  %5589 = vmatpush1.bf16.msra.mxu0 %v7792_v43  ;;  %v1424_v18 = vpop.permute.xlu0 %1423  ;;  %v876_v43 = vmul.bf16 %v9387_v46, %v9552_v11  ;;  %v2056_v1 = vsel %vm187_vm0, %v2052_v16, %v9642_v25  ;;  %v692_v11 = vrot.slane %v9069_v10, 4 }
 0x166   :  { %12769 = vst [vmem:[#allocation29_spill] sm:$0xff] %v9633_v49  ;;  %v12550_v32 = vrot.slane %v9633_v49, 4  ;;  %5590 = vmatprep.subr.bf16.mxu0 %v7789_v31  ;;  %v1438_v47 = vrot.slane %v1424_v18, 4  ;;  %v7784_v31 = vcombine.low %v97_v15, %v99_v35  ;;  %v3358_v15 = vld [vmem:[%s12489_s1 + $0x20] sm:$0x44] }
 0x167   :  { %2265 = vrot.lane.b32.xlu1 %v2237_v0, %s12593_s18  ;;  %897 = vrot.lane.b32.xlu0 %v873_v17, %s8567_s25  ;;  %s12633_s18 = smov 79  }
 0x168   :  { %v1450_v17 = vsel %vm187_vm0, %v1435_v54, %v12550_v32 }
 0x169   :  { %v9646_v28 = vpop.permute.xlu1 %1425  ;;  %v9650_v23 = vpop.permute.xlu0 %2728  ;;  %5591 = vmatpush1.bf16.msra.mxu0 %v7788_v7  ;;  %v877_v7 = vmul.bf16 %v9444_v51, %v9571_v24  ;;  %v1451_v16 = vsel %vm1442_vm7, %v1418_v55, %v1450_v17  ;;  %v7726_v24 = vcombine.low %v3358_v15, %v3358_v15  ;;  %v7727_v55 = vcombine.high %v3358_v15, %v3358_v15 }
 0x16a   :  { %12770 = vst [vmem:[#allocation30_spill] sm:$0xff] %v9646_v28  ;;  %v12549_v0 = vrot.slane %v9646_v28, 4  ;;  %5592 = vmatprep.subr.bf16.mxu0 %v7785_v48 }
 0x16b   :  { %899 = vrot.lane.b32.xlu1 %v874_v38, %s8567_s25  ;;  %903 = vrot.lane.b32.xlu0 %v876_v43, %s8567_s25  ;;  %v2067_v38 = vmul.bf16 %v9656_v40, %v9292_v27  ;;  %v9686_v43 = vrot.slane %v9084_v36, 4 }
 0x16c   :  { %v1454_v57 = vsel %vm187_vm0, %v1438_v47, %v12549_v0  ;;  %v9683_v47 = vsel %vm2054_vm6, %v2056_v1, %v9058_v2  ;;  %v9695_v2 = vsel %vm694_vm8, %v692_v11, %v9069_v10  ;;  %v3371_v10 = vpack.i.b16 %v7726_v24, %v7726_v24 }
 0x16d   :  { %v9673_v35 = vpop.permute.xlu1 %2730  ;;  %v1455_v54 = vsel %vm1442_vm7, %v1424_v18, %v1454_v57  ;;  %v1406_v48 = vpop.permute.xlu0 %1405  ;;  %5593 = vmatpush1.bf16.msra.mxu0 %v7784_v31  ;;  %v3359_v18 = vld [vmem:[%s12489_s1 + $0x28] sm:$0x44]  ;;  %v2068_v31 = vmul.bf16 %v9683_v47, %v9327_v12  ;;  %v2070_v57 = vmul.bf16 %v9524_v45, %v9656_v40  ;;  %v696_v15 = vsel %vm187_vm0, %v692_v11, %v9686_v43 }
 0x16e   :  { %v7853_v0 = vcombine.high %v1451_v16, %v1455_v54  ;;  %v7852_v32 = vcombine.low %v1451_v16, %v1455_v54  ;;  %v7728_v16 = vcombine.low %v3359_v18, %v3359_v18  ;;  %v7729_v54 = vcombine.high %v3359_v18, %v3359_v18 }
 0x16f   :  { %905 = vrot.lane.b32.xlu1 %v877_v7, %s8567_s25  ;;  %2097 = vrot.lane.b32.xlu0 %v2067_v38, %s12585_s17  ;;  %v1429_v7 = vrot.slane %v1406_v48, 4  ;;  %v2071_v49 = vmul.bf16 %v9557_v53, %v9683_v47  ;;  %v707_v11 = vmul.bf16 %v9292_v27, %v9695_v2  ;;  %vm1102_vm6 = vcmask 908288  }
 0x170   :  { %5663 = vmatprep.subr.bf16.mxu1 %v7853_v0  ;;  %v9716_v0 = vsel %vm694_vm8, %v696_v15, %v9084_v36  ;;  %v3385_v18 = vpack.i.b16 %v7728_v16, %v7728_v16  ;;  %v3392_v62 = vpack.i.b16 %v7729_v54, %v7729_v54  ;;  %vm2906_vm8 = vcmask 408576  }
 0x171   :  { %v9697_v1 = vpop.permute.xlu1 %1407  ;;  %5664 = vmatpush1.bf16.msra.mxu1 %v7852_v32  ;;  %v1412_v17 = vpop.permute.xlu0 %1411  ;;  %v3378_v32 = vpack.i.b16 %v7727_v55, %v7727_v55 }
 0x172   :  { %12771 = vst [vmem:[#allocation31_spill] sm:$0xff] %v9697_v1  ;;  %v1432_v38 = vrot.slane %v1412_v17, 4  ;;  %v12773_v24 = vrot.slane %v9697_v1, 4 }
 0x173   :  { %2099 = vrot.lane.b32.xlu1 %v2068_v31, %s12585_s17  ;;  %2103 = vrot.lane.b32.xlu0 %v2070_v57, %s12585_s17  ;;  %v3376_v57 = vrot.slane %v3371_v10, %v8769_v21  ;;  %v3383_v26 = vrot.slane %v3378_v32, %v8769_v21  ;;  %v710_v10 = vmul.bf16 %v9524_v45, %v9695_v2 }
 0x174   :  { %v1441_v55 = vsel %vm187_vm0, %v1429_v7, %v12773_v24  ;;  %v708_v7 = vmul.bf16 %v9327_v12, %v9716_v0 }
 0x175   :  { %v9708_v28 = vpop.permute.xlu1 %1413  ;;  %v2610_v20 = vpop.permute.xlu0 %2609  ;;  %v1443_v16 = vsel %vm1442_vm7, %v1406_v48, %v1441_v55  ;;  %v3397_v48 = vrot.slane %v3392_v62, %v8769_v21 }
 0x176   :  { %12772 = vst [vmem:[#allocation32_spill] sm:$0xff] %v9708_v28  ;;  %v12563_v31 = vrot.slane %v9708_v28, 4 }
 0x177   :  { %2105 = vrot.lane.b32.xlu1 %v2071_v49, %s12585_s17  ;;  %737 = vrot.lane.b32.xlu0 %v707_v11, %s8570_s30  ;;  %v2627_v11 = vrot.slane %v2610_v20, 4 }
 0x178   :  { %v1446_v36 = vsel %vm187_vm0, %v1432_v38, %v12563_v31  ;;  %v7730_v38 = vcombine.low %v3376_v57, %v3383_v26  ;;  %v3390_v31 = vrot.slane %v3385_v18, %v8769_v21 }
 0x179   :  { %v9729_v15 = vpop.permute.xlu1 %2611  ;;  %v1447_v49 = vsel %vm1442_vm7, %v1412_v17, %v1446_v36  ;;  %v2616_v24 = vpop.permute.xlu0 %2615  ;;  %v711_v36 = vmul.bf16 %v9557_v53, %v9716_v0 }
 0x17a   :  { %12774 = vst [vmem:[#allocation33_spill] sm:$0xff] %v9729_v15  ;;  %v7849_v54 = vcombine.high %v1443_v16, %v1447_v49  ;;  %v7848_v28 = vcombine.low %v1443_v16, %v1447_v49  ;;  %v2630_v17 = vrot.slane %v2616_v24, 4  ;;  %v7731_v21 = vcombine.low %v3390_v31, %v3397_v48 }
 0x17b   :  { %739 = vrot.lane.b32.xlu1 %v708_v7, %s8570_s30  ;;  %743 = vrot.lane.b32.xlu0 %v710_v10, %s8570_s30  ;;  %v12776_v7 = vrot.slane %v9729_v15, 4  ;;  %v2061_v10 = vmul.bf16 %v9377_v39, %v9656_v40 }
 0x17c   :  { %5665 = vmatprep.subr.bf16.mxu1 %v7849_v54 }
 0x17d   :  { %v9742_v55 = vpop.permute.xlu1 %2617  ;;  %5666 = vmatpush1.bf16.msra.mxu1 %v7848_v28  ;;  %v1250_v32 = vpop.permute.xlu0 %1249  ;;  %v2642_v26 = vsel %vm187_vm0, %v2627_v11, %v12776_v7 }
 0x17e   :  { %12775 = vst [vmem:[#allocation34_spill] sm:$0xff] %v9742_v55  ;;  %v12564_v16 = vrot.slane %v9742_v55, 4  ;;  %v2643_v18 = vsel %vm12688_vm9, %v2610_v20, %v2642_v26  ;;  %v1267_v11 = vrot.slane %v1250_v32, 4  ;;  %v2062_v20 = vmul.bf16 %v9397_v22, %v9683_v47 }
 0x17f   :  { %745 = vrot.lane.b32.xlu1 %v711_v36, %s8570_s30  ;;  %3408 = vrot.lane.b32.xlu0 %v7730_v38, %s8571_s12 }
 0x180   :  { %v2646_v62 = vsel %vm187_vm0, %v2630_v17, %v12564_v16  ;;  %v2064_v17 = vmul.bf16 %v9387_v46, %v9656_v40  ;;  %v2065_v40 = vmul.bf16 %v9444_v51, %v9683_v47 }
 0x181   :  { %v9755_v28 = vpop.permute.xlu1 %1251  ;;  %v2647_v57 = vsel %vm12688_vm9, %v2616_v24, %v2646_v62  ;;  %v1256_v49 = vpop.permute.xlu0 %1255 }
 0x182   :  { %v12567_v54 = vrot.slane %v9755_v28, 4  ;;  %v7909_v36 = vcombine.high %v2643_v18, %v2647_v57  ;;  %v7908_v38 = vcombine.low %v2643_v18, %v2647_v57  ;;  %v1270_v31 = vrot.slane %v1256_v49, 4 }
 0x183   :  { %3410 = vrot.lane.b32.xlu1 %v7731_v21, %s8571_s12  ;;  %2085 = vrot.lane.b32.xlu0 %v2061_v10, %s12585_s17 }
 0x184   :  { %5667 = vmatprep.subr.bf16.mxu1 %v7909_v36  ;;  %v1282_v26 = vsel %vm187_vm0, %v1267_v11, %v12567_v54  ;;  %v701_v11 = vmul.bf16 %v9377_v39, %v9695_v2  ;;  %v3244_v36 = vrot.slane %v9091_v50, 4 }
 0x185   :  { %v9764_v48 = vpop.permute.xlu1 %1257  ;;  %5668 = vmatpush2.bf16.msra.mxu1 %v7908_v38  ;;  %v9768_v24 = vpop.permute.xlu0 %3919  ;;  %v1283_v57 = vsel %vm1274_vm10, %v1250_v32, %v1282_v26  ;;  %v702_v32 = vmul.bf16 %v9397_v22, %v9716_v0 }
 0x186   :  { %v12566_v7 = vrot.slane %v9764_v48, 4  ;;  %v3247_v26 = vsel %vm3246_vm12, %v3244_v36, %v9091_v50 }
 0x187   :  { %2087 = vrot.lane.b32.xlu1 %v2062_v20, %s12585_s17  ;;  %2091 = vrot.lane.b32.xlu0 %v2064_v17, %s12585_s17  ;;  %v704_v17 = vmul.bf16 %v9387_v46, %v9695_v2 }
 0x188   :  { %v1286_v21 = vsel %vm187_vm0, %v1270_v31, %v12566_v7  ;;  %v9791_v31 = vrot.slane %v9096_v60, 4 }
 0x189   :  { %v9781_v62 = vpop.permute.xlu1 %3921  ;;  %v2598_v18 = vpop.permute.xlu0 %2597  ;;  %v1287_v10 = vsel %vm1274_vm10, %v1256_v49, %v1286_v21 }
 0x18a   :  { %v7845_v38 = vcombine.high %v1283_v57, %v1287_v10  ;;  %v7844_v20 = vcombine.low %v1283_v57, %v1287_v10  ;;  %v2621_v21 = vrot.slane %v2598_v18, 4 }
 0x18b   :  { %2093 = vrot.lane.b32.xlu1 %v2065_v40, %s12585_s17  ;;  %725 = vrot.lane.b32.xlu0 %v701_v11, %s8570_s30  ;;  %v3248_v40 = vsel %vm187_vm0, %v3244_v36, %v9791_v31  ;;  %s12851_s17 = smov 61  }
 0x18c   :  { %5594 = vmatprep.subr.bf16.mxu0 %v7845_v38  ;;  %v705_v38 = vmul.bf16 %v9444_v51, %v9716_v0  ;;  %v9815_v50 = vsel %vm3246_vm12, %v3248_v40, %v9096_v60  ;;  %v8371_v0 = vld [vmem:[%s12490_s2 + $0x4] ss:$28 sps:$4 sm:$0xff]   ;;  %vm4093_vm12 = vcmask 556032  }
 0x18d   :  { %v9795_v47 = vpop.permute.xlu1 %2599  ;;  %5595 = vmatpush2.bf16.msra.mxu0 %v7844_v20  ;;  %v2604_v49 = vpop.permute.xlu0 %2603  ;;  %v3259_v20 = vmul.bf16 %v3247_v26, %v9292_v27  ;;  %5610 = vmatprep.mubr.bf16.mxu0 %v8371_v0  ;;  %v3253_v0 = vmul.bf16 %v3247_v26, %v9377_v39 }
 0x18e   :  { %12777 = vst [vmem:[#allocation35_spill] sm:$0xff] %v9795_v47  ;;  %v12565_v57 = vrot.slane %v9795_v47, 4  ;;  %v2624_v10 = vrot.slane %v2604_v49, 4 }
 0x18f   :  { %727 = vrot.lane.b32.xlu1 %v702_v32, %s8570_s30  ;;  %731 = vrot.lane.b32.xlu0 %v704_v17, %s8570_s30  ;;  %v3260_v32 = vmul.bf16 %v9815_v50, %v9327_v12 }
 0x190   :  { %v2633_v36 = vsel %vm187_vm0, %v2621_v21, %v12565_v57 }
 0x191   :  { %v9808_v11 = vpop.permute.xlu1 %2605  ;;  %v1238_v2 = vpop.permute.xlu0 %1237  ;;  %v2635_v17 = vsel %vm12688_vm9, %v2598_v18, %v2633_v36 }
 0x192   :  { %12778 = vst [vmem:[#allocation36_spill] sm:$0xff] %v9808_v11  ;;  %v12568_v16 = vrot.slane %v9808_v11, 4 }
 0x193   :  { %733 = vrot.lane.b32.xlu1 %v705_v38, %s8570_s30  ;;  %3289 = vrot.lane.b32.xlu0 %v3259_v20, %s8572_s13  ;;  %v3262_v38 = vmul.bf16 %v3247_v26, %v9524_v45  ;;  %v1261_v20 = vrot.slane %v1238_v2, 4 }
 0x194   :  { %v2638_v60 = vsel %vm187_vm0, %v2624_v10, %v12568_v16  ;;  %v3072_v10 = vrot.slane %v9102_v3, 4 }
 0x195   :  { %v9829_v27 = vpop.permute.xlu1 %1239  ;;  %v2639_v21 = vsel %vm12688_vm9, %v2604_v49, %v2638_v60  ;;  %v1244_v40 = vpop.permute.xlu0 %1243  ;;  %v3263_v49 = vmul.bf16 %v9815_v50, %v9557_v53  ;;  %vm3414_vm9 = vcmask 523264  }
 0x196   :  { %v12569_v57 = vrot.slane %v9829_v27, 4  ;;  %v7905_v7 = vcombine.high %v2635_v17, %v2639_v21  ;;  %v7904_v54 = vcombine.low %v2635_v17, %v2639_v21  ;;  %v1264_v12 = vrot.slane %v1244_v40, 4 }
 0x197   :  { %3291 = vrot.lane.b32.xlu1 %v3260_v32, %s8572_s13  ;;  %3295 = vrot.lane.b32.xlu0 %v3262_v38, %s8572_s13  ;;  %v9850_v17 = vrot.slane %v9109_v8, 4  ;;  %v3254_v38 = vmul.bf16 %v9815_v50, %v9397_v22 }
 0x198   :  { %5669 = vmatprep.subr.bf16.mxu1 %v7905_v7  ;;  %v1273_v32 = vsel %vm187_vm0, %v1261_v20, %v12569_v57 }
 0x199   :  { %v9840_v18 = vpop.permute.xlu1 %1245  ;;  %5670 = vmatpush2.bf16.msra.mxu1 %v7904_v54  ;;  %v2438_v36 = vpop.permute.xlu0 %2437  ;;  %v9856_v54 = vsel %vm3074_vm2, %v3072_v10, %v9102_v3  ;;  %v1275_v16 = vsel %vm1274_vm10, %v1238_v2, %v1273_v32 }
 0x19a   :  { %v12574_v60 = vrot.slane %v9840_v18, 4  ;;  %v2455_v57 = vrot.slane %v2438_v36, 4 }
 0x19b   :  { %3297 = vrot.lane.b32.xlu1 %v3263_v49, %s8572_s13  ;;  %3277 = vrot.lane.b32.xlu0 %v3253_v0, %s8572_s13  ;;  %v3256_v0 = vmul.bf16 %v3247_v26, %v9387_v46 }
 0x19c   :  { %v1278_v7 = vsel %vm187_vm0, %v1264_v12, %v12574_v60  ;;  %v9872_v12 = vld [vmem:[%s12488_s0 + $0x28] sm:$0xff]  ;;  %v3076_v60 = vsel %vm187_vm0, %v3072_v10, %v9850_v17 }
 0x19d   :  { %v9861_v21 = vpop.permute.xlu1 %2439  ;;  %v2444_v20 = vpop.permute.xlu0 %2443  ;;  %v1279_v49 = vsel %vm1274_vm10, %v1244_v40, %v1278_v7  ;;  %v3087_v32 = vmul.bf16 %v9856_v54, %v9872_v12  ;;  %v3077_v7 = vsel %vm3074_vm2, %v3076_v60, %v9109_v8  ;;  %vm2734_vm2 = vcmask 400384  }
 0x19e   :  { %12779 = vst [vmem:[#allocation37_spill] sm:$0xff] %v9861_v21  ;;  %v12576_v3 = vrot.slane %v9861_v21, 4  ;;  %v7841_v11 = vcombine.high %v1275_v16, %v1279_v49  ;;  %v7840_v47 = vcombine.low %v1275_v16, %v1279_v49  ;;  %v2458_v2 = vrot.slane %v2444_v20, 4 }
 0x19f   :  { %3279 = vrot.lane.b32.xlu1 %v3254_v38, %s8572_s13  ;;  %3283 = vrot.lane.b32.xlu0 %v3256_v0, %s8572_s13  ;;  %v3257_v16 = vmul.bf16 %v9815_v50, %v9444_v51  ;;  %v9890_v38 = vld [vmem:[%s12488_s0 + $0x30] sm:$0xff] }
 0x1a0   :  { %5596 = vmatprep.subr.bf16.mxu0 %v7841_v11  ;;  %v3088_v50 = vmul.bf16 %v3077_v7, %v9890_v38 }
 0x1a1   :  { %v9878_v26 = vpop.permute.xlu1 %2445  ;;  %5597 = vmatpush2.bf16.msra.mxu0 %v7840_v47  ;;  %v1078_v40 = vpop.permute.xlu0 %1077  ;;  %v2470_v47 = vsel %vm187_vm0, %v2455_v57, %v12576_v3  ;;  %v3090_v57 = vmul.bf16 %v9856_v54, %v9524_v45 }
 0x1a2   :  { %12780 = vst [vmem:[#allocation38_spill] sm:$0xff] %v9878_v26  ;;  %v12579_v10 = vrot.slane %v9878_v26, 4  ;;  %v2471_v60 = vsel %vm12647_vm4, %v2438_v36, %v2470_v47  ;;  %v3091_v36 = vmul.bf16 %v3077_v7, %v9557_v53  ;;  %v3081_v47 = vmul.bf16 %v9856_v54, %v9377_v39 }
 0x1a3   :  { %3285 = vrot.lane.b32.xlu1 %v3257_v16, %s8572_s13  ;;  %3117 = vrot.lane.b32.xlu0 %v3087_v32, %s12660_s27  ;;  %v1095_v16 = vrot.slane %v1078_v40, 4 }
 0x1a4   :  { %v2474_v8 = vsel %vm187_vm0, %v2458_v2, %v12579_v10 }
 0x1a5   :  { %v9900_v11 = vpop.permute.xlu1 %1079  ;;  %v2475_v49 = vsel %vm12647_vm4, %v2444_v20, %v2474_v8  ;;  %v1084_v0 = vpop.permute.xlu0 %1083  ;;  %v2904_v8 = vrot.slane %v9517_v37, 4 }
 0x1a6   :  { %v12582_v3 = vrot.slane %v9900_v11, 4  ;;  %v7901_v32 = vcombine.high %v2471_v60, %v2475_v49  ;;  %v7900_v21 = vcombine.low %v2471_v60, %v2475_v49  ;;  %v1098_v2 = vrot.slane %v1084_v0, 4 }
 0x1a7   :  { %3119 = vrot.lane.b32.xlu1 %v3088_v50, %s12660_s27  ;;  %3123 = vrot.lane.b32.xlu0 %v3090_v57, %s12660_s27  ;;  %v9923_v49 = vrot.slane %v9545_v61, 4  ;;  %v3082_v57 = vmul.bf16 %v3077_v7, %v9397_v22 }
 0x1a8   :  { %5671 = vmatprep.subr.bf16.mxu1 %v7901_v32  ;;  %v1110_v50 = vsel %vm187_vm0, %v1095_v16, %v12582_v3  ;;  %v3084_v3 = vmul.bf16 %v9856_v54, %v9387_v46 }
 0x1a9   :  { %v9910_v10 = vpop.permute.xlu1 %1085  ;;  %5672 = vmatpush2.bf16.msra.mxu1 %v7900_v21  ;;  %v9913_v20 = vpop.permute.xlu0 %3747  ;;  %v1111_v26 = vsel %vm1102_vm6, %v1078_v40, %v1110_v50  ;;  %v3085_v40 = vmul.bf16 %v3077_v7, %v9444_v51 }
 0x1aa   :  { %12781 = vst [vmem:[#allocation39_spill] sm:$0xff] %v9910_v10  ;;  %v12588_v60 = vrot.slane %v9910_v10, 4 }
 0x1ab   :  { %3125 = vrot.lane.b32.xlu1 %v3091_v36, %s12660_s27  ;;  %3105 = vrot.lane.b32.xlu0 %v3081_v47, %s12660_s27  ;;  %v2907_v36 = vsel %vm2906_vm8, %v2904_v8, %v9517_v37 }
 0x1ac   :  { %v1114_v39 = vsel %vm187_vm0, %v1098_v2, %v12588_v60  ;;  %v2908_v2 = vsel %vm187_vm0, %v2904_v8, %v9923_v49  ;;  %v2919_v46 = vmul.bf16 %v9872_v12, %v2907_v36  ;;  %v2922_v7 = vmul.bf16 %v2907_v36, %v9524_v45 }
 0x1ad   :  { %v9930_v21 = vpop.permute.xlu1 %3749  ;;  %v2426_v32 = vpop.permute.xlu0 %2425  ;;  %v1115_v16 = vsel %vm1102_vm6, %v1084_v0, %v1114_v39  ;;  %v9949_v37 = vsel %vm2906_vm8, %v2908_v2, %v9545_v61  ;;  %v9962_v61 = vld [vmem:[%s12488_s0] sm:$0xff]  ;;  %v4091_v2 = vrot.slane %v9607_v9, 4  ;;  %vm12645_vm8 = vcmask 760832  }
 0x1ae   :  { %v7837_v47 = vcombine.high %v1111_v26, %v1115_v16  ;;  %v7836_v55 = vcombine.low %v1111_v26, %v1115_v16  ;;  %v2449_v54 = vrot.slane %v2426_v32, 4  ;;  %v2920_v51 = vmul.bf16 %v9890_v38, %v9949_v37 }
 0x1af   :  { %3107 = vrot.lane.b32.xlu1 %v3082_v57, %s12660_s27  ;;  %3111 = vrot.lane.b32.xlu0 %v3084_v3, %s12660_s27  ;;  %v2923_v57 = vmul.bf16 %v9949_v37, %v9557_v53 }
 0x1b0   :  { %5598 = vmatprep.subr.bf16.mxu0 %v7837_v47  ;;  %v2913_v47 = vmul.bf16 %v2907_v36, %v9962_v61 }
 0x1b1   :  { %v9943_v22 = vpop.permute.xlu1 %2427  ;;  %5599 = vmatpush2.bf16.msra.mxu0 %v7836_v55  ;;  %v2432_v0 = vpop.permute.xlu0 %2431 }
 0x1b2   :  { %12782 = vst [vmem:[#allocation40_spill] sm:$0xff] %v9943_v22  ;;  %v12587_v26 = vrot.slane %v9943_v22, 4  ;;  %v2452_v3 = vrot.slane %v2432_v0, 4 }
 0x1b3   :  { %3113 = vrot.lane.b32.xlu1 %v3085_v40, %s12660_s27  ;;  %2949 = vrot.lane.b32.xlu0 %v2919_v46, %s12635_s19  ;;  %v9978_v40 = vrot.slane %v9623_v63, 4  ;;  %s8580_s27 = smov 63  }
 0x1b4   :  { %v2461_v39 = vsel %vm187_vm0, %v2449_v54, %v12587_v26 }
 0x1b5   :  { %v9954_v8 = vpop.permute.xlu1 %2433  ;;  %v1066_v55 = vpop.permute.xlu0 %1065  ;;  %12784 = vst [vmem:[#allocation42_spill] sm:$0xff] %v9978_v40  ;;  %v2463_v54 = vsel %vm12647_vm4, %v2426_v32, %v2461_v39  ;;  %v4095_v39 = vsel %vm187_vm0, %v4091_v2, %v9978_v40 }
 0x1b6   :  { %12783 = vst [vmem:[#allocation41_spill] sm:$0xff] %v9954_v8  ;;  %v12597_v50 = vrot.slane %v9954_v8, 4  ;;  %v1089_v26 = vrot.slane %v1066_v55, 4 }
 0x1b7   :  { %2951 = vrot.lane.b32.xlu1 %v2920_v51, %s12635_s19  ;;  %2955 = vrot.lane.b32.xlu0 %v2922_v7, %s12635_s19 }
 0x1b8   :  { %v2466_v16 = vsel %vm187_vm0, %v2452_v3, %v12597_v50  ;;  %v9988_v3 = vld [vmem:[%s12488_s0 + $0x8] sm:$0xff]  ;;  %v9993_v50 = vld [vmem:[%s12488_s0 + $0x14] sm:$0xff] }
 0x1b9   :  { %v9980_v46 = vpop.permute.xlu1 %1067  ;;  %v2467_v51 = vsel %vm12647_vm4, %v2432_v0, %v2466_v16  ;;  %v1072_v7 = vpop.permute.xlu0 %1071  ;;  %v9999_v0 = vsel %vm4093_vm12, %v4091_v2, %v9607_v9  ;;  %vm3753_vm4 = vcmask 539648  }
 0x1ba   :  { %12785 = vst [vmem:[#allocation43_spill] sm:$0xff] %v9980_v46  ;;  %v12600_v60 = vrot.slane %v9980_v46, 4  ;;  %v7897_v8 = vcombine.high %v2463_v54, %v2467_v51  ;;  %v7896_v22 = vcombine.low %v2463_v54, %v2467_v51  ;;  %v1092_v32 = vrot.slane %v1072_v7, 4 }
 0x1bb   :  { %2957 = vrot.lane.b32.xlu1 %v2923_v57, %s12635_s19  ;;  %2937 = vrot.lane.b32.xlu0 %v2913_v47, %s12635_s19  ;;  %v2914_v54 = vmul.bf16 %v9949_v37, %v9988_v3  ;;  %v2916_v57 = vmul.bf16 %v2907_v36, %v9993_v50  ;;  %v10024_v36 = vsel %vm4093_vm12, %v4095_v39, %v9623_v63  ;;  %vm934_vm12 = vcmask 916480  }
 0x1bc   :  { %5673 = vmatprep.subr.bf16.mxu1 %v7897_v8  ;;  %v10011_v8 = vld [vmem:[%s12488_s0 + $0x1c] sm:$0xff]  ;;  %v1101_v47 = vsel %vm187_vm0, %v1089_v26, %v12600_v60  ;;  %v4106_v26 = vmul.bf16 %v9999_v0, %v9872_v12 }
 0x1bd   :  { %v10003_v16 = vpop.permute.xlu1 %1073  ;;  %5674 = vmatpush2.bf16.msra.mxu1 %v7896_v22  ;;  %v2270_v51 = vpop.permute.xlu0 %2269  ;;  %v8374_v22 = vld [vmem:[%s12490_s2 + $0xc] ss:$28 sps:$4 sm:$0xff]   ;;  %v2917_v2 = vmul.bf16 %v9949_v37, %v10011_v8  ;;  %v1103_v63 = vsel %vm1102_vm6, %v1066_v55, %v1101_v47 }
 0x1be   :  { %12786 = vst [vmem:[#allocation44_spill] sm:$0xff] %v10003_v16  ;;  %v12605_v9 = vrot.slane %v10003_v16, 4  ;;  %5683 = vmatprep.mubr.bf16.mxu1 %v8374_v22  ;;  %v2287_v37 = vrot.slane %v2270_v51, 4 }
 0x1bf   :  { %2939 = vrot.lane.b32.xlu1 %v2914_v54, %s12635_s19  ;;  %2943 = vrot.lane.b32.xlu0 %v2916_v57, %s12635_s19  ;;  %v2732_v54 = vrot.slane %v9650_v23, 4  ;;  %v10035_v57 = vrot.slane %v9673_v35, 4 }
 0x1c0   :  { %v1106_v15 = vsel %vm187_vm0, %v1092_v32, %v12605_v9 }
 0x1c1   :  { %v10037_v60 = vpop.permute.xlu1 %2271  ;;  %v2276_v1 = vpop.permute.xlu0 %2275  ;;  %v1107_v39 = vsel %vm1102_vm6, %v1072_v7, %v1106_v15  ;;  %v4107_v15 = vmul.bf16 %v10024_v36, %v9890_v38  ;;  %v4109_v7 = vmul.bf16 %v9999_v0, %v9524_v45  ;;  %v10052_v47 = vsel %vm2734_vm2, %v2732_v54, %v9650_v23 }
 0x1c2   :  { %12787 = vst [vmem:[#allocation45_spill] sm:$0xff] %v10037_v60  ;;  %v12610_v40 = vrot.slane %v10037_v60, 4  ;;  %v7833_v32 = vcombine.high %v1103_v63, %v1107_v39  ;;  %v7832_v9 = vcombine.low %v1103_v63, %v1107_v39  ;;  %v2290_v16 = vrot.slane %v2276_v1, 4 }
 0x1c3   :  { %2945 = vrot.lane.b32.xlu1 %v2917_v2, %s12635_s19  ;;  %4136 = vrot.lane.b32.xlu0 %v4106_v26, %s12631_s24  ;;  %v2736_v22 = vsel %vm187_vm0, %v2732_v54, %v10035_v57  ;;  %v4110_v26 = vmul.bf16 %v10024_v36, %v9557_v53  ;;  %s12837_s19 = smov 92  }
 0x1c4   :  { %5600 = vmatprep.subr.bf16.mxu0 %v7833_v32  ;;  %v10069_v54 = vsel %vm2734_vm2, %v2736_v22, %v9673_v35  ;;  %v2750_v22 = vmul.bf16 %v10052_v47, %v9524_v45  ;;  %vm3925_vm2 = vcmask 547840  }
 0x1c5   :  { %v10044_v46 = vpop.permute.xlu1 %2277  ;;  %5601 = vmatpush2.bf16.msra.mxu0 %v7832_v9  ;;  %v910_v55 = vpop.permute.xlu0 %909  ;;  %v2302_v9 = vsel %vm187_vm0, %v2287_v37, %v12610_v40  ;;  %v2751_v45 = vmul.bf16 %v10069_v54, %v9557_v53  ;;  %v4101_v53 = vmul.bf16 %v10024_v36, %v9988_v3 }
 0x1c6   :  { %12788 = vst [vmem:[#allocation46_spill] sm:$0xff] %v10044_v46  ;;  %v12615_v2 = vrot.slane %v10044_v46, 4  ;;  %v2303_v39 = vsel %vm12645_vm8, %v2270_v51, %v2302_v9 }
 0x1c7   :  { %4138 = vrot.lane.b32.xlu1 %v4107_v15, %s12631_s24  ;;  %4142 = vrot.lane.b32.xlu0 %v4109_v7, %s12631_s24  ;;  %v2747_v15 = vmul.bf16 %v9872_v12, %v10052_v47  ;;  %v927_v7 = vrot.slane %v910_v55, 4 }
 0x1c8   :  { %v2306_v23 = vsel %vm187_vm0, %v2290_v16, %v12615_v2  ;;  %v10137_v2 = vrot.slane %v9781_v62, 4 }
 0x1c9   :  { %v10071_v63 = vpop.permute.xlu1 %911  ;;  %v2307_v37 = vsel %vm12645_vm8, %v2276_v1, %v2306_v23  ;;  %v916_v32 = vpop.permute.xlu0 %915  ;;  %v2748_v1 = vmul.bf16 %v9890_v38, %v10069_v54 }
 0x1ca   :  { %12789 = vst [vmem:[#allocation47_spill] sm:$0xff] %v10071_v63  ;;  %v12618_v40 = vrot.slane %v10071_v63, 4  ;;  %v7893_v46 = vcombine.high %v2303_v39, %v2307_v37  ;;  %v7892_v60 = vcombine.low %v2303_v39, %v2307_v37  ;;  %v930_v35 = vrot.slane %v916_v32, 4 }
 0x1cb   :  { %4144 = vrot.lane.b32.xlu1 %v4110_v26, %s12631_s24  ;;  %2777 = vrot.lane.b32.xlu0 %v2747_v15, %s12633_s18  ;;  %v4100_v15 = vmul.bf16 %v9999_v0, %v9962_v61 }
 0x1cc   :  { %5675 = vmatprep.subr.bf16.mxu1 %v7893_v46  ;;  %v942_v26 = vsel %vm187_vm0, %v927_v7, %v12618_v40 }
 0x1cd   :  { %v10080_v16 = vpop.permute.xlu1 %917  ;;  %5676 = vmatpush2.bf16.msra.mxu1 %v7892_v60  ;;  %v10084_v51 = vpop.permute.xlu0 %3579  ;;  %v943_v39 = vsel %vm934_vm12, %v910_v55, %v942_v26  ;;  %v4103_v55 = vmul.bf16 %v9999_v0, %v9993_v50 }
 0x1ce   :  { %12790 = vst [vmem:[#allocation48_spill] sm:$0xff] %v10080_v16  ;;  %v12617_v9 = vrot.slane %v10080_v16, 4 }
 0x1cf   :  { %2779 = vrot.lane.b32.xlu1 %v2748_v1, %s12633_s18  ;;  %2783 = vrot.lane.b32.xlu0 %v2750_v22, %s12633_s18 }
 0x1d0   :  { %v946_v60 = vsel %vm187_vm0, %v930_v35, %v12617_v9 }
 0x1d1   :  { %v10097_v46 = vpop.permute.xlu1 %3581  ;;  %v2258_v23 = vpop.permute.xlu0 %2257  ;;  %v947_v37 = vsel %vm934_vm12, %v916_v32, %v946_v60 }
 0x1d2   :  { %v7829_v7 = vcombine.high %v943_v39, %v947_v37  ;;  %v7828_v1 = vcombine.low %v943_v39, %v947_v37  ;;  %v2281_v32 = vrot.slane %v2258_v23, 4  ;;  %v4104_v39 = vmul.bf16 %v10024_v36, %v10011_v8 }
 0x1d3   :  { %2785 = vrot.lane.b32.xlu1 %v2751_v45, %s12633_s18  ;;  %4124 = vrot.lane.b32.xlu0 %v4100_v15, %s12631_s24  ;;  %v2741_v15 = vmul.bf16 %v9962_v61, %v10052_v47 }
 0x1d4   :  { %5602 = vmatprep.subr.bf16.mxu0 %v7829_v7 }
 0x1d5   :  { %v10107_v35 = vpop.permute.xlu1 %2259  ;;  %5603 = vmatpush2.bf16.msra.mxu0 %v7828_v1  ;;  %v2264_v22 = vpop.permute.xlu0 %2263  ;;  %v2742_v1 = vmul.bf16 %v9988_v3, %v10069_v54 }
 0x1d6   :  { %12791 = vst [vmem:[#allocation49_spill] sm:$0xff] %v10107_v35  ;;  %v12616_v26 = vrot.slane %v10107_v35, 4  ;;  %v2284_v60 = vrot.slane %v2264_v22, 4 }
 0x1d7   :  { %4126 = vrot.lane.b32.xlu1 %v4101_v53, %s12631_s24  ;;  %4130 = vrot.lane.b32.xlu0 %v4103_v55, %s12631_s24  ;;  %v2744_v53 = vmul.bf16 %v9993_v50, %v10052_v47  ;;  %v3923_v55 = vrot.slane %v9768_v24, 4  ;;  %v462_v47 = vld [vmem:[%s12488_s0 + $0x38] sm:$0xf] }
 0x1d8   :  { %v2293_v0 = vsel %vm187_vm0, %v2281_v32, %v12616_v26 }
 0x1d9   :  { %v10116_v45 = vpop.permute.xlu1 %2265  ;;  %v898_v37 = vpop.permute.xlu0 %897 }
 0x1da   :  { %12792 = vst [vmem:[#allocation50_spill] sm:$0xff] %v10116_v45  ;;  %v12621_v7 = vrot.slane %v10116_v45, 4  ;;  %v921_v9 = vrot.slane %v898_v37, 4 }
 0x1db   :  { %4132 = vrot.lane.b32.xlu1 %v4104_v39, %s12631_s24  ;;  %2765 = vrot.lane.b32.xlu0 %v2741_v15, %s12633_s18  ;;  %v2295_v39 = vsel %vm12645_vm8, %v2258_v23, %v2293_v0  ;;  %v12622_v23 = vmov 0   ;;  %v2745_v0 = vmul.bf16 %v10011_v8, %v10069_v54  ;;  %s12658_s24 = smov 61  }
 0x1dc   :  { %v2298_v36 = vsel %vm187_vm0, %v2284_v60, %v12621_v7  ;;  %8261 = vset.pattern.permute.xlu1 %v12622_v23  ;;  %8262 = vset.pattern.permute.xlu0 %v12622_v23 }
 0x1dd   :  { %v10139_v32 = vpop.permute.xlu1 %899  ;;  %v2299_v15 = vsel %vm12645_vm8, %v2264_v22, %v2298_v36  ;;  %v904_v26 = vpop.permute.xlu0 %903  ;;  %vm762_vm8 = vcmask 1014784  }
 0x1de   :  { %12793 = vst [vmem:[#allocation51_spill] sm:$0xff] %v10139_v32  ;;  %v12628_v40 = vrot.slane %v10139_v32, 4  ;;  %v7889_v45 = vcombine.high %v2295_v39, %v2299_v15  ;;  %v7888_v60 = vcombine.low %v2295_v39, %v2299_v15  ;;  %v924_v7 = vrot.slane %v904_v26, 4  ;;  %v12795_v39 = vld [vmem:[#allocation10_spill] sm:$0xff] }
 0x1df   :  { %2767 = vrot.lane.b32.xlu1 %v2742_v1, %s12633_s18  ;;  %2771 = vrot.lane.b32.xlu0 %v2744_v53, %s12633_s18  ;;  %v541_v15 = vmul.bf16 %v12795_v39, %v462_v47  ;;  %v465_v1 = vld [vmem:[%s12488_s0 + $0x4c] sm:$0xf]  ;;  %v3927_v53 = vsel %vm187_vm0, %v3923_v55, %v10137_v2 }
 0x1e0   :  { %5677 = vmatprep.subr.bf16.mxu1 %v7889_v45  ;;  %v10161_v45 = vsel %vm3925_vm2, %v3923_v55, %v9768_v24  ;;  %v933_v54 = vsel %vm187_vm0, %v921_v9, %v12628_v40  ;;  %v544_v47 = vmul.bf16 %v12795_v39, %v465_v1  ;;  %v10177_v23 = vsel %vm3925_vm2, %v3927_v53, %v9781_v62  ;;  %v10189_v62 = vld [vmem:[%s12488_s0 + $0x3c] sm:$0xff] }
 0x1e1   :  { %v10150_v22 = vpop.permute.xlu1 %905  ;;  %5678 = vmatpush2.bf16.msra.mxu1 %v7888_v60  ;;  %v2098_v36 = vpop.permute.xlu0 %2097  ;;  %v935_v32 = vsel %vm934_vm12, %v898_v37, %v933_v54  ;;  %vm12674_vm2 = vcmask 769024  }
 0x1e2   :  { %12794 = vst [vmem:[#allocation52_spill] sm:$0xff] %v10150_v22  ;;  %v12637_v60 = vrot.slane %v10150_v22, 4 }
 0x1e3   :  { %2773 = vrot.lane.b32.xlu1 %v2745_v0, %s12633_s18  ;;  %573 = vrot.lane.b32.xlu0 %v541_v15, %s8553_s21  ;;  %v3938_v0 = vmul.bf16 %v10161_v45, %v9872_v12  ;;  %v2115_v15 = vrot.slane %v2098_v36, 4  ;;  %s8579_s18 = smov 62  }
 0x1e4   :  { %v938_v24 = vsel %vm187_vm0, %v924_v7, %v12637_v60  ;;  %v3939_v7 = vmul.bf16 %v10177_v23, %v9890_v38 }
 0x1e5   :  { %v10179_v55 = vpop.permute.xlu1 %2099  ;;  %v2104_v35 = vpop.permute.xlu0 %2103  ;;  %v939_v9 = vsel %vm934_vm12, %v904_v26, %v938_v24 }
 0x1e6   :  { %12796 = vst [vmem:[#allocation10_spill] sm:$0xff] %v10179_v55  ;;  %v12638_v1 = vrot.slane %v10179_v55, 4  ;;  %v7825_v40 = vcombine.high %v935_v32, %v939_v9  ;;  %v7824_v22 = vcombine.low %v935_v32, %v939_v9  ;;  %v2118_v37 = vrot.slane %v2104_v35, 4 }
 0x1e7   :  { %579 = vrot.lane.b32.xlu1 %v544_v47, %s8553_s21  ;;  %3968 = vrot.lane.b32.xlu0 %v3938_v0, %s12658_s24  ;;  %v3941_v32 = vmul.bf16 %v10161_v45, %v10189_v62  ;;  %v10203_v47 = vld [vmem:[%s12488_s0 + $0x44] sm:$0xff] }
 0x1e8   :  { %5604 = vmatprep.subr.bf16.mxu0 %v7825_v40  ;;  %v2130_v40 = vsel %vm187_vm0, %v2115_v15, %v12638_v1  ;;  %v3942_v0 = vmul.bf16 %v10177_v23, %v10203_v47 }
 0x1e9   :  { %v10193_v26 = vpop.permute.xlu1 %2105  ;;  %5605 = vmatpush2.bf16.msra.mxu0 %v7824_v22  ;;  %v738_v53 = vpop.permute.xlu0 %737  ;;  %v456_v22 = vld [vmem:[%s12488_s0 + $0x10] sm:$0xf]  ;;  %v2131_v60 = vsel %vm12674_vm2, %v2098_v36, %v2130_v40 }
 0x1ea   :  { %12797 = vst [vmem:[#allocation53_spill] sm:$0xff] %v10193_v26  ;;  %v12646_v54 = vrot.slane %v10193_v26, 4  ;;  %v535_v55 = vmul.bf16 %v12795_v39, %v456_v22  ;;  %v755_v16 = vrot.slane %v738_v53, 4 }
 0x1eb   :  { %3970 = vrot.lane.b32.xlu1 %v3939_v7, %s12658_s24  ;;  %3974 = vrot.lane.b32.xlu0 %v3941_v32, %s12658_s24 }
 0x1ec   :  { %v2134_v24 = vsel %vm187_vm0, %v2118_v37, %v12646_v54  ;;  %v459_v37 = vld [vmem:[%s12488_s0 + $0x24] sm:$0xf] }
 0x1ed   :  { %v10216_v9 = vpop.permute.xlu1 %739  ;;  %v2135_v15 = vsel %vm12674_vm2, %v2104_v35, %v2134_v24  ;;  %v744_v1 = vpop.permute.xlu0 %743  ;;  %v538_v35 = vmul.bf16 %v12795_v39, %v459_v37 }
 0x1ee   :  { %12798 = vst [vmem:[#allocation54_spill] sm:$0xff] %v10216_v9  ;;  %v12649_v7 = vrot.slane %v10216_v9, 4  ;;  %v7885_v32 = vcombine.high %v2131_v60, %v2135_v15  ;;  %v7884_v63 = vcombine.low %v2131_v60, %v2135_v15  ;;  %v758_v36 = vrot.slane %v744_v1, 4 }
 0x1ef   :  { %3976 = vrot.lane.b32.xlu1 %v3942_v0, %s12658_s24  ;;  %561 = vrot.lane.b32.xlu0 %v535_v55, %s8553_s21  ;;  %v3932_v60 = vmul.bf16 %v10161_v45, %v9962_v61  ;;  %v3933_v55 = vmul.bf16 %v10177_v23, %v9988_v3 }
 0x1f0   :  { %5679 = vmatprep.subr.bf16.mxu1 %v7885_v32  ;;  %v770_v0 = vsel %vm187_vm0, %v755_v16, %v12649_v7  ;;  %v3935_v16 = vmul.bf16 %v10161_v45, %v9993_v50  ;;  %v3936_v45 = vmul.bf16 %v10177_v23, %v10011_v8 }
 0x1f1   :  { %v10229_v40 = vpop.permute.xlu1 %745  ;;  %5680 = vmatpush2.bf16.msra.mxu1 %v7884_v63  ;;  %v10232_v22 = vpop.permute.xlu0 %3408  ;;  %v771_v32 = vsel %vm762_vm8, %v738_v53, %v770_v0  ;;  %v12801_v0 = vld [vmem:[#allocation8_spill] sm:$0xff] }
 0x1f2   :  { %12799 = vst [vmem:[#allocation55_spill] sm:$0xff] %v10229_v40  ;;  %v12648_v24 = vrot.slane %v10229_v40, 4 }
 0x1f3   :  { %567 = vrot.lane.b32.xlu1 %v538_v35, %s8553_s21  ;;  %3956 = vrot.lane.b32.xlu0 %v3932_v60, %s12658_s24  ;;  %v3751_v35 = vrot.slane %v9913_v20, 4 }
 0x1f4   :  { %v774_v63 = vsel %vm187_vm0, %v758_v36, %v12648_v24  ;;  %v294_v36 = vld [vmem:[%s12488_s0 + $0x38] sm:$0xf]  ;;  %v10258_v24 = vrot.slane %v9930_v21, 4 }
 0x1f5   :  { %v10245_v39 = vpop.permute.xlu1 %3410  ;;  %v2086_v15 = vpop.permute.xlu0 %2085  ;;  %v775_v37 = vsel %vm762_vm8, %v744_v1, %v774_v63  ;;  %v369_v63 = vmul.bf16 %v12801_v0, %v294_v36 }
 0x1f6   :  { %v7821_v60 = vcombine.high %v771_v32, %v775_v37  ;;  %v7820_v54 = vcombine.low %v771_v32, %v775_v37  ;;  %v10269_v32 = vsel %vm3753_vm4, %v3751_v35, %v9913_v20  ;;  %v2109_v37 = vrot.slane %v2086_v15, 4 }
 0x1f7   :  { %3958 = vrot.lane.b32.xlu1 %v3933_v55, %s12658_s24  ;;  %3962 = vrot.lane.b32.xlu0 %v3935_v16, %s12658_s24  ;;  %v297_v55 = vld [vmem:[%s12488_s0 + $0x4c] sm:$0xf]  ;;  %v3766_v36 = vmul.bf16 %v10269_v32, %v9872_v12 }
 0x1f8   :  { %5606 = vmatprep.subr.bf16.mxu0 %v7821_v60  ;;  %v372_v20 = vmul.bf16 %v12801_v0, %v297_v55 }
 0x1f9   :  { %v10262_v1 = vpop.permute.xlu1 %2087  ;;  %5607 = vmatpush2.bf16.msra.mxu0 %v7820_v54  ;;  %v2092_v53 = vpop.permute.xlu0 %2091  ;;  %v3755_v54 = vsel %vm187_vm0, %v3751_v35, %v10258_v24 }
 0x1fa   :  { %12800 = vst [vmem:[#allocation56_spill] sm:$0xff] %v10262_v1  ;;  %v2112_v23 = vrot.slane %v2092_v53, 4  ;;  %v10286_v7 = vsel %vm3753_vm4, %v3755_v54, %v9930_v21  ;;  %v12803_v35 = vrot.slane %v10262_v1, 4  ;;  %vm3585_vm4 = vcmask 531456  }
 0x1fb   :  { %3964 = vrot.lane.b32.xlu1 %v3936_v45, %s12658_s24  ;;  %401 = vrot.lane.b32.xlu0 %v369_v63, %s8551_s11  ;;  %v3767_v21 = vmul.bf16 %v10286_v7, %v9890_v38 }
 0x1fc   :  { %v2121_v45 = vsel %vm187_vm0, %v2109_v37, %v12803_v35  ;;  %v3769_v37 = vmul.bf16 %v10189_v62, %v10269_v32 }
 0x1fd   :  { %v10279_v16 = vpop.permute.xlu1 %2093  ;;  %v726_v60 = vpop.permute.xlu0 %725  ;;  %v2123_v54 = vsel %vm12674_vm2, %v2086_v15, %v2121_v45 }
 0x1fe   :  { %12802 = vst [vmem:[#allocation8_spill] sm:$0xff] %v10279_v16  ;;  %v12662_v26 = vrot.slane %v10279_v16, 4 }
 0x1ff   :  { %407 = vrot.lane.b32.xlu1 %v372_v20, %s8551_s11  ;;  %3796 = vrot.lane.b32.xlu0 %v3766_v36, %s8579_s18  ;;  %v749_v20 = vrot.slane %v726_v60, 4 }
 0x200   :  { %v2126_v63 = vsel %vm187_vm0, %v2112_v23, %v12662_v26  ;;  %v288_v23 = vld [vmem:[%s12488_s0 + $0x10] sm:$0xf] }
 0x201   :  { %v10297_v55 = vpop.permute.xlu1 %727  ;;  %v2127_v1 = vsel %vm12674_vm2, %v2092_v53, %v2126_v63  ;;  %v732_v40 = vpop.permute.xlu0 %731  ;;  %v8372_v53 = vld [vmem:[%s12490_s2 + $0x8] ss:$28 sps:$4 sm:$0xff]   ;;  %vm12700_vm2 = vcmask 621568  }
 0x202   :  { %12804 = vst [vmem:[#allocation57_spill] sm:$0xff] %v10297_v55  ;;  %v12671_v36 = vrot.slane %v10297_v55, 4  ;;  %v7881_v35 = vcombine.high %v2123_v54, %v2127_v1  ;;  %v7880_v16 = vcombine.low %v2123_v54, %v2127_v1  ;;  %v752_v15 = vrot.slane %v732_v40, 4 }
 0x203   :  { %3798 = vrot.lane.b32.xlu1 %v3767_v21, %s8579_s18  ;;  %3802 = vrot.lane.b32.xlu0 %v3769_v37, %s8579_s18  ;;  %v3770_v1 = vmul.bf16 %v10203_v47, %v10286_v7  ;;  %v363_v54 = vmul.bf16 %v12801_v0, %v288_v23  ;;  %v8375_v21 = vld [vmem:[%s12490_s2 + $0x44] ss:$28 sps:$4 sm:$0xff]  }
 0x204   :  { %5681 = vmatprep.subr.bf16.mxu1 %v7881_v35  ;;  %v291_v35 = vld [vmem:[%s12488_s0 + $0x24] sm:$0xf] }
 0x205   :  { %v10314_v45 = vpop.permute.xlu1 %733  ;;  %5682 = vmatpush2.bf16.msra.mxu1 %v7880_v16  ;;  %v3290_v63 = vpop.permute.xlu0 %3289  ;;  %v761_v16 = vsel %vm187_vm0, %v749_v20, %v12671_v36  ;;  %v366_v9 = vmul.bf16 %v12801_v0, %v291_v35  ;;  %v3760_v20 = vmul.bf16 %v10269_v32, %v9962_v61  ;;  %v8369_v0 = vld [vmem:[%s12490_s2] ss:$28 sps:$4 sm:$0xff]  }
 0x206   :  { %12805 = vst [vmem:[#allocation58_spill] sm:$0xff] %v10314_v45  ;;  %v12675_v37 = vrot.slane %v10314_v45, 4  ;;  %v763_v10 = vsel %vm762_vm8, %v726_v60, %v761_v16  ;;  %v3583_v60 = vrot.slane %v10084_v51, 4  ;;  %v10368_v16 = vrot.slane %v10097_v46, 4 }
 0x207   :  { %3804 = vrot.lane.b32.xlu1 %v3770_v1, %s8579_s18  ;;  %389 = vrot.lane.b32.xlu0 %v363_v54, %s8551_s11  ;;  %v3307_v1 = vrot.slane %v3290_v63, 4 }
 0x208   :  { %v766_v23 = vsel %vm187_vm0, %v752_v15, %v12675_v37  ;;  %5684 = vmatmul.mubr.bf16.vlgmr.msra.gmra.mxu1 %v8372_v53  ;;  %v10378_v37 = vsel %vm3585_vm4, %v3583_v60, %v10084_v51  ;;  %v124_v51 = vld [vmem:[%s12488_s0 + $0x4c] sm:$0xf] }
 0x209   :  { %v10334_v26 = vpop.permute.xlu1 %3291  ;;  %v3296_v59 = vpop.permute.xlu0 %3295  ;;  %v767_v55 = vsel %vm762_vm8, %v732_v40, %v766_v23  ;;  %5693 = vmatprep.mubr.bf16.mxu1 %v8375_v21  ;;  %v8377_v40 = vld [vmem:[%s12490_s2 + $0x40] ss:$28 sps:$4 sm:$0xff]   ;;  %v12807_v23 = vld [vmem:[#allocation12_spill] sm:$0xff] }
 0x20a   :  { %v12676_v54 = vrot.slane %v10334_v26, 4  ;;  %v7817_v36 = vcombine.high %v763_v10, %v767_v55  ;;  %v7816_v45 = vcombine.low %v763_v10, %v767_v55  ;;  %v3310_v15 = vrot.slane %v3296_v59, 4  ;;  %v8378_v21 = vld [vmem:[%s12490_s2 + $0x7c] ss:$28 sps:$4 sm:$0xff]  }
 0x20b   :  { %395 = vrot.lane.b32.xlu1 %v366_v9, %s8551_s11  ;;  %3784 = vrot.lane.b32.xlu0 %v3760_v20, %s8579_s18  ;;  %v3761_v10 = vmul.bf16 %v10286_v7, %v9988_v3  ;;  %v3763_v55 = vmul.bf16 %v10269_v32, %v9993_v50 }
 0x20c   :  { %5608 = vmatprep.subr.bf16.mxu0 %v7817_v36  ;;  %v121_v36 = vld [vmem:[%s12488_s0 + $0x38] sm:$0xf] }
 0x20d   :  { %v10351_v53 = vpop.permute.xlu1 %3297  ;;  %5609 = vmatpush2.bf16.msra.mxu0 %v7816_v45  ;;  %v3278_v9 = vpop.permute.xlu0 %3277  ;;  %v3322_v45 = vsel %vm187_vm0, %v3307_v1, %v12676_v54  ;;  %v201_v20 = vmul.bf16 %v12807_v23, %v121_v36  ;;  %v3764_v54 = vmul.bf16 %v10286_v7, %v10011_v8 }
 0x20e   :  { %12806 = vst [vmem:[#allocation59_spill] sm:$0xff] %v10351_v53  ;;  %v12679_v35 = vrot.slane %v10351_v53, 4 }
 0x20f   :  { %3786 = vrot.lane.b32.xlu1 %v3761_v10, %s8579_s18  ;;  %3790 = vrot.lane.b32.xlu0 %v3763_v55, %s8579_s18  ;;  %v3323_v55 = vsel %vm12700_vm2, %v3290_v63, %v3322_v45  ;;  %v3598_v45 = vmul.bf16 %v10378_v37, %v9872_v12 }
 0x210   :  { %v3326_v32 = vsel %vm187_vm0, %v3310_v15, %v12679_v35  ;;  %5611 = vmatmul.mubr.bf16.vlgmr.msra.gmra.mxu0 %v8369_v0  ;;  %5694 = vmatmul.mubr.bf16.gmra.mxu1 %v8377_v40  ;;  %v3301_v15 = vrot.slane %v3278_v9, 4  ;;  %v3587_v35 = vsel %vm187_vm0, %v3583_v60, %v10368_v16 }
 0x211   :  { %v10380_v1 = vpop.permute.xlu1 %3279  ;;  %v3284_v10 = vpop.permute.xlu0 %3283  ;;  %v3327_v53 = vsel %vm12700_vm2, %v3296_v59, %v3326_v32  ;;  %5703 = vmatprep.mubr.bf16.mxu1 %v8378_v21  ;;  %v8380_v59 = vld [vmem:[%s12490_s2 + $0x78] ss:$28 sps:$4 sm:$0xff]   ;;  %v10407_v60 = vsel %vm3585_vm4, %v3587_v35, %v10097_v46  ;;  %vm12694_vm4 = vcmask 629760  }
 0x212   :  { %v12680_v0 = vrot.slane %v10380_v1, 4  ;;  %v7940_v36 = vcombine.low %v3323_v55, %v3327_v53  ;;  %v7941_v40 = vcombine.high %v3323_v55, %v3327_v53  ;;  %v3304_v7 = vrot.slane %v3284_v10, 4 }
 0x213   :  { %3792 = vrot.lane.b32.xlu1 %v3764_v54, %s8579_s18  ;;  %233 = vrot.lane.b32.xlu0 %v201_v20, %s8555_s29  ;;  %v204_v53 = vmul.bf16 %v12807_v23, %v124_v51  ;;  %v8381_v54 = vld [vmem:[%s12490_s2 + $0xb4] ss:$28 sps:$4 sm:$0xff]   ;;  %v3599_v46 = vmul.bf16 %v10407_v60, %v9890_v38  ;;  %v3601_v51 = vmul.bf16 %v10189_v62, %v10378_v37 }
 0x214   :  { %5724 = vmatprep.subr.bf16.mxu0 %v7941_v40  ;;  %v3313_v20 = vsel %vm187_vm0, %v3301_v15, %v12680_v0 }
 0x215   :  { %v10397_v63 = vpop.permute.xlu1 %3285  ;;  %5725 = vmatpush1.bf16.msra.mxu0 %v7940_v36  ;;  %v3118_v21 = vpop.permute.xlu0 %3117  ;;  %v3315_v40 = vsel %vm12700_vm2, %v3278_v9, %v3313_v20  ;;  %v3602_v20 = vmul.bf16 %v10203_v47, %v10407_v60 }
 0x216   :  { %v12681_v32 = vrot.slane %v10397_v63, 4 }
 0x217   :  { %239 = vrot.lane.b32.xlu1 %v204_v53, %s8555_s29  ;;  %3628 = vrot.lane.b32.xlu0 %v3598_v45, %s8580_s27  ;;  %v3135_v53 = vrot.slane %v3118_v21, 4 }
 0x218   :  { %v3318_v55 = vsel %vm187_vm0, %v3304_v7, %v12681_v32  ;;  %5704 = vmatmul.mubr.bf16.gmra.mxu1 %v8380_v59  ;;  %v115_v59 = vld [vmem:[%s12488_s0 + $0x10] sm:$0xf]  ;;  %v3412_v32 = vrot.slane %v10232_v22, 4 }
 0x219   :  { %v10418_v36 = vpop.permute.xlu1 %3119  ;;  %v3124_v35 = vpop.permute.xlu0 %3123  ;;  %v3319_v15 = vsel %vm12700_vm2, %v3284_v10, %v3318_v55  ;;  %5713 = vmatprep.mubr.bf16.mxu1 %v8381_v54  ;;  %v8383_v10 = vld [vmem:[%s12490_s2 + $0xb0] ss:$28 sps:$4 sm:$0xff]   ;;  %vm2802_vm2 = vcmask 646144  }
 0x21a   :  { %12808 = vst [vmem:[#allocation12_spill] sm:$0xff] %v10418_v36  ;;  %v12684_v45 = vrot.slane %v10418_v36, 4  ;;  %v7936_v0 = vcombine.low %v3315_v40, %v3319_v15  ;;  %v7937_v7 = vcombine.high %v3315_v40, %v3319_v15  ;;  %v3138_v9 = vrot.slane %v3124_v35, 4 }
 0x21b   :  { %3630 = vrot.lane.b32.xlu1 %v3599_v46, %s8580_s27  ;;  %3634 = vrot.lane.b32.xlu0 %v3601_v51, %s8580_s27  ;;  %v195_v40 = vmul.bf16 %v12807_v23, %v115_v59  ;;  %v118_v46 = vld [vmem:[%s12488_s0 + $0x24] sm:$0xf]  ;;  %v3592_v59 = vmul.bf16 %v10378_v37, %v9962_v61  ;;  %v10457_v36 = vrot.slane %v10245_v39, 4 }
 0x21c   :  { %5726 = vmatprep.subr.bf16.mxu0 %v7937_v7  ;;  %v3150_v51 = vsel %vm187_vm0, %v3135_v53, %v12684_v45 }
 0x21d   :  { %v10435_v54 = vpop.permute.xlu1 %3125  ;;  %5727 = vmatpush1.bf16.msra.mxu0 %v7936_v0  ;;  %v3106_v55 = vpop.permute.xlu0 %3105  ;;  %v198_v0 = vmul.bf16 %v12807_v23, %v118_v46  ;;  %v12811_v46 = vmov 0  }
 0x21e   :  { %12809 = vst [vmem:[#allocation60_spill] sm:$0xff] %v10435_v54  ;;  %v12685_v15 = vrot.slane %v10435_v54, 4  ;;  %v3129_v45 = vrot.slane %v3106_v55, 4 }
 0x21f   :  { %3636 = vrot.lane.b32.xlu1 %v3602_v20, %s8580_s27  ;;  %221 = vrot.lane.b32.xlu0 %v195_v40, %s8555_s29  ;;  %v3151_v40 = vsel %vm12694_vm4, %v3118_v21, %v3150_v51  ;;  %v8387_v21 = vld [vmem:[%s12490_s2 + $0x38] ss:$28 sps:$4 sm:$0xff]  }
 0x220   :  { %v3154_v7 = vsel %vm187_vm0, %v3138_v9, %v12685_v15  ;;  %5714 = vmatmul.mubr.bf16.gmra.mxu1 %v8383_v10  ;;  %v8385_v10 = vld [vmem:[%s12490_s2 + $0x3c] ss:$28 sps:$4 sm:$0xff]  }
 0x221   :  { %v10459_v53 = vpop.permute.xlu1 %3107  ;;  %v3112_v20 = vpop.permute.xlu0 %3111  ;;  %v3155_v23 = vsel %vm12694_vm4, %v3124_v35, %v3154_v7  ;;  %5829 = vmatprep.mubr.bf16.mxu1 %v12811_v46  ;;  %5620 = vmatprep.mubr.bf16.mxu0 %v8385_v10  ;;  %v3593_v7 = vmul.bf16 %v10407_v60, %v9988_v3 }
 0x222   :  { %12810 = vst [vmem:[#allocation61_spill] sm:$0xff] %v10459_v53  ;;  %v12691_v9 = vrot.slane %v10459_v53, 4  ;;  %v7932_v15 = vcombine.low %v3151_v40, %v3155_v23  ;;  %v7933_v54 = vcombine.high %v3151_v40, %v3155_v23  ;;  %v3132_v35 = vrot.slane %v3112_v20, 4  ;;  %5621 = vmatmul.mubr.bf16.gmra.mxu0 %v8387_v21 }
 0x223   :  { %227 = vrot.lane.b32.xlu1 %v198_v0, %s8555_s29  ;;  %3616 = vrot.lane.b32.xlu0 %v3592_v59, %s8580_s27  ;;  %v3595_v23 = vmul.bf16 %v10378_v37, %v9993_v50  ;;  %v10481_v0 = vsel %vm3414_vm9, %v3412_v32, %v10232_v22  ;;  %v3416_v59 = vsel %vm187_vm0, %v3412_v32, %v10457_v36  ;;  %s12840_s29 = smov 78  }
 0x224   :  { %5728 = vmatprep.subr.bf16.mxu0 %v7933_v54  ;;  %v3596_v37 = vmul.bf16 %v10407_v60, %v10011_v8  ;;  %v10498_v32 = vsel %vm3414_vm9, %v3416_v59, %v10245_v39  ;;  %v8388_v39 = vld [vmem:[%s12490_s2 + $0x74] ss:$28 sps:$4 sm:$0xff]  }
 0x225   :  { %v10473_v51 = vpop.permute.xlu1 %3113  ;;  %5729 = vmatpush1.bf16.msra.mxu0 %v7932_v15  ;;  %v2950_v40 = vpop.permute.xlu0 %2949  ;;  %v3141_v15 = vsel %vm187_vm0, %v3129_v45, %v12691_v9  ;;  %5630 = vmatprep.mubr.bf16.mxu0 %v8388_v39 }
 0x226   :  { %12812 = vst [vmem:[#allocation62_spill] sm:$0xff] %v10473_v51  ;;  %v12704_v54 = vrot.slane %v10473_v51, 4  ;;  %v3143_v45 = vsel %vm12694_vm4, %v3106_v55, %v3141_v15  ;;  %v8390_v55 = vld [vmem:[%s12490_s2 + $0x70] ss:$28 sps:$4 sm:$0xff]   ;;  %v3430_v15 = vmul.bf16 %v10189_v62, %v10481_v0  ;;  %v3431_v62 = vmul.bf16 %v10203_v47, %v10498_v32 }
 0x227   :  { %3618 = vrot.lane.b32.xlu1 %v3593_v7, %s8580_s27  ;;  %3622 = vrot.lane.b32.xlu0 %v3595_v23, %s8580_s27  ;;  %v3427_v7 = vmul.bf16 %v10481_v0, %v9872_v12  ;;  %v2967_v23 = vrot.slane %v2950_v40, 4  ;;  %v8393_v47 = vld [vmem:[%s12490_s2 + $0xac] ss:$28 sps:$4 sm:$0xff]  }
 0x228   :  { %v3146_v22 = vsel %vm187_vm0, %v3132_v35, %v12704_v54  ;;  %v3428_v35 = vmul.bf16 %v10498_v32, %v9890_v38 }
 0x229   :  { %v10500_v10 = vpop.permute.xlu1 %2951  ;;  %v2956_v53 = vpop.permute.xlu0 %2955  ;;  %v3147_v21 = vsel %vm12694_vm4, %v3112_v20, %v3146_v22  ;;  %vm12696_vm4 = vcmask 637952  }
 0x22a   :  { %v12703_v60 = vrot.slane %v10500_v10, 4  ;;  %v7928_v9 = vcombine.low %v3143_v45, %v3147_v21  ;;  %v7929_v51 = vcombine.high %v3143_v45, %v3147_v21  ;;  %v2970_v20 = vrot.slane %v2956_v53, 4  ;;  %5631 = vmatmul.mubr.bf16.gmra.mxu0 %v8390_v55 }
 0x22b   :  { %3624 = vrot.lane.b32.xlu1 %v3596_v37, %s8580_s27  ;;  %3457 = vrot.lane.b32.xlu0 %v3427_v7, %s8571_s12  ;;  %v3421_v7 = vmul.bf16 %v10481_v0, %v9962_v61 }
 0x22c   :  { %5730 = vmatprep.subr.bf16.mxu0 %v7929_v51  ;;  %v2982_v22 = vsel %vm187_vm0, %v2967_v23, %v12703_v60  ;;  %5640 = vmatprep.mubr.bf16.mxu0 %v8393_v47 }
 0x22d   :  { %v10515_v12 = vpop.permute.xlu1 %2957  ;;  %5731 = vmatpush1.bf16.msra.mxu0 %v7928_v9  ;;  %v2938_v59 = vpop.permute.xlu0 %2937  ;;  %v2983_v45 = vsel %vm12696_vm4, %v2950_v40, %v2982_v22  ;;  %v3422_v40 = vmul.bf16 %v10498_v32, %v9988_v3  ;;  %v3424_v22 = vmul.bf16 %v10481_v0, %v9993_v50  ;;  %v3425_v0 = vmul.bf16 %v10498_v32, %v10011_v8  ;;  %v1822_v8 = vld [vmem:[%s12488_s0 + $0x38] sm:$0xf] }
 0x22e   :  { %v12699_v37 = vrot.slane %v10515_v12, 4  ;;  %v2961_v23 = vrot.slane %v2938_v59, 4 }
 0x22f   :  { %3459 = vrot.lane.b32.xlu1 %v3428_v35, %s8571_s12  ;;  %3463 = vrot.lane.b32.xlu0 %v3430_v15, %s8571_s12 }
 0x230   :  { %v2986_v38 = vsel %vm187_vm0, %v2970_v20, %v12699_v37 }
 0x231   :  { %v10530_v9 = vpop.permute.xlu1 %2939  ;;  %v2944_v51 = vpop.permute.xlu0 %2943  ;;  %v2987_v21 = vsel %vm12696_vm4, %v2956_v53, %v2986_v38  ;;  %v8395_v53 = vld [vmem:[%s12490_s2 + $0xa8] ss:$28 sps:$4 sm:$0xff]  }
 0x232   :  { %v12695_v39 = vrot.slane %v10530_v9, 4  ;;  %v7924_v55 = vcombine.low %v2983_v45, %v2987_v21  ;;  %v7925_v35 = vcombine.high %v2983_v45, %v2987_v21  ;;  %v2964_v20 = vrot.slane %v2944_v51, 4  ;;  %v1142_v45 = vld [vmem:[%s12488_s0 + $0x38] sm:$0xf]  ;;  %5641 = vmatmul.mubr.bf16.gmra.mxu0 %v8395_v53 }
 0x233   :  { %3465 = vrot.lane.b32.xlu1 %v3431_v62, %s8571_s12  ;;  %3445 = vrot.lane.b32.xlu0 %v3421_v7, %s8571_s12 }
 0x234   :  { %5732 = vmatprep.subr.bf16.mxu0 %v7925_v35  ;;  %v2973_v62 = vsel %vm187_vm0, %v2961_v23, %v12695_v39 }
 0x235   :  { %v10547_v61 = vpop.permute.xlu1 %2945  ;;  %5733 = vmatpush1.bf16.msra.mxu0 %v7924_v55  ;;  %v4137_v15 = vpop.permute.xlu0 %4136  ;;  %v2975_v7 = vsel %vm12696_vm4, %v2938_v59, %v2973_v62  ;;  %v12814_v55 = vld [vmem:[#allocation17_spill] sm:$0xff] }
 0x236   :  { %v12698_v38 = vrot.slane %v10547_v61, 4  ;;  %v1221_v35 = vmul.bf16 %v12814_v55, %v1142_v45  ;;  %v4154_v47 = vrot.slane %v4137_v15, 4  ;;  %v8398_v59 = vld [vmem:[%s12490_s2 + $0x14] ss:$28 sps:$4 sm:$0xff]  }
 0x237   :  { %3447 = vrot.lane.b32.xlu1 %v3422_v40, %s8571_s12  ;;  %3451 = vrot.lane.b32.xlu0 %v3424_v22, %s8571_s12  ;;  %v12816_v45 = vld [vmem:[#allocation9_spill] sm:$0xff] }
 0x238   :  { %v2978_v3 = vsel %vm187_vm0, %v2964_v20, %v12698_v38  ;;  %v1145_v20 = vld [vmem:[%s12488_s0 + $0x4c] sm:$0xf]  ;;  %5756 = vmatprep.mubr.bf16.mxu0 %v8398_v59 }
 0x239   :  { %v10565_v50 = vpop.permute.xlu1 %4138  ;;  %v4143_v21 = vpop.permute.xlu0 %4142  ;;  %v2979_v23 = vsel %vm12696_vm4, %v2944_v51, %v2978_v3  ;;  %v1224_v53 = vmul.bf16 %v12814_v55, %v1145_v20  ;;  %v1901_v3 = vmul.bf16 %v12816_v45, %v1822_v8  ;;  %vm12717_vm4 = vcmask 490496  }
 0x23a   :  { %12813 = vst [vmem:[#allocation63_spill] sm:$0xff] %v10565_v50  ;;  %v12697_v40 = vrot.slane %v10565_v50, 4  ;;  %v7920_v22 = vcombine.low %v2975_v7, %v2979_v23  ;;  %v7921_v39 = vcombine.high %v2975_v7, %v2979_v23  ;;  %v4157_v32 = vrot.slane %v4143_v21, 4  ;;  %v1136_v23 = vld [vmem:[%s12488_s0 + $0x10] sm:$0xf] }
 0x23b   :  { %3453 = vrot.lane.b32.xlu1 %v3425_v0, %s8571_s12  ;;  %1253 = vrot.lane.b32.xlu0 %v1221_v35, %s8561_s15  ;;  %v1825_v0 = vld [vmem:[%s12488_s0 + $0x4c] sm:$0xf]  ;;  %v1215_v38 = vmul.bf16 %v12814_v55, %v1136_v23 }
 0x23c   :  { %5734 = vmatprep.subr.bf16.mxu0 %v7921_v39  ;;  %v4169_v39 = vsel %vm187_vm0, %v4154_v47, %v12697_v40  ;;  %v1904_v20 = vmul.bf16 %v12816_v45, %v1825_v0  ;;  %v1816_v0 = vld [vmem:[%s12488_s0 + $0x10] sm:$0xf] }
 0x23d   :  { %v10584_v51 = vpop.permute.xlu1 %4144  ;;  %5735 = vmatpush1.bf16.msra.mxu0 %v7920_v22  ;;  %v2778_v62 = vpop.permute.xlu0 %2777  ;;  %v4170_v8 = vsel %vm12717_vm4, %v4137_v15, %v4169_v39 }
 0x23e   :  { %12815 = vst [vmem:[#allocation17_spill] sm:$0xff] %v10584_v51  ;;  %v12701_v7 = vrot.slane %v10584_v51, 4  ;;  %v2795_v59 = vrot.slane %v2778_v62, 4 }
 0x23f   :  { %1259 = vrot.lane.b32.xlu1 %v1224_v53, %s8561_s15  ;;  %1933 = vrot.lane.b32.xlu0 %v1901_v3, %s8552_s20 }
 0x240   :  { %v4173_v35 = vsel %vm187_vm0, %v4157_v32, %v12701_v7  ;;  %v1139_v32 = vld [vmem:[%s12488_s0 + $0x24] sm:$0xf] }
 0x241   :  { %v10603_v22 = vpop.permute.xlu1 %2779  ;;  %v4174_v47 = vsel %vm12717_vm4, %v4143_v21, %v4173_v35  ;;  %v2784_v40 = vpop.permute.xlu0 %2783  ;;  %v1218_v39 = vmul.bf16 %v12814_v55, %v1139_v32  ;;  %v1895_v35 = vmul.bf16 %v12816_v45, %v1816_v0  ;;  %v12818_v7 = vld [vmem:[#allocation23_spill] sm:$0xff] }
 0x242   :  { %v12702_v53 = vrot.slane %v10603_v22, 4  ;;  %v7980_v37 = vcombine.low %v4170_v8, %v4174_v47  ;;  %v7981_v3 = vcombine.high %v4170_v8, %v4174_v47  ;;  %v2798_v15 = vrot.slane %v2784_v40, 4  ;;  %v1819_v47 = vld [vmem:[%s12488_s0 + $0x24] sm:$0xf] }
 0x243   :  { %1939 = vrot.lane.b32.xlu1 %v1904_v20, %s8552_s20  ;;  %1241 = vrot.lane.b32.xlu0 %v1215_v38, %s8561_s15 }
 0x244   :  { %5809 = vmatprep.subr.bf16.mxu1 %v7981_v3  ;;  %v2810_v38 = vsel %vm187_vm0, %v2795_v59, %v12702_v53  ;;  %v1898_v3 = vmul.bf16 %v12816_v45, %v1819_v47  ;;  %v1654_v45 = vld [vmem:[%s12488_s0 + $0x38] sm:$0xf] }
 0x245   :  { %v10618_v21 = vpop.permute.xlu1 %2785  ;;  %5810 = vmatpush1.bf16.msra.mxu1 %v7980_v37  ;;  %v4125_v23 = vpop.permute.xlu0 %4124  ;;  %v974_v37 = vld [vmem:[%s12488_s0 + $0x38] sm:$0xf]  ;;  %v2811_v0 = vsel %vm2802_vm2, %v2778_v62, %v2810_v38 }
 0x246   :  { %v12706_v8 = vrot.slane %v10618_v21, 4  ;;  %v1049_v53 = vmul.bf16 %v12818_v7, %v974_v37  ;;  %v4148_v60 = vrot.slane %v4125_v23, 4  ;;  %v12820_v37 = vld [vmem:[#allocation7_spill] sm:$0xff] }
 0x247   :  { %1247 = vrot.lane.b32.xlu1 %v1218_v39, %s8561_s15  ;;  %1921 = vrot.lane.b32.xlu0 %v1895_v35, %s8552_s20 }
 0x248   :  { %v2814_v55 = vsel %vm187_vm0, %v2798_v15, %v12706_v8  ;;  %v977_v15 = vld [vmem:[%s12488_s0 + $0x4c] sm:$0xf] }
 0x249   :  { %v10637_v20 = vpop.permute.xlu1 %4126  ;;  %v4131_v32 = vpop.permute.xlu0 %4130  ;;  %v2815_v59 = vsel %vm2802_vm2, %v2784_v40, %v2814_v55  ;;  %v1052_v47 = vmul.bf16 %v12818_v7, %v977_v15  ;;  %v1729_v55 = vmul.bf16 %v12820_v37, %v1654_v45 }
 0x24a   :  { %12817 = vst [vmem:[#allocation9_spill] sm:$0xff] %v10637_v20  ;;  %v12705_v39 = vrot.slane %v10637_v20, 4  ;;  %v7916_v54 = vcombine.low %v2811_v0, %v2815_v59  ;;  %v7917_v35 = vcombine.high %v2811_v0, %v2815_v59  ;;  %v4151_v40 = vrot.slane %v4131_v32, 4  ;;  %v1657_v59 = vld [vmem:[%s12488_s0 + $0x4c] sm:$0xf] }
 0x24b   :  { %1927 = vrot.lane.b32.xlu1 %v1898_v3, %s8552_s20  ;;  %1081 = vrot.lane.b32.xlu0 %v1049_v53, %s8564_s16  ;;  %v968_v3 = vld [vmem:[%s12488_s0 + $0x10] sm:$0xf]  ;;  %v1732_v15 = vmul.bf16 %v12820_v37, %v1657_v59 }
 0x24c   :  { %5736 = vmatprep.subr.bf16.mxu0 %v7917_v35  ;;  %v4160_v53 = vsel %vm187_vm0, %v4148_v60, %v12705_v39  ;;  %v1043_v8 = vmul.bf16 %v12818_v7, %v968_v3  ;;  %v1648_v59 = vld [vmem:[%s12488_s0 + $0x10] sm:$0xf] }
 0x24d   :  { %v10652_v62 = vpop.permute.xlu1 %4132  ;;  %5737 = vmatpush1.bf16.msra.mxu0 %v7916_v54  ;;  %v2766_v38 = vpop.permute.xlu0 %2765  ;;  %v4162_v45 = vsel %vm12717_vm4, %v4125_v23, %v4160_v53 }
 0x24e   :  { %12819 = vst [vmem:[#allocation23_spill] sm:$0xff] %v10652_v62  ;;  %v12711_v0 = vrot.slane %v10652_v62, 4  ;;  %v2789_v20 = vrot.slane %v2766_v38, 4 }
 0x24f   :  { %1087 = vrot.lane.b32.xlu1 %v1052_v47, %s8564_s16  ;;  %1761 = vrot.lane.b32.xlu0 %v1729_v55, %s8550_s28 }
 0x250   :  { %v4165_v54 = vsel %vm187_vm0, %v4151_v40, %v12711_v0  ;;  %v971_v40 = vld [vmem:[%s12488_s0 + $0x24] sm:$0xf] }
 0x251   :  { %v10671_v35 = vpop.permute.xlu1 %2767  ;;  %v4166_v60 = vsel %vm12717_vm4, %v4131_v32, %v4165_v54  ;;  %v2772_v39 = vpop.permute.xlu0 %2771  ;;  %v8384_v32 = vld [vmem:[%s12490_s2 + $0x18] ss:$28 sps:$4 sm:$0xff]   ;;  %v1046_v3 = vmul.bf16 %v12818_v7, %v971_v40  ;;  %v12821_v7 = vld [vmem:[#allocation24_spill] sm:$0xff]  ;;  %vm3993_vm4 = vcmask 498688  }
 0x252   :  { %v12712_v47 = vrot.slane %v10671_v35, 4  ;;  %v7976_v51 = vcombine.low %v4162_v45, %v4166_v60  ;;  %v7977_v55 = vcombine.high %v4162_v45, %v4166_v60  ;;  %v2792_v23 = vrot.slane %v2772_v39, 4 }
 0x253   :  { %1767 = vrot.lane.b32.xlu1 %v1732_v15, %s8550_s28  ;;  %1069 = vrot.lane.b32.xlu0 %v1043_v8, %s8564_s16  ;;  %v1723_v45 = vmul.bf16 %v12820_v37, %v1648_v59  ;;  %v1651_v8 = vld [vmem:[%s12488_s0 + $0x24] sm:$0xf] }
 0x254   :  { %5811 = vmatprep.subr.bf16.mxu1 %v7977_v55  ;;  %v2801_v15 = vsel %vm187_vm0, %v2789_v20, %v12712_v47  ;;  %v12822_v55 = vrot.slane %v12821_v7, 4  ;;  %v1726_v20 = vmul.bf16 %v12820_v37, %v1651_v8  ;;  %v1482_v37 = vld [vmem:[%s12488_s0 + $0x38] sm:$0xf] }
 0x255   :  { %v10689_v53 = vpop.permute.xlu1 %2773  ;;  %5812 = vmatpush1.bf16.msra.mxu1 %v7976_v51  ;;  %v574_v54 = vpop.permute.xlu0 %573  ;;  %v802_v51 = vld [vmem:[%s12488_s0 + $0x38] sm:$0xf]  ;;  %v2803_v62 = vsel %vm2802_vm2, %v2766_v38, %v2801_v15  ;;  %v12823_v38 = vrot.slane %v9296_v41, 4 }
 0x256   :  { %v12719_v60 = vrot.slane %v10689_v53, 4  ;;  %v589_v0 = vrot.slane %v574_v54, 4 }
 0x257   :  { %1075 = vrot.lane.b32.xlu1 %v1046_v3, %s8564_s16  ;;  %1749 = vrot.lane.b32.xlu0 %v1723_v45, %s8550_s28  ;;  %v881_v45 = vmul.bf16 %v9534_v58, %v802_v51 }
 0x258   :  { %v604_v40 = vsel %vm187_vm0, %v12822_v55, %v589_v0  ;;  %v2806_v59 = vsel %vm187_vm0, %v2792_v23, %v12719_v60  ;;  %7984 = vmatmul.mubr.msk.bf16.vlgmr.msra.gmra.mxu1 %vm1714_vm1, %v8384_v32  ;;  %v805_v23 = vld [vmem:[%s12488_s0 + $0x4c] sm:$0xf] }
 0x259   :  { %v580_v54 = vpop.permute.xlu1 %579  ;;  %v3969_v47 = vpop.permute.xlu0 %3968  ;;  %v2807_v3 = vsel %vm2802_vm2, %v2772_v39, %v2806_v59  ;;  %5839 = vmatprep.mubr.bf16.mxu1 %v12811_v46  ;;  %v605_v39 = vsel %vm594_vm13, %v12821_v7, %v604_v40  ;;  %v884_v15 = vmul.bf16 %v9534_v58, %v805_v23 }
 0x25a   :  { %v592_v50 = vrot.slane %v580_v54, 4  ;;  %v7912_v0 = vcombine.low %v2803_v62, %v2807_v3  ;;  %v7913_v55 = vcombine.high %v2803_v62, %v2807_v3  ;;  %v8402_v62 = vld [vmem:[%s12490_s2 + $0x50] ss:$28 sps:$4 sm:$0xff]   ;;  %v12824_v54 = vld [vmem:[#allocation11_spill] sm:$0xff]  ;;  %v3986_v40 = vrot.slane %v3969_v47, 4 }
 0x25b   :  { %1755 = vrot.lane.b32.xlu1 %v1726_v20, %s8550_s28  ;;  %913 = vrot.lane.b32.xlu0 %v881_v45, %s8567_s25  ;;  %v1561_v7 = vmul.bf16 %v12824_v54, %v1482_v37  ;;  %v1485_v45 = vld [vmem:[%s12488_s0 + $0x4c] sm:$0xf]  ;;  %s12834_s28 = smov 77  }
 0x25c   :  { %v608_v32 = vsel %vm187_vm0, %v12823_v38, %v592_v50  ;;  %5738 = vmatprep.subr.bf16.mxu0 %v7913_v55  ;;  %v1564_v23 = vmul.bf16 %v12824_v54, %v1485_v45  ;;  %v1476_v38 = vld [vmem:[%s12488_s0 + $0x10] sm:$0xf]  ;;  %v8406_v45 = vld [vmem:[%s12490_s2 + $0x88] ss:$28 sps:$4 sm:$0xff]  }
 0x25d   :  { %v10733_v8 = vpop.permute.xlu1 %3970  ;;  %5739 = vmatpush1.bf16.msra.mxu0 %v7912_v0  ;;  %v609_v51 = vsel %vm594_vm13, %v9296_v41, %v608_v32  ;;  %v3975_v59 = vpop.permute.xlu0 %3974  ;;  %v796_v0 = vld [vmem:[%s12488_s0 + $0x10] sm:$0xf] }
 0x25e   :  { %v12718_v20 = vrot.slane %v10733_v8, 4  ;;  %v7814_v50 = vcombine.low %v605_v39, %v609_v51  ;;  %v7815_v3 = vcombine.high %v605_v39, %v609_v51  ;;  %v3989_v41 = vrot.slane %v3975_v59, 4 }
 0x25f   :  { %919 = vrot.lane.b32.xlu1 %v884_v15, %s8567_s25  ;;  %1593 = vrot.lane.b32.xlu0 %v1561_v7, %s8554_s26  ;;  %v875_v39 = vmul.bf16 %v9534_v58, %v796_v0  ;;  %v12825_v7 = vrot.slane %v9370_v29, 4 }
 0x260   :  { %5870 = vmatprep.subr.bf16.mxu1 %v7815_v3  ;;  %7985 = vmatmul.mubr.msk.bf16.gmra.mxu1 %vm1714_vm1, %v8402_v62  ;;  %v799_v62 = vld [vmem:[%s12488_s0 + $0x24] sm:$0xf]  ;;  %v4001_v51 = vsel %vm187_vm0, %v3986_v40, %v12718_v20  ;;  %v1555_v20 = vmul.bf16 %v12824_v54, %v1476_v38 }
 0x261   :  { %v10749_v55 = vpop.permute.xlu1 %3976  ;;  %5871 = vmatpush1.bf16.msra.mxu1 %v7814_v50  ;;  %v562_v37 = vpop.permute.xlu0 %561  ;;  %5849 = vmatprep.mubr.bf16.mxu1 %v12811_v46 }
 0x262   :  { %v12720_v32 = vrot.slane %v10749_v55, 4  ;;  %v583_v15 = vrot.slane %v562_v37, 4  ;;  %v878_v37 = vmul.bf16 %v9534_v58, %v799_v62 }
 0x263   :  { %1599 = vrot.lane.b32.xlu1 %v1564_v23, %s8554_s26  ;;  %901 = vrot.lane.b32.xlu0 %v875_v39, %s8567_s25  ;;  %v4002_v23 = vsel %vm3993_vm4, %v3969_v47, %v4001_v51  ;;  %v12826_v47 = vrot.slane %v9406_v14, 4 }
 0x264   :  { %v596_v50 = vsel %vm187_vm0, %v12825_v7, %v583_v15  ;;  %v4005_v3 = vsel %vm187_vm0, %v3989_v41, %v12720_v32  ;;  %v1479_v41 = vld [vmem:[%s12488_s0 + $0x24] sm:$0xf]  ;;  %v634_v32 = vld [vmem:[%s12488_s0 + $0x38] sm:$0xf] }
 0x265   :  { %v568_v0 = vpop.permute.xlu1 %567  ;;  %v3957_v40 = vpop.permute.xlu0 %3956  ;;  %v4006_v39 = vsel %vm3993_vm4, %v3975_v59, %v4005_v3  ;;  %v597_v58 = vsel %vm594_vm13, %v9370_v29, %v596_v50  ;;  %v1558_v62 = vmul.bf16 %v12824_v54, %v1479_v41  ;;  %v1314_v54 = vld [vmem:[%s12488_s0 + $0x38] sm:$0xf] }
 0x266   :  { %v586_v60 = vrot.slane %v568_v0, 4  ;;  %v7972_v15 = vcombine.low %v4002_v23, %v4006_v39  ;;  %v7973_v7 = vcombine.high %v4002_v23, %v4006_v39  ;;  %v3980_v29 = vrot.slane %v3957_v40, 4 }
 0x267   :  { %907 = vrot.lane.b32.xlu1 %v878_v37, %s8567_s25  ;;  %1581 = vrot.lane.b32.xlu0 %v1555_v20, %s8554_s26  ;;  %v709_v20 = vmul.bf16 %v9686_v43, %v634_v32  ;;  %v8410_v32 = vld [vmem:[%s12490_s2 + $0xc0] ss:$28 sps:$4 sm:$0xff]  }
 0x268   :  { %v600_v59 = vsel %vm187_vm0, %v12826_v47, %v586_v60  ;;  %5740 = vmatprep.subr.bf16.mxu0 %v7973_v7  ;;  %7986 = vmatmul.mubr.msk.bf16.gmra.mxu1 %vm1714_vm1, %v8406_v45  ;;  %v637_v45 = vld [vmem:[%s12488_s0 + $0x4c] sm:$0xf] }
 0x269   :  { %v10793_v38 = vpop.permute.xlu1 %3958  ;;  %5741 = vmatpush2.bf16.msra.mxu0 %v7972_v15  ;;  %v601_v51 = vsel %vm594_vm13, %v9406_v14, %v600_v59  ;;  %v3963_v3 = vpop.permute.xlu0 %3962  ;;  %5859 = vmatprep.mubr.bf16.mxu1 %v12811_v46  ;;  %v712_v23 = vmul.bf16 %v9686_v43, %v637_v45  ;;  %v12827_v15 = vld [vmem:[#allocation13_spill] sm:$0xff]  ;;  %v1317_v47 = vld [vmem:[%s12488_s0 + $0x4c] sm:$0xf]  ;;  %vm3821_vm13 = vcmask 506880  }
 0x26a   :  { %v12728_v50 = vrot.slane %v10793_v38, 4  ;;  %v7810_v60 = vcombine.low %v597_v58, %v601_v51  ;;  %v7811_v0 = vcombine.high %v597_v58, %v601_v51  ;;  %v3983_v14 = vrot.slane %v3963_v3, 4 }
 0x26b   :  { %1587 = vrot.lane.b32.xlu1 %v1558_v62, %s8554_s26  ;;  %741 = vrot.lane.b32.xlu0 %v709_v20, %s8570_s30  ;;  %v1389_v7 = vmul.bf16 %v12827_v15, %v1314_v54  ;;  %v628_v62 = vld [vmem:[%s12488_s0 + $0x10] sm:$0xf]  ;;  %v12828_v51 = vrot.slane %v9158_v13, 4 }
 0x26c   :  { %5872 = vmatprep.subr.bf16.mxu1 %v7811_v0  ;;  %v3992_v59 = vsel %vm187_vm0, %v3980_v29, %v12728_v50  ;;  %v1392_v29 = vmul.bf16 %v12827_v15, %v1317_v47  ;;  %v12829_v47 = vrot.slane %v9174_v6, 4 }
 0x26d   :  { %v10812_v37 = vpop.permute.xlu1 %3964  ;;  %5873 = vmatpush1.bf16.msra.mxu1 %v7810_v60  ;;  %v402_v39 = vpop.permute.xlu0 %401  ;;  %v3994_v54 = vsel %vm3993_vm4, %v3957_v40, %v3992_v59  ;;  %v1308_v40 = vld [vmem:[%s12488_s0 + $0x10] sm:$0xf] }
 0x26e   :  { %v12722_v41 = vrot.slane %v10812_v37, 4  ;;  %v417_v58 = vrot.slane %v402_v39, 4  ;;  %v703_v39 = vmul.bf16 %v9686_v43, %v628_v62 }
 0x26f   :  { %747 = vrot.lane.b32.xlu1 %v712_v23, %s8570_s30  ;;  %1421 = vrot.lane.b32.xlu0 %v1389_v7, %s8558_s23  ;;  %v8483_v7 = vld [vmem:[%s12490_s2 + $0x4] ss:$28 sps:$4 sm:$0xff]  }
 0x270   :  { %v432_v20 = vsel %vm187_vm0, %v12828_v51, %v417_v58  ;;  %v3997_v60 = vsel %vm187_vm0, %v3983_v14, %v12722_v41  ;;  %7987 = vmatmul.mubr.msk.bf16.gmra.mxu1 %vm1714_vm1, %v8410_v32  ;;  %v631_v32 = vld [vmem:[%s12488_s0 + $0x24] sm:$0xf] }
 0x271   :  { %v408_v0 = vpop.permute.xlu1 %407  ;;  %v3797_v45 = vpop.permute.xlu0 %3796  ;;  %v3998_v23 = vsel %vm3993_vm4, %v3963_v3, %v3997_v60  ;;  %5902 = vmatprep.mubr.bf16.mxu1 %v8483_v7  ;;  %v433_v3 = vsel %vm422_vm15, %v9158_v13, %v432_v20  ;;  %v706_v60 = vmul.bf16 %v9686_v43, %v631_v32  ;;  %v1311_v7 = vld [vmem:[%s12488_s0 + $0x24] sm:$0xf] }
 0x272   :  { %v420_v58 = vrot.slane %v408_v0, 4  ;;  %v7968_v51 = vcombine.low %v3994_v54, %v3998_v23  ;;  %v7969_v14 = vcombine.high %v3994_v54, %v3998_v23  ;;  %v3814_v23 = vrot.slane %v3797_v45, 4 }
 0x273   :  { %1427 = vrot.lane.b32.xlu1 %v1392_v29, %s8558_s23  ;;  %729 = vrot.lane.b32.xlu0 %v703_v39, %s8570_s30  ;;  %v1383_v29 = vmul.bf16 %v12827_v15, %v1308_v40  ;;  %v2502_v40 = vld [vmem:[%s12488_s0 + $0x38] sm:$0xf] }
 0x274   :  { %v436_v59 = vsel %vm187_vm0, %v12829_v47, %v420_v58  ;;  %5742 = vmatprep.subr.bf16.mxu0 %v7969_v14  ;;  %v3182_v58 = vld [vmem:[%s12488_s0 + $0x38] sm:$0xf] }
 0x275   :  { %v10855_v62 = vpop.permute.xlu1 %3798  ;;  %5743 = vmatpush2.bf16.msra.mxu0 %v7968_v51  ;;  %v437_v0 = vsel %vm422_vm15, %v9174_v6, %v436_v59  ;;  %v3803_v54 = vpop.permute.xlu0 %3802  ;;  %v1386_v51 = vmul.bf16 %v12827_v15, %v1311_v7  ;;  %v3261_v32 = vmul.bf16 %v9791_v31, %v3182_v58  ;;  %v3185_v59 = vld [vmem:[%s12488_s0 + $0x4c] sm:$0xf]  ;;  %v12830_v15 = vrot.slane %v9209_v30, 4 }
 0x276   :  { %v12721_v39 = vrot.slane %v10855_v62, 4  ;;  %v7806_v13 = vcombine.low %v433_v3, %v437_v0  ;;  %v7807_v20 = vcombine.high %v433_v3, %v437_v0  ;;  %v3817_v6 = vrot.slane %v3803_v54, 4 }
 0x277   :  { %735 = vrot.lane.b32.xlu1 %v706_v60, %s8570_s30  ;;  %1409 = vrot.lane.b32.xlu0 %v1383_v29, %s8558_s23 }
 0x278   :  { %5874 = vmatprep.subr.bf16.mxu1 %v7807_v20  ;;  %v3829_v60 = vsel %vm187_vm0, %v3814_v23, %v12721_v39  ;;  %v3264_v20 = vmul.bf16 %v9791_v31, %v3185_v59 }
 0x279   :  { %v10870_v43 = vpop.permute.xlu1 %3804  ;;  %5875 = vmatpush1.bf16.msra.mxu1 %v7806_v13  ;;  %v390_v14 = vpop.permute.xlu0 %389  ;;  %v3830_v58 = vsel %vm3821_vm13, %v3797_v45, %v3829_v60 }
 0x27a   :  { %v12723_v3 = vrot.slane %v10870_v43, 4  ;;  %v411_v47 = vrot.slane %v390_v14, 4  ;;  %v12831_v14 = vld [vmem:[#allocation14_spill] sm:$0xff] }
 0x27b   :  { %1415 = vrot.lane.b32.xlu1 %v1386_v51, %s8558_s23  ;;  %3293 = vrot.lane.b32.xlu0 %v3261_v32, %s8572_s13  ;;  %v2581_v51 = vmul.bf16 %v12831_v14, %v2502_v40 }
 0x27c   :  { %v424_v0 = vsel %vm187_vm0, %v12830_v15, %v411_v47  ;;  %v3833_v29 = vsel %vm187_vm0, %v3817_v6, %v12723_v3  ;;  %v2505_v47 = vld [vmem:[%s12488_s0 + $0x4c] sm:$0xf]  ;;  %v3176_v6 = vld [vmem:[%s12488_s0 + $0x10] sm:$0xf] }
 0x27d   :  { %v396_v13 = vpop.permute.xlu1 %395  ;;  %v3785_v7 = vpop.permute.xlu0 %3784  ;;  %v3834_v23 = vsel %vm3821_vm13, %v3803_v54, %v3833_v29  ;;  %v425_v45 = vsel %vm422_vm15, %v9209_v30, %v424_v0  ;;  %v12832_v54 = vrot.slane %v9216_v4, 4  ;;  %v2584_v60 = vmul.bf16 %v12831_v14, %v2505_v47  ;;  %v2496_v30 = vld [vmem:[%s12488_s0 + $0x10] sm:$0xf] }
 0x27e   :  { %v414_v39 = vrot.slane %v396_v13, 4  ;;  %v7964_v32 = vcombine.low %v3830_v58, %v3834_v23  ;;  %v7965_v41 = vcombine.high %v3830_v58, %v3834_v23  ;;  %v3255_v13 = vmul.bf16 %v9791_v31, %v3176_v6  ;;  %v3179_v58 = vld [vmem:[%s12488_s0 + $0x24] sm:$0xf] }
 0x27f   :  { %3299 = vrot.lane.b32.xlu1 %v3264_v20, %s8572_s13  ;;  %2613 = vrot.lane.b32.xlu0 %v2581_v51, %s8560_s14  ;;  %v3808_v0 = vrot.slane %v3785_v7, 4  ;;  %v2575_v6 = vmul.bf16 %v12831_v14, %v2496_v30  ;;  %v12833_v30 = vrot.slane %v9496_v42, 4 }
 0x280   :  { %v428_v40 = vsel %vm187_vm0, %v12832_v54, %v414_v39  ;;  %5744 = vmatprep.subr.bf16.mxu0 %v7965_v41  ;;  %v3014_v54 = vld [vmem:[%s12488_s0 + $0x38] sm:$0xf] }
 0x281   :  { %v10909_v59 = vpop.permute.xlu1 %3786  ;;  %5745 = vmatpush2.bf16.msra.mxu0 %v7964_v32  ;;  %v429_v15 = vsel %vm422_vm15, %v9216_v4, %v428_v40  ;;  %v3791_v29 = vpop.permute.xlu0 %3790  ;;  %v46_v4 = vld [vmem:[%s12489_s1 + $0x8] sm:$0x11]  ;;  %v3258_v32 = vmul.bf16 %v9791_v31, %v3179_v58  ;;  %vm3653_vm15 = vcmask 515072   ;;  %s12841_s1 = smov 93  }
 0x282   :  { %v12724_v20 = vrot.slane %v10909_v59, 4  ;;  %v7802_v39 = vcombine.low %v425_v45, %v429_v15  ;;  %v7803_v41 = vcombine.high %v425_v45, %v429_v15  ;;  %v3811_v23 = vrot.slane %v3791_v29, 4  ;;  %v2499_v45 = vld [vmem:[%s12488_s0 + $0x24] sm:$0xf] }
 0x283   :  { %2619 = vrot.lane.b32.xlu1 %v2584_v60, %s8560_s14  ;;  %3281 = vrot.lane.b32.xlu0 %v3255_v13, %s8572_s13  ;;  %v7608_v40 = vcombine.low %v46_v4, %v46_v4  ;;  %v7609_v60 = vcombine.high %v46_v4, %v46_v4  ;;  %v3089_v4 = vmul.bf16 %v9850_v17, %v3014_v54 }
 0x284   :  { %5876 = vmatprep.subr.bf16.mxu1 %v7803_v41  ;;  %v3820_v31 = vsel %vm187_vm0, %v3808_v0, %v12724_v20  ;;  %v2578_v41 = vmul.bf16 %v12831_v14, %v2499_v45 }
 0x285   :  { %v10927_v51 = vpop.permute.xlu1 %3792  ;;  %5877 = vmatpush1.bf16.msra.mxu1 %v7802_v39  ;;  %v234_v47 = vpop.permute.xlu0 %233  ;;  %v3822_v0 = vsel %vm3821_vm13, %v3785_v7, %v3820_v31  ;;  %v72_v20 = vpack.i.b16 %v7608_v40, %v7608_v40 }
 0x286   :  { %v12727_v15 = vrot.slane %v10927_v51, 4  ;;  %v249_v13 = vrot.slane %v234_v47, 4 }
 0x287   :  { %3287 = vrot.lane.b32.xlu1 %v3258_v32, %s8572_s13  ;;  %2601 = vrot.lane.b32.xlu0 %v2575_v6, %s8560_s14  ;;  %v3017_v6 = vld [vmem:[%s12488_s0 + $0x4c] sm:$0xf] }
 0x288   :  { %v264_v39 = vsel %vm187_vm0, %v12833_v30, %v249_v13  ;;  %v3825_v58 = vsel %vm187_vm0, %v3811_v23, %v12727_v15  ;;  %v79_v13 = vpack.i.b16 %v7609_v60, %v7609_v60  ;;  %v2334_v23 = vld [vmem:[%s12488_s0 + $0x38] sm:$0xf]  ;;  %v3092_v40 = vmul.bf16 %v9850_v17, %v3017_v6  ;;  %v2337_v6 = vld [vmem:[%s12488_s0 + $0x4c] sm:$0xf] }
 0x289   :  { %v240_v47 = vpop.permute.xlu1 %239  ;;  %v3629_v3 = vpop.permute.xlu0 %3628  ;;  %v3826_v32 = vsel %vm3821_vm13, %v3791_v29, %v3825_v58  ;;  %v265_v7 = vsel %vm254_vm5, %v9496_v42, %v264_v39  ;;  %v12835_v29 = vrot.slane %v9513_v52, 4 }
 0x28a   :  { %v252_v30 = vrot.slane %v240_v47, 4  ;;  %v7960_v14 = vcombine.low %v3822_v0, %v3826_v32  ;;  %v7961_v45 = vcombine.high %v3822_v0, %v3826_v32  ;;  %v84_v42 = vrot.slane %v79_v13, %v8660_v19 }
 0x28b   :  { %2607 = vrot.lane.b32.xlu1 %v2578_v41, %s8560_s14  ;;  %3121 = vrot.lane.b32.xlu0 %v3089_v4, %s12834_s28  ;;  %v12836_v41 = vld [vmem:[#allocation21_spill] sm:$0xff]  ;;  %v77_v4 = vrot.slane %v72_v20, %v8660_v19  ;;  %v3646_v39 = vrot.slane %v3629_v3, 4 }
 0x28c   :  { %v268_v54 = vsel %vm187_vm0, %v12835_v29, %v252_v30  ;;  %5746 = vmatprep.subr.bf16.mxu0 %v7961_v45  ;;  %v2409_v47 = vmul.bf16 %v12836_v41, %v2334_v23  ;;  %v2412_v13 = vmul.bf16 %v12836_v41, %v2337_v6  ;;  %v3011_v23 = vld [vmem:[%s12488_s0 + $0x24] sm:$0xf] }
 0x28d   :  { %v10967_v60 = vpop.permute.xlu1 %3630  ;;  %5747 = vmatpush2.bf16.msra.mxu0 %v7960_v14  ;;  %v269_v31 = vsel %vm254_vm5, %v9513_v52, %v268_v54  ;;  %v3635_v58 = vpop.permute.xlu0 %3634  ;;  %v3008_v52 = vld [vmem:[%s12488_s0 + $0x10] sm:$0xf]  ;;  %v7611_v29 = vcombine.low %v77_v4, %v84_v42  ;;  %v12838_v4 = vrot.slane %v9597_v33, 4 }
 0x28e   :  { %v12725_v0 = vrot.slane %v10967_v60, 4  ;;  %v7798_v32 = vcombine.low %v265_v7, %v269_v31  ;;  %v7799_v30 = vcombine.high %v265_v7, %v269_v31  ;;  %v3649_v20 = vrot.slane %v3635_v58, 4  ;;  %v2328_v7 = vld [vmem:[%s12488_s0 + $0x10] sm:$0xf] }
 0x28f   :  { %3127 = vrot.lane.b32.xlu1 %v3092_v40, %s12834_s28  ;;  %2441 = vrot.lane.b32.xlu0 %v2409_v47, %s12837_s19  ;;  %v3083_v45 = vmul.bf16 %v9850_v17, %v3008_v52  ;;  %v42_v47 = vld [vmem:[%s12488_s0 + $0x30] sm:$0xff]  ;;  %v2403_v6 = vmul.bf16 %v12836_v41, %v2328_v7  ;;  %v38_v7 = vld [vmem:[%s12488_s0 + $0x8] sm:$0xff] }
 0x290   :  { %5878 = vmatprep.subr.bf16.mxu1 %v7799_v30  ;;  %v3661_v31 = vsel %vm187_vm0, %v3646_v39, %v12725_v0  ;;  %v3086_v30 = vmul.bf16 %v9850_v17, %v3011_v23  ;;  %v2842_v17 = vld [vmem:[%s12488_s0 + $0x38] sm:$0xf]  ;;  %v102_v23 = vmul.bf16 %v7611_v29, %v42_v47 }
 0x291   :  { %v10983_v19 = vpop.permute.xlu1 %3636  ;;  %5879 = vmatpush1.bf16.msra.mxu1 %v7798_v32  ;;  %v222_v14 = vpop.permute.xlu0 %221  ;;  %v44_v32 = vld [vmem:[%s12488_s0 + $0x44] sm:$0xff]  ;;  %v3662_v0 = vsel %vm3653_vm15, %v3629_v3, %v3661_v31  ;;  %v40_v3 = vld [vmem:[%s12488_s0 + $0x1c] sm:$0xff]  ;;  %v12839_v31 = vrot.slane %v9605_v44, 4 }
 0x292   :  { %v12726_v54 = vrot.slane %v10983_v19, 4  ;;  %v243_v40 = vrot.slane %v222_v14, 4  ;;  %v100_v15 = vmul.bf16 %v7611_v29, %v40_v3 }
 0x293   :  { %2447 = vrot.lane.b32.xlu1 %v2412_v13, %s12837_s19  ;;  %3109 = vrot.lane.b32.xlu0 %v3083_v45, %s12834_s28  ;;  %v2331_v45 = vld [vmem:[%s12488_s0 + $0x24] sm:$0xf] }
 0x294   :  { %v256_v42 = vsel %vm187_vm0, %v12838_v4, %v243_v40  ;;  %v3665_v39 = vsel %vm187_vm0, %v3649_v20, %v12726_v54  ;;  %v104_v40 = vmul.bf16 %v7611_v29, %v44_v32  ;;  %v2921_v32 = vmul.bf16 %v9923_v49, %v2842_v17 }
 0x295   :  { %v228_v52 = vpop.permute.xlu1 %227  ;;  %v3617_v14 = vpop.permute.xlu0 %3616  ;;  %v3666_v13 = vsel %vm3653_vm15, %v3635_v58, %v3665_v39  ;;  %v257_v58 = vsel %vm254_vm5, %v9597_v33, %v256_v42 }
 0x296   :  { %v246_v4 = vrot.slane %v228_v52, 4  ;;  %v7956_v20 = vcombine.low %v3662_v0, %v3666_v13  ;;  %v7957_v54 = vcombine.high %v3662_v0, %v3666_v13  ;;  %v2406_v0 = vmul.bf16 %v12836_v41, %v2331_v45  ;;  %v2845_v41 = vld [vmem:[%s12488_s0 + $0x4c] sm:$0xf] }
 0x297   :  { %3115 = vrot.lane.b32.xlu1 %v3086_v30, %s12834_s28  ;;  %2429 = vrot.lane.b32.xlu0 %v2403_v6, %s12837_s19  ;;  %v7791_v6 = vcombine.high %v102_v23, %v104_v40  ;;  %v98_v13 = vmul.bf16 %v7611_v29, %v38_v7  ;;  %v3640_v33 = vrot.slane %v3617_v14, 4  ;;  %v2924_v45 = vmul.bf16 %v9923_v49, %v2845_v41  ;;  %v2165_v7 = vld [vmem:[%s12488_s0 + $0x4c] sm:$0xf] }
 0x298   :  { %v260_v47 = vsel %vm187_vm0, %v12839_v31, %v246_v4  ;;  %5748 = vmatprep.subr.bf16.mxu0 %v7957_v54  ;;  %v2162_v54 = vld [vmem:[%s12488_s0 + $0x38] sm:$0xf]  ;;  %v7790_v3 = vcombine.low %v102_v23, %v104_v40 }
 0x299   :  { %v11036_v39 = vpop.permute.xlu1 %3618  ;;  %5749 = vmatpush2.bf16.msra.mxu0 %v7956_v20  ;;  %v261_v30 = vsel %vm254_vm5, %v9605_v44, %v260_v47  ;;  %v3623_v52 = vpop.permute.xlu0 %3622  ;;  %v2241_v20 = vmul.bf16 %v9462_v34, %v2162_v54  ;;  %v7787_v47 = vcombine.high %v98_v13, %v100_v15 }
 0x29a   :  { %v3641_v42 = vrot.slane %v11036_v39, 4  ;;  %v7794_v50 = vcombine.low %v257_v58, %v261_v30  ;;  %v7795_v4 = vcombine.high %v257_v58, %v261_v30  ;;  %v3643_v44 = vrot.slane %v3623_v52, 4 }
 0x29b   :  { %2435 = vrot.lane.b32.xlu1 %v2406_v0, %s12837_s19  ;;  %2953 = vrot.lane.b32.xlu0 %v2921_v32, %s12840_s29  ;;  %v2244_v0 = vmul.bf16 %v9462_v34, %v2165_v7  ;;  %v2156_v7 = vld [vmem:[%s12488_s0 + $0x10] sm:$0xf] }
 0x29c   :  { %5880 = vmatprep.subr.bf16.mxu1 %v7795_v4  ;;  %v3652_v31 = vsel %vm187_vm0, %v3640_v33, %v3641_v42  ;;  %v7786_v4 = vcombine.low %v98_v13, %v100_v15 }
 0x29d   :  { %v11049_v29 = vpop.permute.xlu1 %3624  ;;  %5881 = vmatpush1.bf16.msra.mxu1 %v7794_v50  ;;  %v3458_v17 = vpop.permute.xlu0 %3457  ;;  %v2836_v50 = vld [vmem:[%s12488_s0 + $0x10] sm:$0xf]  ;;  %v3654_v30 = vsel %vm3653_vm15, %v3617_v14, %v3652_v31 }
 0x29e   :  { %v3644_v58 = vrot.slane %v11049_v29, 4  ;;  %5882 = vmatprep.subr.bf16.mxu1 %v7791_v6  ;;  %v2915_v6 = vmul.bf16 %v9923_v49, %v2836_v50  ;;  %v3475_v41 = vrot.slane %v3458_v17, 4  ;;  %v2159_v50 = vld [vmem:[%s12488_s0 + $0x24] sm:$0xf] }
 0x29f   :  { %2959 = vrot.lane.b32.xlu1 %v2924_v45, %s12840_s29  ;;  %2273 = vrot.lane.b32.xlu0 %v2241_v20, %s12841_s1 }
 0x2a0   :  { %v3657_v23 = vsel %vm187_vm0, %v3643_v44, %v3644_v58  ;;  %v2839_v44 = vld [vmem:[%s12488_s0 + $0x24] sm:$0xf] }
 0x2a1   :  { %v11069_v40 = vpop.permute.xlu1 %3459  ;;  %v3464_v32 = vpop.permute.xlu0 %3463  ;;  %v3658_v33 = vsel %vm3653_vm15, %v3623_v52, %v3657_v23  ;;  %5883 = vmatpush1.bf16.msra.mxu1 %v7790_v3  ;;  %v2918_v52 = vmul.bf16 %v9923_v49, %v2839_v44  ;;  %v2235_v3 = vmul.bf16 %v9462_v34, %v2156_v7 }
 0x2a2   :  { %v12731_v54 = vrot.slane %v11069_v40, 4  ;;  %v7952_v45 = vcombine.low %v3654_v30, %v3658_v33  ;;  %v7953_v20 = vcombine.high %v3654_v30, %v3658_v33  ;;  %5884 = vmatprep.subr.bf16.mxu1 %v7787_v47  ;;  %v3478_v14 = vrot.slane %v3464_v32, 4 }
 0x2a3   :  { %2279 = vrot.lane.b32.xlu1 %v2244_v0, %s12841_s1  ;;  %2941 = vrot.lane.b32.xlu0 %v2915_v6, %s12840_s29  ;;  %v2674_v0 = vld [vmem:[%s12488_s0 + $0x38] sm:$0xf]  ;;  %v2238_v30 = vmul.bf16 %v9462_v34, %v2159_v50 }
 0x2a4   :  { %5750 = vmatprep.subr.bf16.mxu0 %v7953_v20  ;;  %v3489_v47 = vsel %vm187_vm0, %v3475_v41, %v12731_v54  ;;  %v2749_v41 = vmul.bf16 %v10035_v57, %v2674_v0  ;;  %v1994_v34 = vld [vmem:[%s12488_s0 + $0x38] sm:$0xf] }
 0x2a5   :  { %v11083_v15 = vpop.permute.xlu1 %3465  ;;  %5751 = vmatpush2.bf16.msra.mxu0 %v7952_v45  ;;  %v3446_v13 = vpop.permute.xlu0 %3445  ;;  %5885 = vmatpush1.bf16.msra.mxu1 %v7786_v4  ;;  %v3490_v6 = vsel %vm3414_vm9, %v3458_v17, %v3489_v47  ;;  %v2069_v50 = vmul.bf16 %v9642_v25, %v1994_v34 }
 0x2a6   :  { %v12730_v31 = vrot.slane %v11083_v15, 4  ;;  %v3469_v45 = vrot.slane %v3446_v13, 4 }
 0x2a7   :  { %2947 = vrot.lane.b32.xlu1 %v2918_v52, %s12840_s29  ;;  %2261 = vrot.lane.b32.xlu0 %v2235_v3, %s12841_s1  ;;  %s12842_s29 = smov 79  }
 0x2a8   :  { %v3493_v49 = vsel %vm187_vm0, %v3478_v14, %v12730_v31  ;;  %v2677_v14 = vld [vmem:[%s12488_s0 + $0x4c] sm:$0xf] }
 0x2a9   :  { %v11102_v23 = vpop.permute.xlu1 %3447  ;;  %v3452_v33 = vpop.permute.xlu0 %3451  ;;  %v3494_v4 = vsel %vm3414_vm9, %v3464_v32, %v3493_v49  ;;  %v2752_v52 = vmul.bf16 %v10035_v57, %v2677_v14  ;;  %v1997_v49 = vld [vmem:[%s12488_s0 + $0x4c] sm:$0xf] }
 0x2aa   :  { %v12729_v20 = vrot.slane %v11102_v23, 4  ;;  %v7948_v44 = vcombine.low %v3490_v6, %v3494_v4  ;;  %v7949_v7 = vcombine.high %v3490_v6, %v3494_v4  ;;  %v3472_v17 = vrot.slane %v3452_v33, 4  ;;  %v2668_v6 = vld [vmem:[%s12488_s0 + $0x10] sm:$0xf] }
 0x2ab   :  { %2267 = vrot.lane.b32.xlu1 %v2238_v30, %s12841_s1  ;;  %2781 = vrot.lane.b32.xlu0 %v2749_v41, %s12842_s29  ;;  %s12843_s1 = smov 94   ;;  %v12844_v4 = vrot.slane %v9755_v28, 4  ;;  %v2072_v14 = vmul.bf16 %v9642_v25, %v1997_v49 }
 0x2ac   :  { %5752 = vmatprep.subr.bf16.mxu0 %v7949_v7  ;;  %v3481_v30 = vsel %vm187_vm0, %v3469_v45, %v12729_v20 }
 0x2ad   :  { %v11117_v32 = vpop.permute.xlu1 %3453  ;;  %5753 = vmatpush2.bf16.msra.mxu0 %v7948_v44  ;;  %v1254_v3 = vpop.permute.xlu0 %1253  ;;  %v3482_v34 = vsel %vm3414_vm9, %v3446_v13, %v3481_v30  ;;  %v12846_v30 = vld [vmem:[#allocation20_spill] sm:$0xff] }
 0x2ae   :  { %v3473_v47 = vrot.slane %v11117_v32, 4  ;;  %v1269_v0 = vrot.slane %v1254_v3, 4 }
 0x2af   :  { %2787 = vrot.lane.b32.xlu1 %v2752_v52, %s12842_s29  ;;  %2101 = vrot.lane.b32.xlu0 %v2069_v50, %s12843_s1  ;;  %v2743_v52 = vmul.bf16 %v10035_v57, %v2668_v6  ;;  %v12847_v6 = vrot.slane %v12846_v30, 4 }
 0x2b0   :  { %v1284_v41 = vsel %vm187_vm0, %v12844_v4, %v1269_v0  ;;  %v3485_v44 = vsel %vm187_vm0, %v3472_v17, %v3473_v47  ;;  %v2671_v0 = vld [vmem:[%s12488_s0 + $0x24] sm:$0xf]  ;;  %v1988_v17 = vld [vmem:[%s12488_s0 + $0x10] sm:$0xf] }
 0x2b1   :  { %v1260_v7 = vpop.permute.xlu1 %1259  ;;  %v1934_v45 = vpop.permute.xlu0 %1933  ;;  %v3486_v3 = vsel %vm3414_vm9, %v3452_v33, %v3485_v44  ;;  %v1285_v13 = vsel %vm1274_vm10, %v9755_v28, %v1284_v41  ;;  %v12845_v33 = vrot.slane %v9764_v48, 4  ;;  %v8396_v44 = vld [vmem:[%s12490_s2 + $0x10] ss:$28 sps:$4 sm:$0xff]   ;;  %v2063_v41 = vmul.bf16 %v9642_v25, %v1988_v17 }
 0x2b2   :  { %v1272_v20 = vrot.slane %v1260_v7, 4  ;;  %v1949_v50 = vrot.slane %v1934_v45, 4  ;;  %v7944_v31 = vcombine.low %v3482_v34, %v3486_v3  ;;  %v7945_v54 = vcombine.high %v3482_v34, %v3486_v3 }
 0x2b3   :  { %2107 = vrot.lane.b32.xlu1 %v2072_v14, %s12843_s1  ;;  %2769 = vrot.lane.b32.xlu0 %v2743_v52, %s12842_s29  ;;  %v2746_v14 = vmul.bf16 %v10035_v57, %v2671_v0  ;;  %v3861_v57 = vld [vmem:[%s12488_s0 + $0x38] sm:$0xf] }
 0x2b4   :  { %v1288_v49 = vsel %vm187_vm0, %v12845_v33, %v1272_v20  ;;  %v1964_v4 = vsel %vm187_vm0, %v12847_v6, %v1949_v50  ;;  %5754 = vmatprep.subr.bf16.mxu0 %v7945_v54  ;;  %v8399_v20 = vld [vmem:[%s12490_s2 + $0x4c] ss:$28 sps:$4 sm:$0xff]   ;;  %v12848_v50 = vld [vmem:[#allocation22_spill] sm:$0xff] }
 0x2b5   :  { %v1940_v7 = vpop.permute.xlu1 %1939  ;;  %5755 = vmatpush2.bf16.msra.mxu0 %v7944_v31  ;;  %v1242_v45 = vpop.permute.xlu0 %1241  ;;  %v1289_v28 = vsel %vm1274_vm10, %v9764_v48, %v1288_v49  ;;  %v1991_v31 = vld [vmem:[%s12488_s0 + $0x24] sm:$0xf]  ;;  %v1965_v48 = vsel %vm1954_vm11, %v12846_v30, %v1964_v4  ;;  %v12849_v0 = vrot.slane %v12848_v50, 4  ;;  %v3940_v30 = vmul.bf16 %v10137_v2, %v3861_v57 }
 0x2b6   :  { %v1952_v34 = vrot.slane %v1940_v7, 4  ;;  %v1263_v54 = vrot.slane %v1242_v45, 4  ;;  %v7846_v3 = vcombine.low %v1285_v13, %v1289_v28  ;;  %v7847_v52 = vcombine.high %v1285_v13, %v1289_v28 }
 0x2b7   :  { %2775 = vrot.lane.b32.xlu1 %v2746_v14, %s12842_s29  ;;  %2089 = vrot.lane.b32.xlu0 %v2063_v41, %s12843_s1  ;;  %v12850_v13 = vrot.slane %v9829_v27, 4  ;;  %v2066_v6 = vmul.bf16 %v9642_v25, %v1991_v31  ;;  %v8401_v31 = vld [vmem:[%s12490_s2 + $0x48] ss:$28 sps:$4 sm:$0xff]  }
 0x2b8   :  { %v1968_v17 = vsel %vm187_vm0, %v12849_v0, %v1952_v34  ;;  %5886 = vmatprep.subr.bf16.mxu1 %v7847_v52  ;;  %5757 = vmatmul.mubr.bf16.vlgmr.msra.gmra.mxu0 %v8396_v44  ;;  %v3864_v34 = vld [vmem:[%s12488_s0 + $0x4c] sm:$0xf]  ;;  %v3855_v44 = vld [vmem:[%s12488_s0 + $0x10] sm:$0xf] }
 0x2b9   :  { %v1276_v33 = vsel %vm187_vm0, %v12850_v13, %v1263_v54  ;;  %v1248_v49 = vpop.permute.xlu1 %1247  ;;  %5887 = vmatpush2.bf16.msra.mxu1 %v7846_v3  ;;  %v1922_v7 = vpop.permute.xlu0 %1921  ;;  %v1969_v14 = vsel %vm1954_vm11, %v12848_v50, %v1968_v17  ;;  %5766 = vmatprep.mubr.bf16.mxu0 %v8399_v20  ;;  %v12852_v20 = vrot.slane %v9840_v18, 4  ;;  %v12853_v3 = vrot.slane %v9319_v56, 4  ;;  %v8403_v17 = vld [vmem:[%s12490_s2 + $0x84] ss:$28 sps:$4 sm:$0xff]  }
 0x2ba   :  { %v1266_v4 = vrot.slane %v1248_v49, 4  ;;  %v1943_v45 = vrot.slane %v1922_v7, 4  ;;  %v7878_v28 = vcombine.low %v1965_v48, %v1969_v14  ;;  %v7879_v41 = vcombine.high %v1965_v48, %v1969_v14  ;;  %v3858_v7 = vld [vmem:[%s12488_s0 + $0x24] sm:$0xf]  ;;  %v3693_v14 = vld [vmem:[%s12488_s0 + $0x38] sm:$0xf] }
 0x2bb   :  { %2095 = vrot.lane.b32.xlu1 %v2066_v6, %s12843_s1  ;;  %3972 = vrot.lane.b32.xlu0 %v3940_v30, %s12851_s17  ;;  %v1277_v25 = vsel %vm1274_vm10, %v9829_v27, %v1276_v33  ;;  %v3943_v48 = vmul.bf16 %v10137_v2, %v3864_v34  ;;  %v3934_v0 = vmul.bf16 %v10137_v2, %v3855_v44  ;;  %v12854_v30 = vrot.slane %v9342_v5, 4  ;;  %s12877_s1 = smov 60  }
 0x2bc   :  { %v1280_v54 = vsel %vm187_vm0, %v12852_v20, %v1266_v4  ;;  %v1956_v52 = vsel %vm187_vm0, %v12853_v3, %v1943_v45  ;;  %5943 = vmatprep.subr.bf16.mxu0 %v7879_v41  ;;  %v12855_v45 = vrot.slane %v9900_v11, 4  ;;  %v3937_v34 = vmul.bf16 %v10137_v2, %v3858_v7  ;;  %v12856_v2 = vld [vmem:[#allocation39_spill] sm:$0xff] }
 0x2bd   :  { %v1928_v57 = vpop.permute.xlu1 %1927  ;;  %5944 = vmatpush1.bf16.msra.mxu0 %v7878_v28  ;;  %v1082_v50 = vpop.permute.xlu0 %1081  ;;  %v1281_v27 = vsel %vm1274_vm10, %v9840_v18, %v1280_v54  ;;  %v1957_v18 = vsel %vm1954_vm11, %v9319_v56, %v1956_v52  ;;  %v3768_v56 = vmul.bf16 %v10258_v24, %v3693_v14  ;;  %v8407_v14 = vld [vmem:[%s12490_s2 + $0xbc] ss:$28 sps:$4 sm:$0xff]  }
 0x2be   :  { %v1946_v13 = vrot.slane %v1928_v57, 4  ;;  %v1097_v33 = vrot.slane %v1082_v50, 4  ;;  %v7842_v49 = vcombine.low %v1277_v25, %v1281_v27  ;;  %v7843_v6 = vcombine.high %v1277_v25, %v1281_v27  ;;  %v3696_v57 = vld [vmem:[%s12488_s0 + $0x4c] sm:$0xf]  ;;  %v12858_v27 = vld [vmem:[#allocation15_spill] sm:$0xff] }
 0x2bf   :  { %3978 = vrot.lane.b32.xlu1 %v3943_v48, %s12851_s17  ;;  %3960 = vrot.lane.b32.xlu0 %v3934_v0, %s12851_s17  ;;  %v12857_v48 = vrot.slane %v12856_v2, 4  ;;  %v12859_v0 = vrot.slane %v12858_v27, 4 }
 0x2c0   :  { %v1960_v4 = vsel %vm187_vm0, %v12854_v30, %v1946_v13  ;;  %v1112_v28 = vsel %vm187_vm0, %v12855_v45, %v1097_v33  ;;  %5888 = vmatprep.subr.bf16.mxu1 %v7843_v6  ;;  %5767 = vmatmul.mubr.bf16.gmra.mxu0 %v8401_v31  ;;  %v3687_v31 = vld [vmem:[%s12488_s0 + $0x10] sm:$0xf]  ;;  %v8405_v13 = vld [vmem:[%s12490_s2 + $0x80] ss:$28 sps:$4 sm:$0xff]  }
 0x2c1   :  { %v1088_v41 = vpop.permute.xlu1 %1087  ;;  %5889 = vmatpush2.bf16.msra.mxu1 %v7842_v49  ;;  %v1762_v44 = vpop.permute.xlu0 %1761  ;;  %v1961_v25 = vsel %vm1954_vm11, %v9342_v5, %v1960_v4  ;;  %5776 = vmatprep.mubr.bf16.mxu0 %v8403_v17  ;;  %v1113_v5 = vsel %vm1102_vm6, %v9900_v11, %v1112_v28  ;;  %v3771_v49 = vmul.bf16 %v10258_v24, %v3696_v57  ;;  %v3690_v28 = vld [vmem:[%s12488_s0 + $0x24] sm:$0xf]  ;;  %vm12905_vm11 = vcmask 621568  }
 0x2c2   :  { %v1100_v20 = vrot.slane %v1088_v41, 4  ;;  %v1777_v54 = vrot.slane %v1762_v44, 4  ;;  %v7874_v3 = vcombine.low %v1957_v18, %v1961_v25  ;;  %v7875_v52 = vcombine.high %v1957_v18, %v1961_v25  ;;  %v3521_v41 = vld [vmem:[%s12488_s0 + $0x38] sm:$0xf]  ;;  %v12860_v44 = vld [vmem:[#allocation16_spill] sm:$0xff] }
 0x2c3   :  { %3966 = vrot.lane.b32.xlu1 %v3937_v34, %s12851_s17  ;;  %3800 = vrot.lane.b32.xlu0 %v3768_v56, %s8579_s18  ;;  %v3762_v7 = vmul.bf16 %v10258_v24, %v3687_v31  ;;  %v12861_v25 = vrot.slane %v12860_v44, 4  ;;  %v3765_v57 = vmul.bf16 %v10258_v24, %v3690_v28 }
 0x2c4   :  { %v1116_v50 = vsel %vm187_vm0, %v12857_v48, %v1100_v20  ;;  %v1792_v17 = vsel %vm187_vm0, %v12859_v0, %v1777_v54  ;;  %5945 = vmatprep.subr.bf16.mxu0 %v7875_v52  ;;  %v12862_v20 = vld [vmem:[#allocation43_spill] sm:$0xff] }
 0x2c5   :  { %v1768_v33 = vpop.permute.xlu1 %1767  ;;  %5946 = vmatpush1.bf16.msra.mxu0 %v7874_v3  ;;  %v1070_v6 = vpop.permute.xlu0 %1069  ;;  %v1117_v11 = vsel %vm1102_vm6, %v12856_v2, %v1116_v50  ;;  %v1793_v34 = vsel %vm1782_vm14, %v12858_v27, %v1792_v17  ;;  %v12863_v54 = vrot.slane %v12862_v20, 4  ;;  %v3600_v2 = vmul.bf16 %v10368_v16, %v3521_v41  ;;  %v3524_v17 = vld [vmem:[%s12488_s0 + $0x4c] sm:$0xf] }
 0x2c6   :  { %v1780_v18 = vrot.slane %v1768_v33, 4  ;;  %v1091_v30 = vrot.slane %v1070_v6, 4  ;;  %v7838_v4 = vcombine.low %v1113_v5, %v1117_v11  ;;  %v7839_v45 = vcombine.high %v1113_v5, %v1117_v11  ;;  %v12864_v33 = vld [vmem:[#allocation44_spill] sm:$0xff]  ;;  %v12866_v11 = vld [vmem:[#allocation18_spill] sm:$0xff] }
 0x2c7   :  { %3806 = vrot.lane.b32.xlu1 %v3771_v49, %s8579_s18  ;;  %3788 = vrot.lane.b32.xlu0 %v3762_v7, %s8579_s18  ;;  %v12865_v49 = vrot.slane %v12864_v33, 4  ;;  %v12867_v7 = vrot.slane %v12866_v11, 4 }
 0x2c8   :  { %v1796_v56 = vsel %vm187_vm0, %v12861_v25, %v1780_v18  ;;  %v1104_v3 = vsel %vm187_vm0, %v12863_v54, %v1091_v30  ;;  %5890 = vmatprep.subr.bf16.mxu1 %v7839_v45  ;;  %5777 = vmatmul.mubr.bf16.gmra.mxu0 %v8405_v13  ;;  %v3515_v13 = vld [vmem:[%s12488_s0 + $0x10] sm:$0xf]  ;;  %v8409_v18 = vld [vmem:[%s12490_s2 + $0xb8] ss:$28 sps:$4 sm:$0xff]  }
 0x2c9   :  { %v1076_v52 = vpop.permute.xlu1 %1075  ;;  %5891 = vmatpush2.bf16.msra.mxu1 %v7838_v4  ;;  %v1750_v31 = vpop.permute.xlu0 %1749  ;;  %v1797_v5 = vsel %vm1782_vm14, %v12860_v44, %v1796_v56  ;;  %5786 = vmatprep.mubr.bf16.mxu0 %v8407_v14  ;;  %v1105_v24 = vsel %vm1102_vm6, %v12862_v20, %v1104_v3  ;;  %v3603_v4 = vmul.bf16 %v10368_v16, %v3524_v17  ;;  %v3518_v20 = vld [vmem:[%s12488_s0 + $0x24] sm:$0xf]  ;;  %v3354_v54 = vld [vmem:[%s12488_s0 + $0x38] sm:$0xf] }
 0x2ca   :  { %v1094_v48 = vrot.slane %v1076_v52, 4  ;;  %v1771_v50 = vrot.slane %v1750_v31, 4  ;;  %v7870_v27 = vcombine.low %v1793_v34, %v1797_v5  ;;  %v7871_v0 = vcombine.high %v1793_v34, %v1797_v5  ;;  %v12868_v52 = vld [vmem:[#allocation19_spill] sm:$0xff] }
 0x2cb   :  { %3794 = vrot.lane.b32.xlu1 %v3765_v57, %s8579_s18  ;;  %3632 = vrot.lane.b32.xlu0 %v3600_v2, %s8580_s27  ;;  %v3594_v41 = vmul.bf16 %v10368_v16, %v3515_v13  ;;  %v12869_v57 = vrot.slane %v12868_v52, 4  ;;  %v12870_v5 = vld [vmem:[#allocation47_spill] sm:$0xff]  ;;  %v3429_v13 = vmul.bf16 %v10457_v36, %v3354_v54 }
 0x2cc   :  { %v1108_v6 = vsel %vm187_vm0, %v12865_v49, %v1094_v48  ;;  %v1784_v14 = vsel %vm187_vm0, %v12867_v7, %v1771_v50  ;;  %5947 = vmatprep.subr.bf16.mxu0 %v7871_v0  ;;  %v12871_v2 = vrot.slane %v12870_v5, 4  ;;  %v3357_v7 = vld [vmem:[%s12488_s0 + $0x4c] sm:$0xf] }
 0x2cd   :  { %v1756_v30 = vpop.permute.xlu1 %1755  ;;  %5948 = vmatpush1.bf16.msra.mxu0 %v7870_v27  ;;  %v914_v45 = vpop.permute.xlu0 %913  ;;  %v1109_v28 = vsel %vm1102_vm6, %v12864_v33, %v1108_v6  ;;  %v1785_v3 = vsel %vm1782_vm14, %v12866_v11, %v1784_v14  ;;  %v3597_v27 = vmul.bf16 %v10368_v16, %v3518_v20  ;;  %v4033_v16 = vld [vmem:[%s12488_s0 + $0x38] sm:$0xf] }
 0x2ce   :  { %v1774_v34 = vrot.slane %v1756_v30, 4  ;;  %v929_v44 = vrot.slane %v914_v45, 4  ;;  %v7834_v25 = vcombine.low %v1105_v24, %v1109_v28  ;;  %v7835_v56 = vcombine.high %v1105_v24, %v1109_v28  ;;  %v8484_v24 = vld [vmem:[%s12490_s2 + $0xc] ss:$28 sps:$4 sm:$0xff]   ;;  %v12874_v45 = vld [vmem:[#allocation25_spill] sm:$0xff]  ;;  %v12876_v20 = vld [vmem:[#allocation42_spill] sm:$0xff] }
 0x2cf   :  { %3638 = vrot.lane.b32.xlu1 %v3603_v4, %s8580_s27  ;;  %3620 = vrot.lane.b32.xlu0 %v3594_v41, %s8580_s27  ;;  %v12875_v28 = vrot.slane %v12874_v45, 4  ;;  %v4108_v54 = vmul.bf16 %v12876_v20, %v4033_v16 }
 0x2d0   :  { %v1788_v31 = vsel %vm187_vm0, %v12869_v57, %v1774_v34  ;;  %v944_v48 = vsel %vm187_vm0, %v12871_v2, %v929_v44  ;;  %5892 = vmatprep.subr.bf16.mxu1 %v7835_v56  ;;  %5787 = vmatmul.mubr.bf16.gmra.mxu0 %v8409_v18  ;;  %v12872_v18 = vld [vmem:[#allocation48_spill] sm:$0xff]  ;;  %v3432_v44 = vmul.bf16 %v10457_v36, %v3357_v7  ;;  %v3348_v2 = vld [vmem:[%s12488_s0 + $0x10] sm:$0xf] }
 0x2d1   :  { %v920_v50 = vpop.permute.xlu1 %919  ;;  %5893 = vmatpush2.bf16.msra.mxu1 %v7834_v25  ;;  %v1594_v0 = vpop.permute.xlu0 %1593  ;;  %v1789_v17 = vsel %vm1782_vm14, %v12868_v52, %v1788_v31  ;;  %5975 = vmatprep.mubr.bf16.mxu0 %v8484_v24  ;;  %v945_v14 = vsel %vm934_vm12, %v12870_v5, %v944_v48  ;;  %v12873_v30 = vrot.slane %v12872_v18, 4  ;;  %v4036_v5 = vld [vmem:[%s12488_s0 + $0x4c] sm:$0xf]  ;;  %v3423_v7 = vmul.bf16 %v10457_v36, %v3348_v2  ;;  %vm12910_vm14 = vmmov %vm12905_vm11 }
 0x2d2   :  { %v932_v33 = vrot.slane %v920_v50, 4  ;;  %v1609_v49 = vrot.slane %v1594_v0, 4  ;;  %v7866_v6 = vcombine.low %v1785_v3, %v1789_v17  ;;  %v7867_v11 = vcombine.high %v1785_v3, %v1789_v17  ;;  %v12878_v50 = vld [vmem:[#allocation26_spill] sm:$0xff]  ;;  %v12880_v17 = vld [vmem:[#allocation51_spill] sm:$0xff] }
 0x2d3   :  { %3626 = vrot.lane.b32.xlu1 %v3597_v27, %s8580_s27  ;;  %3461 = vrot.lane.b32.xlu0 %v3429_v13, %s8571_s12  ;;  %v12879_v27 = vrot.slane %v12878_v50, 4  ;;  %v12881_v13 = vrot.slane %v12880_v17, 4 }
 0x2d4   :  { %v948_v4 = vsel %vm187_vm0, %v12873_v30, %v932_v33  ;;  %v1624_v41 = vsel %vm187_vm0, %v12875_v28, %v1609_v49  ;;  %5949 = vmatprep.subr.bf16.mxu0 %v7867_v11  ;;  %v4111_v49 = vmul.bf16 %v12876_v20, %v4036_v5  ;;  %v5612_v28 = vpop.f32.mrf.mxu0 }
 0x2d5   :  { %v1600_v34 = vpop.permute.xlu1 %1599  ;;  %5950 = vmatpush1.bf16.msra.mxu0 %v7866_v6  ;;  %v902_v25 = vpop.permute.xlu0 %901  ;;  %v949_v56 = vsel %vm934_vm12, %v12872_v18, %v948_v4  ;;  %v1625_v48 = vsel %vm1614_vm3, %v12874_v45, %v1624_v41  ;;  %v3351_v4 = vld [vmem:[%s12488_s0 + $0x24] sm:$0xf]  ;;  %v4027_v45 = vld [vmem:[%s12488_s0 + $0x10] sm:$0xf] }
 0x2d6   :  { %v1612_v3 = vrot.slane %v1600_v34, 4  ;;  %v923_v52 = vrot.slane %v902_v25, 4  ;;  %v7830_v57 = vcombine.low %v945_v14, %v949_v56  ;;  %v7831_v31 = vcombine.high %v945_v14, %v949_v56  ;;  %v12882_v34 = vld [vmem:[#allocation52_spill] sm:$0xff]  ;;  %v12884_v56 = vld [vmem:[#allocation27_spill] sm:$0xff] }
 0x2d7   :  { %3467 = vrot.lane.b32.xlu1 %v3432_v44, %s8571_s12  ;;  %4140 = vrot.lane.b32.xlu0 %v4108_v54, %s12877_s1  ;;  %v12883_v44 = vrot.slane %v12882_v34, 4  ;;  %v12885_v54 = vrot.slane %v12884_v56, 4  ;;  %v3426_v5 = vmul.bf16 %v10457_v36, %v3351_v4 }
 0x2d8   :  { %v1628_v0 = vsel %vm187_vm0, %v12879_v27, %v1612_v3  ;;  %v936_v24 = vsel %vm187_vm0, %v12881_v13, %v923_v52  ;;  %5894 = vmatprep.subr.bf16.mxu1 %v7831_v31  ;;  %v5614_v52 = vpop.f32.mrf.mxu0 }
 0x2d9   :  { %v908_v33 = vpop.permute.xlu1 %907  ;;  %5895 = vmatpush2.bf16.msra.mxu1 %v7830_v57  ;;  %v1582_v6 = vpop.permute.xlu0 %1581  ;;  %v1629_v11 = vsel %vm1614_vm3, %v12878_v50, %v1628_v0  ;;  %v937_v41 = vsel %vm934_vm12, %v12880_v17, %v936_v24  ;;  %v4102_v50 = vmul.bf16 %v12876_v20, %v4027_v45 }
 0x2da   :  { %v926_v16 = vrot.slane %v908_v33, 4  ;;  %v1603_v14 = vrot.slane %v1582_v6, 4  ;;  %v7862_v18 = vcombine.low %v1625_v48, %v1629_v11  ;;  %v7863_v30 = vcombine.high %v1625_v48, %v1629_v11  ;;  %v5685_v57 = vpop.f32.mrf.mxu1  ;;  %v4030_v33 = vld [vmem:[%s12488_s0 + $0x24] sm:$0xf] }
 0x2db   :  { %4146 = vrot.lane.b32.xlu1 %v4111_v49, %s12877_s1  ;;  %3449 = vrot.lane.b32.xlu0 %v3423_v7, %s8571_s12  ;;  %v11387_v27 = vadd.f32 %v5685_v57, %v5612_v28  ;;  %v5616_v49 = vpop.f32.mrf.mxu0  ;;  %v12886_v7 = vld [vmem:[#allocation28_spill] sm:$0xff] }
 0x2dc   :  { %v940_v25 = vsel %vm187_vm0, %v12883_v44, %v926_v16  ;;  %v1616_v3 = vsel %vm187_vm0, %v12885_v54, %v1603_v14  ;;  %5951 = vmatprep.subr.bf16.mxu0 %v7863_v30  ;;  %v5687_v6 = vpop.f32.mrf.mxu1  ;;  %v12887_v16 = vrot.slane %v12886_v7, 4 }
 0x2dd   :  { %v1588_v31 = vpop.permute.xlu1 %1587  ;;  %5952 = vmatpush1.bf16.msra.mxu0 %v7862_v18  ;;  %v742_v2 = vpop.permute.xlu0 %741  ;;  %v941_v48 = vsel %vm934_vm12, %v12882_v34, %v940_v25  ;;  %v1617_v36 = vsel %vm1614_vm3, %v12884_v56, %v1616_v3  ;;  %v11396_v11 = vadd.f32 %v5687_v6, %v5614_v52  ;;  %v12888_v18 = vld [vmem:[#allocation54_spill] sm:$0xff]  ;;  %vm12927_vm12 = vcmask 629760  }
 0x2de   :  { %v1606_v0 = vrot.slane %v1588_v31, 4  ;;  %v757_v17 = vrot.slane %v742_v2, 4  ;;  %v7826_v13 = vcombine.low %v937_v41, %v941_v48  ;;  %v7827_v24 = vcombine.high %v937_v41, %v941_v48  ;;  %v5689_v45 = vpop.f32.mrf.mxu1  ;;  %v5618_v57 = vpop.f32.mrf.mxu0 }
 0x2df   :  { %3455 = vrot.lane.b32.xlu1 %v3426_v5, %s8571_s12  ;;  %4128 = vrot.lane.b32.xlu0 %v4102_v50, %s12877_s1  ;;  %v12889_v30 = vrot.slane %v12888_v18, 4  ;;  %v4105_v41 = vmul.bf16 %v12876_v20, %v4030_v33  ;;  %v11407_v25 = vadd.f32 %v5689_v45, %v5616_v49  ;;  %v12890_v20 = vld [vmem:[#allocation55_spill] sm:$0xff] }
 0x2e0   :  { %v1620_v14 = vsel %vm187_vm0, %v12887_v16, %v1606_v0  ;;  %5896 = vmatprep.subr.bf16.mxu1 %v7827_v24  ;;  %v5691_v31 = vpop.f32.mrf.mxu1  ;;  %v12891_v48 = vrot.slane %v12890_v20, 4  ;;  %v12892_v0 = vld [vmem:[#allocation29_spill] sm:$0xff] }
 0x2e1   :  { %v772_v4 = vsel %vm187_vm0, %v12889_v30, %v757_v17  ;;  %v748_v28 = vpop.permute.xlu1 %747  ;;  %5897 = vmatpush2.bf16.msra.mxu1 %v7826_v13  ;;  %v1422_v34 = vpop.permute.xlu0 %1421  ;;  %v1621_v44 = vsel %vm1614_vm3, %v12886_v7, %v1620_v14  ;;  %v11412_v2 = vadd.f32 %v5691_v31, %v5618_v57  ;;  %v12893_v17 = vrot.slane %v12892_v0, 4 }
 0x2e2   :  { %v760_v56 = vrot.slane %v748_v28, 4  ;;  %v1437_v54 = vrot.slane %v1422_v34, 4  ;;  %v7858_v3 = vcombine.low %v1617_v36, %v1621_v44  ;;  %v7859_v52 = vcombine.high %v1617_v36, %v1621_v44  ;;  %v5695_v24 = vpop.f32.mrf.mxu1  ;;  %v12894_v28 = vld [vmem:[#allocation30_spill] sm:$0xff]  ;;  %v12896_v44 = vld [vmem:[#allocation57_spill] sm:$0xff] }
 0x2e3   :  { %4134 = vrot.lane.b32.xlu1 %v4105_v41, %s12877_s1  ;;  %v773_v5 = vsel %vm762_vm8, %v12888_v18, %v772_v4  ;;  %v5622_v18 = vpop.f32.mrf.mxu0  ;;  %v12895_v41 = vrot.slane %v12894_v28, 4  ;;  %vm12911_vm3 = vcmask 654336  }
 0x2e4   :  { %v776_v50 = vsel %vm187_vm0, %v12891_v48, %v760_v56  ;;  %v1452_v13 = vsel %vm187_vm0, %v12893_v17, %v1437_v54  ;;  %5953 = vmatprep.subr.bf16.mxu0 %v7859_v52  ;;  %v5697_v30 = vpop.f32.mrf.mxu1  ;;  %v11424_v45 = vadd.f32 %v5695_v24, %v5622_v18  ;;  %v12897_v56 = vrot.slane %v12896_v44, 4  ;;  %vm12915_vm5 = vmmov %vm12911_vm3 }
 0x2e5   :  { %v1428_v33 = vpop.permute.xlu1 %1427  ;;  %5954 = vmatpush1.bf16.msra.mxu0 %v7858_v3  ;;  %v730_v49 = vpop.permute.xlu0 %729  ;;  %v777_v6 = vsel %vm762_vm8, %v12890_v20, %v776_v50  ;;  %v1453_v4 = vsel %vm1442_vm7, %v12892_v0, %v1452_v13  ;;  %vm12921_vm6 = vmmov %vm12911_vm3 }
 0x2e6   :  { %v1440_v36 = vrot.slane %v1428_v33, 4  ;;  %v751_v7 = vrot.slane %v730_v49, 4  ;;  %v7822_v16 = vcombine.low %v773_v5, %v777_v6  ;;  %v7823_v14 = vcombine.high %v773_v5, %v777_v6  ;;  %v5624_v3 = vpop.f32.mrf.mxu0  ;;  %v5699_v52 = vpop.f32.mrf.mxu1  ;;  %v12898_v6 = vld [vmem:[#allocation58_spill] sm:$0xff] }
 0x2e7   :  { %v11434_v20 = vadd.f32 %v5697_v30, %v5624_v3 }
 0x2e8   :  { %v1456_v34 = vsel %vm187_vm0, %v12895_v41, %v1440_v36  ;;  %v764_v54 = vsel %vm187_vm0, %v12897_v56, %v751_v7  ;;  %5898 = vmatprep.subr.bf16.mxu1 %v7823_v14  ;;  %v5626_v13 = vpop.f32.mrf.mxu0  ;;  %v5701_v24 = vpop.f32.mrf.mxu1  ;;  %v12899_v36 = vrot.slane %v12898_v6, 4 }
 0x2e9   :  { %v736_v57 = vpop.permute.xlu1 %735  ;;  %5899 = vmatpush2.bf16.msra.mxu1 %v7822_v16  ;;  %v1410_v31 = vpop.permute.xlu0 %1409  ;;  %v1457_v5 = vsel %vm1442_vm7, %v12894_v28, %v1456_v34  ;;  %v765_v33 = vsel %vm762_vm8, %v12896_v44, %v764_v54  ;;  %v11438_v49 = vadd.f32 %v5699_v52, %v5626_v13  ;;  %v12900_v16 = vld [vmem:[#allocation31_spill] sm:$0xff]  ;;  %v12904_v13 = vrot.slane %v10334_v26, 4 }
 0x2ea   :  { %v754_v48 = vrot.slane %v736_v57, 4  ;;  %v1431_v50 = vrot.slane %v1410_v31, 4  ;;  %v7854_v0 = vcombine.low %v1453_v4, %v1457_v5  ;;  %v7855_v17 = vcombine.high %v1453_v4, %v1457_v5  ;;  %v5628_v30 = vpop.f32.mrf.mxu0  ;;  %v5705_v28 = vpop.f32.mrf.mxu1 }
 0x2eb   :  { %v12901_v14 = vrot.slane %v12900_v16, 4  ;;  %v11448_v44 = vadd.f32 %v5701_v24, %v5628_v30 }
 0x2ec   :  { %v768_v7 = vsel %vm187_vm0, %v12899_v36, %v754_v48  ;;  %5955 = vmatprep.subr.bf16.mxu0 %v7855_v17  ;;  %v5632_v57 = vpop.f32.mrf.mxu0  ;;  %v5707_v31 = vpop.f32.mrf.mxu1 }
 0x2ed   :  { %v1444_v18 = vsel %vm187_vm0, %v12901_v14, %v1431_v50  ;;  %v1416_v41 = vpop.permute.xlu1 %1415  ;;  %5956 = vmatpush1.bf16.msra.mxu0 %v7854_v0  ;;  %v3294_v4 = vpop.permute.xlu0 %3293  ;;  %v769_v34 = vsel %vm762_vm8, %v12898_v6, %v768_v7  ;;  %v11452_v48 = vadd.f32 %v5705_v28, %v5632_v57  ;;  %v12902_v50 = vld [vmem:[#allocation32_spill] sm:$0xff]  ;;  %vm12926_vm8 = vmmov %vm12911_vm3 }
 0x2ee   :  { %v1434_v56 = vrot.slane %v1416_v41, 4  ;;  %v3309_v54 = vrot.slane %v3294_v4, 4  ;;  %v7818_v3 = vcombine.low %v765_v33, %v769_v34  ;;  %v7819_v52 = vcombine.high %v765_v33, %v769_v34  ;;  %v5634_v6 = vpop.f32.mrf.mxu0  ;;  %v5709_v36 = vpop.f32.mrf.mxu1 }
 0x2ef   :  { %v1445_v5 = vsel %vm1442_vm7, %v12900_v16, %v1444_v18  ;;  %v12903_v17 = vrot.slane %v12902_v50, 4  ;;  %v11462_v16 = vadd.f32 %v5707_v31, %v5634_v6 }
 0x2f0   :  { %v3324_v24 = vsel %vm187_vm0, %v12904_v13, %v3309_v54  ;;  %5900 = vmatprep.subr.bf16.mxu1 %v7819_v52  ;;  %v5636_v4 = vpop.f32.mrf.mxu0  ;;  %v5711_v34 = vpop.f32.mrf.mxu1  ;;  %v12906_v52 = vld [vmem:[#allocation59_spill] sm:$0xff] }
 0x2f1   :  { %v1448_v0 = vsel %vm187_vm0, %v12903_v17, %v1434_v56  ;;  %v3300_v7 = vpop.permute.xlu1 %3299  ;;  %5901 = vmatpush2.bf16.msra.mxu1 %v7818_v3  ;;  %v2614_v33 = vpop.permute.xlu0 %2613  ;;  %v3325_v56 = vsel %vm12905_vm11, %v10334_v26, %v3324_v24  ;;  %v11466_v54 = vadd.f32 %v5709_v36, %v5636_v4  ;;  %v12907_v57 = vrot.slane %v12906_v52, 4  ;;  %v12908_v17 = vld [vmem:[#allocation33_spill] sm:$0xff]  ;;  %v8486_v36 = vld [vmem:[%s12490_s2 + $0x3c] ss:$28 sps:$4 sm:$0xff]  }
 0x2f2   :  { %v1449_v14 = vsel %vm1442_vm7, %v12902_v50, %v1448_v0  ;;  %v3312_v18 = vrot.slane %v3300_v7, 4  ;;  %v2629_v30 = vrot.slane %v2614_v33, 4  ;;  %v12909_v13 = vrot.slane %v12908_v17, 4  ;;  %v5638_v50 = vpop.f32.mrf.mxu0  ;;  %v5715_v0 = vpop.f32.mrf.mxu1  ;;  %v12912_v4 = vld [vmem:[#allocation34_spill] sm:$0xff]  ;;  %vm12916_vm7 = vmmov %vm12905_vm11 }
 0x2f3   :  { %v7850_v28 = vcombine.low %v1445_v5, %v1449_v14  ;;  %v7851_v41 = vcombine.high %v1445_v5, %v1449_v14  ;;  %v8485_v5 = vld [vmem:[%s12490_s2] ss:$28 sps:$4 sm:$0xff]   ;;  %v11482_v7 = vadd.f32 %v5711_v34, %v5638_v50  ;;  %vm12920_vm10 = vmmov %vm12916_vm7 }
 0x2f4   :  { %v3328_v3 = vsel %vm187_vm0, %v12907_v57, %v3312_v18  ;;  %v2644_v31 = vsel %vm187_vm0, %v12909_v13, %v2629_v30  ;;  %5903 = vmatmul.mubr.bf16.vlgmr.msra.gmra.mxu1 %v8485_v5  ;;  %v5642_v13 = vpop.f32.mrf.mxu0  ;;  %v5717_v5 = vpop.f32.mrf.mxu1  ;;  %vm12932_vm11 = vmmov %vm12927_vm12 }
 0x2f5   :  { %5957 = vmatprep.subr.bf16.mxu0 %v7851_v41  ;;  %v2620_v6 = vpop.permute.xlu1 %2619  ;;  %v3282_v26 = vpop.permute.xlu0 %3281  ;;  %v3329_v24 = vsel %vm12910_vm14, %v12906_v52, %v3328_v3  ;;  %5912 = vmatprep.mubr.bf16.mxu1 %v8486_v36  ;;  %v2645_v41 = vsel %vm12911_vm3, %v12908_v17, %v2644_v31  ;;  %v12914_v52 = vrot.slane %v10380_v1, 4  ;;  %vm12933_vm14 = vcmask 752640  }
 0x2f6   :  { %5958 = vmatpush1.bf16.msra.mxu0 %v7850_v28  ;;  %v2632_v33 = vrot.slane %v2620_v6, 4  ;;  %v3303_v14 = vrot.slane %v3282_v26, 4  ;;  %v7942_v18 = vcombine.low %v3325_v56, %v3329_v24  ;;  %v7943_v30 = vcombine.high %v3325_v56, %v3329_v24  ;;  %v5644_v36 = vpop.f32.mrf.mxu0  ;;  %vm12938_vm3 = vmmov %vm12933_vm14 }
 0x2f7   :  { %v12913_v28 = vrot.slane %v12912_v4, 4  ;;  %v11494_v6 = vadd.f32 %v5715_v0, %v5642_v13  ;;  %v8487_v0 = vld [vmem:[%s12490_s2 + $0x38] ss:$28 sps:$4 sm:$0xff]  }
 0x2f8   :  { %v3316_v3 = vsel %vm187_vm0, %v12914_v52, %v3303_v14  ;;  %6016 = vmatprep.subr.bf16.mxu1 %v7943_v30  ;;  %v11498_v14 = vadd.f32 %v5717_v5, %v5644_v36  ;;  %v12917_v30 = vrot.slane %v10397_v63, 4  ;;  %v8488_v5 = vld [vmem:[%s12490_s2 + $0x74] ss:$28 sps:$4 sm:$0xff]   ;;  %v12922_v36 = vld [vmem:[#allocation36_spill] sm:$0xff] }
 0x2f9   :  { %v2648_v57 = vsel %vm187_vm0, %v12913_v28, %v2632_v33  ;;  %v3288_v34 = vpop.permute.xlu1 %3287  ;;  %6017 = vmatpush1.bf16.msra.mxu1 %v7942_v18  ;;  %v2602_v50 = vpop.permute.xlu0 %2601  ;;  %v3317_v33 = vsel %vm12916_vm7, %v10380_v1, %v3316_v3  ;;  %v12918_v28 = vld [vmem:[#allocation35_spill] sm:$0xff] }
 0x2fa   :  { %v2649_v56 = vsel %vm12915_vm5, %v12912_v4, %v2648_v57  ;;  %v3306_v17 = vrot.slane %v3288_v34, 4  ;;  %v2623_v31 = vrot.slane %v2602_v50, 4  ;;  %v12919_v52 = vrot.slane %v12918_v28, 4  ;;  %v5719_v57 = vpop.f32.mrf.mxu1  ;;  %vm12939_vm5 = vmmov %vm12932_vm11 }
 0x2fb   :  { %v7910_v26 = vcombine.low %v2645_v41, %v2649_v56  ;;  %v7911_v24 = vcombine.high %v2645_v41, %v2649_v56  ;;  %v5646_v41 = vpop.f32.mrf.mxu0  ;;  %vm12944_vm7 = vmmov %vm12939_vm5 }
 0x2fc   :  { %v3320_v18 = vsel %vm187_vm0, %v12917_v30, %v3306_v17  ;;  %v2636_v4 = vsel %vm187_vm0, %v12919_v52, %v2623_v31  ;;  %5913 = vmatmul.mubr.bf16.gmra.mxu1 %v8487_v0  ;;  %v11514_v34 = vadd.f32 %v5719_v57, %v5646_v41  ;;  %v12924_v52 = vld [vmem:[#allocation12_spill] sm:$0xff] }
 0x2fd   :  { %5959 = vmatprep.subr.bf16.mxu0 %v7911_v24  ;;  %v2608_v13 = vpop.permute.xlu1 %2607  ;;  %v3122_v1 = vpop.permute.xlu0 %3121  ;;  %v3321_v3 = vsel %vm12920_vm10, %v10397_v63, %v3320_v18  ;;  %5922 = vmatprep.mubr.bf16.mxu1 %v8488_v5  ;;  %v2637_v24 = vsel %vm12921_vm6, %v12918_v28, %v2636_v4  ;;  %v12925_v63 = vrot.slane %v12924_v52, 4  ;;  %v12928_v4 = vld [vmem:[#allocation60_spill] sm:$0xff]  ;;  %vm12945_vm10 = vmmov %vm12938_vm3 }
 0x2fe   :  { %5960 = vmatpush2.bf16.msra.mxu0 %v7910_v26  ;;  %v2626_v50 = vrot.slane %v2608_v13, 4  ;;  %v3137_v56 = vrot.slane %v3122_v1, 4  ;;  %v7938_v17 = vcombine.low %v3317_v33, %v3321_v3  ;;  %v7939_v31 = vcombine.high %v3317_v33, %v3321_v3  ;;  %vm12949_vm6 = vmmov %vm12938_vm3 }
 0x2ff   :  { %v12923_v26 = vrot.slane %v12922_v36, 4  ;;  %v12929_v5 = vrot.slane %v12928_v4, 4 }
 0x300   :  { %v3152_v18 = vsel %vm187_vm0, %v12925_v63, %v3137_v56  ;;  %6018 = vmatprep.subr.bf16.mxu1 %v7939_v31 }
 0x301   :  { %v2640_v30 = vsel %vm187_vm0, %v12923_v26, %v2626_v50  ;;  %v3128_v0 = vpop.permute.xlu1 %3127  ;;  %6019 = vmatpush1.bf16.msra.mxu1 %v7938_v17  ;;  %v2442_v41 = vpop.permute.xlu0 %2441  ;;  %v3153_v28 = vsel %vm12927_vm12, %v12924_v52, %v3152_v18  ;;  %v12930_v26 = vld [vmem:[#allocation37_spill] sm:$0xff]  ;;  %v8490_v52 = vld [vmem:[%s12490_s2 + $0xac] ss:$28 sps:$4 sm:$0xff]  }
 0x302   :  { %v2641_v57 = vsel %vm12926_vm8, %v12922_v36, %v2640_v30  ;;  %v3140_v13 = vrot.slane %v3128_v0, 4  ;;  %v2457_v33 = vrot.slane %v2442_v41, 4  ;;  %v12931_v56 = vrot.slane %v12930_v26, 4  ;;  %v8489_v17 = vld [vmem:[%s12490_s2 + $0x70] ss:$28 sps:$4 sm:$0xff]  }
 0x303   :  { %v7906_v1 = vcombine.low %v2637_v24, %v2641_v57  ;;  %v7907_v3 = vcombine.high %v2637_v24, %v2641_v57  ;;  %vm12950_vm8 = vcmask 637952  }
 0x304   :  { %v3156_v50 = vsel %vm187_vm0, %v12929_v5, %v3140_v13  ;;  %v2472_v31 = vsel %vm187_vm0, %v12931_v56, %v2457_v33  ;;  %5923 = vmatmul.mubr.bf16.gmra.mxu1 %v8489_v17  ;;  %v12934_v13 = vld [vmem:[#allocation38_spill] sm:$0xff]  ;;  %vm12954_vm12 = vmmov %vm12950_vm8 }
 0x305   :  { %5961 = vmatprep.subr.bf16.mxu0 %v7907_v3  ;;  %v2448_v36 = vpop.permute.xlu1 %2447  ;;  %v3110_v24 = vpop.permute.xlu0 %3109  ;;  %v3157_v30 = vsel %vm12932_vm11, %v12928_v4, %v3156_v50  ;;  %5932 = vmatprep.mubr.bf16.mxu1 %v8490_v52  ;;  %v2473_v57 = vsel %vm12933_vm14, %v12930_v26, %v2472_v31  ;;  %v12935_v33 = vrot.slane %v12934_v13, 4  ;;  %v12936_v3 = vld [vmem:[#allocation61_spill] sm:$0xff]  ;;  %v12940_v31 = vld [vmem:[#allocation62_spill] sm:$0xff]  ;;  %vm12955_vm11 = vcmask 760832  }
 0x306   :  { %5962 = vmatpush2.bf16.msra.mxu0 %v7906_v1  ;;  %v2460_v63 = vrot.slane %v2448_v36, 4  ;;  %v3131_v18 = vrot.slane %v3110_v24, 4  ;;  %v7934_v0 = vcombine.low %v3153_v28, %v3157_v30  ;;  %v7935_v41 = vcombine.high %v3153_v28, %v3157_v30  ;;  %vm12959_vm14 = vmmov %vm12955_vm11 }
 0x307   :  { %v12937_v5 = vrot.slane %v12936_v3, 4  ;;  %v12941_v52 = vrot.slane %v12940_v31, 4 }
 0x308   :  { %v2476_v1 = vsel %vm187_vm0, %v12935_v33, %v2460_v63  ;;  %6020 = vmatprep.subr.bf16.mxu1 %v7935_v41  ;;  %v12942_v33 = vld [vmem:[#allocation40_spill] sm:$0xff] }
 0x309   :  { %v3144_v4 = vsel %vm187_vm0, %v12937_v5, %v3131_v18  ;;  %v3116_v50 = vpop.permute.xlu1 %3115  ;;  %6021 = vmatpush1.bf16.msra.mxu1 %v7934_v0  ;;  %v2430_v56 = vpop.permute.xlu0 %2429  ;;  %v2477_v17 = vsel %vm12938_vm3, %v12934_v13, %v2476_v1  ;;  %v12943_v18 = vrot.slane %v12942_v33, 4  ;;  %v8491_v0 = vld [vmem:[%s12490_s2 + $0xa8] ss:$28 sps:$4 sm:$0xff]   ;;  %vm12960_vm3 = vmmov %vm12950_vm8 }
 0x30a   :  { %v3134_v36 = vrot.slane %v3116_v50, 4  ;;  %v2451_v28 = vrot.slane %v2430_v56, 4  ;;  %v7902_v24 = vcombine.low %v2473_v57, %v2477_v17  ;;  %v7903_v30 = vcombine.high %v2473_v57, %v2477_v17 }
 0x30b   :  { %v3145_v26 = vsel %vm12939_vm5, %v12936_v3, %v3144_v4  ;;  %v8492_v3 = vld [vmem:[%s12490_s2 + $0x14] ss:$28 sps:$4 sm:$0xff]   ;;  %vm12964_vm5 = vmmov %vm12960_vm3 }
 0x30c   :  { %v3148_v63 = vsel %vm187_vm0, %v12941_v52, %v3134_v36  ;;  %v2464_v41 = vsel %vm187_vm0, %v12943_v18, %v2451_v28  ;;  %5963 = vmatprep.subr.bf16.mxu0 %v7903_v30  ;;  %5933 = vmatmul.mubr.bf16.gmra.mxu1 %v8491_v0  ;;  %v12946_v36 = vld [vmem:[#allocation41_spill] sm:$0xff]  ;;  %v12948_v30 = vrot.slane %v10500_v10, 4 }
 0x30d   :  { %v2436_v13 = vpop.permute.xlu1 %2435  ;;  %5964 = vmatpush2.bf16.msra.mxu0 %v7902_v24  ;;  %v2954_v57 = vpop.permute.xlu0 %2953  ;;  %v3149_v1 = vsel %vm12944_vm7, %v12940_v31, %v3148_v63  ;;  %6048 = vmatprep.mubr.bf16.mxu1 %v8492_v3  ;;  %v2465_v17 = vsel %vm12945_vm10, %v12942_v33, %v2464_v41  ;;  %v12947_v28 = vrot.slane %v12946_v36, 4  ;;  %v12951_v41 = vrot.slane %v10515_v12, 4  ;;  %v12952_v3 = vld [vmem:[#allocation45_spill] sm:$0xff]  ;;  %vm12965_vm7 = vmmov %vm12955_vm11 }
 0x30e   :  { %v2454_v5 = vrot.slane %v2436_v13, 4  ;;  %v2969_v4 = vrot.slane %v2954_v57, 4  ;;  %v7930_v50 = vcombine.low %v3145_v26, %v3149_v1  ;;  %v7931_v56 = vcombine.high %v3145_v26, %v3149_v1  ;;  %vm12969_vm10 = vmmov %vm12965_vm7 }
 0x310   :  { %v2468_v24 = vsel %vm187_vm0, %v12947_v28, %v2454_v5  ;;  %v2984_v31 = vsel %vm187_vm0, %v12948_v30, %v2969_v4  ;;  %6022 = vmatprep.subr.bf16.mxu1 %v7931_v56  ;;  %v12953_v5 = vrot.slane %v12952_v3, 4 }
 0x311   :  { %v2960_v52 = vpop.permute.xlu1 %2959  ;;  %6023 = vmatpush1.bf16.msra.mxu1 %v7930_v50  ;;  %v2274_v63 = vpop.permute.xlu0 %2273  ;;  %v2469_v18 = vsel %vm12949_vm6, %v12946_v36, %v2468_v24  ;;  %v2985_v33 = vsel %vm12950_vm8, %v10500_v10, %v2984_v31  ;;  %v12956_v31 = vld [vmem:[#allocation46_spill] sm:$0xff]  ;;  %vm12973_vm6 = vcmask 769024  }
 0x312   :  { %v2972_v0 = vrot.slane %v2960_v52, 4  ;;  %v2289_v26 = vrot.slane %v2274_v63, 4  ;;  %v7898_v13 = vcombine.low %v2465_v17, %v2469_v18  ;;  %v7899_v57 = vcombine.high %v2465_v17, %v2469_v18  ;;  %vm12977_vm8 = vmmov %vm12973_vm6 }
 0x313   :  { %v12957_v52 = vrot.slane %v12956_v31, 4  ;;  %v12958_v18 = vrot.slane %v10530_v9, 4 }
 0x314   :  { %v2988_v1 = vsel %vm187_vm0, %v12951_v41, %v2972_v0  ;;  %v2304_v4 = vsel %vm187_vm0, %v12953_v5, %v2289_v26  ;;  %5965 = vmatprep.subr.bf16.mxu0 %v7899_v57  ;;  %v12961_v5 = vrot.slane %v10547_v61, 4 }
 0x315   :  { %v2280_v50 = vpop.permute.xlu1 %2279  ;;  %5966 = vmatpush2.bf16.msra.mxu0 %v7898_v13  ;;  %v2942_v56 = vpop.permute.xlu0 %2941  ;;  %v2989_v36 = vsel %vm12954_vm12, %v10515_v12, %v2988_v1  ;;  %v2305_v10 = vsel %vm12955_vm11, %v12952_v3, %v2304_v4  ;;  %vm12981_vm12 = vmmov %vm12973_vm6 }
 0x316   :  { %v2292_v28 = vrot.slane %v2280_v50, 4  ;;  %v2963_v17 = vrot.slane %v2942_v56, 4  ;;  %v7926_v24 = vcombine.low %v2985_v33, %v2989_v36  ;;  %v7927_v30 = vcombine.high %v2985_v33, %v2989_v36  ;;  %v12962_v50 = vld [vmem:[#allocation49_spill] sm:$0xff] }
 0x317   :  { %v12963_v56 = vrot.slane %v12962_v50, 4 }
 0x318   :  { %v2308_v63 = vsel %vm187_vm0, %v12957_v52, %v2292_v28  ;;  %v2976_v0 = vsel %vm187_vm0, %v12958_v18, %v2963_v17  ;;  %6024 = vmatprep.subr.bf16.mxu1 %v7927_v30 }
 0x319   :  { %v2948_v26 = vpop.permute.xlu1 %2947  ;;  %6025 = vmatpush1.bf16.msra.mxu1 %v7926_v24  ;;  %v2262_v13 = vpop.permute.xlu0 %2261  ;;  %v2309_v12 = vsel %vm12959_vm14, %v12956_v31, %v2308_v63  ;;  %v2977_v3 = vsel %vm12960_vm3, %v10530_v9, %v2976_v0  ;;  %v12966_v63 = vld [vmem:[#allocation50_spill] sm:$0xff] }
 0x31a   :  { %v2966_v57 = vrot.slane %v2948_v26, 4  ;;  %v2283_v33 = vrot.slane %v2262_v13, 4  ;;  %v7894_v41 = vcombine.low %v2305_v10, %v2309_v12  ;;  %v7895_v1 = vcombine.high %v2305_v10, %v2309_v12 }
 0x31b   :  { %v12967_v18 = vrot.slane %v12966_v63, 4  ;;  %v12968_v26 = vrot.slane %v10603_v22, 4 }
 0x31c   :  { %v2980_v4 = vsel %vm187_vm0, %v12961_v5, %v2966_v57  ;;  %v2296_v36 = vsel %vm187_vm0, %v12963_v56, %v2283_v33  ;;  %5967 = vmatprep.subr.bf16.mxu0 %v7895_v1  ;;  %v12971_v56 = vld [vmem:[#allocation10_spill] sm:$0xff] }
 0x31d   :  { %v2268_v28 = vpop.permute.xlu1 %2267  ;;  %5968 = vmatpush2.bf16.msra.mxu0 %v7894_v41  ;;  %v2782_v17 = vpop.permute.xlu0 %2781  ;;  %v2981_v24 = vsel %vm12964_vm5, %v10547_v61, %v2980_v4  ;;  %v2297_v9 = vsel %vm12965_vm7, %v12962_v50, %v2296_v36  ;;  %v12970_v4 = vrot.slane %v10618_v21, 4  ;;  %v12972_v36 = vrot.slane %v12971_v56, 4 }
 0x31e   :  { %v2286_v30 = vrot.slane %v2268_v28, 4  ;;  %v2797_v10 = vrot.slane %v2782_v17, 4  ;;  %v7922_v31 = vcombine.low %v2977_v3, %v2981_v24  ;;  %v7923_v52 = vcombine.high %v2977_v3, %v2981_v24 }
 0x320   :  { %v2300_v0 = vsel %vm187_vm0, %v12967_v18, %v2286_v30  ;;  %v2812_v13 = vsel %vm187_vm0, %v12968_v26, %v2797_v10  ;;  %6026 = vmatprep.subr.bf16.mxu1 %v7923_v52  ;;  %v12976_v26 = vrot.slane %v10671_v35, 4 }
 0x321   :  { %v2788_v12 = vpop.permute.xlu1 %2787  ;;  %6027 = vmatpush1.bf16.msra.mxu1 %v7922_v31  ;;  %v2102_v57 = vpop.permute.xlu0 %2101  ;;  %v2301_v61 = vsel %vm12969_vm10, %v12966_v63, %v2300_v0  ;;  %v2813_v5 = vsel %vm2802_vm2, %v10603_v22, %v2812_v13  ;;  %v12974_v63 = vld [vmem:[#allocation53_spill] sm:$0xff] }
 0x322   :  { %v2800_v33 = vrot.slane %v2788_v12, 4  ;;  %v2117_v41 = vrot.slane %v2102_v57, 4  ;;  %v7890_v1 = vcombine.low %v2297_v9, %v2301_v61  ;;  %v7891_v3 = vcombine.high %v2297_v9, %v2301_v61 }
 0x323   :  { %v12975_v18 = vrot.slane %v12974_v63, 4 }
 0x324   :  { %v2816_v50 = vsel %vm187_vm0, %v12970_v4, %v2800_v33  ;;  %v2132_v28 = vsel %vm187_vm0, %v12972_v36, %v2117_v41  ;;  %5969 = vmatprep.subr.bf16.mxu0 %v7891_v3 }
 0x325   :  { %v2108_v17 = vpop.permute.xlu1 %2107  ;;  %5970 = vmatpush2.bf16.msra.mxu0 %v7890_v1  ;;  %v2770_v24 = vpop.permute.xlu0 %2769  ;;  %v2817_v30 = vsel %vm2802_vm2, %v10618_v21, %v2816_v50  ;;  %v2133_v22 = vsel %vm12973_vm6, %v12971_v56, %v2132_v28  ;;  %v12979_v50 = vld [vmem:[#allocation56_spill] sm:$0xff] }
 0x326   :  { %v2120_v10 = vrot.slane %v2108_v17, 4  ;;  %v2791_v31 = vrot.slane %v2770_v24, 4  ;;  %v7918_v52 = vcombine.low %v2813_v5, %v2817_v30  ;;  %v7919_v9 = vcombine.high %v2813_v5, %v2817_v30 }
 0x327   :  { %v12978_v5 = vrot.slane %v10689_v53, 4  ;;  %v12980_v56 = vrot.slane %v12979_v50, 4 }
 0x328   :  { %v2136_v0 = vsel %vm187_vm0, %v12975_v18, %v2120_v10  ;;  %v2804_v13 = vsel %vm187_vm0, %v12976_v26, %v2791_v31  ;;  %6028 = vmatprep.subr.bf16.mxu1 %v7919_v9  ;;  %v12982_v9 = vld [vmem:[#allocation8_spill] sm:$0xff]  ;;  %v12984_v18 = vrot.slane %v10733_v8, 4 }
 0x329   :  { %v2776_v12 = vpop.permute.xlu1 %2775  ;;  %6029 = vmatpush1.bf16.msra.mxu1 %v7918_v52  ;;  %v2090_v57 = vpop.permute.xlu0 %2089  ;;  %v2137_v21 = vsel %vm12977_vm8, %v12974_v63, %v2136_v0  ;;  %v2805_v3 = vsel %vm2802_vm2, %v10671_v35, %v2804_v13 }
 0x32a   :  { %v2794_v61 = vrot.slane %v2776_v12, 4  ;;  %v2111_v33 = vrot.slane %v2090_v57, 4  ;;  %v7886_v41 = vcombine.low %v2133_v22, %v2137_v21  ;;  %v7887_v1 = vcombine.high %v2133_v22, %v2137_v21 }
 0x32b   :  { %v12983_v22 = vrot.slane %v12982_v9, 4 }
 0x32c   :  { %v2808_v4 = vsel %vm187_vm0, %v12978_v5, %v2794_v61  ;;  %v2124_v36 = vsel %vm187_vm0, %v12980_v56, %v2111_v33  ;;  %5971 = vmatprep.subr.bf16.mxu0 %v7887_v1 }
 0x32d   :  { %v2096_v28 = vpop.permute.xlu1 %2095  ;;  %5972 = vmatpush2.bf16.msra.mxu0 %v7886_v41  ;;  %v3973_v17 = vpop.permute.xlu0 %3972  ;;  %v2809_v24 = vsel %vm2802_vm2, %v10689_v53, %v2808_v4  ;;  %v2125_v35 = vsel %vm12981_vm12, %v12979_v50, %v2124_v36  ;;  %vm12985_vm2 = vmmov %vm12973_vm6  ;;  %v12986_v41 = vrot.slane %v10749_v55, 4 }
 0x32e   :  { %v2114_v30 = vrot.slane %v2096_v28, 4  ;;  %v3988_v10 = vrot.slane %v3973_v17, 4  ;;  %v7914_v31 = vcombine.low %v2805_v3, %v2809_v24  ;;  %v7915_v52 = vcombine.high %v2805_v3, %v2809_v24 }
 0x32f   :  { %v12987_v3 = vrot.slane %v10793_v38, 4 }
 0x330   :  { %v2128_v63 = vsel %vm187_vm0, %v12983_v22, %v2114_v30  ;;  %v4003_v0 = vsel %vm187_vm0, %v12984_v18, %v3988_v10  ;;  %6030 = vmatprep.subr.bf16.mxu1 %v7915_v52  ;;  %v12988_v30 = vrot.slane %v10812_v37, 4  ;;  %v8494_v22 = vld [vmem:[%s12490_s2 + $0x44] ss:$28 sps:$4 sm:$0xff]  }
 0x331   :  { %v3979_v26 = vpop.permute.xlu1 %3978  ;;  %6031 = vmatpush1.bf16.msra.mxu1 %v7914_v31  ;;  %v3961_v13 = vpop.permute.xlu0 %3960  ;;  %v2129_v53 = vsel %vm12985_vm2, %v12982_v9, %v2128_v63  ;;  %v4004_v33 = vsel %vm3993_vm4, %v10733_v8, %v4003_v0  ;;  %v12989_v31 = vrot.slane %v10855_v62, 4 }
 0x332   :  { %v3991_v12 = vrot.slane %v3979_v26, 4  ;;  %v3982_v57 = vrot.slane %v3961_v13, 4  ;;  %v7882_v21 = vcombine.low %v2125_v35, %v2129_v53  ;;  %v7883_v61 = vcombine.high %v2125_v35, %v2129_v53  ;;  %v8493_v35 = vld [vmem:[%s12490_s2 + $0x8] ss:$28 sps:$4 sm:$0xff]  }
 0x333   :  { %v12990_v53 = vrot.slane %v10870_v43, 4 }
 0x334   :  { %v4007_v1 = vsel %vm187_vm0, %v12986_v41, %v3991_v12  ;;  %v3995_v5 = vsel %vm187_vm0, %v12987_v3, %v3982_v57  ;;  %5973 = vmatprep.subr.bf16.mxu0 %v7883_v61  ;;  %v12991_v57 = vrot.slane %v10909_v59, 4 }
 0x335   :  { %v3967_v4 = vpop.permute.xlu1 %3966  ;;  %5974 = vmatpush2.bf16.msra.mxu0 %v7882_v21  ;;  %v3801_v50 = vpop.permute.xlu0 %3800  ;;  %v4008_v56 = vsel %vm3993_vm4, %v10749_v55, %v4007_v1  ;;  %v3996_v8 = vsel %vm3993_vm4, %v10793_v38, %v3995_v5 }
 0x336   :  { %v3985_v36 = vrot.slane %v3967_v4, 4  ;;  %v3816_v28 = vrot.slane %v3801_v50, 4  ;;  %v7974_v17 = vcombine.low %v4004_v33, %v4008_v56  ;;  %v7975_v24 = vcombine.high %v4004_v33, %v4008_v56 }
 0x337   :  { %v12992_v4 = vrot.slane %v10927_v51, 4  ;;  %v12993_v56 = vrot.slane %v10967_v60, 4 }
 0x338   :  { %v3999_v10 = vsel %vm187_vm0, %v12988_v30, %v3985_v36  ;;  %v3831_v52 = vsel %vm187_vm0, %v12989_v31, %v3816_v28  ;;  %5976 = vmatmul.mubr.bf16.vlgmr.msra.gmra.mxu0 %v8493_v35  ;;  %6032 = vmatprep.subr.bf16.mxu1 %v7975_v24  ;;  %v8495_v28 = vld [vmem:[%s12490_s2 + $0x40] ss:$28 sps:$4 sm:$0xff]   ;;  %v12994_v35 = vrot.slane %v10983_v19, 4 }
 0x339   :  { %v3807_v55 = vpop.permute.xlu1 %3806  ;;  %6033 = vmatpush2.bf16.msra.mxu1 %v7974_v17  ;;  %v3789_v9 = vpop.permute.xlu0 %3788  ;;  %v4000_v38 = vsel %vm3993_vm4, %v10812_v37, %v3999_v10  ;;  %5985 = vmatprep.mubr.bf16.mxu0 %v8494_v22  ;;  %v3832_v13 = vsel %vm3821_vm13, %v10855_v62, %v3831_v52  ;;  %v8496_v24 = vld [vmem:[%s12490_s2 + $0x7c] ss:$28 sps:$4 sm:$0xff]   ;;  %vm12999_vm4 = vcmask 490496  }
 0x33a   :  { %v3819_v63 = vrot.slane %v3807_v55, 4  ;;  %v3810_v18 = vrot.slane %v3789_v9, 4  ;;  %v7970_v0 = vcombine.low %v3996_v8, %v4000_v38  ;;  %v7971_v26 = vcombine.high %v3996_v8, %v4000_v38  ;;  %vm13009_vm11 = vmmov %vm12999_vm4 }
 0x33c   :  { %v3835_v12 = vsel %vm187_vm0, %v12990_v53, %v3819_v63  ;;  %v3823_v37 = vsel %vm187_vm0, %v12991_v57, %v3810_v18  ;;  %6034 = vmatprep.subr.bf16.mxu1 %v7971_v26 }
 0x33d   :  { %v3795_v21 = vpop.permute.xlu1 %3794  ;;  %6035 = vmatpush2.bf16.msra.mxu1 %v7970_v0  ;;  %v3633_v61 = vpop.permute.xlu0 %3632  ;;  %v3836_v33 = vsel %vm3821_vm13, %v10870_v43, %v3835_v12  ;;  %v3824_v62 = vsel %vm3821_vm13, %v10909_v59, %v3823_v37  ;;  %v8497_v12 = vld [vmem:[%s12490_s2 + $0x78] ss:$28 sps:$4 sm:$0xff]  }
 0x33e   :  { %v3813_v41 = vrot.slane %v3795_v21, 4  ;;  %v3648_v1 = vrot.slane %v3633_v61, 4  ;;  %v7966_v3 = vcombine.low %v3832_v13, %v3836_v33  ;;  %v7967_v5 = vcombine.high %v3832_v13, %v3836_v33 }
 0x340   :  { %v3827_v50 = vsel %vm187_vm0, %v12992_v4, %v3813_v41  ;;  %v3663_v36 = vsel %vm187_vm0, %v12993_v56, %v3648_v1  ;;  %5986 = vmatmul.mubr.bf16.gmra.mxu0 %v8495_v28  ;;  %6036 = vmatprep.subr.bf16.mxu1 %v7967_v5  ;;  %v12996_v1 = vrot.slane %v11083_v15, 4  ;;  %v12997_v5 = vld [vmem:[#allocation63_spill] sm:$0xff] }
 0x341   :  { %v3639_v43 = vpop.permute.xlu1 %3638  ;;  %6037 = vmatpush2.bf16.msra.mxu1 %v7966_v3  ;;  %v3621_v17 = vpop.permute.xlu0 %3620  ;;  %v3828_v59 = vsel %vm3821_vm13, %v10927_v51, %v3827_v50  ;;  %5995 = vmatprep.mubr.bf16.mxu0 %v8496_v24  ;;  %v3664_v52 = vsel %vm3653_vm15, %v10967_v60, %v3663_v36  ;;  %vm13003_vm13 = vmmov %vm12999_vm4 }
 0x342   :  { %v3651_v8 = vrot.slane %v3639_v43, 4  ;;  %v3642_v30 = vrot.slane %v3621_v17, 4  ;;  %v7962_v10 = vcombine.low %v3824_v62, %v3828_v59  ;;  %v7963_v31 = vcombine.high %v3824_v62, %v3828_v59  ;;  %v13000_v59 = vld [vmem:[#allocation17_spill] sm:$0xff] }
 0x343   :  { %v12998_v62 = vrot.slane %v12997_v5, 4  ;;  %v13001_v24 = vrot.slane %v13000_v59, 4 }
 0x344   :  { %v3667_v55 = vsel %vm187_vm0, %v12994_v35, %v3651_v8  ;;  %v3655_v51 = vsel %vm187_vm0, %v3641_v42, %v3642_v30  ;;  %6038 = vmatprep.subr.bf16.mxu1 %v7963_v31  ;;  %v12995_v42 = vrot.slane %v11069_v40, 4  ;;  %v13002_v30 = vrot.slane %v11102_v23, 4  ;;  %v8499_v31 = vld [vmem:[%s12490_s2 + $0xb0] ss:$28 sps:$4 sm:$0xff]  }
 0x345   :  { %v3627_v9 = vpop.permute.xlu1 %3626  ;;  %6039 = vmatpush2.bf16.msra.mxu1 %v7962_v10  ;;  %v3462_v38 = vpop.permute.xlu0 %3461  ;;  %v3668_v22 = vsel %vm3653_vm15, %v10983_v19, %v3667_v55  ;;  %v3656_v60 = vsel %vm3653_vm15, %v11036_v39, %v3655_v51 }
 0x346   :  { %v3645_v63 = vrot.slane %v3627_v9, 4  ;;  %v3477_v18 = vrot.slane %v3462_v38, 4  ;;  %v7958_v0 = vcombine.low %v3664_v52, %v3668_v22  ;;  %v7959_v26 = vcombine.high %v3664_v52, %v3668_v22 }
 0x348   :  { %v3659_v13 = vsel %vm187_vm0, %v3644_v58, %v3645_v63  ;;  %v3491_v53 = vsel %vm187_vm0, %v12995_v42, %v3477_v18  ;;  %5996 = vmatmul.mubr.bf16.gmra.mxu0 %v8497_v12  ;;  %6040 = vmatprep.subr.bf16.mxu1 %v7959_v26  ;;  %v8498_v58 = vld [vmem:[%s12490_s2 + $0xb4] ss:$28 sps:$4 sm:$0xff]  }
 0x349   :  { %v3468_v19 = vpop.permute.xlu1 %3467  ;;  %6041 = vmatpush2.bf16.msra.mxu1 %v7958_v0  ;;  %v4141_v57 = vpop.permute.xlu0 %4140  ;;  %v3660_v39 = vsel %vm3653_vm15, %v11049_v29, %v3659_v13  ;;  %6005 = vmatprep.mubr.bf16.mxu0 %v8498_v58  ;;  %v3492_v41 = vsel %vm3414_vm9, %v11069_v40, %v3491_v53  ;;  %v13004_v18 = vld [vmem:[#allocation9_spill] sm:$0xff]  ;;  %vm13006_vm15 = vmmov %vm12999_vm4 }
 0x34a   :  { %v3480_v37 = vrot.slane %v3468_v19, 4  ;;  %v4156_v21 = vrot.slane %v4141_v57, 4  ;;  %v7954_v61 = vcombine.low %v3656_v60, %v3660_v39  ;;  %v7955_v33 = vcombine.high %v3656_v60, %v3660_v39  ;;  %v13007_v19 = vld [vmem:[#allocation23_spill] sm:$0xff] }
 0x34b   :  { %v13005_v0 = vrot.slane %v13004_v18, 4  ;;  %v13008_v57 = vrot.slane %v13007_v19, 4 }
 0x34c   :  { %v3495_v3 = vsel %vm187_vm0, %v12996_v1, %v3480_v37  ;;  %v4171_v29 = vsel %vm187_vm0, %v12998_v62, %v4156_v21  ;;  %6042 = vmatprep.subr.bf16.mxu1 %v7955_v33  ;;  %v11777_v21 = vpop.f32.mrf.mxu1 }
 0x34d   :  { %v4147_v4 = vpop.permute.xlu1 %4146  ;;  %6043 = vmatpush2.bf16.msra.mxu1 %v7954_v61  ;;  %v3450_v50 = vpop.permute.xlu0 %3449  ;;  %v3496_v56 = vsel %vm3414_vm9, %v11083_v15, %v3495_v3  ;;  %v4172_v40 = vsel %vm12999_vm4, %v12997_v5, %v4171_v29  ;;  %v8501_v61 = vld [vmem:[%s12490_s2 + $0x4c] ss:$28 sps:$4 sm:$0xff]   ;;  %v8504_v5 = vld [vmem:[%s12490_s2 + $0x84] ss:$28 sps:$4 sm:$0xff]  }
 0x34e   :  { %v4159_v36 = vrot.slane %v4147_v4, 4  ;;  %v3471_v28 = vrot.slane %v3450_v50, 4  ;;  %v7950_v43 = vcombine.low %v3492_v41, %v3496_v56  ;;  %v7951_v17 = vcombine.high %v3492_v41, %v3496_v56  ;;  %v5831_v33 = vpop.f32.mrf.mxu1  ;;  %v8502_v41 = vld [vmem:[%s12490_s2 + $0x18] ss:$28 sps:$4 sm:$0xff]   ;;  %v8503_v3 = vld [vmem:[%s12490_s2 + $0x48] ss:$28 sps:$4 sm:$0xff]  }
 0x34f   :  { %v8505_v29 = vld [vmem:[%s12490_s2 + $0x50] ss:$28 sps:$4 sm:$0xff]   ;;  %v8506_v50 = vld [vmem:[%s12490_s2 + $0x80] ss:$28 sps:$4 sm:$0xff]  }
 0x350   :  { %v4175_v8 = vsel %vm187_vm0, %v13001_v24, %v4159_v36  ;;  %v3483_v10 = vsel %vm187_vm0, %v13002_v30, %v3471_v28  ;;  %6006 = vmatmul.mubr.bf16.gmra.mxu0 %v8499_v31  ;;  %6044 = vmatprep.subr.bf16.mxu1 %v7951_v17  ;;  %v11790_v1 = vpop.f32.mrf.mxu1  ;;  %v8507_v56 = vld [vmem:[%s12490_s2 + $0xbc] ss:$28 sps:$4 sm:$0xff]   ;;  %v8508_v28 = vld [vmem:[%s12490_s2 + $0x88] ss:$28 sps:$4 sm:$0xff]  }
 0x351   :  { %v3456_v15 = vpop.permute.xlu1 %3455  ;;  %6045 = vmatpush2.bf16.msra.mxu1 %v7950_v43  ;;  %v4129_v52 = vpop.permute.xlu0 %4128  ;;  %v4176_v35 = vsel %vm13003_vm13, %v13000_v59, %v4175_v8  ;;  %6121 = vmatprep.mubr.bf16.mxu0 %v12811_v46  ;;  %v3484_v22 = vsel %vm3414_vm9, %v11102_v23, %v3483_v10  ;;  %v8509_v17 = vld [vmem:[%s12490_s2 + $0xb8] ss:$28 sps:$4 sm:$0xff]   ;;  %v8510_v24 = vld [vmem:[%s12490_s2 + $0xc0] ss:$28 sps:$4 sm:$0xff]  }
 0x352   :  { %v3474_v55 = vrot.slane %v3456_v15, 4  ;;  %v4150_v51 = vrot.slane %v4129_v52, 4  ;;  %v7982_v9 = vcombine.low %v4172_v40, %v4176_v35  ;;  %v7983_v38 = vcombine.high %v4172_v40, %v4176_v35  ;;  %v5835_v62 = vpop.f32.mrf.mxu1  ;;  %v11821_v40 = vpop.f32.mrf.mxu0 }
 0x354   :  { %v3487_v63 = vsel %vm187_vm0, %v3473_v47, %v3474_v55  ;;  %v4163_v26 = vsel %vm187_vm0, %v13005_v0, %v4150_v51  ;;  %6101 = vmatprep.subr.bf16.mxu0 %v7983_v38  ;;  %v11803_v4 = vpop.f32.mrf.mxu1 }
 0x355   :  { %v4135_v60 = vpop.permute.xlu1 %4134  ;;  %6102 = vmatpush1.bf16.msra.mxu0 %v7982_v9  ;;  %v3488_v13 = vsel %vm3414_vm9, %v11117_v32, %v3487_v63  ;;  %v4164_v23 = vsel %vm13006_vm15, %v13004_v18, %v4163_v26  ;;  %v8500_v32 = vld [vmem:[%s12490_s2 + $0x10] ss:$28 sps:$4 sm:$0xff]  }
 0x356   :  { %v4153_v42 = vrot.slane %v4135_v60, 4  ;;  %v7946_v53 = vcombine.low %v3484_v22, %v3488_v13  ;;  %v7947_v12 = vcombine.high %v3484_v22, %v3488_v13  ;;  %v5841_v36 = vpop.f32.mrf.mxu1 }
 0x358   :  { %v4167_v47 = vsel %vm187_vm0, %v13008_v57, %v4153_v42  ;;  %6046 = vmatprep.subr.bf16.mxu1 %v7947_v12  ;;  %v11816_v43 = vpop.f32.mrf.mxu1 }
 0x359   :  { %6047 = vmatpush2.bf16.msra.mxu1 %v7946_v53  ;;  %v4168_v39 = vsel %vm13009_vm11, %v13007_v19, %v4167_v47 }
 0x35a   :  { %v7978_v58 = vcombine.low %v4164_v23, %v4168_v39  ;;  %v7979_v37 = vcombine.high %v4164_v23, %v4168_v39  ;;  %v5845_v59 = vpop.f32.mrf.mxu1 }
 0x35c   :  { %6049 = vmatmul.mubr.bf16.vlgmr.msra.gmra.mxu1 %v8500_v32  ;;  %6103 = vmatprep.subr.bf16.mxu0 %v7979_v37  ;;  %v11830_v31 = vpop.f32.mrf.mxu1 }
 0x35d   :  { %6104 = vmatpush1.bf16.msra.mxu0 %v7978_v58  ;;  %6058 = vmatprep.mubr.bf16.mxu1 %v8501_v61 }
 0x35e   :  { %v5851_v51 = vpop.f32.mrf.mxu1 }
 0x360   :  { %7988 = vmatmul.mubr.msk.bf16.vlgmr.msra.gmra.mxu0 %vm1714_vm1, %v8502_v41  ;;  %v11838_v18 = vpop.f32.mrf.mxu1 }
 0x361   :  { %6131 = vmatprep.mubr.bf16.mxu0 %v12811_v46 }
 0x362   :  { %v5855_v13 = vpop.f32.mrf.mxu1 }
 0x364   :  { %6059 = vmatmul.mubr.bf16.gmra.mxu1 %v8503_v3  ;;  %v11848_v23 = vpop.f32.mrf.mxu1 }
 0x365   :  { %6068 = vmatprep.mubr.bf16.mxu1 %v8504_v5 }
 0x366   :  { %v5861_v39 = vpop.f32.mrf.mxu1 }
 0x368   :  { %7989 = vmatmul.mubr.msk.bf16.gmra.mxu0 %vm1714_vm1, %v8505_v29 }
 0x369   :  { %6141 = vmatprep.mubr.bf16.mxu0 %v12811_v46 }
 0x36c   :  { %6069 = vmatmul.mubr.bf16.gmra.mxu1 %v8506_v50 }
 0x36d   :  { %6078 = vmatprep.mubr.bf16.mxu1 %v8507_v56 }
 0x370   :  { %7990 = vmatmul.mubr.msk.bf16.gmra.mxu0 %vm1714_vm1, %v8508_v28 }
 0x371   :  { %6151 = vmatprep.mubr.bf16.mxu0 %v12811_v46 }
 0x374   :  { %6079 = vmatmul.mubr.bf16.gmra.mxu1 %v8509_v17 }
 0x378   :  { %7991 = vmatmul.mubr.msk.bf16.gmra.mxu0 %vm1714_vm1, %v8510_v24  ;;  %v5758_v8 = vpop.f32.mrf.mxu0 }
 0x379   :  { %v5759_v30 = vadd.f32 %v5758_v8, %v11387_v27 }
 0x37a   :  { %v11828_v10 = vpop.f32.mrf.mxu0 }
 0x37b   :  { %v11832_v15 = vadd.f32 %v5831_v33, %v5759_v30 }
 0x37c   :  { %v5762_v52 = vpop.f32.mrf.mxu0 }
 0x37d   :  { %13010 = vst [vmem:[#allocation7_spill] sm:$0xff] %v11832_v15  ;;  %v5763_v35 = vadd.f32 %v5762_v52, %v11407_v25 }
 0x37e   :  { %v5764_v55 = vpop.f32.mrf.mxu0 }
 0x37f   :  { %v11835_v9 = vadd.f32 %v5835_v62, %v5763_v35 }
 0x380   :  { %v5768_v38 = vpop.f32.mrf.mxu0 }
 0x381   :  { %v5769_v22 = vadd.f32 %v5768_v38, %v11424_v45 }
 0x382   :  { %v5770_v63 = vpop.f32.mrf.mxu0 }
 0x383   :  { %v11840_v27 = vadd.f32 %v5841_v36, %v5769_v22 }
 0x384   :  { %v5772_v0 = vpop.f32.mrf.mxu0 }
 0x385   :  { %v5773_v26 = vadd.f32 %v5772_v0, %v11438_v49 }
 0x386   :  { %v5774_v60 = vpop.f32.mrf.mxu0 }
 0x387   :  { %v11843_v42 = vadd.f32 %v5845_v59, %v5773_v26 }
 0x388   :  { %v5778_v25 = vpop.f32.mrf.mxu0 }
 0x389   :  { %v5779_v53 = vadd.f32 %v5778_v25, %v11452_v48  ;;  %v11860_v48 = vpop.f32.mrf.mxu1 }
 0x38a   :  { %v11846_v12 = vpop.f32.mrf.mxu0 }
 0x38b   :  { %v11850_v45 = vadd.f32 %v5851_v51, %v5779_v53  ;;  %v5865_v3 = vpop.f32.mrf.mxu1 }
 0x38c   :  { %v5782_v19 = vpop.f32.mrf.mxu0 }
 0x38d   :  { %v5783_v57 = vadd.f32 %v5782_v19, %v11466_v54  ;;  %v11867_v54 = vpop.f32.mrf.mxu1 }
 0x38e   :  { %v11853_v47 = vpop.f32.mrf.mxu0  ;;  %13012 = vst [vmem:[#allocation11_spill] sm:$0xff] %v11867_v54 }
 0x38f   :  { %v11855_v49 = vadd.f32 %v5855_v13, %v5783_v57 }
 0x390   :  { %v5788_v58 = vpop.f32.mrf.mxu0 }
 0x391   :  { %v5789_v37 = vadd.f32 %v5788_v58, %v11494_v6 }
 0x392   :  { %v11858_v32 = vpop.f32.mrf.mxu0 }
 0x393   :  { %v11862_v61 = vadd.f32 %v5861_v39, %v5789_v37 }
 0x394   :  { %v5792_v33 = vpop.f32.mrf.mxu0 }
 0x395   :  { %v5793_v41 = vadd.f32 %v5792_v33, %v11514_v34  ;;  %v5761_v33 = vadd.f32 %v11828_v10, %v11396_v11 }
 0x396   :  { %v11873_v28 = vpop.f32.mrf.mxu0 }
 0x397   :  { %v11865_v5 = vadd.f32 %v5865_v3, %v5793_v41  ;;  %13013 = vst [vmem:[#allocation13_spill] sm:$0xff] %v11873_v28  ;;  %v5765_v41 = vadd.f32 %v5764_v55, %v11412_v2  ;;  %v11916_v54 = vadd.f32 %v11790_v1, %v5761_v33  ;;  %v5775_v2 = vadd.f32 %v5774_v60, %v11448_v44 }
 0x398   :  { %v6210_v55 = vmul.f32 %v11832_v15, %v11832_v15  ;;  %v11941_v44 = vadd.f32 %v11777_v21, %v11821_v40 }
 0x399   :  { %13011 = vst [vmem:[#allocation24_spill] sm:$0xff] %v11865_v5  ;;  %v5771_v5 = vadd.f32 %v5770_v63, %v11434_v20  ;;  %13019 = vst [vmem:[#allocation15_spill] sm:$0xff] %v11916_v54  ;;  %v6211_v20 = vmul.f32 %v11916_v54, %v11916_v54 }
 0x39b   :  { %v11926_v11 = vadd.f32 %v11816_v43, %v5771_v5 }
 0x3b4   :  { %v5904_v62 = vpop.f32.mrf.mxu1 }
 0x3b6   :  { %v5906_v29 = vpop.f32.mrf.mxu1 }
 0x3b8   :  { %v5908_v50 = vpop.f32.mrf.mxu1 }
 0x3ba   :  { %v5910_v56 = vpop.f32.mrf.mxu1 }
 0x3bc   :  { %v11869_v36 = vpop.f32.mrf.mxu1 }
 0x3be   :  { %v11871_v6 = vpop.f32.mrf.mxu1 }
 0x3c0   :  { %v11875_v17 = vpop.f32.mrf.mxu1 }
 0x3c2   :  { %v11877_v34 = vpop.f32.mrf.mxu1 }
 0x3c4   :  { %v11879_v52 = vpop.f32.mrf.mxu1 }
 0x3c6   :  { %v11883_v38 = vpop.f32.mrf.mxu1 }
 0x3c8   :  { %v11889_v26 = vpop.f32.mrf.mxu1 }
 0x3ca   :  { %v11895_v53 = vpop.f32.mrf.mxu1 }
 0x3cc   :  { %v11901_v39 = vpop.f32.mrf.mxu1 }
 0x3cd   :  { %13014 = vst [vmem:[#allocation14_spill] sm:$0xff] %v11901_v39  ;;  %v11919_v39 = vadd.f32 %v11803_v4, %v5765_v41  ;;  %v6214_v4 = vmul.f32 %v11835_v9, %v11835_v9  ;;  %v6162_v41 = vadd.f32 %v11916_v54, %v11832_v15 }
 0x3ce   :  { %v11905_v37 = vpop.f32.mrf.mxu1 }
 0x3cf   :  { %13016 = vst [vmem:[#allocation20_spill] sm:$0xff] %v11905_v37  ;;  %v6215_v63 = vmul.f32 %v11919_v39, %v11919_v39 }
 0x3d0   :  { %v11912_v46 = vpop.f32.mrf.mxu1 }
 0x3d1   :  { %13018 = vst [vmem:[#allocation39_spill] sm:$0xff] %v11912_v46  ;;  %v6242_v46 = vadd.f32 %v6211_v20, %v6210_v55 }
 0x3d2   :  { %v11923_v37 = vpop.f32.mrf.mxu1 }
 0x3d3   :  { %13021 = vst [vmem:[#allocation43_spill] sm:$0xff] %v11923_v37  ;;  %v11950_v37 = vadd.f32 %v11830_v31, %v5775_v2 }
 0x3d5   :  { %v6223_v55 = vmul.f32 %v11950_v37, %v11950_v37 }
 0x3f8   :  { %v5977_v59 = vpop.f32.mrf.mxu0 }
 0x3f9   :  { %v5978_v1 = vadd.f32 %v5977_v59, %v5904_v62  ;;  %v6218_v62 = vmul.f32 %v11840_v27, %v11840_v27  ;;  %v6219_v59 = vmul.f32 %v11926_v11, %v11926_v11 }
 0x3fa   :  { %v5979_v24 = vpop.f32.mrf.mxu0 }
 0x3fb   :  { %v5980_v60 = vadd.f32 %v5979_v24, %v5906_v29  ;;  %v6167_v29 = vadd.f32 %v11919_v39, %v11835_v9  ;;  %v6247_v24 = vadd.f32 %v6215_v63, %v6214_v4 }
 0x3fc   :  { %v5981_v8 = vpop.f32.mrf.mxu0 }
 0x3fe   :  { %v5983_v30 = vpop.f32.mrf.mxu0 }
 0x400   :  { %v5987_v35 = vpop.f32.mrf.mxu0 }
 0x402   :  { %v11881_v51 = vpop.f32.mrf.mxu0 }
 0x404   :  { %v11885_v22 = vpop.f32.mrf.mxu0 }
 0x406   :  { %v11887_v0 = vpop.f32.mrf.mxu0 }
 0x408   :  { %v11891_v13 = vpop.f32.mrf.mxu0 }
 0x40a   :  { %v11893_v25 = vpop.f32.mrf.mxu0 }
 0x40c   :  { %v11897_v19 = vpop.f32.mrf.mxu0 }
 0x40e   :  { %v11899_v57 = vpop.f32.mrf.mxu0 }
 0x410   :  { %v11903_v58 = vpop.f32.mrf.mxu0 }
 0x411   :  { %13015 = vst [vmem:[#allocation21_spill] sm:$0xff] %v11903_v58 }
 0x412   :  { %v11910_v3 = vpop.f32.mrf.mxu0 }
 0x413   :  { %13017 = vst [vmem:[#allocation22_spill] sm:$0xff] %v11910_v3  ;;  %v5982_v3 = vadd.f32 %v5981_v8, %v5908_v50  ;;  %v6252_v8 = vadd.f32 %v6219_v59, %v6218_v62  ;;  %v6226_v62 = vmul.f32 %v11850_v45, %v11850_v45 }
 0x414   :  { %v11921_v58 = vpop.f32.mrf.mxu0 }
 0x415   :  { %13020 = vst [vmem:[#allocation16_spill] sm:$0xff] %v11921_v58 }
 0x416   :  { %v11937_v33 = vpop.f32.mrf.mxu0 }
 0x417   :  { %13022 = vst [vmem:[#allocation44_spill] sm:$0xff] %v11937_v33 }
 0x41c   :  { %v6050_v10 = vpop.f32.mrf.mxu1 }
 0x41d   :  { %v6051_v5 = vadd.f32 %v6050_v10, %v5978_v1  ;;  %v6172_v10 = vadd.f32 %v11926_v11, %v11840_v27  ;;  %v5984_v1 = vadd.f32 %v5983_v30, %v5910_v56  ;;  %v5781_v56 = vadd.f32 %v11846_v12, %v11462_v16 }
 0x41e   :  { %v6052_v43 = vpop.f32.mrf.mxu1 }
 0x41f   :  { %v6053_v21 = vadd.f32 %v6052_v43, %v5980_v60  ;;  %v5990_v43 = vadd.f32 %v11881_v51, %v11871_v6  ;;  %v11987_v6 = vadd.f32 %v11838_v18, %v5781_v56  ;;  %v5785_v51 = vadd.f32 %v11853_v47, %v11482_v7 }
 0x420   :  { %v6054_v33 = vpop.f32.mrf.mxu1  ;;  %v6123_v58 = vpop.f32.mrf.mxu0 }
 0x421   :  { %v11952_v40 = vadd.f32 %v6123_v58, %v6051_v5  ;;  %v6055_v28 = vadd.f32 %v6054_v33, %v5982_v3  ;;  %v6222_v58 = vmul.f32 %v11843_v42, %v11843_v42  ;;  %v5988_v3 = vadd.f32 %v5987_v35, %v11869_v36 }
 0x422   :  { %v6056_v54 = vpop.f32.mrf.mxu1  ;;  %v6125_v15 = vpop.f32.mrf.mxu0  ;;  %v6177_v33 = vadd.f32 %v11950_v37, %v11843_v42 }
 0x423   :  { %v6163_v31 = vadd.f32 %v6162_v41, %v11952_v40  ;;  %v6212_v2 = vmul.f32 %v11952_v40, %v11952_v40  ;;  %v11961_v50 = vadd.f32 %v6125_v15, %v6053_v21  ;;  %v6057_v4 = vadd.f32 %v6056_v54, %v5984_v1 }
 0x424   :  { %v6060_v30 = vpop.f32.mrf.mxu1  ;;  %v6127_v20 = vpop.f32.mrf.mxu0  ;;  %v6257_v35 = vadd.f32 %v6223_v55, %v6222_v58  ;;  %v5992_v21 = vadd.f32 %v11885_v22, %v11875_v17 }
 0x425   :  { %v11970_v63 = vadd.f32 %v6127_v20, %v6055_v28  ;;  %v6164_v15 = vadd.f32 %v6163_v31, %v11961_v50  ;;  %v6213_v60 = vmul.f32 %v11961_v50, %v11961_v50  ;;  %v6243_v12 = vadd.f32 %v6242_v46, %v6212_v2 }
 0x426   :  { %v6062_v5 = vpop.f32.mrf.mxu1  ;;  %v6129_v16 = vpop.f32.mrf.mxu0  ;;  %v6061_v41 = vadd.f32 %v6060_v30, %v5988_v3  ;;  %v5994_v2 = vadd.f32 %v11887_v0, %v11877_v34  ;;  %v6182_v20 = vadd.f32 %v11987_v6, %v11850_v45  ;;  %v6227_v34 = vmul.f32 %v11987_v6, %v11987_v6 }
 0x427   :  { %v6168_v36 = vadd.f32 %v6167_v29, %v11970_v63  ;;  %v6216_v54 = vmul.f32 %v11970_v63, %v11970_v63  ;;  %v11982_v28 = vadd.f32 %v6129_v16, %v6057_v4  ;;  %6165 = vadd.xlane.f32.xlu0 %v6164_v15  ;;  %v6063_v29 = vadd.f32 %v6062_v5, %v5990_v43 }
 0x428   :  { %v6064_v46 = vpop.f32.mrf.mxu1  ;;  %v6133_v59 = vpop.f32.mrf.mxu0  ;;  %v6244_v56 = vadd.f32 %v6243_v12, %v6213_v60  ;;  %v12010_v0 = vadd.f32 %v11848_v23, %v5785_v51  ;;  %v5791_v5 = vadd.f32 %v11858_v32, %v11498_v14  ;;  %v6000_v23 = vadd.f32 %v11893_v25, %v11883_v38 }
 0x429   :  { %v11993_v1 = vadd.f32 %v6133_v59, %v6061_v41  ;;  %v6169_v31 = vadd.f32 %v6168_v36, %v11982_v28  ;;  %v6217_v18 = vmul.f32 %v11982_v28, %v11982_v28  ;;  %v6248_v7 = vadd.f32 %v6247_v24, %v6216_v54 }
 0x42a   :  { %v6066_v58 = vpop.f32.mrf.mxu1  ;;  %v6135_v55 = vpop.f32.mrf.mxu0  ;;  %v6065_v47 = vadd.f32 %v6064_v46, %v5992_v21  ;;  %v5998_v24 = vadd.f32 %v11891_v13, %v11879_v52  ;;  %v6262_v46 = vadd.f32 %v6227_v34, %v6226_v62  ;;  %v6230_v14 = vmul.f32 %v11855_v49, %v11855_v49 }
 0x42b   :  { %v6173_v30 = vadd.f32 %v6172_v10, %v11993_v1  ;;  %v6220_v17 = vmul.f32 %v11993_v1, %v11993_v1  ;;  %v12003_v22 = vadd.f32 %v6135_v55, %v6063_v29  ;;  %6170 = vadd.xlane.f32.xlu1 %v6169_v31  ;;  %6245 = vadd.xlane.f32.xlu0 %v6244_v56 }
 0x42c   :  { %v6070_v10 = vpop.f32.mrf.mxu1  ;;  %v6137_v3 = vpop.f32.mrf.mxu0  ;;  %v6067_v4 = vadd.f32 %v6066_v58, %v5994_v2  ;;  %v6249_v52 = vadd.f32 %v6248_v7, %v6217_v18  ;;  %v6187_v32 = vadd.f32 %v12010_v0, %v11855_v49  ;;  %v6002_v38 = vadd.f32 %v11897_v19, %v11889_v26 }
 0x42d   :  { %v6221_v15 = vmul.f32 %v12003_v22, %v12003_v22  ;;  %v12016_v43 = vadd.f32 %v6137_v3, %v6065_v47  ;;  %v6174_v60 = vadd.f32 %v6173_v30, %v12003_v22  ;;  %v6253_v13 = vadd.f32 %v6252_v8, %v6220_v17  ;;  %v13024_v30 = vld [vmem:[#allocation14_spill] sm:$0xff] }
 0x42e   :  { %v6072_v16 = vpop.f32.mrf.mxu1  ;;  %v6139_v12 = vpop.f32.mrf.mxu0  ;;  %v6071_v41 = vadd.f32 %v6070_v10, %v5998_v24  ;;  %v12038_v62 = vadd.f32 %v11860_v48, %v5791_v5  ;;  %v6004_v31 = vadd.f32 %v11899_v57, %v11895_v53  ;;  %v6231_v48 = vmul.f32 %v12010_v0, %v12010_v0  ;;  %v13023_v57 = vld [vmem:[#allocation13_spill] sm:$0xff]  ;;  %v13027_v5 = vld [vmem:[#allocation22_spill] sm:$0xff] }
 0x42f   :  { %v6178_v36 = vadd.f32 %v6177_v33, %v12016_v43  ;;  %v6224_v54 = vmul.f32 %v12016_v43, %v12016_v43  ;;  %v12026_v51 = vadd.f32 %v6139_v12, %v6067_v4  ;;  %6175 = vadd.xlane.f32.xlu1 %v6174_v60  ;;  %6250 = vadd.xlane.f32.xlu0 %v6249_v52  ;;  %v13026_v60 = vld [vmem:[#allocation20_spill] sm:$0xff] }
 0x430   :  { %v6074_v25 = vpop.f32.mrf.mxu1  ;;  %v6143_v8 = vpop.f32.mrf.mxu0  ;;  %v6073_v33 = vadd.f32 %v6072_v16, %v6000_v23  ;;  %v6254_v21 = vadd.f32 %v6253_v13, %v6221_v15  ;;  %v6234_v53 = vmul.f32 %v11862_v61, %v11862_v61  ;;  %v5795_v47 = vadd.f32 %v13023_v57, %v11941_v44 }
 0x431   :  { %v12034_v59 = vadd.f32 %v6143_v8, %v6071_v41  ;;  %v6179_v29 = vadd.f32 %v6178_v36, %v12026_v51  ;;  %v6225_v2 = vmul.f32 %v12026_v51, %v12026_v51  ;;  %v6258_v19 = vadd.f32 %v6257_v35, %v6224_v54  ;;  %v13025_v35 = vld [vmem:[#allocation21_spill] sm:$0xff]  ;;  %v13028_v8 = vld [vmem:[#allocation11_spill] sm:$0xff] }
 0x432   :  { %v6076_v18 = vpop.f32.mrf.mxu1  ;;  %v6145_v26 = vpop.f32.mrf.mxu0  ;;  %v6075_v58 = vadd.f32 %v6074_v25, %v6002_v38  ;;  %v6008_v17 = vadd.f32 %v13025_v35, %v13024_v30  ;;  %v6235_v15 = vmul.f32 %v12038_v62, %v12038_v62  ;;  %v6010_v44 = vadd.f32 %v13027_v5, %v13026_v60 }
 0x433   :  { %v6183_v55 = vadd.f32 %v6182_v20, %v12034_v59  ;;  %v6228_v56 = vmul.f32 %v12034_v59, %v12034_v59  ;;  %v12047_v7 = vadd.f32 %v6145_v26, %v6073_v33  ;;  %6255 = vadd.xlane.f32.xlu1 %v6254_v21  ;;  %6180 = vadd.xlane.f32.xlu0 %v6179_v29  ;;  %v13029_v21 = vld [vmem:[#allocation39_spill] sm:$0xff]  ;;  %v13030_v29 = vld [vmem:[#allocation16_spill] sm:$0xff] }
 0x434   :  { %v6080_v20 = vpop.f32.mrf.mxu1  ;;  %v6147_v34 = vpop.f32.mrf.mxu0  ;;  %v6077_v24 = vadd.f32 %v6076_v18, %v6004_v31  ;;  %v6259_v12 = vadd.f32 %v6258_v19, %v6225_v2  ;;  %v6267_v38 = vadd.f32 %v6231_v48, %v6230_v14  ;;  %v6192_v25 = vadd.f32 %v12038_v62, %v11862_v61  ;;  %v13031_v14 = vld [vmem:[#allocation43_spill] sm:$0xff] }
 0x435   :  { %v6229_v10 = vmul.f32 %v12047_v7, %v12047_v7  ;;  %v12059_v3 = vadd.f32 %v6147_v34, %v6075_v58  ;;  %v6184_v4 = vadd.f32 %v6183_v55, %v12047_v7  ;;  %v6263_v52 = vadd.f32 %v6262_v46, %v6228_v56  ;;  %v13032_v55 = vld [vmem:[#allocation44_spill] sm:$0xff] }
 0x436   :  { %v6082_v23 = vpop.f32.mrf.mxu1  ;;  %v6149_v16 = vpop.f32.mrf.mxu0  ;;  %v6081_v13 = vadd.f32 %v6080_v20, %v6008_v17  ;;  %v12074_v33 = vadd.f32 %v13028_v8, %v5795_v47  ;;  %v6012_v31 = vadd.f32 %v13030_v29, %v13029_v21  ;;  %v6272_v58 = vadd.f32 %v6235_v15, %v6234_v53 }
 0x437   :  { %v6188_v41 = vadd.f32 %v6187_v32, %v12059_v3  ;;  %v6232_v36 = vmul.f32 %v12059_v3, %v12059_v3  ;;  %v12069_v54 = vadd.f32 %v6149_v16, %v6077_v24  ;;  %6185 = vadd.xlane.f32.xlu1 %v6184_v4  ;;  %6260 = vadd.xlane.f32.xlu0 %v6259_v12  ;;  %v13033_v24 = vld [vmem:[#allocation24_spill] sm:$0xff] }
 0x438   :  { %v6084_v46 = vpop.f32.mrf.mxu1  ;;  %v6153_v2 = vpop.f32.mrf.mxu0  ;;  %v6083_v32 = vadd.f32 %v6082_v23, %v6010_v44  ;;  %v6264_v26 = vadd.f32 %v6263_v52, %v6229_v10  ;;  %v6014_v56 = vadd.f32 %v13032_v55, %v13031_v14  ;;  %v6238_v53 = vmul.f32 %v13033_v24, %v13033_v24  ;;  %v8417_v14 = vld [vmem:[%s12497_s9 + $0x30] sm:$0xff]  }
 0x439   :  { %v12078_v18 = vadd.f32 %v6153_v2, %v6081_v13  ;;  %v6189_v19 = vadd.f32 %v6188_v41, %v12069_v54  ;;  %v6233_v48 = vmul.f32 %v12069_v54, %v12069_v54  ;;  %v6268_v30 = vadd.f32 %v6267_v38, %v6232_v36  ;;  %v8412_v2 = vld [vmem:[%s12497_s9 + $0xf8] sm:$0xff]   ;;  %v8418_v55 = vld [vmem:[%s12497_s9 + $0xb0] sm:$0xff]  }
 0x43a   :  { %v6086_v57 = vpop.f32.mrf.mxu1  ;;  %v6155_v47 = vpop.f32.mrf.mxu0  ;;  %v6085_v35 = vadd.f32 %v6084_v46, %v6012_v31  ;;  %v6197_v10 = vadd.f32 %v12074_v33, %v13033_v24  ;;  %v6239_v4 = vmul.f32 %v12074_v33, %v12074_v33  ;;  %v8411_v46 = vld [vmem:[%s12497_s9 + $0x78] sm:$0xff]   ;;  %8108 = vmatprep.subr.bf16.mxu1 %v8412_v2 }
 0x43b   :  { %v6193_v17 = vadd.f32 %v6192_v25, %v12078_v18  ;;  %v6236_v20 = vmul.f32 %v12078_v18, %v12078_v18  ;;  %v12088_v34 = vadd.f32 %v6155_v47, %v6083_v32  ;;  %6265 = vadd.xlane.f32.xlu1 %v6264_v26  ;;  %v6087_v15 = vadd.f32 %v6086_v57, %v6014_v56  ;;  %v8413_v32 = vld [vmem:[%s12497_s9 + $0x38] sm:$0xff]   ;;  %v8419_v56 = vld [vmem:[%s12497_s9 + $0x68] sm:$0xff]  }
 0x43c   :  { %6190 = vadd.xlane.f32.xlu0 %v6189_v19  ;;  %v6157_v60 = vpop.f32.mrf.mxu0  ;;  %v6269_v52 = vadd.f32 %v6268_v30, %v6233_v48  ;;  %v6277_v38 = vadd.f32 %v6239_v4, %v6238_v53  ;;  %v8414_v26 = vld [vmem:[%s12497_s9 + $0xb8] sm:$0xff]   ;;  %v8415_v19 = vld [vmem:[%s12497_s9 + $0x70] sm:$0xff]   ;;  %8068 = vmatprep.subr.bf16.mxu0 %v8411_v46  ;;  %v8420_v48 = vld [vmem:[%s12497_s9 + $0xe8] sm:$0xff]  }
 0x43d   :  { %v6237_v5 = vmul.f32 %v12088_v34, %v12088_v34  ;;  %v12098_v44 = vadd.f32 %v6157_v60, %v6085_v35  ;;  %v6194_v23 = vadd.f32 %v6193_v17, %v12088_v34  ;;  %v6273_v16 = vadd.f32 %v6272_v58, %v6236_v20  ;;  %v8416_v58 = vld [vmem:[%s12497_s9 + $0xf0] sm:$0xff]   ;;  %8069 = vmatpush3.bf16.msra.mxu0 %v8413_v32  ;;  %v8421_v57 = vld [vmem:[%s12497_s9 + $0x28] sm:$0xff]   ;;  %v8423_v30 = vld [vmem:[%s12497_s9 + $0x60] sm:$0xff]  }
 0x43e   :  { %v6159_v12 = vpop.f32.mrf.mxu0  ;;  %8109 = vmatpush3.bf16.msra.mxu1 %v8414_v26  ;;  %8070 = vmatprep.subr.bf16.mxu0 %v8415_v19  ;;  %v8422_v47 = vld [vmem:[%s12497_s9 + $0xa8] sm:$0xff]   ;;  %v8424_v35 = vld [vmem:[%s12497_s9 + $0xe0] sm:$0xff]   ;;  %v8427_v53 = vld [vmem:[%s12497_s9 + $0x58] sm:$0xff]  }
 0x43f   :  { %v6198_v13 = vadd.f32 %v6197_v10, %v12098_v44  ;;  %v6240_v41 = vmul.f32 %v12098_v44, %v12098_v44  ;;  %v12104_v36 = vadd.f32 %v6159_v12, %v6087_v15  ;;  %6195 = vadd.xlane.f32.xlu1 %v6194_v23  ;;  %v6274_v25 = vadd.f32 %v6273_v16, %v6237_v5  ;;  %v8425_v17 = vld [vmem:[%s12497_s9 + $0x20] sm:$0xff]   ;;  %v8428_v10 = vld [vmem:[%s12497_s9 + $0xd8] sm:$0xff]  }
 0x440   :  { %6270 = vadd.xlane.f32.xlu0 %v6269_v52  ;;  %8110 = vmatprep.subr.bf16.mxu1 %v8416_v58  ;;  %v8426_v20 = vld [vmem:[%s12497_s9 + $0xa0] sm:$0xff]  }
 0x441   :  { %v6199_v8 = vadd.f32 %v6198_v13, %v12104_v36  ;;  %v6241_v21 = vmul.f32 %v12104_v36, %v12104_v36  ;;  %v6278_v29 = vadd.f32 %v6277_v38, %v6240_v41  ;;  %8071 = vmatpush3.bf16.msra.mxu0 %v8417_v14 }
 0x442   :  { %8111 = vmatpush3.bf16.msra.mxu1 %v8418_v55  ;;  %8072 = vmatprep.subr.bf16.mxu0 %v8419_v56 }
 0x443   :  { %6275 = vadd.xlane.f32.xlu1 %v6274_v25  ;;  %v6279_v31 = vadd.f32 %v6278_v29, %v6241_v21  ;;  %8112 = vmatprep.subr.bf16.mxu1 %v8420_v48 }
 0x444   :  { %6200 = vadd.xlane.f32.xlu0 %v6199_v8 }
 0x445   :  { %8073 = vmatpush3.bf16.msra.mxu0 %v8421_v57 }
 0x446   :  { %8113 = vmatpush3.bf16.msra.mxu1 %v8422_v47  ;;  %8074 = vmatprep.subr.bf16.mxu0 %v8423_v30 }
 0x447   :  { %8114 = vmatprep.subr.bf16.mxu1 %v8424_v35 }
 0x448   :  { %6280 = vadd.xlane.f32.xlu0 %v6279_v31 }
 0x449   :  { %8075 = vmatpush3.bf16.msra.mxu0 %v8425_v17 }
 0x44a   :  { %8115 = vmatpush3.bf16.msra.mxu1 %v8426_v20  ;;  %8076 = vmatprep.subr.bf16.mxu0 %v8427_v53 }
 0x44b   :  { %8116 = vmatprep.subr.bf16.mxu1 %v8428_v10 }
 0x4b0   :  { %v6166_v4 = vpop.xlane.xlu0 %6165 }
 0x4b1   :  { %v12163_v15 = vmul.f32 0.001953125, %v6166_v4 }
 0x4b3   :  { %v6290_v23 = vmul.f32 %v12163_v15, %v12163_v15 }
 0x4b4   :  { %v6171_v60 = vpop.xlane.xlu1 %6170  ;;  %v6246_v5 = vpop.xlane.xlu0 %6245 }
 0x4b5   :  { %v12167_v16 = vmul.f32 0.001953125, %v6171_v60  ;;  %v6282_v12 = vmul.f32 0.001953125, %v6246_v5 }
 0x4b7   :  { %v6298_v52 = vsub.f32 %v6282_v12, %v6290_v23  ;;  %v6291_v25 = vmul.f32 %v12167_v16, %v12167_v16 }
 0x4b8   :  { %v6176_v13 = vpop.xlane.xlu1 %6175  ;;  %v6251_v38 = vpop.xlane.xlu0 %6250 }
 0x4b9   :  { %v12169_v41 = vmul.f32 0.001953125, %v6176_v13  ;;  %v6306_v8 = vmax.f32 %v6298_v52, 0.0  ;;  %v6283_v21 = vmul.f32 0.001953125, %v6251_v38 }
 0x4bb   :  { %v6322_v29 = vadd.f32 1e-05, %v6306_v8  ;;  %v6299_v31 = vsub.f32 %v6283_v21, %v6291_v25  ;;  %v6292_v2 = vmul.f32 %v12169_v41, %v12169_v41  ;;  %v6314_v21 = vld [vmem:[%s12491_s3] sm:$0xff] }
 0x4bc   :  { %v6256_v46 = vpop.xlane.xlu1 %6255  ;;  %v6181_v26 = vpop.xlane.xlu0 %6180 }
 0x4bd   :  { %v6284_v32 = vmul.f32 0.001953125, %v6256_v46  ;;  %8443 = vrsqrt.f32 %v6322_v29  ;;  %v6307_v19 = vmax.f32 %v6299_v31, 0.0  ;;  %v12175_v58 = vmul.f32 0.001953125, %v6181_v26  ;;  %v8429_v46 = vld [vmem:[%s12497_s9 + $0x18] sm:$0xff]  }
 0x4be   :  { %8077 = vmatpush3.bf16.msra.mxu0 %v8429_v46 }
 0x4bf   :  { %v6300_v14 = vsub.f32 %v6284_v32, %v6292_v2  ;;  %v6323_v55 = vadd.f32 1e-05, %v6307_v19  ;;  %v6293_v30 = vmul.f32 %v12175_v58, %v12175_v58  ;;  %v8430_v2 = vld [vmem:[%s12497_s9 + $0x98] sm:$0xff]   ;;  %v8431_v32 = vld [vmem:[%s12497_s9 + $0x50] sm:$0xff]  }
 0x4c0   :  { %v6186_v56 = vpop.xlane.xlu1 %6185  ;;  %v6261_v47 = vpop.xlane.xlu0 %6260  ;;  %8117 = vmatpush3.bf16.msra.mxu1 %v8430_v2  ;;  %8078 = vmatprep.subr.bf16.mxu0 %v8431_v32 }
 0x4c1   :  { %v6308_v48 = vmax.f32 %v6300_v14, 0.0  ;;  %v12177_v57 = vmul.f32 0.001953125, %v6186_v56  ;;  %8445 = vrsqrt.f32 %v6323_v55  ;;  %v6285_v35 = vmul.f32 0.001953125, %v6261_v47  ;;  %v8432_v14 = vld [vmem:[%s12497_s9 + $0xd0] sm:$0xff]  }
 0x4c2   :  { %8118 = vmatprep.subr.bf16.mxu1 %v8432_v14 }
 0x4c3   :  { %v6324_v17 = vadd.f32 1e-05, %v6308_v48  ;;  %v6301_v20 = vsub.f32 %v6285_v35, %v6293_v30  ;;  %v6294_v10 = vmul.f32 %v12177_v57, %v12177_v57 }
 0x4c4   :  { %v6266_v53 = vpop.xlane.xlu1 %6265 }
 0x4c5   :  { %v6286_v4 = vmul.f32 0.001953125, %v6266_v53  ;;  %v6191_v60 = vpop.xlane.xlu0 %6190  ;;  %v6309_v5 = vmax.f32 %v6301_v20, 0.0  ;;  %8447 = vrsqrt.f32 %v6324_v17  ;;  %v6346_v17 = vld [vmem:[%s12492_s4] sm:$0xff]  ;;  %v6315_v20 = vld [vmem:[%s12491_s3 + $0x8] sm:$0xff] }
 0x4c6   :  { %v12183_v23 = vmul.f32 0.001953125, %v6191_v60 }
 0x4c7   :  { %v6302_v12 = vsub.f32 %v6286_v4, %v6294_v10  ;;  %v6325_v52 = vadd.f32 1e-05, %v6309_v5 }
 0x4c8   :  { %v6196_v13 = vpop.xlane.xlu1 %6195  ;;  %v6295_v29 = vmul.f32 %v12183_v23, %v12183_v23 }
 0x4c9   :  { %v6310_v38 = vmax.f32 %v6302_v12, 0.0  ;;  %v12185_v25 = vmul.f32 0.001953125, %v6196_v13  ;;  %v6271_v8 = vpop.xlane.xlu0 %6270  ;;  %8449 = vrsqrt.f32 %v6325_v52  ;;  %v8433_v13 = vld [vmem:[%s12497_s9 + $0x10] sm:$0xff]  }
 0x4ca   :  { %v6287_v31 = vmul.f32 0.001953125, %v6271_v8  ;;  %v8444_v26 = vpop.eup %8443  ;;  %v8435_v8 = vld [vmem:[%s12497_s9 + $0x48] sm:$0xff]   ;;  %8079 = vmatpush3.bf16.msra.mxu0 %v8433_v13 }
 0x4cb   :  { %v6326_v19 = vadd.f32 1e-05, %v6310_v38  ;;  %v6338_v48 = vmul.f32 %v8444_v26, %v6314_v21  ;;  %v6296_v47 = vmul.f32 %v12185_v25, %v12185_v25  ;;  %v8434_v38 = vld [vmem:[%s12497_s9 + $0x90] sm:$0xff]   ;;  %8080 = vmatprep.subr.bf16.mxu0 %v8435_v8 }
 0x4cc   :  { %v6303_v55 = vsub.f32 %v6287_v31, %v6295_v29  ;;  %v6276_v56 = vpop.xlane.xlu1 %6275  ;;  %v8436_v31 = vld [vmem:[%s12497_s9 + $0xc8] sm:$0xff]   ;;  %8119 = vmatpush3.bf16.msra.mxu1 %v8434_v38 }
 0x4cd   :  { %8451 = vrsqrt.f32 %v6326_v19  ;;  %v6288_v30 = vmul.f32 0.001953125, %v6276_v56  ;;  %v6201_v35 = vpop.xlane.xlu0 %6200  ;;  %6372 = vperm.xlu1 %8261, %v6338_v48   ;;  %v6354_v10 = vmul.f32 %v6338_v48, %v12163_v15  ;;  %v6347_v15 = vld [vmem:[%s12492_s4 + $0x8] sm:$0xff]  ;;  %8120 = vmatprep.subr.bf16.mxu1 %v8436_v31  ;;  %v6316_v48 = vld [vmem:[%s12491_s3 + $0x10] sm:$0xff] }
 0x4ce   :  { %v12212_v53 = vmul.f32 0.001953125, %v6201_v35  ;;  %v8446_v4 = vpop.eup %8445  ;;  %v6311_v5 = vmax.f32 %v6303_v55, 0.0  ;;  %v8440_v35 = vld [vmem:[%s12497_s9 + $0xc0] sm:$0xff]  }
 0x4cf   :  { %v6304_v60 = vsub.f32 %v6288_v30, %v6296_v47  ;;  %v6362_v12 = vsub.f32 %v6346_v17, %v6354_v10  ;;  %v6339_v52 = vmul.f32 %v8446_v4, %v6315_v20  ;;  %v8437_v47 = vld [vmem:[%s12497_s9 + $0x8] sm:$0xff]   ;;  %v8439_v30 = vld [vmem:[%s12497_s9 + $0x40] sm:$0xff]  }
 0x4d0   :  { %v6297_v46 = vmul.f32 %v12212_v53, %v12212_v53  ;;  %v6327_v19 = vadd.f32 1e-05, %v6311_v5  ;;  %v6318_v10 = vld [vmem:[%s12491_s3 + $0x20] sm:$0xff]  ;;  %8081 = vmatpush3.bf16.msra.mxu0 %v8437_v47 }
 0x4d1   :  { %v6312_v21 = vmax.f32 %v6304_v60, 0.0  ;;  %v6281_v29 = vpop.xlane.xlu0 %6280  ;;  %6444 = vperm.xlu1 %8261, %v6362_v12   ;;  %6377 = vperm.xlu0 %8262, %v6339_v52   ;;  %v6355_v32 = vmul.f32 %v6339_v52, %v12167_v16  ;;  %v8438_v16 = vld [vmem:[%s12497_s9 + $0x88] sm:$0xff]   ;;  %v8441_v4 = vld [vmem:[%s12497_s9] sm:$0xff]   ;;  %v6317_v12 = vld [vmem:[%s12491_s3 + $0x18] sm:$0xff] }
 0x4d2   :  { %v6289_v2 = vmul.f32 0.001953125, %v6281_v29  ;;  %v8448_v56 = vpop.eup %8447  ;;  %8121 = vmatpush3.bf16.msra.mxu1 %v8438_v16  ;;  %v8442_v60 = vld [vmem:[%s12497_s9 + $0x80] sm:$0xff]   ;;  %8082 = vmatprep.subr.bf16.mxu0 %v8439_v30  ;;  %v7055_v30 = vld [vmem:[%s12494_s6 + $0x18] sm:$0xff] }
 0x4d3   :  { %v6328_v26 = vadd.f32 1e-05, %v6312_v21  ;;  %v6363_v55 = vsub.f32 %v6347_v15, %v6355_v32  ;;  %v6340_v20 = vmul.f32 %v8448_v56, %v6316_v48  ;;  %8122 = vmatprep.subr.bf16.mxu1 %v8440_v35  ;;  %v6350_v29 = vld [vmem:[%s12492_s4 + $0x20] sm:$0xff]  ;;  %v6348_v15 = vld [vmem:[%s12492_s4 + $0x10] sm:$0xff]  ;;  %v6319_v48 = vld [vmem:[%s12491_s3 + $0x28] sm:$0xff] }
 0x4d4   :  { %v6305_v14 = vsub.f32 %v6289_v2, %v6297_v46  ;;  %8083 = vmatpush3.bf16.msra.mxu0 %v8441_v4 }
 0x4d5   :  { %8453 = vrsqrt.f32 %v6328_v26  ;;  %6449 = vperm.xlu1 %8261, %v6363_v55   ;;  %v6356_v21 = vmul.f32 %v6340_v20, %v12169_v41  ;;  %v6320_v41 = vld [vmem:[%s12491_s3 + $0x30] sm:$0xff]  ;;  %v6349_v26 = vld [vmem:[%s12492_s4 + $0x18] sm:$0xff] }
 0x4d6   :  { %8455 = vrsqrt.f32 %v6327_v19  ;;  %v6313_v17 = vmax.f32 %v6305_v14, 0.0  ;;  %v8450_v5 = vpop.eup %8449  ;;  %8123 = vmatpush3.bf16.msra.mxu1 %v8442_v60 }
 0x4d7   :  { %v6341_v8 = vmul.f32 %v8450_v5, %v6317_v12  ;;  %v6364_v2 = vsub.f32 %v6348_v15, %v6356_v21  ;;  %v6353_v12 = vld [vmem:[%s12492_s4 + $0x38] sm:$0xff]  ;;  %v7052_v21 = vld [vmem:[%s12494_s6] sm:$0xff] }
 0x4d8   :  { %v6329_v38 = vadd.f32 1e-05, %v6313_v17  ;;  %v7184_v15 = vld [vmem:[%s12496_s8 + $0x18] sm:$0xff] }
 0x4d9   :  { %6382 = vperm.xlu1 %8261, %v6340_v20   ;;  %v6357_v32 = vmul.f32 %v6341_v8, %v12175_v58  ;;  %v6321_v20 = vld [vmem:[%s12491_s3 + $0x38] sm:$0xff] }
 0x4da   :  { %v8452_v52 = vpop.eup %8451  ;;  %8457 = vrsqrt.f32 %v6329_v38  ;;  %v7185_v38 = vld [vmem:[%s12496_s8 + $0x20] sm:$0xff] }
 0x4db   :  { %v6342_v13 = vmul.f32 %v8452_v52, %v6318_v10  ;;  %v6365_v55 = vsub.f32 %v6349_v26, %v6357_v32  ;;  %v7053_v10 = vld [vmem:[%s12494_s6 + $0x8] sm:$0xff]  ;;  %v7183_v52 = vld [vmem:[%s12496_s8 + $0x10] sm:$0xff]  ;;  %v13034_v32 = vld [vmem:[#allocation7_spill] sm:$0xff] }
 0x4dc   :  { %v13035_v26 = vld [vmem:[#allocation15_spill] sm:$0xff] }
 0x4dd   :  { %v6358_v31 = vmul.f32 %v6342_v13, %v12177_v57  ;;  %6387 = vperm.xlu1 %8261, %v6341_v8   ;;  %v6352_v57 = vld [vmem:[%s12492_s4 + $0x30] sm:$0xff] }
 0x4de   :  { %v7187_v8 = vld [vmem:[%s12496_s8 + $0x30] sm:$0xff] }
 0x4df   :  { %v6366_v46 = vsub.f32 %v6350_v29, %v6358_v31  ;;  %v7182_v29 = vld [vmem:[%s12496_s8 + $0x8] sm:$0xff] }
 0x4e0   :  { %v7186_v31 = vld [vmem:[%s12496_s8 + $0x28] sm:$0xff] }
 0x4e1   :  { %6464 = vperm.xlu0 %8262, %v6366_v46   ;;  %6454 = vperm.xlu1 %8261, %v6364_v2   ;;  %v7188_v46 = vld [vmem:[%s12496_s8 + $0x38] sm:$0xff] }
 0x4e2   :  { %v8454_v19 = vpop.eup %8453 }
 0x4e3   :  { %v6344_v14 = vmul.f32 %v8454_v19, %v6320_v41  ;;  %v8456_v56 = vpop.eup %8455 }
 0x4e4   :  { %v6343_v16 = vmul.f32 %v8456_v56, %v6319_v48 }
 0x4e5   :  { %6402 = vperm.xlu0 %8262, %v6344_v14   ;;  %v6360_v58 = vmul.f32 %v6344_v14, %v12185_v25  ;;  %6459 = vperm.xlu1 %8261, %v6365_v55   ;;  %v6351_v25 = vld [vmem:[%s12492_s4 + $0x28] sm:$0xff] }
 0x4e6   :  { %v6359_v35 = vmul.f32 %v6343_v16, %v12183_v23  ;;  %v7181_v23 = vld [vmem:[%s12496_s8] sm:$0xff] }
 0x4e7   :  { %v6368_v47 = vsub.f32 %v6352_v57, %v6360_v58  ;;  %v8458_v17 = vpop.eup %8457 }
 0x4e8   :  { %v6367_v4 = vsub.f32 %v6351_v25, %v6359_v35  ;;  %v6345_v60 = vmul.f32 %v8458_v17, %v6321_v20 }
 0x4e9   :  { %6474 = vperm.xlu0 %8262, %v6368_v47   ;;  %6392 = vperm.xlu1 %8261, %v6342_v13  }
 0x4ea   :  { %v6361_v5 = vmul.f32 %v6345_v60, %v12212_v53  ;;  %v7054_v53 = vld [vmem:[%s12494_s6 + $0x10] sm:$0xff] }
 0x4ec   :  { %v6369_v13 = vsub.f32 %v6353_v12, %v6361_v5 }
 0x4ed   :  { %7073 = vperm.xlu0 %8262, %v7055_v30   ;;  %6397 = vperm.xlu1 %8261, %v6343_v16  }
 0x4f1   :  { %7063 = vperm.xlu0 %8262, %v7053_v10   ;;  %6469 = vperm.xlu1 %8261, %v6367_v4  }
 0x4f5   :  { %7191 = vperm.xlu0 %8262, %v7181_v23   ;;  %6407 = vperm.xlu1 %8261, %v6345_v60  }
 0x4f9   :  { %7201 = vperm.xlu0 %8262, %v7183_v52   ;;  %6479 = vperm.xlu1 %8261, %v6369_v13  }
 0x4fd   :  { %7211 = vperm.xlu0 %8262, %v7185_v38   ;;  %7068 = vperm.xlu1 %8261, %v7054_v53  }
 0x501   :  { %7221 = vperm.xlu0 %8262, %v7187_v8   ;;  %7058 = vperm.xlu1 %8261, %v7052_v21  }
 0x505   :  { %7196 = vperm.xlu1 %8261, %v7182_v29  }
 0x509   :  { %7206 = vperm.xlu1 %8261, %v7184_v15  }
 0x50d   :  { %7216 = vperm.xlu1 %8261, %v7186_v31  }
 0x511   :  { %7226 = vperm.xlu1 %8261, %v7188_v46  }
 0x548   :  { %v6373_v2 = vpop.permute.xlu1 %6372 }
 0x549   :  { %v6410_v41 = vmul.f32 %v6373_v2, %v13034_v32  ;;  %v6411_v19 = vmul.f32 %v6373_v2, %v13035_v26  ;;  %v6412_v14 = vmul.f32 %v6373_v2, %v11952_v40  ;;  %v6413_v55 = vmul.f32 %v6373_v2, %v11961_v50 }
 0x54c   :  { %v6445_v57 = vpop.permute.xlu1 %6444  ;;  %v6378_v56 = vpop.permute.xlu0 %6377 }
 0x54d   :  { %v6482_v58 = vadd.f32 %v6445_v57, %v6410_v41  ;;  %v6483_v48 = vadd.f32 %v6445_v57, %v6411_v19  ;;  %v6484_v47 = vadd.f32 %v6445_v57, %v6412_v14  ;;  %v6485_v16 = vadd.f32 %v6445_v57, %v6413_v55 }
 0x54e   :  { %v6414_v30 = vmul.f32 %v6378_v56, %v11835_v9  ;;  %v6415_v35 = vmul.f32 %v6378_v56, %v11919_v39  ;;  %v6416_v17 = vmul.f32 %v6378_v56, %v11970_v63  ;;  %v6417_v25 = vmul.f32 %v6378_v56, %v11982_v28 }
 0x54f   :  { %v6514_v20 = vmax.f32 %v6482_v58, 0.0  ;;  %v6516_v10 = vmax.f32 %v6484_v47, 0.0  ;;  %v6515_v4 = vmax.f32 %v6483_v48, 0.0  ;;  %v6517_v40 = vmax.f32 %v6485_v16, 0.0 }
 0x550   :  { %v6450_v60 = vpop.permute.xlu1 %6449 }
 0x551   :  { %v6486_v50 = vadd.f32 %v6450_v60, %v6414_v30  ;;  %v6487_v23 = vadd.f32 %v6450_v60, %v6415_v35  ;;  %v6488_v5 = vadd.f32 %v6450_v60, %v6416_v17  ;;  %v6489_v12 = vadd.f32 %v6450_v60, %v6417_v25 }
 0x552   :  { %v12337_v52 = vpack.c.bf16 %v6515_v4, %v6514_v20  ;;  %v12339_v13 = vpack.c.bf16 %v6517_v40, %v6516_v10 }
 0x553   :  { %v6518_v9 = vmax.f32 %v6486_v50, 0.0  ;;  %v6520_v38 = vmax.f32 %v6488_v5, 0.0  ;;  %v6519_v39 = vmax.f32 %v6487_v23, 0.0  ;;  %v6521_v53 = vmax.f32 %v6489_v12, 0.0 }
 0x554   :  { %v6383_v63 = vpop.permute.xlu1 %6382 }
 0x555   :  { %v6546_v8 = vpack.c.bf16 %v6518_v9, %v6514_v20  ;;  %v6548_v28 = vpack.c.bf16 %v6520_v38, %v6516_v10  ;;  %v6547_v21 = vpack.c.bf16 %v6519_v39, %v6515_v4  ;;  %v6549_v29 = vpack.c.bf16 %v6521_v53, %v6517_v40 }
 0x556   :  { %v12341_v15 = vpack.c.bf16 %v6519_v39, %v6518_v9  ;;  %v12343_v31 = vpack.c.bf16 %v6521_v53, %v6520_v38  ;;  %v6418_v2 = vmul.f32 %v6383_v63, %v11840_v27  ;;  %v6419_v32 = vmul.f32 %v6383_v63, %v11926_v11 }
 0x557   :  { %6946 = vmatprep.mubr.bf16.mxu0 %v6547_v21  ;;  %7011 = vmatprep.mubr.bf16.mxu1 %v6549_v29  ;;  %v6420_v41 = vmul.f32 %v6383_v63, %v11993_v1  ;;  %v6421_v26 = vmul.f32 %v6383_v63, %v12003_v22 }
 0x558   :  { %v6388_v46 = vpop.permute.xlu1 %6387  ;;  %6947 = vmatmul.mubr.bf16.vlgmr.msra.gmra.mxu0 %v6546_v8  ;;  %7012 = vmatmul.mubr.bf16.vlgmr.msra.gmra.mxu1 %v6548_v28 }
 0x559   :  { %v6422_v48 = vmul.f32 %v6388_v46, %v11843_v42  ;;  %v6423_v47 = vmul.f32 %v6388_v46, %v11950_v37  ;;  %v6424_v16 = vmul.f32 %v6388_v46, %v12016_v43  ;;  %v6425_v27 = vmul.f32 %v6388_v46, %v12026_v51 }
 0x55c   :  { %v6465_v19 = vpop.permute.xlu0 %6464  ;;  %v6455_v14 = vpop.permute.xlu1 %6454 }
 0x55d   :  { %v6490_v55 = vadd.f32 %v6455_v14, %v6418_v2  ;;  %v6491_v57 = vadd.f32 %v6455_v14, %v6419_v32  ;;  %v6492_v56 = vadd.f32 %v6455_v14, %v6420_v41  ;;  %v6493_v58 = vadd.f32 %v6455_v14, %v6421_v26 }
 0x55f   :  { %v6523_v11 = vmax.f32 %v6491_v57, 0.0  ;;  %v6525_v35 = vmax.f32 %v6493_v58, 0.0  ;;  %v6522_v1 = vmax.f32 %v6490_v55, 0.0  ;;  %v6524_v17 = vmax.f32 %v6492_v56, 0.0 }
 0x560   :  { %v6403_v30 = vpop.permute.xlu0 %6402  ;;  %v6460_v22 = vpop.permute.xlu1 %6459 }
 0x561   :  { %v6494_v25 = vadd.f32 %v6460_v22, %v6422_v48  ;;  %v6495_v20 = vadd.f32 %v6460_v22, %v6423_v47  ;;  %v6496_v10 = vadd.f32 %v6460_v22, %v6424_v16  ;;  %v6497_v4 = vadd.f32 %v6460_v22, %v6425_v27 }
 0x562   :  { %v12353_v40 = vpack.c.bf16 %v6523_v11, %v6522_v1  ;;  %v12355_v60 = vpack.c.bf16 %v6525_v35, %v6524_v17  ;;  %v6434_v51 = vmul.f32 %v6403_v30, %v11862_v61  ;;  %v6435_v23 = vmul.f32 %v6403_v30, %v12038_v62 }
 0x563   :  { %v6527_v42 = vmax.f32 %v6495_v20, 0.0  ;;  %v6529_v37 = vmax.f32 %v6497_v4, 0.0  ;;  %v6526_v50 = vmax.f32 %v6494_v25, 0.0  ;;  %v6528_v43 = vmax.f32 %v6496_v10, 0.0 }
 0x564   :  { %v6436_v5 = vmul.f32 %v6403_v30, %v12078_v18  ;;  %v6437_v12 = vmul.f32 %v6403_v30, %v12088_v34  ;;  %v6393_v9 = vpop.permute.xlu1 %6392  ;;  %v6475_v8 = vpop.permute.xlu0 %6474 }
 0x565   :  { %v6426_v38 = vmul.f32 %v6393_v9, %v11850_v45  ;;  %v6427_v39 = vmul.f32 %v6393_v9, %v11987_v6  ;;  %v6428_v53 = vmul.f32 %v6393_v9, %v12034_v59  ;;  %v6429_v63 = vmul.f32 %v6393_v9, %v12047_v7 }
 0x566   :  { %v6551_v28 = vpack.c.bf16 %v6527_v42, %v6523_v11  ;;  %v6553_v21 = vpack.c.bf16 %v6529_v37, %v6525_v35  ;;  %v6550_v29 = vpack.c.bf16 %v6526_v50, %v6522_v1  ;;  %v6552_v61 = vpack.c.bf16 %v6528_v43, %v6524_v17 }
 0x567   :  { %v6499_v46 = vadd.f32 %v6465_v19, %v6427_v39  ;;  %v6501_v62 = vadd.f32 %v6465_v19, %v6429_v63  ;;  %v6498_v2 = vadd.f32 %v6465_v19, %v6426_v38  ;;  %v6500_v18 = vadd.f32 %v6465_v19, %v6428_v53 }
 0x568   :  { %v12365_v32 = vadd.f32 %v6475_v8, %v6434_v51  ;;  %v6507_v34 = vadd.f32 %v6475_v8, %v6435_v23  ;;  %6954 = vmatprep.mubr.bf16.mxu0 %v6551_v28  ;;  %7019 = vmatprep.mubr.bf16.mxu1 %v6553_v21  ;;  %v6398_v45 = vpop.permute.xlu1 %6397  ;;  %v6508_v6 = vadd.f32 %v6475_v8, %v6436_v5 }
 0x569   :  { %v6509_v41 = vadd.f32 %v6475_v8, %v6437_v12  ;;  %v6430_v59 = vmul.f32 %v6398_v45, %v11855_v49  ;;  %v6431_v7 = vmul.f32 %v6398_v45, %v12010_v0  ;;  %6955 = vmatmul.mubr.bf16.gmra.mxu0 %v6550_v29  ;;  %7020 = vmatmul.mubr.bf16.gmra.mxu1 %v6552_v61  ;;  %v6531_v26 = vmax.f32 %v6499_v46, 0.0 }
 0x56a   :  { %v6533_v14 = vmax.f32 %v6501_v62, 0.0  ;;  %v6530_v55 = vmax.f32 %v6498_v2, 0.0  ;;  %v6532_v57 = vmax.f32 %v6500_v18, 0.0  ;;  %v6432_v19 = vmul.f32 %v6398_v45, %v12059_v3 }
 0x56b   :  { %v6433_v56 = vmul.f32 %v6398_v45, %v12069_v54  ;;  %v12371_v58 = vpack.c.bf16 %v6527_v42, %v6526_v50  ;;  %v12373_v48 = vpack.c.bf16 %v6529_v37, %v6528_v43  ;;  %v6539_v35 = vmax.f32 %v6507_v34, 0.0 }
 0x56c   :  { %v6470_v47 = vpop.permute.xlu1 %6469  ;;  %v12375_v16 = vpack.c.bf16 %v6531_v26, %v6530_v55  ;;  %v12377_v49 = vpack.c.bf16 %v6533_v14, %v6532_v57  ;;  %v6541_v1 = vmax.f32 %v6509_v41, 0.0  ;;  %v6538_v17 = vmax.f32 %v12365_v32, 0.0  ;;  %v7048_v32 = vld [vmem:[%s12493_s5] sm:$0xff] }
 0x56d   :  { %v6502_v0 = vadd.f32 %v6470_v47, %v6430_v59  ;;  %v6503_v27 = vadd.f32 %v6470_v47, %v6431_v7  ;;  %v6504_v30 = vadd.f32 %v6470_v47, %v6432_v19  ;;  %v6505_v11 = vadd.f32 %v6470_v47, %v6433_v56 }
 0x56e   :  { %v6540_v3 = vmax.f32 %v6508_v6, 0.0  ;;  %v12388_v38 = vpack.c.bf16 %v6539_v35, %v6538_v17 }
 0x56f   :  { %v6535_v22 = vmax.f32 %v6503_v27, 0.0  ;;  %v6537_v54 = vmax.f32 %v6505_v11, 0.0  ;;  %v6534_v25 = vmax.f32 %v6502_v0, 0.0  ;;  %v6536_v20 = vmax.f32 %v6504_v30, 0.0 }
 0x570   :  { %v6408_v10 = vpop.permute.xlu1 %6407  ;;  %v12390_v39 = vpack.c.bf16 %v6541_v1, %v6540_v3 }
 0x571   :  { %v6438_v4 = vmul.f32 %v6408_v10, %v13033_v24  ;;  %v6439_v42 = vmul.f32 %v6408_v10, %v12074_v33  ;;  %v6440_v37 = vmul.f32 %v6408_v10, %v12098_v44  ;;  %v6441_v50 = vmul.f32 %v6408_v10, %v12104_v36 }
 0x572   :  { %v6555_v43 = vpack.c.bf16 %v6535_v22, %v6531_v26  ;;  %v6557_v51 = vpack.c.bf16 %v6537_v54, %v6533_v14  ;;  %v6554_v23 = vpack.c.bf16 %v6534_v25, %v6530_v55  ;;  %v6556_v5 = vpack.c.bf16 %v6536_v20, %v6532_v57 }
 0x573   :  { %v12384_v12 = vpack.c.bf16 %v6537_v54, %v6536_v20  ;;  %v12386_v9 = vpack.c.bf16 %v6535_v22, %v6534_v25 }
 0x574   :  { %6962 = vmatprep.mubr.bf16.mxu0 %v6555_v43  ;;  %7027 = vmatprep.mubr.bf16.mxu1 %v6557_v51  ;;  %v6480_v24 = vpop.permute.xlu1 %6479 }
 0x575   :  { %v6510_v33 = vadd.f32 %v6480_v24, %v6438_v4  ;;  %v6511_v53 = vadd.f32 %v6480_v24, %v6439_v42  ;;  %v6512_v44 = vadd.f32 %v6480_v24, %v6440_v37  ;;  %v6513_v63 = vadd.f32 %v6480_v24, %v6441_v50  ;;  %6963 = vmatmul.mubr.bf16.gmra.mxu0 %v6554_v23 }
 0x576   :  { %7028 = vmatmul.mubr.bf16.gmra.mxu1 %v6556_v5 }
 0x577   :  { %v6543_v36 = vmax.f32 %v6511_v53, 0.0  ;;  %v6545_v8 = vmax.f32 %v6513_v63, 0.0  ;;  %v6542_v28 = vmax.f32 %v6510_v33, 0.0  ;;  %v6544_v21 = vmax.f32 %v6512_v44, 0.0 }
 0x579   :  { %v6559_v29 = vpack.c.bf16 %v6543_v36, %v6539_v35  ;;  %v6561_v61 = vpack.c.bf16 %v6545_v8, %v6541_v1  ;;  %v6558_v46 = vpack.c.bf16 %v6542_v28, %v6538_v17  ;;  %v6560_v62 = vpack.c.bf16 %v6544_v21, %v6540_v3 }
 0x57a   :  { %v12392_v2 = vpack.c.bf16 %v6543_v36, %v6542_v28  ;;  %v12394_v18 = vpack.c.bf16 %v6545_v8, %v6544_v21 }
 0x57b   :  { %6970 = vmatprep.mubr.bf16.mxu0 %v6559_v29  ;;  %7035 = vmatprep.mubr.bf16.mxu1 %v6561_v61 }
 0x57c   :  { %13036 = vst [vmem:[#allocation18_spill] sm:$0xff] %v12394_v18 }
 0x57d   :  { %6971 = vmatmul.mubr.bf16.gmra.mxu0 %v6558_v46 }
 0x57e   :  { %7036 = vmatmul.mubr.bf16.gmra.mxu1 %v6560_v62  ;;  %8176 = vmatprep.mubr.msk.f32.mxu0 %vm1714_vm1, %v7048_v32 }
 0x618   :  { %v8084_v34 = vpop.f32.mrf.mxu0  ;;  %v8124_v45 = vpop.f32.mrf.mxu1 }
 0x61a   :  { %v8085_v6 = vpop.f32.mrf.mxu0  ;;  %v8125_v41 = vpop.f32.mrf.mxu1 }
 0x61c   :  { %v8087_v59 = vpop.f32.mrf.mxu0  ;;  %v8127_v7 = vpop.f32.mrf.mxu1 }
 0x61e   :  { %v8088_v26 = vpop.f32.mrf.mxu0  ;;  %v8128_v14 = vpop.f32.mrf.mxu1 }
 0x61f   :  { %v8089_v21 = vadd.f32 %v8088_v26, %v8087_v59  ;;  %v8129_v29 = vadd.f32 %v8128_v14, %v8127_v7  ;;  %v7074_v26 = vpop.permute.xlu0 %7073 }
 0x629   :  { %v8090_v55 = vpop.f32.mrf.mxu0  ;;  %v8130_v57 = vpop.f32.mrf.mxu1 }
 0x62b   :  { %v8091_v19 = vpop.f32.mrf.mxu0  ;;  %v8131_v56 = vpop.f32.mrf.mxu1 }
 0x62c   :  { %v8092_v33 = vadd.f32 %v8091_v19, %v8090_v55  ;;  %v8132_v63 = vadd.f32 %v8131_v56, %v8130_v57 }
 0x62d   :  { %v8093_v47 = vpop.f32.mrf.mxu0  ;;  %v8133_v0 = vpop.f32.mrf.mxu1 }
 0x62f   :  { %v8094_v27 = vpop.f32.mrf.mxu0  ;;  %v8134_v30 = vpop.f32.mrf.mxu1 }
 0x630   :  { %v8095_v50 = vadd.f32 %v8094_v27, %v8093_v47  ;;  %v8135_v43 = vadd.f32 %v8134_v30, %v8133_v0  ;;  %v8086_v47 = vadd.f32 %v8085_v6, %v8084_v34  ;;  %v8126_v0 = vadd.f32 %v8125_v41, %v8124_v45  ;;  %v7049_v34 = vld [vmem:[%s12493_s5 + $0x8] sm:$0xff]  ;;  %v7051_v45 = vld [vmem:[%s12493_s5 + $0x18] sm:$0xff]  ;;  %v7173_v6 = vld [vmem:[%s12495_s7] sm:$0xff] }
 0x631   :  { %v7022_v27 = vadd.f32 %v8132_v63, %v8092_v33  ;;  %v7175_v41 = vld [vmem:[%s12495_s7 + $0x10] sm:$0xff] }
 0x632   :  { %v7025_v61 = vadd.f32 %v8135_v43, %v8095_v50  ;;  %v7014_v57 = vadd.f32 %v8126_v0, %v8086_v47  ;;  %8193 = vmatprep.mubr.msk.f32.mxu1 %vm1714_vm1, %v7175_v41  ;;  %v7177_v50 = vld [vmem:[%s12495_s7 + $0x20] sm:$0xff]  ;;  %v7178_v43 = vld [vmem:[%s12495_s7 + $0x28] sm:$0xff] }
 0x635   :  { %v8096_v11 = vpop.f32.mrf.mxu0 }
 0x636   :  { %v8136_v35 = vpop.f32.mrf.mxu1 }
 0x637   :  { %v8097_v1 = vpop.f32.mrf.mxu0 }
 0x638   :  { %v8137_v17 = vpop.f32.mrf.mxu1  ;;  %v8098_v46 = vadd.f32 %v8097_v1, %v8096_v11  ;;  %v7069_v11 = vpop.permute.xlu1 %7068 }
 0x639   :  { %v8099_v3 = vpop.f32.mrf.mxu0  ;;  %v8138_v62 = vadd.f32 %v8137_v17, %v8136_v35 }
 0x63a   :  { %v8139_v22 = vpop.f32.mrf.mxu1 }
 0x63b   :  { %v8100_v54 = vpop.f32.mrf.mxu0  ;;  %v7030_v55 = vadd.f32 %v8138_v62, %v8098_v46 }
 0x63c   :  { %v8140_v25 = vpop.f32.mrf.mxu1  ;;  %v8101_v36 = vadd.f32 %v8100_v54, %v8099_v3 }
 0x63d   :  { %v8102_v20 = vpop.f32.mrf.mxu0  ;;  %v8141_v8 = vadd.f32 %v8140_v25, %v8139_v22  ;;  %v7044_v59 = vadd.f32 %v7030_v55, %v7014_v57  ;;  %v7064_v22 = vpop.permute.xlu0 %7063 }
 0x63e   :  { %v8142_v10 = vpop.f32.mrf.mxu1  ;;  %v7059_v25 = vpop.permute.xlu1 %7058 }
 0x63f   :  { %v8103_v4 = vpop.f32.mrf.mxu0  ;;  %v7033_v30 = vadd.f32 %v8141_v8, %v8101_v36 }
 0x640   :  { %v8143_v42 = vpop.f32.mrf.mxu1  ;;  %v8104_v23 = vadd.f32 %v8103_v4, %v8102_v20 }
 0x641   :  { %v8105_v37 = vpop.f32.mrf.mxu0  ;;  %v8144_v5 = vadd.f32 %v8143_v42, %v8142_v10  ;;  %v7017_v10 = vadd.f32 %v8129_v29, %v8089_v21  ;;  %v7174_v42 = vld [vmem:[%s12495_s7 + $0x8] sm:$0xff]  ;;  %v7192_v33 = vpop.permute.xlu0 %7191 }
 0x642   :  { %v8145_v51 = vpop.f32.mrf.mxu1 }
 0x643   :  { %v8106_v24 = vpop.f32.mrf.mxu0  ;;  %v7038_v32 = vadd.f32 %v8144_v5, %v8104_v23  ;;  %v7045_v56 = vadd.f32 %v7033_v30, %v7017_v10  ;;  %v7180_v23 = vld [vmem:[%s12495_s7 + $0x38] sm:$0xff]  ;;  %v8581_v5 = vmov 1  }
 0x644   :  { %v8107_v53 = vadd.f32 %v8106_v24, %v8105_v37  ;;  %v8146_v44 = vpop.f32.mrf.mxu1  ;;  %v7176_v37 = vld [vmem:[%s12495_s7 + $0x18] sm:$0xff]  ;;  %8264 = vset.pattern.permute.xlu0 %v8581_v5  ;;  %v7197_v24 = vpop.permute.xlu1 %7196 }
 0x645   :  { %v8147_v28 = vadd.f32 %v8146_v44, %v8145_v51  ;;  %v7046_v19 = vadd.f32 %v7038_v32, %v7022_v27  ;;  %v7179_v51 = vld [vmem:[%s12495_s7 + $0x30] sm:$0xff]  ;;  %v7202_v44 = vpop.permute.xlu0 %7201  ;;  %s8582_s7 = smov [#allocation4]  }
 0x646   :  { %s7595_s11 = sshll.u32 %s8582_s7, 4  ;;  %s7596_s11 = int_to_ptr.vmem [resolvable:$true] %s7595_s11 }
 0x647   :  { %v7041_v18 = vadd.f32 %v8147_v28, %v8107_v53  ;;  %s8511_s16 = scalar_lea.vmem %s7596_s11, 2048  ;;  %p8516_p1 = scmp.lt.s32.totalorder %s7596_s11, %s7596_s11 }
 0x648   :  { %v7207_v53 = vpop.permute.xlu1 %7206  ;;  %p8512_p0 = scmp.ne.s32.totalorder %s7596_s11, %s8511_s16  ;;  %p8517_p2 = scmp.lt.s32.totalorder %s8511_s16, %s8511_s16 }
 0x649   :  { %v7047_v20 = vadd.f32 %v7041_v18, %v7025_v61  ;;  %v7050_v18 = vld [vmem:[%s12493_s5 + $0x10] sm:$0xff]  ;;  %v7212_v62 = vpop.permute.xlu0 %7211 }
 0x64a   :  { %p8518_p3 = por %p8517_p2, %p8516_p1 }
 0x64b   :  { %8168 = vmatprep.subr.mxu0 %v7047_v20 }
 0x64c   :  { %8169 = vmatpush3.msra.mxu0 %v7047_v20  ;;  %v7217_v8 = vpop.permute.xlu1 %7216  ;;  %p8519_p4 = pnand %p8518_p3, %p8512_p0 }
 0x64d   :  { %8170 = vmatprep.subr.mxu0 %v7046_v19  ;;  %v7222_v41 = vpop.permute.xlu0 %7221 }
 0x64e   :  { %8171 = vmatpush3.msra.mxu0 %v7046_v19 }
 0x64f   :  { %8172 = vmatprep.subr.mxu0 %v7045_v56 }
 0x650   :  { %8173 = vmatpush3.msra.mxu0 %v7045_v56  ;;  %v7227_v30 = vpop.permute.xlu1 %7226 }
 0x651   :  { %8174 = vmatprep.subr.mxu0 %v7044_v59 }
 0x652   :  { %8175 = vmatpush3.msra.mxu0 %v7044_v59 }
 0x653   :  { %8177 = vmatmul.mubr.msk.f32.vlgmr.msra.gmra.mxu0 %vm1714_vm1, %v7049_v34 }
 0x654   :  { %8179 = vmatprep.mubr.msk.f32.mxu0 %vm1714_vm1, %v7050_v18 }
 0x657   :  { %8180 = vmatmul.mubr.msk.f32.gmra.mxu0 %vm1714_vm1, %v7051_v45 }
 0x658   :  { %8190 = vmatprep.mubr.msk.f32.mxu0 %vm1714_vm1, %v7173_v6 }
 0x713   :  { %v8178_v7 = vpop.f32.mrf.mxu0 }
 0x714   :  { %v7160_v54 = vadd.f32 %v8178_v7, %v7064_v22 }
 0x715   :  { %v7154_v14 = vpop.f32.mrf.mxu0 }
 0x716   :  { %v7155_v4 = vadd.f32 %v7154_v14, %v7059_v25 }
 0x717   :  { %v8181_v35 = vpop.f32.mrf.mxu0 }
 0x718   :  { %v7170_v1 = vadd.f32 %v8181_v35, %v7074_v26 }
 0x719   :  { %v7164_v17 = vpop.f32.mrf.mxu0 }
 0x71a   :  { %v7165_v3 = vadd.f32 %v7164_v17, %v7069_v11  ;;  %8182 = vmatprep.subr.mxu0 %v7170_v1  ;;  %8202 = vmatprep.subr.mxu1 %v7170_v1 }
 0x71b   :  { %8183 = vmatpush3.msra.mxu0 %v7170_v1  ;;  %8206 = vmatpush3.msra.mxu1 %v7170_v1 }
 0x71c   :  { %8184 = vmatprep.subr.mxu0 %v7165_v3  ;;  %8203 = vmatprep.subr.mxu1 %v7165_v3 }
 0x71d   :  { %8185 = vmatpush3.msra.mxu0 %v7165_v3  ;;  %8207 = vmatpush3.msra.mxu1 %v7165_v3 }
 0x71e   :  { %8186 = vmatprep.subr.mxu0 %v7160_v54  ;;  %8204 = vmatprep.subr.mxu1 %v7160_v54 }
 0x71f   :  { %8187 = vmatpush3.msra.mxu0 %v7160_v54  ;;  %8208 = vmatpush3.msra.mxu1 %v7160_v54 }
 0x720   :  { %8188 = vmatprep.subr.mxu0 %v7155_v4  ;;  %8205 = vmatprep.subr.mxu1 %v7155_v4 }
 0x721   :  { %8189 = vmatpush3.msra.mxu0 %v7155_v4  ;;  %8209 = vmatpush3.msra.mxu1 %v7155_v4 }
 0x722   :  { %8191 = vmatmul.mubr.msk.f32.vlgmr.msra.gmra.mxu0 %vm1714_vm1, %v7174_v42  ;;  %8194 = vmatmul.mubr.msk.f32.vlgmr.msra.gmra.mxu1 %vm1714_vm1, %v7176_v37 }
 0x723   :  { %8196 = vmatprep.mubr.msk.f32.mxu1 %vm1714_vm1, %v7177_v50 }
 0x726   :  { %8197 = vmatmul.mubr.msk.f32.gmra.mxu1 %vm1714_vm1, %v7178_v43 }
 0x727   :  { %8199 = vmatprep.mubr.msk.f32.mxu1 %vm1714_vm1, %v7179_v51 }
 0x72a   :  { %8200 = vmatmul.mubr.msk.f32.gmra.mxu1 %vm1714_vm1, %v7180_v23 }
 0x7e2   :  { %v8192_v63 = vpop.f32.mrf.mxu0  ;;  %v8195_v36 = vpop.f32.mrf.mxu1 }
 0x7e3   :  { %v7325_v61 = vadd.f32 %v8192_v63, %v7197_v24  ;;  %v7335_v56 = vadd.f32 %v8195_v36, %v7207_v53 }
 0x7e4   :  { %v7329_v28 = vpop.f32.mrf.mxu1  ;;  %v7319_v21 = vpop.f32.mrf.mxu0 }
 0x7e5   :  { %v7320_v47 = vadd.f32 %v7319_v21, %v7192_v33  ;;  %v7330_v35 = vadd.f32 %v7329_v28, %v7202_v44 }
 0x7e6   :  { %v8198_v29 = vpop.f32.mrf.mxu1 }
 0x7e7   :  { %v7345_v46 = vadd.f32 %v8198_v29, %v7217_v8 }
 0x7e8   :  { %v7339_v32 = vpop.f32.mrf.mxu1 }
 0x7e9   :  { %v7359_v0 = vmax.f32 %v7325_v61, %v7345_v46  ;;  %v7340_v27 = vadd.f32 %v7339_v32, %v7212_v62  ;;  %v13037_v32 = vmov 0  }
 0x7ea   :  { %v8201_v20 = vpop.f32.mrf.mxu1 }
 0x7eb   :  { %v7363_v10 = vsub.f32 %v7325_v61, %v7359_v0  ;;  %v7375_v55 = vsub.f32 %v7345_v46, %v7359_v0  ;;  %v7358_v19 = vmax.f32 %v7320_v47, %v7340_v27  ;;  %v7355_v57 = vadd.f32 %v8201_v20, %v7227_v30 }
 0x7ec   :  { %v7349_v59 = vpop.f32.mrf.mxu1 }
 0x7ed   :  { %v7368_v34 = vmul.f32 1.442695, %v7363_v10  ;;  %v7380_v18 = vmul.f32 1.442695, %v7375_v55  ;;  %v7362_v45 = vsub.f32 %v7320_v47, %v7358_v19  ;;  %v7374_v6 = vsub.f32 %v7340_v27, %v7358_v19 }
 0x7ee   :  { %v7361_v7 = vmax.f32 %v7335_v56, %v7355_v57  ;;  %v7350_v11 = vadd.f32 %v7349_v59, %v7222_v41  ;;  %v7413_v59 = vunpack.c.h.bf16 %v12341_v15 }
 0x7ef   :  { %8459 = vpow2.f32 %v7368_v34  ;;  %v7366_v26 = vmul.f32 1.442695, %v7362_v45  ;;  %v7378_v14 = vmul.f32 1.442695, %v7374_v6  ;;  %v7452_v34 = vunpack.c.l.bf16 %v12386_v9 }
 0x7f0   :  { %8461 = vpow2.f32 %v7380_v18  ;;  %v7365_v1 = vsub.f32 %v7335_v56, %v7361_v7  ;;  %v7360_v17 = vmax.f32 %v7330_v35, %v7350_v11  ;;  %v7377_v3 = vsub.f32 %v7355_v57, %v7361_v7 }
 0x7f1   :  { %8463 = vpow2.f32 %v7366_v26  ;;  %v7412_v56 = vunpack.c.l.bf16 %v12341_v15  ;;  %v7453_v18 = vunpack.c.h.bf16 %v12386_v9  ;;  %v7509_v9 = vunpack.c.h.bf16 %v12343_v31 }
 0x7f2   :  { %8465 = vpow2.f32 %v7378_v14  ;;  %v7372_v22 = vmul.f32 1.442695, %v7365_v1  ;;  %v7364_v54 = vsub.f32 %v7330_v35, %v7360_v17  ;;  %v7384_v25 = vmul.f32 1.442695, %v7377_v3 }
 0x7f3   :  { %v7376_v4 = vsub.f32 %v7350_v11, %v7360_v17  ;;  %v7410_v11 = vunpack.c.l.bf16 %v12337_v52  ;;  %v7544_v35 = vunpack.c.l.bf16 %v12384_v12  ;;  %v7545_v1 = vunpack.c.h.bf16 %v12384_v12 }
 0x7f4   :  { %8467 = vpow2.f32 %v7372_v22  ;;  %v7370_v42 = vmul.f32 1.442695, %v7364_v54  ;;  %v7508_v3 = vunpack.c.l.bf16 %v12343_v31  ;;  %v7450_v22 = vunpack.c.l.bf16 %v12375_v16 }
 0x7f5   :  { %8469 = vpow2.f32 %v7384_v25  ;;  %v7382_v43 = vmul.f32 1.442695, %v7376_v4  ;;  %v7451_v54 = vunpack.c.h.bf16 %v12375_v16  ;;  %v7543_v31 = vunpack.c.h.bf16 %v12377_v49 }
 0x7f6   :  { %8471 = vpow2.f32 %v7370_v42 }
 0x7fc   :  { %v8460_v37 = vpop.eup %8459 }
 0x7fd   :  { %v8462_v50 = vpop.eup %8461 }
 0x7fe   :  { %v8464_v51 = vpop.eup %8463  ;;  %v7387_v23 = vadd.f32 %v8462_v50, %v8460_v37 }
 0x7ff   :  { %v8466_v24 = vpop.eup %8465 }
 0x800   :  { %8473 = vrcp.f32 %v7387_v23  ;;  %v7386_v33 = vadd.f32 %v8466_v24, %v8464_v51 }
 0x801   :  { %8475 = vpow2.f32 %v7382_v43  ;;  %v8468_v53 = vpop.eup %8467 }
 0x802   :  { %8477 = vrcp.f32 %v7386_v33  ;;  %v8470_v44 = vpop.eup %8469 }
 0x803   :  { %v8472_v63 = vpop.eup %8471  ;;  %v7389_v36 = vadd.f32 %v8470_v44, %v8468_v53 }
 0x805   :  { %8479 = vrcp.f32 %v7389_v36  ;;  %v7506_v36 = vunpack.c.l.bf16 %v12339_v13 }
 0x80d   :  { %v8474_v8 = vpop.eup %8473 }
 0x80e   :  { %v8476_v28 = vpop.eup %8475  ;;  %v7403_v21 = vmul.f32 %v8474_v8, %v8462_v50  ;;  %v7399_v29 = vmul.f32 %v8474_v8, %v8460_v37  ;;  %v7507_v8 = vunpack.c.h.bf16 %v12339_v13  ;;  %v7456_v13 = vunpack.c.l.bf16 %v12392_v2 }
 0x80f   :  { %v8478_v61 = vpop.eup %8477  ;;  %v7388_v46 = vadd.f32 %v8476_v28, %v8472_v63 }
 0x810   :  { %7555 = vperm.xlu0 %8264, %v7403_v21   ;;  %7425 = vperm.xlu1 %8261, %v7399_v29   ;;  %v7398_v62 = vmul.f32 %v8478_v61, %v8464_v51  ;;  %v7402_v47 = vmul.f32 %v8478_v61, %v8466_v24  ;;  %v7542_v24 = vunpack.c.l.bf16 %v12377_v49 }
 0x811   :  { %8481 = vrcp.f32 %v7388_v46 }
 0x812   :  { %v8480_v0 = vpop.eup %8479 }
 0x813   :  { %v7401_v27 = vmul.f32 %v8480_v0, %v8468_v53  ;;  %v7405_v20 = vmul.f32 %v8480_v0, %v8470_v44  ;;  %v7416_v0 = vunpack.c.l.bf16 %v12371_v58 }
 0x814   :  { %8265 = vset.pattern.permute.xlu0 %v13037_v32  ;;  %7465 = vperm.xlu1 %8261, %v7403_v21  }
 0x815   :  { %7420 = vperm.xlu0 %8265, %v7398_v62  }
 0x818   :  { %8263 = vset.pattern.permute.xlu1 %v8581_v5 }
 0x819   :  { %7519 = vperm.xlu1 %8263, %v7399_v29   ;;  %7460 = vperm.xlu0 %8265, %v7402_v47  }
 0x81d   :  { %7551 = vperm.xlu1 %8263, %v7402_v47   ;;  %8266 = vset.pattern.permute.xlu0 %v8581_v5 }
 0x81e   :  { %7515 = vperm.xlu0 %8266, %v7398_v62   ;;  %v8482_v30 = vpop.eup %8481 }
 0x81f   :  { %v7400_v10 = vmul.f32 %v8482_v30, %v8472_v63  ;;  %v7404_v55 = vmul.f32 %v8482_v30, %v8476_v28  ;;  %v7457_v30 = vunpack.c.h.bf16 %v12392_v2 }
 0x821   :  { %8267 = vset.pattern.permute.xlu1 %v13037_v32 }
 0x822   :  { %7435 = vperm.xlu1 %8267, %v7401_v27   ;;  %7527 = vperm.xlu0 %8266, %v7401_v27   ;;  %v7417_v27 = vunpack.c.h.bf16 %v12371_v58  ;;  %v7455_v58 = vunpack.c.h.bf16 %v12388_v38 }
 0x826   :  { %7475 = vperm.xlu1 %8267, %v7405_v20   ;;  %8268 = vset.pattern.permute.xlu0 %v13037_v32 }
 0x827   :  { %7430 = vperm.xlu0 %8268, %v7400_v10  }
 0x82a   :  { %8269 = vset.pattern.permute.xlu1 %v8581_v5 }
 0x82b   :  { %7523 = vperm.xlu1 %8269, %v7400_v10   ;;  %7470 = vperm.xlu0 %8268, %v7404_v55  }
 0x82f   :  { %7559 = vperm.xlu1 %8269, %v7404_v55   ;;  %8270 = vset.pattern.permute.xlu0 %v8581_v5  ;;  %v7411_v5 = vunpack.c.h.bf16 %v12337_v52 }
 0x830   :  { %7563 = vperm.xlu0 %8270, %v7405_v20  }
 0x88b   :  { %v7426_v19 = vpop.permute.xlu1 %7425  ;;  %v7556_v57 = vpop.permute.xlu0 %7555 }
 0x88c   :  { %v7440_v6 = vmul.f32 %v7426_v19, %v7412_v56  ;;  %v7441_v41 = vmul.f32 %v7426_v19, %v7413_v59  ;;  %v7568_v25 = vmul.f32 %v7556_v57, %v7544_v35  ;;  %v7569_v4 = vmul.f32 %v7556_v57, %v7545_v1 }
 0x88d   :  { %v7511_v35 = vunpack.c.h.bf16 %v12355_v60 }
 0x88f   :  { %v7466_v45 = vpop.permute.xlu1 %7465 }
 0x890   :  { %v7480_v7 = vmul.f32 %v7466_v45, %v7452_v34  ;;  %v7481_v26 = vmul.f32 %v7466_v45, %v7453_v18  ;;  %v7421_v14 = vpop.permute.xlu0 %7420  ;;  %v7414_v18 = vunpack.c.l.bf16 %v12353_v40  ;;  %v7415_v45 = vunpack.c.h.bf16 %v12353_v40 }
 0x891   :  { %v7438_v42 = vmul.f32 %v7421_v14, %v7410_v11  ;;  %v7439_v52 = vmul.f32 %v7421_v14, %v7411_v5  ;;  %v7510_v5 = vunpack.c.l.bf16 %v12355_v60  ;;  %v7546_v40 = vunpack.c.l.bf16 %v12390_v39 }
 0x892   :  { %v7488_v17 = vadd.f32 %v7480_v7, %v7440_v6  ;;  %v7489_v15 = vadd.f32 %v7481_v26, %v7441_v41  ;;  %v7454_v6 = vunpack.c.l.bf16 %v12388_v38  ;;  %v7512_v38 = vunpack.c.l.bf16 %v12373_v48 }
 0x894   :  { %7496 = vst [vmem:[#allocation4 + $0x20] sm:$0xff] %v7488_v17  ;;  %7497 = vst [vmem:[#allocation4 + $0x28] sm:$0xff] %v7489_v15  ;;  %v7520_v37 = vpop.permute.xlu1 %7519  ;;  %v7461_v50 = vpop.permute.xlu0 %7460  ;;  %v7547_v15 = vunpack.c.h.bf16 %v12390_v39 }
 0x895   :  { %v7532_v43 = vmul.f32 %v7520_v37, %v7508_v3  ;;  %v7533_v12 = vmul.f32 %v7520_v37, %v7509_v9  ;;  %v7478_v51 = vmul.f32 %v7461_v50, %v7450_v22  ;;  %v7479_v23 = vmul.f32 %v7461_v50, %v7451_v54  ;;  %v13038_v22 = vld [vmem:[#allocation18_spill] sm:$0xff] }
 0x896   :  { %v7513_v3 = vunpack.c.h.bf16 %v12373_v48  ;;  %v7548_v54 = vunpack.c.l.bf16 %v13038_v22 }
 0x897   :  { %v7576_v33 = vadd.f32 %v7568_v25, %v7532_v43  ;;  %v7577_v53 = vadd.f32 %v7569_v4, %v7533_v12  ;;  %v7486_v44 = vadd.f32 %v7478_v51, %v7438_v42  ;;  %v7487_v16 = vadd.f32 %v7479_v23, %v7439_v52 }
 0x898   :  { %v7552_v63 = vpop.permute.xlu1 %7551  ;;  %v7549_v25 = vunpack.c.h.bf16 %v13038_v22 }
 0x899   :  { %7584 = vst [vmem:[#allocation4 + $0x30] sm:$0xff] %v7576_v33  ;;  %7585 = vst [vmem:[#allocation4 + $0x38] sm:$0xff] %v7577_v53  ;;  %v7566_v28 = vmul.f32 %v7552_v63, %v7542_v24  ;;  %v7567_v21 = vmul.f32 %v7552_v63, %v7543_v31  ;;  %v7516_v29 = vpop.permute.xlu0 %7515 }
 0x89a   :  { %7494 = vst [vmem:[#allocation4] sm:$0xff] %v7486_v44  ;;  %7495 = vst [vmem:[#allocation4 + $0x8] sm:$0xff] %v7487_v16  ;;  %v7530_v61 = vmul.f32 %v7516_v29, %v7506_v36  ;;  %v7531_v46 = vmul.f32 %v7516_v29, %v7507_v8 }
 0x89c   :  { %v7574_v62 = vadd.f32 %v7566_v28, %v7530_v61  ;;  %v7575_v49 = vadd.f32 %v7567_v21, %v7531_v46 }
 0x89d   :  { %v7436_v32 = vpop.permute.xlu1 %7435  ;;  %v7528_v47 = vpop.permute.xlu0 %7527 }
 0x89e   :  { %7582 = vst [vmem:[#allocation4 + $0x10] sm:$0xff] %v7574_v62  ;;  %7583 = vst [vmem:[#allocation4 + $0x18] sm:$0xff] %v7575_v49  ;;  %v7444_v10 = vmul.f32 %v7436_v32, %v7416_v0  ;;  %v7445_v55 = vmul.f32 %v7436_v32, %v7417_v27  ;;  %v7536_v50 = vmul.f32 %v7528_v47, %v7512_v38 }
 0x89f   :  { %v7537_v39 = vmul.f32 %v7528_v47, %v7513_v3 }
 0x8a1   :  { %v7476_v20 = vpop.permute.xlu1 %7475 }
 0x8a2   :  { %v7484_v19 = vmul.f32 %v7476_v20, %v7456_v13  ;;  %v7485_v57 = vmul.f32 %v7476_v20, %v7457_v30  ;;  %v7431_v56 = vpop.permute.xlu0 %7430 }
 0x8a3   :  { %v7442_v7 = vmul.f32 %v7431_v56, %v7414_v18  ;;  %v7443_v26 = vmul.f32 %v7431_v56, %v7415_v45 }
 0x8a4   :  { %v7492_v59 = vadd.f32 %v7484_v19, %v7444_v10  ;;  %v7493_v34 = vadd.f32 %v7485_v57, %v7445_v55 }
 0x8a6   :  { %7500 = vst [vmem:[#allocation4 + $0x60] sm:$0xff] %v7492_v59  ;;  %7501 = vst [vmem:[#allocation4 + $0x68] sm:$0xff] %v7493_v34  ;;  %v7524_v41 = vpop.permute.xlu1 %7523  ;;  %v7471_v2 = vpop.permute.xlu0 %7470 }
 0x8a7   :  { %v7482_v14 = vmul.f32 %v7471_v2, %v7454_v6  ;;  %v7483_v11 = vmul.f32 %v7471_v2, %v7455_v58  ;;  %v7534_v4 = vmul.f32 %v7524_v41, %v7510_v5  ;;  %v7535_v42 = vmul.f32 %v7524_v41, %v7511_v35 }
 0x8a9   :  { %v7490_v1 = vadd.f32 %v7482_v14, %v7442_v7  ;;  %v7491_v17 = vadd.f32 %v7483_v11, %v7443_v26 }
 0x8aa   :  { %v7560_v9 = vpop.permute.xlu1 %7559 }
 0x8ab   :  { %7498 = vst [vmem:[#allocation4 + $0x40] sm:$0xff] %v7490_v1  ;;  %7499 = vst [vmem:[#allocation4 + $0x48] sm:$0xff] %v7491_v17  ;;  %v7570_v60 = vmul.f32 %v7560_v9, %v7546_v40  ;;  %v7571_v52 = vmul.f32 %v7560_v9, %v7547_v15  ;;  %v7564_v37 = vpop.permute.xlu0 %7563 }
 0x8ac   :  { %v7572_v43 = vmul.f32 %v7564_v37, %v7548_v54  ;;  %v7573_v12 = vmul.f32 %v7564_v37, %v7549_v25 }
 0x8ad   :  { %v7578_v51 = vadd.f32 %v7570_v60, %v7534_v4  ;;  %v7579_v48 = vadd.f32 %v7571_v52, %v7535_v42 }
 0x8ae   :  { %v7580_v23 = vadd.f32 %v7572_v43, %v7536_v50  ;;  %v7581_v24 = vadd.f32 %v7573_v12, %v7537_v39 }
 0x8af   :  { %7586 = vst [vmem:[#allocation4 + $0x50] sm:$0xff] %v7578_v51  ;;  %7587 = vst [vmem:[#allocation4 + $0x58] sm:$0xff] %v7579_v48 }
 0x8b0   :  { %7588 = vst [vmem:[#allocation4 + $0x70] sm:$0xff] %v7580_v23  ;;  %7589 = vst [vmem:[#allocation4 + $0x78] sm:$0xff] %v7581_v24 }
 0x8b1   :  { %8522 = shalt.err (!%p8519_p4)
}
 0x8b2   :  { %s8583_s15 = smov 512   ;;  %s13039_s29 = smov 32  }
 0x8b3   :  { %7601 = dma.vmem_to_hbm [thread:$0]  %s7596_s11, 2048, %s12498_s10, [#allocation5], %s8583_s15, %s8583_s15, %s13039_s29  }
 0x8b4   :  { %8531 = dma.done.wait [#allocation5], 2048  }
 0x8b5   :  { %8532 = vsyncadd [#allocation5], 4294965248 }
 0x8b6   :  { %7605 = vsyncpa [#allocation5], 1 }

</bundles_post_ra>
